<compile_context>
chip_gen: v7x
topology: tpu7x:2x2x1
jax: 0.10.0
libtpu: 0.0.40
codegen_flags: <defaults>
</compile_context>

<pallas_src>
import functools
import math

import jax
import jax.numpy as jnp
from jax.experimental import pallas as pl
from jax.experimental.pallas import tpu as pltpu


# ------------------------------ small helpers -------------------------------

def _const_spec(shape):
    """BlockSpec for an operand that is identical for every grid step."""
    zeros = (0,) * len(shape)
    return pl.BlockSpec(tuple(shape), lambda *_: zeros)


def _batch_spec(shape):
    """BlockSpec selecting one batch element per grid step (leading axis)."""
    rest = (0,) * (len(shape) - 1)
    return pl.BlockSpec((1,) + tuple(shape[1:]), lambda b: (b,) + rest)


def _row_tile(m, cap=512):
    if m <= cap:
        return m
    t = cap
    while t >= 8:
        if m % t == 0:
            return t
        t -= 8
    return m


# ---------------------------- in-kernel building blocks ----------------------

def _ln(x, g, b, eps):
    # f32 statistics; g/b are (1, D)
    mean = jnp.mean(x, axis=-1, keepdims=True)
    var = jnp.mean(jnp.square(x - mean), axis=-1, keepdims=True)
    return (x - mean) * jax.lax.rsqrt(var + eps) * g + b


def _mha_heads(q2d, k2d, v2d, mask, num_heads, scale):
    """Multi-head attention on 2-D (S, D) slabs, heads split by static slices.

    mask is (Sq, Sk) with 1=keep / 0=masked, or None (skip the select)."""
    d_model = q2d.shape[-1]
    dh = d_model // num_heads
    outs = []
    for h in range(num_heads):
        sl = slice(h * dh, (h + 1) * dh)
        qh = q2d[:, sl].astype(jnp.bfloat16)
        kh = k2d[:, sl].astype(jnp.bfloat16)
        vh = v2d[:, sl].astype(jnp.bfloat16)
        # scores = qh @ kh^T  (contract on the head dim, no explicit transpose)
        s = jax.lax.dot_general(qh, kh, (((1,), (1,)), ((), ())),
                                preferred_element_type=jnp.float32) * scale
        if mask is not None:
            s = jnp.where(mask == 0.0, -1e9, s)
        s = s - jnp.max(s, axis=-1, keepdims=True)
        p = jnp.exp(s)
        p = p * pl.reciprocal(jnp.sum(p, axis=-1, keepdims=True), approx=True)
        outs.append(jnp.dot(p.astype(jnp.bfloat16), vh,
                            preferred_element_type=jnp.float32))
    return jnp.concatenate(outs, axis=-1)            # (S, D) f32


# ------------------------------- Pallas kernels ------------------------------

def _encoder_block_kernel(x_ref, pe_ref, mask_ref,
                          ln1_g, ln1_b, wqkv, bqkv, wo, bo,
                          ln2_g, ln2_b, w1, b1, w2, b2,
                          o_ref, *, num_heads, add_pe, eps):
    x = x_ref[0]                                      # (S, D) f32
    if add_pe:                                        # PE fused into block 0
        x = x + pe_ref[...]
    d_model = x.shape[-1]
    scale = 1.0 / math.sqrt(d_model // num_heads)

    # --- pre-norm self attention (fused QKV) ---
    h = _ln(x, ln1_g[...], ln1_b[...], eps)
    qkv = jnp.dot(h.astype(jnp.bfloat16), wqkv[...],
                  preferred_element_type=jnp.float32) + bqkv[...]
    attn = _mha_heads(qkv[:, :d_model], qkv[:, d_model:2 * d_model],
                      qkv[:, 2 * d_model:], mask_ref[0, 0], num_heads, scale)
    x = x + jnp.dot(attn.astype(jnp.bfloat16), wo[...],
                    preferred_element_type=jnp.float32) + bo[...]

    # --- pre-norm FFN ---
    h = _ln(x, ln2_g[...], ln2_b[...], eps)
    ff = jnp.dot(h.astype(jnp.bfloat16), w1[...],
                 preferred_element_type=jnp.float32) + b1[...]
    ff = jnp.maximum(ff, 0.0)
    x = x + jnp.dot(ff.astype(jnp.bfloat16), w2[...],
                    preferred_element_type=jnp.float32) + b2[...]
    o_ref[0] = x


def _decoder_block_kernel(x_ref, mem_ref, mask_ref,
                          ln1_g, ln1_b, wqkv_s, bqkv_s, wo_s, bo_s,
                          ln2_g, ln2_b, wq_c, bq_c, wkv_c, bkv_c, wo_c, bo_c,
                          ln3_g, ln3_b, w1, b1, w2, b2,
                          o_ref, *, num_heads, eps):
    x = x_ref[0]                                      # (S, D)
    mem = mem_ref[0]                                  # (S, D)
    d_model = x.shape[-1]
    scale = 1.0 / math.sqrt(d_model // num_heads)

    # --- masked self attention (fused QKV) ---
    h = _ln(x, ln1_g[...], ln1_b[...], eps)
    qkv = jnp.dot(h.astype(jnp.bfloat16), wqkv_s[...],
                  preferred_element_type=jnp.float32) + bqkv_s[...]
    attn = _mha_heads(qkv[:, :d_model], qkv[:, d_model:2 * d_model],
                      qkv[:, 2 * d_model:], mask_ref[0, 0], num_heads, scale)
    x = x + jnp.dot(attn.astype(jnp.bfloat16), wo_s[...],
                    preferred_element_type=jnp.float32) + bo_s[...]

    # --- cross attention (no mask in reference wiring -> select skipped) ---
    h = _ln(x, ln2_g[...], ln2_b[...], eps)
    q = jnp.dot(h.astype(jnp.bfloat16), wq_c[...],
                preferred_element_type=jnp.float32) + bq_c[...]
    kv = jnp.dot(mem.astype(jnp.bfloat16), wkv_c[...],
                 preferred_element_type=jnp.float32) + bkv_c[...]
    attn = _mha_heads(q, kv[:, :d_model], kv[:, d_model:],
                      None, num_heads, scale)
    x = x + jnp.dot(attn.astype(jnp.bfloat16), wo_c[...],
                    preferred_element_type=jnp.float32) + bo_c[...]

    # --- FFN ---
    h = _ln(x, ln3_g[...], ln3_b[...], eps)
    ff = jnp.dot(h.astype(jnp.bfloat16), w1[...],
                 preferred_element_type=jnp.float32) + b1[...]
    ff = jnp.maximum(ff, 0.0)
    x = x + jnp.dot(ff.astype(jnp.bfloat16), w2[...],
                    preferred_element_type=jnp.float32) + b2[...]
    o_ref[0] = x


def _ln_pe_kernel(x_ref, pe_ref, g_ref, b_ref, o_ref, *, eps):
    # encoder final LayerNorm fused with the tgt positional-encoding add
    o_ref[0] = _ln(x_ref[0], g_ref[...], b_ref[...], eps) + pe_ref[...]


def _final_proj_kernel(x_ref, g_ref, b_ref, w_ref, bias_ref, o_ref, *, eps):
    # decoder final LN + vocab projection + softmax(-1), row tile (tm, D)
    h = _ln(x_ref[...], g_ref[...], b_ref[...], eps)
    logits = jnp.dot(h.astype(jnp.bfloat16), w_ref[...],
                     preferred_element_type=jnp.float32) + bias_ref[...]
    logits = logits - jnp.max(logits, axis=-1, keepdims=True)
    e = jnp.exp(logits)
    o_ref[...] = e / jnp.sum(e, axis=-1, keepdims=True)   # exact division


# ------------------------------ pallas_call wrappers -------------------------

_PARALLEL_1D = pltpu.CompilerParams(dimension_semantics=("parallel",))


def _encoder_block_call(blk, x, pe, mask, num_heads, add_pe, eps):
    B, S, D = x.shape
    dff = blk["w1"].shape[1]
    kern = functools.partial(_encoder_block_kernel, num_heads=num_heads,
                             add_pe=add_pe, eps=eps)
    return pl.pallas_call(
        kern,
        out_shape=jax.ShapeDtypeStruct((B, S, D), jnp.float32),
        grid=(B,),
        in_specs=[
            _batch_spec((B, S, D)),                 # x
            _const_spec((S, D)),                    # pe
            _batch_spec((B, 1, S, S)),              # src mask
            _const_spec((1, D)), _const_spec((1, D)),          # ln1
            _const_spec((D, 3 * D)), _const_spec((1, 3 * D)),  # wqkv, bqkv
            _const_spec((D, D)), _const_spec((1, D)),          # wo, bo
            _const_spec((1, D)), _const_spec((1, D)),          # ln2
            _const_spec((D, dff)), _const_spec((1, dff)),      # w1, b1
            _const_spec((dff, D)), _const_spec((1, D)),        # w2, b2
        ],
        out_specs=_batch_spec((B, S, D)),
        compiler_params=_PARALLEL_1D,
    )(x, pe, mask,
      blk["ln1_g"], blk["ln1_b"], blk["wqkv"], blk["bqkv"],
      blk["wo"], blk["bo"], blk["ln2_g"], blk["ln2_b"],
      blk["w1"], blk["b1"], blk["w2"], blk["b2"])


def _decoder_block_call(blk, x, memory, tgt_mask, num_heads, eps):
    B, S, D = x.shape
    dff = blk["w1"].shape[1]
    kern = functools.partial(_decoder_block_kernel, num_heads=num_heads, eps=eps)
    return pl.pallas_call(
        kern,
        out_shape=jax.ShapeDtypeStruct((B, S, D), jnp.float32),
        grid=(B,),
        in_specs=[
            _batch_spec((B, S, D)),                 # x
            _batch_spec((B, S, D)),                 # memory
            _batch_spec((B, 1, S, S)),              # tgt mask
            _const_spec((1, D)), _const_spec((1, D)),          # ln1
            _const_spec((D, 3 * D)), _const_spec((1, 3 * D)),  # wqkv_s, bqkv_s
            _const_spec((D, D)), _const_spec((1, D)),          # wo_s, bo_s
            _const_spec((1, D)), _const_spec((1, D)),          # ln2
            _const_spec((D, D)), _const_spec((1, D)),          # wq_c, bq_c
            _const_spec((D, 2 * D)), _const_spec((1, 2 * D)),  # wkv_c, bkv_c
            _const_spec((D, D)), _const_spec((1, D)),          # wo_c, bo_c
            _const_spec((1, D)), _const_spec((1, D)),          # ln3
            _const_spec((D, dff)), _const_spec((1, dff)),      # w1, b1
            _const_spec((dff, D)), _const_spec((1, D)),        # w2, b2
        ],
        out_specs=_batch_spec((B, S, D)),
        compiler_params=_PARALLEL_1D,
    )(x, memory, tgt_mask,
      blk["ln1_g"], blk["ln1_b"], blk["wqkv_s"], blk["bqkv_s"],
      blk["wo_s"], blk["bo_s"], blk["ln2_g"], blk["ln2_b"],
      blk["wq_c"], blk["bq_c"], blk["wkv_c"], blk["bkv_c"],
      blk["wo_c"], blk["bo_c"], blk["ln3_g"], blk["ln3_b"],
      blk["w1"], blk["b1"], blk["w2"], blk["b2"])


def _ln_pe_call(x, pe, g, b, eps):
    B, S, D = x.shape
    return pl.pallas_call(
        functools.partial(_ln_pe_kernel, eps=eps),
        out_shape=jax.ShapeDtypeStruct((B, S, D), jnp.float32),
        grid=(B,),
        in_specs=[_batch_spec((B, S, D)), _const_spec((S, D)),
                  _const_spec((1, D)), _const_spec((1, D))],
        out_specs=_batch_spec((B, S, D)),
        compiler_params=_PARALLEL_1D,
    )(x, pe, g, b)


def _final_proj_call(z, g, b, w, bias, eps):
    B, S, D = z.shape
    V = w.shape[1]
    M = B * S
    tm = _row_tile(M)
    z2 = z.reshape(M, D)
    out = pl.pallas_call(
        functools.partial(_final_proj_kernel, eps=eps),
        out_shape=jax.ShapeDtypeStruct((M, V), jnp.float32),
        grid=(M // tm,),
        in_specs=[pl.BlockSpec((tm, D), lambda i: (i, 0)),
                  _const_spec((1, D)), _const_spec((1, D)),
                  _const_spec((D, V)), _const_spec((1, V))],
        out_specs=pl.BlockSpec((tm, V), lambda i: (i, 0)),
        compiler_params=_PARALLEL_1D,
    )(z2, g, b, w, bias)
    return out.reshape(B, S, V)


# --------------------------------- forward -----------------------------------

def transformer_forward(params, x, src_mask, tgt_mask, *, num_heads, eps=1e-6):
    # NOTE: eps=1e-6 matches the "from scratch" LayerNormalization default.
    S = x.shape[1]
    src_pe = params["src_pe"][:S]
    tgt_pe = params["tgt_pe"][:S]

    # encode: src_pos(x) -> encoder (PE add fused into block 0)
    enc = params["encoder"]
    h = x
    for i, blk in enumerate(enc["blocks"]):
        h = _encoder_block_call(blk, h, src_pe, src_mask,
                                num_heads, add_pe=(i == 0), eps=eps)
    # memory = tgt_pos(encoder output): final encoder LN fused with PE add
    memory = _ln_pe_call(h, tgt_pe, enc["ln_g"], enc["ln_b"], eps)

    # decode: decoder input = ORIGINAL x (no PE), memory = tgt_pos(enc out)
    dec = params["decoder"]
    z = x
    for blk in dec["blocks"]:
        z = _decoder_block_call(blk, z, memory, tgt_mask, num_heads, eps)

    # final LN + projection + softmax(-1), fused and row-tiled
    return _final_proj_call(z, dec["ln_g"], dec["ln_b"],
                            params["proj_w"], params["proj_b"], eps)


# ----------------------------- parameter creation ----------------------------

def sinusoidal_pe(S, D):
    pos = jnp.arange(S, dtype=jnp.float32)[:, None]
    i = jnp.arange(0, D, 2, dtype=jnp.float32)[None, :]
    div = jnp.exp(-i * (math.log(10000.0) / D))
    pe = jnp.zeros((S, D), jnp.float32)
    pe = pe.at[:, 0::2].set(jnp.sin(pos * div))
    pe = pe.at[:, 1::2].set(jnp.cos(pos * div))
    return pe


def init_params(key, *, d_model, num_heads, d_ff, vocab, n_layers, max_seq):
    del num_heads  # head count is a static arg of the forward, not a param
    w_dtype = jnp.bfloat16  # matmul weights stored in bf16 (MXU-native)

    def dense(k, d_in, d_out):
        w = (jax.random.normal(k, (d_in, d_out), jnp.float32) * 0.02).astype(w_dtype)
        b = jnp.zeros((1, d_out), jnp.float32)
        return w, b

    def ln():
        return (jnp.ones((1, d_model), jnp.float32),
                jnp.zeros((1, d_model), jnp.float32))

    def enc_block(k):
        k1, k2, k3, k4 = jax.random.split(k, 4)
        wqkv, bqkv = dense(k1, d_model, 3 * d_model)
        wo, bo = dense(k2, d_model, d_model)
        w1, b1 = dense(k3, d_model, d_ff)
        w2, b2 = dense(k4, d_ff, d_model)
        g1, bb1 = ln(); g2, bb2 = ln()
        return dict(ln1_g=g1, ln1_b=bb1, wqkv=wqkv, bqkv=bqkv, wo=wo, bo=bo,
                    ln2_g=g2, ln2_b=bb2, w1=w1, b1=b1, w2=w2, b2=b2)

    def dec_block(k):
        ks = jax.random.split(k, 7)
        wqkv_s, bqkv_s = dense(ks[0], d_model, 3 * d_model)
        wo_s, bo_s = dense(ks[1], d_model, d_model)
        wq_c, bq_c = dense(ks[2], d_model, d_model)
        wkv_c, bkv_c = dense(ks[3], d_model, 2 * d_model)
        wo_c, bo_c = dense(ks[4], d_model, d_model)
        w1, b1 = dense(ks[5], d_model, d_ff)
        w2, b2 = dense(ks[6], d_ff, d_model)
        g1, bb1 = ln(); g2, bb2 = ln(); g3, bb3 = ln()
        return dict(ln1_g=g1, ln1_b=bb1,
                    wqkv_s=wqkv_s, bqkv_s=bqkv_s, wo_s=wo_s, bo_s=bo_s,
                    ln2_g=g2, ln2_b=bb2,
                    wq_c=wq_c, bq_c=bq_c, wkv_c=wkv_c, bkv_c=bkv_c,
                    wo_c=wo_c, bo_c=bo_c,
                    ln3_g=g3, ln3_b=bb3, w1=w1, b1=b1, w2=w2, b2=b2)

    keys = jax.random.split(key, 2 * n_layers + 1)
    enc_blocks = [enc_block(keys[i]) for i in range(n_layers)]
    dec_blocks = [dec_block(keys[n_layers + i]) for i in range(n_layers)]
    eg, eb = ln()
    dg, db = ln()
    pw, pb = dense(keys[-1], d_model, vocab)
    return dict(
        src_pe=sinusoidal_pe(max_seq, d_model),
        tgt_pe=sinusoidal_pe(max_seq, d_model),
        encoder=dict(blocks=enc_blocks, ln_g=eg, ln_b=eb),
        decoder=dict(blocks=dec_blocks, ln_g=dg, ln_b=db),
        proj_w=pw, proj_b=pb,
    )


# ----------------------------------- main ------------------------------------

if __name__ == "__main__":
    B, S, D, H, DFF, VOCAB, LAYERS = 2, 8, 32, 4, 64, 64, 2

    key = jax.random.PRNGKey(0)
    k_param, k_x = jax.random.split(key)
    params = init_params(k_param, d_model=D, num_heads=H, d_ff=DFF,
                         vocab=VOCAB, n_layers=LAYERS, max_seq=S)

    x = jax.random.normal(k_x, (B, S, D), jnp.float32)      # embedded source
    src_mask = jnp.ones((B, 1, S, S), jnp.float32)           # no padding
    tgt_mask = jnp.broadcast_to(
        jnp.tril(jnp.ones((S, S), jnp.float32))[None, None], (B, 1, S, S))

    # num_heads is a static Python int (bound before jit) — it must never be
    # a traced value because it drives head-slicing shapes.
    fwd = jax.jit(functools.partial(transformer_forward, num_heads=H))
    out = jax.block_until_ready(fwd(params, x, src_mask, tgt_mask))

    assert out.shape == (B, S, VOCAB)
    assert bool(jnp.all(jnp.isfinite(out)))
    # softmax rows must sum to 1
    assert bool(jnp.allclose(jnp.sum(out, axis=-1), 1.0, atol=1e-4))
    print("KERNEL_OK")
</pallas_src>

<mosaic_0001>
module attributes {stable_mosaic.version = 11 : i64} {
  func.func @_ln_pe_kernel(%arg0: i32, %arg1: memref<1x8x32xf32, #tpu.memory_space<vmem>>, %arg2: memref<8x32xf32, #tpu.memory_space<vmem>>, %arg3: memref<1x32xf32, #tpu.memory_space<vmem>>, %arg4: memref<1x32xf32, #tpu.memory_space<vmem>>, %arg5: memref<1x8x32xf32, #tpu.memory_space<vmem>>) attributes {dimension_semantics = [#tpu.dimension_semantics<parallel>], iteration_bounds = array<i64: 2>, scalar_prefetch = 0 : i64, scratch_operands = 0 : i64, tpu.core_type = #tpu.core_type<tc>, window_params = [{transform_indices = @transform_0, window_bounds = array<i64: 1, 8, 32>}, {pipeline_mode = #tpu.pipeline_mode<synchronous>, transform_indices = @transform_1, window_bounds = array<i64: 8, 32>}, {pipeline_mode = #tpu.pipeline_mode<synchronous>, transform_indices = @transform_2, window_bounds = array<i64: 1, 32>}, {pipeline_mode = #tpu.pipeline_mode<synchronous>, transform_indices = @transform_3, window_bounds = array<i64: 1, 32>}, {transform_indices = @transform_4, window_bounds = array<i64: 1, 8, 32>}]} {
    %c0 = arith.constant 0 : index
    %c0_0 = arith.constant 0 : index
    %c0_1 = arith.constant 0 : index
    %0 = vector.load %arg1[%c0, %c0_0, %c0_1] : memref<1x8x32xf32, #tpu.memory_space<vmem>>, vector<1x8x32xf32>
    %1 = vector.shape_cast %0 : vector<1x8x32xf32> to vector<8x32xf32>
    %c0_2 = arith.constant 0 : index
    %c0_3 = arith.constant 0 : index
    %2 = vector.load %arg3[%c0_2, %c0_3] : memref<1x32xf32, #tpu.memory_space<vmem>>, vector<1x32xf32>
    %c0_4 = arith.constant 0 : index
    %c0_5 = arith.constant 0 : index
    %3 = vector.load %arg4[%c0_4, %c0_5] : memref<1x32xf32, #tpu.memory_space<vmem>>, vector<1x32xf32>
    %cst = arith.constant dense<0.000000e+00> : vector<8xf32>
    %4 = vector.multi_reduction <add>, %1, %cst [1] : vector<8x32xf32> to vector<8xf32>
    %5 = vector.shape_cast %4 : vector<8xf32> to vector<8x1xf32>
    %cst_6 = arith.constant 3.200000e+01 : f32
    %6 = vector.broadcast %cst_6 : f32 to vector<8x1xf32>
    %7 = arith.divf %5, %6 : vector<8x1xf32>
    %8 = vector.broadcast %7 : vector<8x1xf32> to vector<8x32xf32>
    %9 = arith.subf %1, %8 : vector<8x32xf32>
    %10 = arith.mulf %9, %9 : vector<8x32xf32>
    %cst_7 = arith.constant dense<0.000000e+00> : vector<8xf32>
    %11 = vector.multi_reduction <add>, %10, %cst_7 [1] : vector<8x32xf32> to vector<8xf32>
    %12 = vector.shape_cast %11 : vector<8xf32> to vector<8x1xf32>
    %cst_8 = arith.constant 3.200000e+01 : f32
    %13 = vector.broadcast %cst_8 : f32 to vector<8x1xf32>
    %14 = arith.divf %12, %13 : vector<8x1xf32>
    %15 = vector.broadcast %7 : vector<8x1xf32> to vector<8x32xf32>
    %16 = arith.subf %1, %15 : vector<8x32xf32>
    %cst_9 = arith.constant 9.99999997E-7 : f32
    %17 = vector.broadcast %cst_9 : f32 to vector<8x1xf32>
    %18 = arith.addf %14, %17 : vector<8x1xf32>
    %19 = math.rsqrt %18 : vector<8x1xf32>
    %20 = vector.broadcast %19 : vector<8x1xf32> to vector<8x32xf32>
    %21 = arith.mulf %16, %20 : vector<8x32xf32>
    %22 = vector.broadcast %2 : vector<1x32xf32> to vector<8x32xf32>
    %23 = arith.mulf %21, %22 : vector<8x32xf32>
    %24 = vector.broadcast %3 : vector<1x32xf32> to vector<8x32xf32>
    %25 = arith.addf %23, %24 : vector<8x32xf32>
    %c0_10 = arith.constant 0 : index
    %c0_11 = arith.constant 0 : index
    %26 = vector.load %arg2[%c0_10, %c0_11] : memref<8x32xf32, #tpu.memory_space<vmem>>, vector<8x32xf32>
    %27 = arith.addf %25, %26 : vector<8x32xf32>
    %c0_12 = arith.constant 0 : index
    %c0_13 = arith.constant 0 : index
    %c0_14 = arith.constant 0 : index
    %28 = vector.load %arg5[%c0_12, %c0_13, %c0_14] : memref<1x8x32xf32, #tpu.memory_space<vmem>>, vector<1x8x32xf32>
    %29 = vector.shape_cast %28 : vector<1x8x32xf32> to vector<8x32xf32>
    %30 = vector.shape_cast %27 : vector<8x32xf32> to vector<1x8x32xf32>
    tpu.vector_store %arg5[%c0_12, %c0_13, %c0_14], %30 {strides = array<i32>} : memref<1x8x32xf32, #tpu.memory_space<vmem>>, vector<1x8x32xf32>,
    return
  }
  func.func @transform_0(%arg0: i32) -> (i32, i32, i32) {
    %c0_i32 = arith.constant 0 : i32
    %c0_i32_0 = arith.constant 0 : i32
    %c0_i32_1 = arith.constant 0 : i32
    return %arg0, %c0_i32, %c0_i32_0 : i32, i32, i32
  }
  func.func @transform_1(%arg0: i32) -> (i32, i32) {
    %c0_i32 = arith.constant 0 : i32
    %c0_i32_0 = arith.constant 0 : i32
    %c0_i32_1 = arith.constant 0 : i32
    return %c0_i32, %c0_i32_0 : i32, i32
  }
  func.func @transform_2(%arg0: i32) -> (i32, i32) {
    %c0_i32 = arith.constant 0 : i32
    %c0_i32_0 = arith.constant 0 : i32
    %c0_i32_1 = arith.constant 0 : i32
    return %c0_i32, %c0_i32_0 : i32, i32
  }
  func.func @transform_3(%arg0: i32) -> (i32, i32) {
    %c0_i32 = arith.constant 0 : i32
    %c0_i32_0 = arith.constant 0 : i32
    %c0_i32_1 = arith.constant 0 : i32
    return %c0_i32, %c0_i32_0 : i32, i32
  }
  func.func @transform_4(%arg0: i32) -> (i32, i32, i32) {
    %c0_i32 = arith.constant 0 : i32
    %c0_i32_0 = arith.constant 0 : i32
    %c0_i32_1 = arith.constant 0 : i32
    return %arg0, %c0_i32, %c0_i32_0 : i32, i32, i32
  }
}

module attributes {stable_mosaic.version = 11 : i64} {
  func.func @_encoder_block_kernel(%arg0: i32, %arg1: memref<1x8x32xf32, #tpu.memory_space<vmem>>, %arg2: memref<8x32xf32, #tpu.memory_space<vmem>>, %arg3: memref<1x1x8x8xf32, #tpu.memory_space<vmem>>, %arg4: memref<1x32xf32, #tpu.memory_space<vmem>>, %arg5: memref<1x32xf32, #tpu.memory_space<vmem>>, %arg6: memref<32x96xbf16, #tpu.memory_space<vmem>>, %arg7: memref<1x96xf32, #tpu.memory_space<vmem>>, %arg8: memref<32x32xbf16, #tpu.memory_space<vmem>>, %arg9: memref<1x32xf32, #tpu.memory_space<vmem>>, %arg10: memref<1x32xf32, #tpu.memory_space<vmem>>, %arg11: memref<1x32xf32, #tpu.memory_space<vmem>>, %arg12: memref<32x64xbf16, #tpu.memory_space<vmem>>, %arg13: memref<1x64xf32, #tpu.memory_space<vmem>>, %arg14: memref<64x32xbf16, #tpu.memory_space<vmem>>, %arg15: memref<1x32xf32, #tpu.memory_space<vmem>>, %arg16: memref<1x8x32xf32, #tpu.memory_space<vmem>>) attributes {dimension_semantics = [#tpu.dimension_semantics<parallel>], iteration_bounds = array<i64: 2>, scalar_prefetch = 0 : i64, scratch_operands = 0 : i64, tpu.core_type = #tpu.core_type<tc>, window_params = [{transform_indices = @transform_0, window_bounds = array<i64: 1, 8, 32>}, {pipeline_mode = #tpu.pipeline_mode<synchronous>, transform_indices = @transform_1, window_bounds = array<i64: 8, 32>}, {transform_indices = @transform_2, window_bounds = array<i64: 1, 1, 8, 8>}, {pipeline_mode = #tpu.pipeline_mode<synchronous>, transform_indices = @transform_3, window_bounds = array<i64: 1, 32>}, {pipeline_mode = #tpu.pipeline_mode<synchronous>, transform_indices = @transform_4, window_bounds = array<i64: 1, 32>}, {pipeline_mode = #tpu.pipeline_mode<synchronous>, transform_indices = @transform_5, window_bounds = array<i64: 32, 96>}, {pipeline_mode = #tpu.pipeline_mode<synchronous>, transform_indices = @transform_6, window_bounds = array<i64: 1, 96>}, {pipeline_mode = #tpu.pipeline_mode<synchronous>, transform_indices = @transform_7, window_bounds = array<i64: 32, 32>}, {pipeline_mode = #tpu.pipeline_mode<synchronous>, transform_indices = @transform_8, window_bounds = array<i64: 1, 32>}, {pipeline_mode = #tpu.pipeline_mode<synchronous>, transform_indices = @transform_9, window_bounds = array<i64: 1, 32>}, {pipeline_mode = #tpu.pipeline_mode<synchronous>, transform_indices = @transform_10, window_bounds = array<i64: 1, 32>}, {pipeline_mode = #tpu.pipeline_mode<synchronous>, transform_indices = @transform_11, window_bounds = array<i64: 32, 64>}, {pipeline_mode = #tpu.pipeline_mode<synchronous>, transform_indices = @transform_12, window_bounds = array<i64: 1, 64>}, {pipeline_mode = #tpu.pipeline_mode<synchronous>, transform_indices = @transform_13, window_bounds = array<i64: 64, 32>}, {pipeline_mode = #tpu.pipeline_mode<synchronous>, transform_indices = @transform_14, window_bounds = array<i64: 1, 32>}, {transform_indices = @transform_15, window_bounds = array<i64: 1, 8, 32>}]} {
    %c0 = arith.constant 0 : index
    %c0_0 = arith.constant 0 : index
    %c0_1 = arith.constant 0 : index
    %0 = vector.load %arg1[%c0, %c0_0, %c0_1] : memref<1x8x32xf32, #tpu.memory_space<vmem>>, vector<1x8x32xf32>
    %1 = vector.shape_cast %0 : vector<1x8x32xf32> to vector<8x32xf32>
    %c0_2 = arith.constant 0 : index
    %c0_3 = arith.constant 0 : index
    %2 = vector.load %arg2[%c0_2, %c0_3] : memref<8x32xf32, #tpu.memory_space<vmem>>, vector<8x32xf32>
    %3 = arith.addf %1, %2 : vector<8x32xf32>
    %c0_4 = arith.constant 0 : index
    %c0_5 = arith.constant 0 : index
    %4 = vector.load %arg4[%c0_4, %c0_5] : memref<1x32xf32, #tpu.memory_space<vmem>>, vector<1x32xf32>
    %c0_6 = arith.constant 0 : index
    %c0_7 = arith.constant 0 : index
    %5 = vector.load %arg5[%c0_6, %c0_7] : memref<1x32xf32, #tpu.memory_space<vmem>>, vector<1x32xf32>
    %cst = arith.constant dense<0.000000e+00> : vector<8xf32>
    %6 = vector.multi_reduction <add>, %3, %cst [1] : vector<8x32xf32> to vector<8xf32>
    %7 = vector.shape_cast %6 : vector<8xf32> to vector<8x1xf32>
    %cst_8 = arith.constant 3.200000e+01 : f32
    %8 = vector.broadcast %cst_8 : f32 to vector<8x1xf32>
    %9 = arith.divf %7, %8 : vector<8x1xf32>
    %10 = vector.broadcast %9 : vector<8x1xf32> to vector<8x32xf32>
    %11 = arith.subf %3, %10 : vector<8x32xf32>
    %12 = arith.mulf %11, %11 : vector<8x32xf32>
    %cst_9 = arith.constant dense<0.000000e+00> : vector<8xf32>
    %13 = vector.multi_reduction <add>, %12, %cst_9 [1] : vector<8x32xf32> to vector<8xf32>
    %14 = vector.shape_cast %13 : vector<8xf32> to vector<8x1xf32>
    %cst_10 = arith.constant 3.200000e+01 : f32
    %15 = vector.broadcast %cst_10 : f32 to vector<8x1xf32>
    %16 = arith.divf %14, %15 : vector<8x1xf32>
    %17 = vector.broadcast %9 : vector<8x1xf32> to vector<8x32xf32>
    %18 = arith.subf %3, %17 : vector<8x32xf32>
    %cst_11 = arith.constant 9.99999997E-7 : f32
    %19 = vector.broadcast %cst_11 : f32 to vector<8x1xf32>
    %20 = arith.addf %16, %19 : vector<8x1xf32>
    %21 = math.rsqrt %20 : vector<8x1xf32>
    %22 = vector.broadcast %21 : vector<8x1xf32> to vector<8x32xf32>
    %23 = arith.mulf %18, %22 : vector<8x32xf32>
    %24 = vector.broadcast %4 : vector<1x32xf32> to vector<8x32xf32>
    %25 = arith.mulf %23, %24 : vector<8x32xf32>
    %26 = vector.broadcast %5 : vector<1x32xf32> to vector<8x32xf32>
    %27 = arith.addf %25, %26 : vector<8x32xf32>
    %28 = arith.truncf %27 : vector<8x32xf32> to vector<8x32xbf16>
    %c0_12 = arith.constant 0 : index
    %c0_13 = arith.constant 0 : index
    %29 = vector.load %arg6[%c0_12, %c0_13] : memref<32x96xbf16, #tpu.memory_space<vmem>>, vector<32x96xbf16>
    %cst_14 = arith.constant dense<0.000000e+00> : vector<8x96xf32>
    %30 = tpu.matmul %28, %29, %cst_14 {dimension_numbers = #tpu.dot_dimension_numbers<[1], [0], [0], [1], [0, 0, 1, 1], [], []>} : vector<8x32xbf16>, vector<32x96xbf16>, vector<8x96xf32> -> vector<8x96xf32>
    %c0_15 = arith.constant 0 : index
    %c0_16 = arith.constant 0 : index
    %31 = vector.load %arg7[%c0_15, %c0_16] : memref<1x96xf32, #tpu.memory_space<vmem>>, vector<1x96xf32>
    %32 = vector.broadcast %31 : vector<1x96xf32> to vector<8x96xf32>
    %33 = arith.addf %30, %32 : vector<8x96xf32>
    %34 = vector.extract_strided_slice %33 {offsets = [0, 0], sizes = [8, 32], strides = [1, 1]} : vector<8x96xf32> to vector<8x32xf32>
    %35 = vector.extract_strided_slice %33 {offsets = [0, 32], sizes = [8, 32], strides = [1, 1]} : vector<8x96xf32> to vector<8x32xf32>
    %36 = vector.extract_strided_slice %33 {offsets = [0, 64], sizes = [8, 32], strides = [1, 1]} : vector<8x96xf32> to vector<8x32xf32>
    %c0_17 = arith.constant 0 : index
    %c0_18 = arith.constant 0 : index
    %c0_19 = arith.constant 0 : index
    %c0_20 = arith.constant 0 : index
    %37 = vector.load %arg3[%c0_17, %c0_18, %c0_19, %c0_20] : memref<1x1x8x8xf32, #tpu.memory_space<vmem>>, vector<1x1x8x8xf32>
    %38 = vector.shape_cast %37 : vector<1x1x8x8xf32> to vector<8x8xf32>
    %39 = vector.extract_strided_slice %34 {offsets = [0, 0], sizes = [8, 8], strides = [1, 1]} : vector<8x32xf32> to vector<8x8xf32>
    %40 = arith.truncf %39 : vector<8x8xf32> to vector<8x8xbf16>
    %41 = vector.extract_strided_slice %35 {offsets = [0, 0], sizes = [8, 8], strides = [1, 1]} : vector<8x32xf32> to vector<8x8xf32>
    %42 = arith.truncf %41 : vector<8x8xf32> to vector<8x8xbf16>
    %43 = vector.extract_strided_slice %36 {offsets = [0, 0], sizes = [8, 8], strides = [1, 1]} : vector<8x32xf32> to vector<8x8xf32>
    %44 = arith.truncf %43 : vector<8x8xf32> to vector<8x8xbf16>
    %cst_21 = arith.constant dense<0.000000e+00> : vector<8x8xf32>
    %45 = tpu.matmul %40, %42, %cst_21 {dimension_numbers = #tpu.dot_dimension_numbers<[1], [1], [0], [0], [0, 0, 1, 0], [], []>} : vector<8x8xbf16>, vector<8x8xbf16>, vector<8x8xf32> -> vector<8x8xf32>
    %cst_22 = arith.constant 0.353553385 : f32
    %46 = vector.broadcast %cst_22 : f32 to vector<8x8xf32>
    %47 = arith.mulf %45, %46 : vector<8x8xf32>
    %cst_23 = arith.constant 0.000000e+00 : f32
    %48 = vector.broadcast %cst_23 : f32 to vector<8x8xf32>
    %49 = arith.cmpf oeq, %38, %48 : vector<8x8xf32>
    %cst_24 = arith.constant -1.000000e+09 : f32
    %50 = vector.broadcast %cst_24 : f32 to vector<8x8xf32>
    %51 = arith.select %49, %50, %47 : vector<8x8xi1>, vector<8x8xf32>
    %cst_25 = arith.constant dense<0xFF800000> : vector<8xf32>
    %52 = vector.multi_reduction <maximumf>, %51, %cst_25 [1] : vector<8x8xf32> to vector<8xf32>
    %53 = vector.shape_cast %52 : vector<8xf32> to vector<8x1xf32>
    %54 = vector.broadcast %53 : vector<8x1xf32> to vector<8x8xf32>
    %55 = arith.subf %51, %54 : vector<8x8xf32>
    %56 = math.exp %55 : vector<8x8xf32>
    %cst_26 = arith.constant dense<0.000000e+00> : vector<8xf32>
    %57 = vector.multi_reduction <add>, %56, %cst_26 [1] : vector<8x8xf32> to vector<8xf32>
    %58 = vector.shape_cast %57 : vector<8xf32> to vector<8x1xf32>
    %59 = tpu.reciprocal %58 {approx = true} : vector<8x1xf32> -> vector<8x1xf32>
    %60 = vector.broadcast %59 : vector<8x1xf32> to vector<8x8xf32>
    %61 = arith.mulf %56, %60 : vector<8x8xf32>
    %62 = arith.truncf %61 : vector<8x8xf32> to vector<8x8xbf16>
    %cst_27 = arith.constant dense<0.000000e+00> : vector<8x8xf32>
    %63 = tpu.matmul %62, %44, %cst_27 {dimension_numbers = #tpu.dot_dimension_numbers<[1], [0], [0], [1], [0, 0, 1, 1], [], []>} : vector<8x8xbf16>, vector<8x8xbf16>, vector<8x8xf32> -> vector<8x8xf32>
    %64 = vector.extract_strided_slice %34 {offsets = [0, 8], sizes = [8, 8], strides = [1, 1]} : vector<8x32xf32> to vector<8x8xf32>
    %65 = arith.truncf %64 : vector<8x8xf32> to vector<8x8xbf16>
    %66 = vector.extract_strided_slice %35 {offsets = [0, 8], sizes = [8, 8], strides = [1, 1]} : vector<8x32xf32> to vector<8x8xf32>
    %67 = arith.truncf %66 : vector<8x8xf32> to vector<8x8xbf16>
    %68 = vector.extract_strided_slice %36 {offsets = [0, 8], sizes = [8, 8], strides = [1, 1]} : vector<8x32xf32> to vector<8x8xf32>
    %69 = arith.truncf %68 : vector<8x8xf32> to vector<8x8xbf16>
    %cst_28 = arith.constant dense<0.000000e+00> : vector<8x8xf32>
    %70 = tpu.matmul %65, %67, %cst_28 {dimension_numbers = #tpu.dot_dimension_numbers<[1], [1], [0], [0], [0, 0, 1, 0], [], []>} : vector<8x8xbf16>, vector<8x8xbf16>, vector<8x8xf32> -> vector<8x8xf32>
    %cst_29 = arith.constant 0.353553385 : f32
    %71 = vector.broadcast %cst_29 : f32 to vector<8x8xf32>
    %72 = arith.mulf %70, %71 : vector<8x8xf32>
    %cst_30 = arith.constant 0.000000e+00 : f32
    %73 = vector.broadcast %cst_30 : f32 to vector<8x8xf32>
    %74 = arith.cmpf oeq, %38, %73 : vector<8x8xf32>
    %cst_31 = arith.constant -1.000000e+09 : f32
    %75 = vector.broadcast %cst_31 : f32 to vector<8x8xf32>
    %76 = arith.select %74, %75, %72 : vector<8x8xi1>, vector<8x8xf32>
    %cst_32 = arith.constant dense<0xFF800000> : vector<8xf32>
    %77 = vector.multi_reduction <maximumf>, %76, %cst_32 [1] : vector<8x8xf32> to vector<8xf32>
    %78 = vector.shape_cast %77 : vector<8xf32> to vector<8x1xf32>
    %79 = vector.broadcast %78 : vector<8x1xf32> to vector<8x8xf32>
    %80 = arith.subf %76, %79 : vector<8x8xf32>
    %81 = math.exp %80 : vector<8x8xf32>
    %cst_33 = arith.constant dense<0.000000e+00> : vector<8xf32>
    %82 = vector.multi_reduction <add>, %81, %cst_33 [1] : vector<8x8xf32> to vector<8xf32>
    %83 = vector.shape_cast %82 : vector<8xf32> to vector<8x1xf32>
    %84 = tpu.reciprocal %83 {approx = true} : vector<8x1xf32> -> vector<8x1xf32>
    %85 = vector.broadcast %84 : vector<8x1xf32> to vector<8x8xf32>
    %86 = arith.mulf %81, %85 : vector<8x8xf32>
    %87 = arith.truncf %86 : vector<8x8xf32> to vector<8x8xbf16>
    %cst_34 = arith.constant dense<0.000000e+00> : vector<8x8xf32>
    %88 = tpu.matmul %87, %69, %cst_34 {dimension_numbers = #tpu.dot_dimension_numbers<[1], [0], [0], [1], [0, 0, 1, 1], [], []>} : vector<8x8xbf16>, vector<8x8xbf16>, vector<8x8xf32> -> vector<8x8xf32>
    %89 = vector.extract_strided_slice %34 {offsets = [0, 16], sizes = [8, 8], strides = [1, 1]} : vector<8x32xf32> to vector<8x8xf32>
    %90 = arith.truncf %89 : vector<8x8xf32> to vector<8x8xbf16>
    %91 = vector.extract_strided_slice %35 {offsets = [0, 16], sizes = [8, 8], strides = [1, 1]} : vector<8x32xf32> to vector<8x8xf32>
    %92 = arith.truncf %91 : vector<8x8xf32> to vector<8x8xbf16>
    %93 = vector.extract_strided_slice %36 {offsets = [0, 16], sizes = [8, 8], strides = [1, 1]} : vector<8x32xf32> to vector<8x8xf32>
    %94 = arith.truncf %93 : vector<8x8xf32> to vector<8x8xbf16>
    %cst_35 = arith.constant dense<0.000000e+00> : vector<8x8xf32>
    %95 = tpu.matmul %90, %92, %cst_35 {dimension_numbers = #tpu.dot_dimension_numbers<[1], [1], [0], [0], [0, 0, 1, 0], [], []>} : vector<8x8xbf16>, vector<8x8xbf16>, vector<8x8xf32> -> vector<8x8xf32>
    %cst_36 = arith.constant 0.353553385 : f32
    %96 = vector.broadcast %cst_36 : f32 to vector<8x8xf32>
    %97 = arith.mulf %95, %96 : vector<8x8xf32>
    %cst_37 = arith.constant 0.000000e+00 : f32
    %98 = vector.broadcast %cst_37 : f32 to vector<8x8xf32>
    %99 = arith.cmpf oeq, %38, %98 : vector<8x8xf32>
    %cst_38 = arith.constant -1.000000e+09 : f32
    %100 = vector.broadcast %cst_38 : f32 to vector<8x8xf32>
    %101 = arith.select %99, %100, %97 : vector<8x8xi1>, vector<8x8xf32>
    %cst_39 = arith.constant dense<0xFF800000> : vector<8xf32>
    %102 = vector.multi_reduction <maximumf>, %101, %cst_39 [1] : vector<8x8xf32> to vector<8xf32>
    %103 = vector.shape_cast %102 : vector<8xf32> to vector<8x1xf32>
    %104 = vector.broadcast %103 : vector<8x1xf32> to vector<8x8xf32>
    %105 = arith.subf %101, %104 : vector<8x8xf32>
    %106 = math.exp %105 : vector<8x8xf32>
    %cst_40 = arith.constant dense<0.000000e+00> : vector<8xf32>
    %107 = vector.multi_reduction <add>, %106, %cst_40 [1] : vector<8x8xf32> to vector<8xf32>
    %108 = vector.shape_cast %107 : vector<8xf32> to vector<8x1xf32>
    %109 = tpu.reciprocal %108 {approx = true} : vector<8x1xf32> -> vector<8x1xf32>
    %110 = vector.broadcast %109 : vector<8x1xf32> to vector<8x8xf32>
    %111 = arith.mulf %106, %110 : vector<8x8xf32>
    %112 = arith.truncf %111 : vector<8x8xf32> to vector<8x8xbf16>
    %cst_41 = arith.constant dense<0.000000e+00> : vector<8x8xf32>
    %113 = tpu.matmul %112, %94, %cst_41 {dimension_numbers = #tpu.dot_dimension_numbers<[1], [0], [0], [1], [0, 0, 1, 1], [], []>} : vector<8x8xbf16>, vector<8x8xbf16>, vector<8x8xf32> -> vector<8x8xf32>
    %114 = vector.extract_strided_slice %34 {offsets = [0, 24], sizes = [8, 8], strides = [1, 1]} : vector<8x32xf32> to vector<8x8xf32>
    %115 = arith.truncf %114 : vector<8x8xf32> to vector<8x8xbf16>
    %116 = vector.extract_strided_slice %35 {offsets = [0, 24], sizes = [8, 8], strides = [1, 1]} : vector<8x32xf32> to vector<8x8xf32>
    %117 = arith.truncf %116 : vector<8x8xf32> to vector<8x8xbf16>
    %118 = vector.extract_strided_slice %36 {offsets = [0, 24], sizes = [8, 8], strides = [1, 1]} : vector<8x32xf32> to vector<8x8xf32>
    %119 = arith.truncf %118 : vector<8x8xf32> to vector<8x8xbf16>
    %cst_42 = arith.constant dense<0.000000e+00> : vector<8x8xf32>
    %120 = tpu.matmul %115, %117, %cst_42 {dimension_numbers = #tpu.dot_dimension_numbers<[1], [1], [0], [0], [0, 0, 1, 0], [], []>} : vector<8x8xbf16>, vector<8x8xbf16>, vector<8x8xf32> -> vector<8x8xf32>
    %cst_43 = arith.constant 0.353553385 : f32
    %121 = vector.broadcast %cst_43 : f32 to vector<8x8xf32>
    %122 = arith.mulf %120, %121 : vector<8x8xf32>
    %cst_44 = arith.constant 0.000000e+00 : f32
    %123 = vector.broadcast %cst_44 : f32 to vector<8x8xf32>
    %124 = arith.cmpf oeq, %38, %123 : vector<8x8xf32>
    %cst_45 = arith.constant -1.000000e+09 : f32
    %125 = vector.broadcast %cst_45 : f32 to vector<8x8xf32>
    %126 = arith.select %124, %125, %122 : vector<8x8xi1>, vector<8x8xf32>
    %cst_46 = arith.constant dense<0xFF800000> : vector<8xf32>
    %127 = vector.multi_reduction <maximumf>, %126, %cst_46 [1] : vector<8x8xf32> to vector<8xf32>
    %128 = vector.shape_cast %127 : vector<8xf32> to vector<8x1xf32>
    %129 = vector.broadcast %128 : vector<8x1xf32> to vector<8x8xf32>
    %130 = arith.subf %126, %129 : vector<8x8xf32>
    %131 = math.exp %130 : vector<8x8xf32>
    %cst_47 = arith.constant dense<0.000000e+00> : vector<8xf32>
    %132 = vector.multi_reduction <add>, %131, %cst_47 [1] : vector<8x8xf32> to vector<8xf32>
    %133 = vector.shape_cast %132 : vector<8xf32> to vector<8x1xf32>
    %134 = tpu.reciprocal %133 {approx = true} : vector<8x1xf32> -> vector<8x1xf32>
    %135 = vector.broadcast %134 : vector<8x1xf32> to vector<8x8xf32>
    %136 = arith.mulf %131, %135 : vector<8x8xf32>
    %137 = arith.truncf %136 : vector<8x8xf32> to vector<8x8xbf16>
    %cst_48 = arith.constant dense<0.000000e+00> : vector<8x8xf32>
    %138 = tpu.matmul %137, %119, %cst_48 {dimension_numbers = #tpu.dot_dimension_numbers<[1], [0], [0], [1], [0, 0, 1, 1], [], []>} : vector<8x8xbf16>, vector<8x8xbf16>, vector<8x8xf32> -> vector<8x8xf32>
    %139 = tpu.concatenate %63, %88, %113, %138 in 1 : vector<8x8xf32>, vector<8x8xf32>, vector<8x8xf32>, vector<8x8xf32> -> vector<8x32xf32>
    %140 = arith.truncf %139 : vector<8x32xf32> to vector<8x32xbf16>
    %c0_49 = arith.constant 0 : index
    %c0_50 = arith.constant 0 : index
    %141 = vector.load %arg8[%c0_49, %c0_50] : memref<32x32xbf16, #tpu.memory_space<vmem>>, vector<32x32xbf16>
    %cst_51 = arith.constant dense<0.000000e+00> : vector<8x32xf32>
    %142 = tpu.matmul %140, %141, %cst_51 {dimension_numbers = #tpu.dot_dimension_numbers<[1], [0], [0], [1], [0, 0, 1, 1], [], []>} : vector<8x32xbf16>, vector<32x32xbf16>, vector<8x32xf32> -> vector<8x32xf32>
    %143 = arith.addf %3, %142 : vector<8x32xf32>
    %c0_52 = arith.constant 0 : index
    %c0_53 = arith.constant 0 : index
    %144 = vector.load %arg9[%c0_52, %c0_53] : memref<1x32xf32, #tpu.memory_space<vmem>>, vector<1x32xf32>
    %145 = vector.broadcast %144 : vector<1x32xf32> to vector<8x32xf32>
    %146 = arith.addf %143, %145 : vector<8x32xf32>
    %c0_54 = arith.constant 0 : index
    %c0_55 = arith.constant 0 : index
    %147 = vector.load %arg10[%c0_54, %c0_55] : memref<1x32xf32, #tpu.memory_space<vmem>>, vector<1x32xf32>
    %c0_56 = arith.constant 0 : index
    %c0_57 = arith.constant 0 : index
    %148 = vector.load %arg11[%c0_56, %c0_57] : memref<1x32xf32, #tpu.memory_space<vmem>>, vector<1x32xf32>
    %cst_58 = arith.constant dense<0.000000e+00> : vector<8xf32>
    %149 = vector.multi_reduction <add>, %146, %cst_58 [1] : vector<8x32xf32> to vector<8xf32>
    %150 = vector.shape_cast %149 : vector<8xf32> to vector<8x1xf32>
    %cst_59 = arith.constant 3.200000e+01 : f32
    %151 = vector.broadcast %cst_59 : f32 to vector<8x1xf32>
    %152 = arith.divf %150, %151 : vector<8x1xf32>
    %153 = vector.broadcast %152 : vector<8x1xf32> to vector<8x32xf32>
    %154 = arith.subf %146, %153 : vector<8x32xf32>
    %155 = arith.mulf %154, %154 : vector<8x32xf32>
    %cst_60 = arith.constant dense<0.000000e+00> : vector<8xf32>
    %156 = vector.multi_reduction <add>, %155, %cst_60 [1] : vector<8x32xf32> to vector<8xf32>
    %157 = vector.shape_cast %156 : vector<8xf32> to vector<8x1xf32>
    %cst_61 = arith.constant 3.200000e+01 : f32
    %158 = vector.broadcast %cst_61 : f32 to vector<8x1xf32>
    %159 = arith.divf %157, %158 : vector<8x1xf32>
    %160 = vector.broadcast %152 : vector<8x1xf32> to vector<8x32xf32>
    %161 = arith.subf %146, %160 : vector<8x32xf32>
    %cst_62 = arith.constant 9.99999997E-7 : f32
    %162 = vector.broadcast %cst_62 : f32 to vector<8x1xf32>
    %163 = arith.addf %159, %162 : vector<8x1xf32>
    %164 = math.rsqrt %163 : vector<8x1xf32>
    %165 = vector.broadcast %164 : vector<8x1xf32> to vector<8x32xf32>
    %166 = arith.mulf %161, %165 : vector<8x32xf32>
    %167 = vector.broadcast %147 : vector<1x32xf32> to vector<8x32xf32>
    %168 = arith.mulf %166, %167 : vector<8x32xf32>
    %169 = vector.broadcast %148 : vector<1x32xf32> to vector<8x32xf32>
    %170 = arith.addf %168, %169 : vector<8x32xf32>
    %171 = arith.truncf %170 : vector<8x32xf32> to vector<8x32xbf16>
    %c0_63 = arith.constant 0 : index
    %c0_64 = arith.constant 0 : index
    %172 = vector.load %arg12[%c0_63, %c0_64] : memref<32x64xbf16, #tpu.memory_space<vmem>>, vector<32x64xbf16>
    %cst_65 = arith.constant dense<0.000000e+00> : vector<8x64xf32>
    %173 = tpu.matmul %171, %172, %cst_65 {dimension_numbers = #tpu.dot_dimension_numbers<[1], [0], [0], [1], [0, 0, 1, 1], [], []>} : vector<8x32xbf16>, vector<32x64xbf16>, vector<8x64xf32> -> vector<8x64xf32>
    %c0_66 = arith.constant 0 : index
    %c0_67 = arith.constant 0 : index
    %174 = vector.load %arg13[%c0_66, %c0_67] : memref<1x64xf32, #tpu.memory_space<vmem>>, vector<1x64xf32>
    %175 = vector.broadcast %174 : vector<1x64xf32> to vector<8x64xf32>
    %176 = arith.addf %173, %175 : vector<8x64xf32>
    %cst_68 = arith.constant 0.000000e+00 : f32
    %177 = vector.broadcast %cst_68 : f32 to vector<8x64xf32>
    %178 = arith.maximumf %176, %177 : vector<8x64xf32>
    %179 = arith.truncf %178 : vector<8x64xf32> to vector<8x64xbf16>
    %c0_69 = arith.constant 0 : index
    %c0_70 = arith.constant 0 : index
    %180 = vector.load %arg14[%c0_69, %c0_70] : memref<64x32xbf16, #tpu.memory_space<vmem>>, vector<64x32xbf16>
    %cst_71 = arith.constant dense<0.000000e+00> : vector<8x32xf32>
    %181 = tpu.matmul %179, %180, %cst_71 {dimension_numbers = #tpu.dot_dimension_numbers<[1], [0], [0], [1], [0, 0, 1, 1], [], []>} : vector<8x64xbf16>, vector<64x32xbf16>, vector<8x32xf32> -> vector<8x32xf32>
    %182 = arith.addf %146, %181 : vector<8x32xf32>
    %c0_72 = arith.constant 0 : index
    %c0_73 = arith.constant 0 : index
    %183 = vector.load %arg15[%c0_72, %c0_73] : memref<1x32xf32, #tpu.memory_space<vmem>>, vector<1x32xf32>
    %184 = vector.broadcast %183 : vector<1x32xf32> to vector<8x32xf32>
    %185 = arith.addf %182, %184 : vector<8x32xf32>
    %c0_74 = arith.constant 0 : index
    %c0_75 = arith.constant 0 : index
    %c0_76 = arith.constant 0 : index
    %186 = vector.load %arg16[%c0_74, %c0_75, %c0_76] : memref<1x8x32xf32, #tpu.memory_space<vmem>>, vector<1x8x32xf32>
    %187 = vector.shape_cast %186 : vector<1x8x32xf32> to vector<8x32xf32>
    %188 = vector.shape_cast %185 : vector<8x32xf32> to vector<1x8x32xf32>
    tpu.vector_store %arg16[%c0_74, %c0_75, %c0_76], %188 {strides = array<i32>} : memref<1x8x32xf32, #tpu.memory_space<vmem>>, vector<1x8x32xf32>,
    return
  }
  func.func @transform_0(%arg0: i32) -> (i32, i32, i32) {
    %c0_i32 = arith.constant 0 : i32
    %c0_i32_0 = arith.constant 0 : i32
    %c0_i32_1 = arith.constant 0 : i32
    return %arg0, %c0_i32, %c0_i32_0 : i32, i32, i32
  }
  func.func @transform_1(%arg0: i32) -> (i32, i32) {
    %c0_i32 = arith.constant 0 : i32
    %c0_i32_0 = arith.constant 0 : i32
    %c0_i32_1 = arith.constant 0 : i32
    return %c0_i32, %c0_i32_0 : i32, i32
  }
  func.func @transform_2(%arg0: i32) -> (i32, i32, i32, i32) {
    %c0_i32 = arith.constant 0 : i32
    %c0_i32_0 = arith.constant 0 : i32
    %c0_i32_1 = arith.constant 0 : i32
    %c0_i32_2 = arith.constant 0 : i32
    return %arg0, %c0_i32, %c0_i32_0, %c0_i32_1 : i32, i32, i32, i32
  }
  func.func @transform_3(%arg0: i32) -> (i32, i32) {
    %c0_i32 = arith.constant 0 : i32
    %c0_i32_0 = arith.constant 0 : i32
    %c0_i32_1 = arith.constant 0 : i32
    return %c0_i32, %c0_i32_0 : i32, i32
  }
  func.func @transform_4(%arg0: i32) -> (i32, i32) {
    %c0_i32 = arith.constant 0 : i32
    %c0_i32_0 = arith.constant 0 : i32
    %c0_i32_1 = arith.constant 0 : i32
    return %c0_i32, %c0_i32_0 : i32, i32
  }
  func.func @transform_5(%arg0: i32) -> (i32, i32) {
    %c0_i32 = arith.constant 0 : i32
    %c0_i32_0 = arith.constant 0 : i32
    %c0_i32_1 = arith.constant 0 : i32
    return %c0_i32, %c0_i32_0 : i32, i32
  }
  func.func @transform_6(%arg0: i32) -> (i32, i32) {
    %c0_i32 = arith.constant 0 : i32
    %c0_i32_0 = arith.constant 0 : i32
    %c0_i32_1 = arith.constant 0 : i32
    return %c0_i32, %c0_i32_0 : i32, i32
  }
  func.func @transform_7(%arg0: i32) -> (i32, i32) {
    %c0_i32 = arith.constant 0 : i32
    %c0_i32_0 = arith.constant 0 : i32
    %c0_i32_1 = arith.constant 0 : i32
    return %c0_i32, %c0_i32_0 : i32, i32
  }
  func.func @transform_8(%arg0: i32) -> (i32, i32) {
    %c0_i32 = arith.constant 0 : i32
    %c0_i32_0 = arith.constant 0 : i32
    %c0_i32_1 = arith.constant 0 : i32
    return %c0_i32, %c0_i32_0 : i32, i32
  }
  func.func @transform_9(%arg0: i32) -> (i32, i32) {
    %c0_i32 = arith.constant 0 : i32
    %c0_i32_0 = arith.constant 0 : i32
    %c0_i32_1 = arith.constant 0 : i32
    return %c0_i32, %c0_i32_0 : i32, i32
  }
  func.func @transform_10(%arg0: i32) -> (i32, i32) {
    %c0_i32 = arith.constant 0 : i32
    %c0_i32_0 = arith.constant 0 : i32
    %c0_i32_1 = arith.constant 0 : i32
    return %c0_i32, %c0_i32_0 : i32, i32
  }
  func.func @transform_11(%arg0: i32) -> (i32, i32) {
    %c0_i32 = arith.constant 0 : i32
    %c0_i32_0 = arith.constant 0 : i32
    %c0_i32_1 = arith.constant 0 : i32
    return %c0_i32, %c0_i32_0 : i32, i32
  }
  func.func @transform_12(%arg0: i32) -> (i32, i32) {
    %c0_i32 = arith.constant 0 : i32
    %c0_i32_0 = arith.constant 0 : i32
    %c0_i32_1 = arith.constant 0 : i32
    return %c0_i32, %c0_i32_0 : i32, i32
  }
  func.func @transform_13(%arg0: i32) -> (i32, i32) {
    %c0_i32 = arith.constant 0 : i32
    %c0_i32_0 = arith.constant 0 : i32
    %c0_i32_1 = arith.constant 0 : i32
    return %c0_i32, %c0_i32_0 : i32, i32
  }
  func.func @transform_14(%arg0: i32) -> (i32, i32) {
    %c0_i32 = arith.constant 0 : i32
    %c0_i32_0 = arith.constant 0 : i32
    %c0_i32_1 = arith.constant 0 : i32
    return %c0_i32, %c0_i32_0 : i32, i32
  }
  func.func @transform_15(%arg0: i32) -> (i32, i32, i32) {
    %c0_i32 = arith.constant 0 : i32
    %c0_i32_0 = arith.constant 0 : i32
    %c0_i32_1 = arith.constant 0 : i32
    return %arg0, %c0_i32, %c0_i32_0 : i32, i32, i32
  }
}

module attributes {stable_mosaic.version = 11 : i64} {
  func.func @_encoder_block_kernel(%arg0: i32, %arg1: memref<1x8x32xf32, #tpu.memory_space<vmem>>, %arg2: memref<8x32xf32, #tpu.memory_space<vmem>>, %arg3: memref<1x1x8x8xf32, #tpu.memory_space<vmem>>, %arg4: memref<1x32xf32, #tpu.memory_space<vmem>>, %arg5: memref<1x32xf32, #tpu.memory_space<vmem>>, %arg6: memref<32x96xbf16, #tpu.memory_space<vmem>>, %arg7: memref<1x96xf32, #tpu.memory_space<vmem>>, %arg8: memref<32x32xbf16, #tpu.memory_space<vmem>>, %arg9: memref<1x32xf32, #tpu.memory_space<vmem>>, %arg10: memref<1x32xf32, #tpu.memory_space<vmem>>, %arg11: memref<1x32xf32, #tpu.memory_space<vmem>>, %arg12: memref<32x64xbf16, #tpu.memory_space<vmem>>, %arg13: memref<1x64xf32, #tpu.memory_space<vmem>>, %arg14: memref<64x32xbf16, #tpu.memory_space<vmem>>, %arg15: memref<1x32xf32, #tpu.memory_space<vmem>>, %arg16: memref<1x8x32xf32, #tpu.memory_space<vmem>>) attributes {dimension_semantics = [#tpu.dimension_semantics<parallel>], iteration_bounds = array<i64: 2>, scalar_prefetch = 0 : i64, scratch_operands = 0 : i64, tpu.core_type = #tpu.core_type<tc>, window_params = [{transform_indices = @transform_0, window_bounds = array<i64: 1, 8, 32>}, {pipeline_mode = #tpu.pipeline_mode<synchronous>, transform_indices = @transform_1, window_bounds = array<i64: 8, 32>}, {transform_indices = @transform_2, window_bounds = array<i64: 1, 1, 8, 8>}, {pipeline_mode = #tpu.pipeline_mode<synchronous>, transform_indices = @transform_3, window_bounds = array<i64: 1, 32>}, {pipeline_mode = #tpu.pipeline_mode<synchronous>, transform_indices = @transform_4, window_bounds = array<i64: 1, 32>}, {pipeline_mode = #tpu.pipeline_mode<synchronous>, transform_indices = @transform_5, window_bounds = array<i64: 32, 96>}, {pipeline_mode = #tpu.pipeline_mode<synchronous>, transform_indices = @transform_6, window_bounds = array<i64: 1, 96>}, {pipeline_mode = #tpu.pipeline_mode<synchronous>, transform_indices = @transform_7, window_bounds = array<i64: 32, 32>}, {pipeline_mode = #tpu.pipeline_mode<synchronous>, transform_indices = @transform_8, window_bounds = array<i64: 1, 32>}, {pipeline_mode = #tpu.pipeline_mode<synchronous>, transform_indices = @transform_9, window_bounds = array<i64: 1, 32>}, {pipeline_mode = #tpu.pipeline_mode<synchronous>, transform_indices = @transform_10, window_bounds = array<i64: 1, 32>}, {pipeline_mode = #tpu.pipeline_mode<synchronous>, transform_indices = @transform_11, window_bounds = array<i64: 32, 64>}, {pipeline_mode = #tpu.pipeline_mode<synchronous>, transform_indices = @transform_12, window_bounds = array<i64: 1, 64>}, {pipeline_mode = #tpu.pipeline_mode<synchronous>, transform_indices = @transform_13, window_bounds = array<i64: 64, 32>}, {pipeline_mode = #tpu.pipeline_mode<synchronous>, transform_indices = @transform_14, window_bounds = array<i64: 1, 32>}, {transform_indices = @transform_15, window_bounds = array<i64: 1, 8, 32>}]} {
    %c0 = arith.constant 0 : index
    %c0_0 = arith.constant 0 : index
    %c0_1 = arith.constant 0 : index
    %0 = vector.load %arg1[%c0, %c0_0, %c0_1] : memref<1x8x32xf32, #tpu.memory_space<vmem>>, vector<1x8x32xf32>
    %1 = vector.shape_cast %0 : vector<1x8x32xf32> to vector<8x32xf32>
    %c0_2 = arith.constant 0 : index
    %c0_3 = arith.constant 0 : index
    %2 = vector.load %arg4[%c0_2, %c0_3] : memref<1x32xf32, #tpu.memory_space<vmem>>, vector<1x32xf32>
    %c0_4 = arith.constant 0 : index
    %c0_5 = arith.constant 0 : index
    %3 = vector.load %arg5[%c0_4, %c0_5] : memref<1x32xf32, #tpu.memory_space<vmem>>, vector<1x32xf32>
    %cst = arith.constant dense<0.000000e+00> : vector<8xf32>
    %4 = vector.multi_reduction <add>, %1, %cst [1] : vector<8x32xf32> to vector<8xf32>
    %5 = vector.shape_cast %4 : vector<8xf32> to vector<8x1xf32>
    %cst_6 = arith.constant 3.200000e+01 : f32
    %6 = vector.broadcast %cst_6 : f32 to vector<8x1xf32>
    %7 = arith.divf %5, %6 : vector<8x1xf32>
    %8 = vector.broadcast %7 : vector<8x1xf32> to vector<8x32xf32>
    %9 = arith.subf %1, %8 : vector<8x32xf32>
    %10 = arith.mulf %9, %9 : vector<8x32xf32>
    %cst_7 = arith.constant dense<0.000000e+00> : vector<8xf32>
    %11 = vector.multi_reduction <add>, %10, %cst_7 [1] : vector<8x32xf32> to vector<8xf32>
    %12 = vector.shape_cast %11 : vector<8xf32> to vector<8x1xf32>
    %cst_8 = arith.constant 3.200000e+01 : f32
    %13 = vector.broadcast %cst_8 : f32 to vector<8x1xf32>
    %14 = arith.divf %12, %13 : vector<8x1xf32>
    %15 = vector.broadcast %7 : vector<8x1xf32> to vector<8x32xf32>
    %16 = arith.subf %1, %15 : vector<8x32xf32>
    %cst_9 = arith.constant 9.99999997E-7 : f32
    %17 = vector.broadcast %cst_9 : f32 to vector<8x1xf32>
    %18 = arith.addf %14, %17 : vector<8x1xf32>
    %19 = math.rsqrt %18 : vector<8x1xf32>
    %20 = vector.broadcast %19 : vector<8x1xf32> to vector<8x32xf32>
    %21 = arith.mulf %16, %20 : vector<8x32xf32>
    %22 = vector.broadcast %2 : vector<1x32xf32> to vector<8x32xf32>
    %23 = arith.mulf %21, %22 : vector<8x32xf32>
    %24 = vector.broadcast %3 : vector<1x32xf32> to vector<8x32xf32>
    %25 = arith.addf %23, %24 : vector<8x32xf32>
    %26 = arith.truncf %25 : vector<8x32xf32> to vector<8x32xbf16>
    %c0_10 = arith.constant 0 : index
    %c0_11 = arith.constant 0 : index
    %27 = vector.load %arg6[%c0_10, %c0_11] : memref<32x96xbf16, #tpu.memory_space<vmem>>, vector<32x96xbf16>
    %cst_12 = arith.constant dense<0.000000e+00> : vector<8x96xf32>
    %28 = tpu.matmul %26, %27, %cst_12 {dimension_numbers = #tpu.dot_dimension_numbers<[1], [0], [0], [1], [0, 0, 1, 1], [], []>} : vector<8x32xbf16>, vector<32x96xbf16>, vector<8x96xf32> -> vector<8x96xf32>
    %c0_13 = arith.constant 0 : index
    %c0_14 = arith.constant 0 : index
    %29 = vector.load %arg7[%c0_13, %c0_14] : memref<1x96xf32, #tpu.memory_space<vmem>>, vector<1x96xf32>
    %30 = vector.broadcast %29 : vector<1x96xf32> to vector<8x96xf32>
    %31 = arith.addf %28, %30 : vector<8x96xf32>
    %32 = vector.extract_strided_slice %31 {offsets = [0, 0], sizes = [8, 32], strides = [1, 1]} : vector<8x96xf32> to vector<8x32xf32>
    %33 = vector.extract_strided_slice %31 {offsets = [0, 32], sizes = [8, 32], strides = [1, 1]} : vector<8x96xf32> to vector<8x32xf32>
    %34 = vector.extract_strided_slice %31 {offsets = [0, 64], sizes = [8, 32], strides = [1, 1]} : vector<8x96xf32> to vector<8x32xf32>
    %c0_15 = arith.constant 0 : index
    %c0_16 = arith.constant 0 : index
    %c0_17 = arith.constant 0 : index
    %c0_18 = arith.constant 0 : index
    %35 = vector.load %arg3[%c0_15, %c0_16, %c0_17, %c0_18] : memref<1x1x8x8xf32, #tpu.memory_space<vmem>>, vector<1x1x8x8xf32>
    %36 = vector.shape_cast %35 : vector<1x1x8x8xf32> to vector<8x8xf32>
    %37 = vector.extract_strided_slice %32 {offsets = [0, 0], sizes = [8, 8], strides = [1, 1]} : vector<8x32xf32> to vector<8x8xf32>
    %38 = arith.truncf %37 : vector<8x8xf32> to vector<8x8xbf16>
    %39 = vector.extract_strided_slice %33 {offsets = [0, 0], sizes = [8, 8], strides = [1, 1]} : vector<8x32xf32> to vector<8x8xf32>
    %40 = arith.truncf %39 : vector<8x8xf32> to vector<8x8xbf16>
    %41 = vector.extract_strided_slice %34 {offsets = [0, 0], sizes = [8, 8], strides = [1, 1]} : vector<8x32xf32> to vector<8x8xf32>
    %42 = arith.truncf %41 : vector<8x8xf32> to vector<8x8xbf16>
    %cst_19 = arith.constant dense<0.000000e+00> : vector<8x8xf32>
    %43 = tpu.matmul %38, %40, %cst_19 {dimension_numbers = #tpu.dot_dimension_numbers<[1], [1], [0], [0], [0, 0, 1, 0], [], []>} : vector<8x8xbf16>, vector<8x8xbf16>, vector<8x8xf32> -> vector<8x8xf32>
    %cst_20 = arith.constant 0.353553385 : f32
    %44 = vector.broadcast %cst_20 : f32 to vector<8x8xf32>
    %45 = arith.mulf %43, %44 : vector<8x8xf32>
    %cst_21 = arith.constant 0.000000e+00 : f32
    %46 = vector.broadcast %cst_21 : f32 to vector<8x8xf32>
    %47 = arith.cmpf oeq, %36, %46 : vector<8x8xf32>
    %cst_22 = arith.constant -1.000000e+09 : f32
    %48 = vector.broadcast %cst_22 : f32 to vector<8x8xf32>
    %49 = arith.select %47, %48, %45 : vector<8x8xi1>, vector<8x8xf32>
    %cst_23 = arith.constant dense<0xFF800000> : vector<8xf32>
    %50 = vector.multi_reduction <maximumf>, %49, %cst_23 [1] : vector<8x8xf32> to vector<8xf32>
    %51 = vector.shape_cast %50 : vector<8xf32> to vector<8x1xf32>
    %52 = vector.broadcast %51 : vector<8x1xf32> to vector<8x8xf32>
    %53 = arith.subf %49, %52 : vector<8x8xf32>
    %54 = math.exp %53 : vector<8x8xf32>
    %cst_24 = arith.constant dense<0.000000e+00> : vector<8xf32>
    %55 = vector.multi_reduction <add>, %54, %cst_24 [1] : vector<8x8xf32> to vector<8xf32>
    %56 = vector.shape_cast %55 : vector<8xf32> to vector<8x1xf32>
    %57 = tpu.reciprocal %56 {approx = true} : vector<8x1xf32> -> vector<8x1xf32>
    %58 = vector.broadcast %57 : vector<8x1xf32> to vector<8x8xf32>
    %59 = arith.mulf %54, %58 : vector<8x8xf32>
    %60 = arith.truncf %59 : vector<8x8xf32> to vector<8x8xbf16>
    %cst_25 = arith.constant dense<0.000000e+00> : vector<8x8xf32>
    %61 = tpu.matmul %60, %42, %cst_25 {dimension_numbers = #tpu.dot_dimension_numbers<[1], [0], [0], [1], [0, 0, 1, 1], [], []>} : vector<8x8xbf16>, vector<8x8xbf16>, vector<8x8xf32> -> vector<8x8xf32>
    %62 = vector.extract_strided_slice %32 {offsets = [0, 8], sizes = [8, 8], strides = [1, 1]} : vector<8x32xf32> to vector<8x8xf32>
    %63 = arith.truncf %62 : vector<8x8xf32> to vector<8x8xbf16>
    %64 = vector.extract_strided_slice %33 {offsets = [0, 8], sizes = [8, 8], strides = [1, 1]} : vector<8x32xf32> to vector<8x8xf32>
    %65 = arith.truncf %64 : vector<8x8xf32> to vector<8x8xbf16>
    %66 = vector.extract_strided_slice %34 {offsets = [0, 8], sizes = [8, 8], strides = [1, 1]} : vector<8x32xf32> to vector<8x8xf32>
    %67 = arith.truncf %66 : vector<8x8xf32> to vector<8x8xbf16>
    %cst_26 = arith.constant dense<0.000000e+00> : vector<8x8xf32>
    %68 = tpu.matmul %63, %65, %cst_26 {dimension_numbers = #tpu.dot_dimension_numbers<[1], [1], [0], [0], [0, 0, 1, 0], [], []>} : vector<8x8xbf16>, vector<8x8xbf16>, vector<8x8xf32> -> vector<8x8xf32>
    %cst_27 = arith.constant 0.353553385 : f32
    %69 = vector.broadcast %cst_27 : f32 to vector<8x8xf32>
    %70 = arith.mulf %68, %69 : vector<8x8xf32>
    %cst_28 = arith.constant 0.000000e+00 : f32
    %71 = vector.broadcast %cst_28 : f32 to vector<8x8xf32>
    %72 = arith.cmpf oeq, %36, %71 : vector<8x8xf32>
    %cst_29 = arith.constant -1.000000e+09 : f32
    %73 = vector.broadcast %cst_29 : f32 to vector<8x8xf32>
    %74 = arith.select %72, %73, %70 : vector<8x8xi1>, vector<8x8xf32>
    %cst_30 = arith.constant dense<0xFF800000> : vector<8xf32>
    %75 = vector.multi_reduction <maximumf>, %74, %cst_30 [1] : vector<8x8xf32> to vector<8xf32>
    %76 = vector.shape_cast %75 : vector<8xf32> to vector<8x1xf32>
    %77 = vector.broadcast %76 : vector<8x1xf32> to vector<8x8xf32>
    %78 = arith.subf %74, %77 : vector<8x8xf32>
    %79 = math.exp %78 : vector<8x8xf32>
    %cst_31 = arith.constant dense<0.000000e+00> : vector<8xf32>
    %80 = vector.multi_reduction <add>, %79, %cst_31 [1] : vector<8x8xf32> to vector<8xf32>
    %81 = vector.shape_cast %80 : vector<8xf32> to vector<8x1xf32>
    %82 = tpu.reciprocal %81 {approx = true} : vector<8x1xf32> -> vector<8x1xf32>
    %83 = vector.broadcast %82 : vector<8x1xf32> to vector<8x8xf32>
    %84 = arith.mulf %79, %83 : vector<8x8xf32>
    %85 = arith.truncf %84 : vector<8x8xf32> to vector<8x8xbf16>
    %cst_32 = arith.constant dense<0.000000e+00> : vector<8x8xf32>
    %86 = tpu.matmul %85, %67, %cst_32 {dimension_numbers = #tpu.dot_dimension_numbers<[1], [0], [0], [1], [0, 0, 1, 1], [], []>} : vector<8x8xbf16>, vector<8x8xbf16>, vector<8x8xf32> -> vector<8x8xf32>
    %87 = vector.extract_strided_slice %32 {offsets = [0, 16], sizes = [8, 8], strides = [1, 1]} : vector<8x32xf32> to vector<8x8xf32>
    %88 = arith.truncf %87 : vector<8x8xf32> to vector<8x8xbf16>
    %89 = vector.extract_strided_slice %33 {offsets = [0, 16], sizes = [8, 8], strides = [1, 1]} : vector<8x32xf32> to vector<8x8xf32>
    %90 = arith.truncf %89 : vector<8x8xf32> to vector<8x8xbf16>
    %91 = vector.extract_strided_slice %34 {offsets = [0, 16], sizes = [8, 8], strides = [1, 1]} : vector<8x32xf32> to vector<8x8xf32>
    %92 = arith.truncf %91 : vector<8x8xf32> to vector<8x8xbf16>
    %cst_33 = arith.constant dense<0.000000e+00> : vector<8x8xf32>
    %93 = tpu.matmul %88, %90, %cst_33 {dimension_numbers = #tpu.dot_dimension_numbers<[1], [1], [0], [0], [0, 0, 1, 0], [], []>} : vector<8x8xbf16>, vector<8x8xbf16>, vector<8x8xf32> -> vector<8x8xf32>
    %cst_34 = arith.constant 0.353553385 : f32
    %94 = vector.broadcast %cst_34 : f32 to vector<8x8xf32>
    %95 = arith.mulf %93, %94 : vector<8x8xf32>
    %cst_35 = arith.constant 0.000000e+00 : f32
    %96 = vector.broadcast %cst_35 : f32 to vector<8x8xf32>
    %97 = arith.cmpf oeq, %36, %96 : vector<8x8xf32>
    %cst_36 = arith.constant -1.000000e+09 : f32
    %98 = vector.broadcast %cst_36 : f32 to vector<8x8xf32>
    %99 = arith.select %97, %98, %95 : vector<8x8xi1>, vector<8x8xf32>
    %cst_37 = arith.constant dense<0xFF800000> : vector<8xf32>
    %100 = vector.multi_reduction <maximumf>, %99, %cst_37 [1] : vector<8x8xf32> to vector<8xf32>
    %101 = vector.shape_cast %100 : vector<8xf32> to vector<8x1xf32>
    %102 = vector.broadcast %101 : vector<8x1xf32> to vector<8x8xf32>
    %103 = arith.subf %99, %102 : vector<8x8xf32>
    %104 = math.exp %103 : vector<8x8xf32>
    %cst_38 = arith.constant dense<0.000000e+00> : vector<8xf32>
    %105 = vector.multi_reduction <add>, %104, %cst_38 [1] : vector<8x8xf32> to vector<8xf32>
    %106 = vector.shape_cast %105 : vector<8xf32> to vector<8x1xf32>
    %107 = tpu.reciprocal %106 {approx = true} : vector<8x1xf32> -> vector<8x1xf32>
    %108 = vector.broadcast %107 : vector<8x1xf32> to vector<8x8xf32>
    %109 = arith.mulf %104, %108 : vector<8x8xf32>
    %110 = arith.truncf %109 : vector<8x8xf32> to vector<8x8xbf16>
    %cst_39 = arith.constant dense<0.000000e+00> : vector<8x8xf32>
    %111 = tpu.matmul %110, %92, %cst_39 {dimension_numbers = #tpu.dot_dimension_numbers<[1], [0], [0], [1], [0, 0, 1, 1], [], []>} : vector<8x8xbf16>, vector<8x8xbf16>, vector<8x8xf32> -> vector<8x8xf32>
    %112 = vector.extract_strided_slice %32 {offsets = [0, 24], sizes = [8, 8], strides = [1, 1]} : vector<8x32xf32> to vector<8x8xf32>
    %113 = arith.truncf %112 : vector<8x8xf32> to vector<8x8xbf16>
    %114 = vector.extract_strided_slice %33 {offsets = [0, 24], sizes = [8, 8], strides = [1, 1]} : vector<8x32xf32> to vector<8x8xf32>
    %115 = arith.truncf %114 : vector<8x8xf32> to vector<8x8xbf16>
    %116 = vector.extract_strided_slice %34 {offsets = [0, 24], sizes = [8, 8], strides = [1, 1]} : vector<8x32xf32> to vector<8x8xf32>
    %117 = arith.truncf %116 : vector<8x8xf32> to vector<8x8xbf16>
    %cst_40 = arith.constant dense<0.000000e+00> : vector<8x8xf32>
    %118 = tpu.matmul %113, %115, %cst_40 {dimension_numbers = #tpu.dot_dimension_numbers<[1], [1], [0], [0], [0, 0, 1, 0], [], []>} : vector<8x8xbf16>, vector<8x8xbf16>, vector<8x8xf32> -> vector<8x8xf32>
    %cst_41 = arith.constant 0.353553385 : f32
    %119 = vector.broadcast %cst_41 : f32 to vector<8x8xf32>
    %120 = arith.mulf %118, %119 : vector<8x8xf32>
    %cst_42 = arith.constant 0.000000e+00 : f32
    %121 = vector.broadcast %cst_42 : f32 to vector<8x8xf32>
    %122 = arith.cmpf oeq, %36, %121 : vector<8x8xf32>
    %cst_43 = arith.constant -1.000000e+09 : f32
    %123 = vector.broadcast %cst_43 : f32 to vector<8x8xf32>
    %124 = arith.select %122, %123, %120 : vector<8x8xi1>, vector<8x8xf32>
    %cst_44 = arith.constant dense<0xFF800000> : vector<8xf32>
    %125 = vector.multi_reduction <maximumf>, %124, %cst_44 [1] : vector<8x8xf32> to vector<8xf32>
    %126 = vector.shape_cast %125 : vector<8xf32> to vector<8x1xf32>
    %127 = vector.broadcast %126 : vector<8x1xf32> to vector<8x8xf32>
    %128 = arith.subf %124, %127 : vector<8x8xf32>
    %129 = math.exp %128 : vector<8x8xf32>
    %cst_45 = arith.constant dense<0.000000e+00> : vector<8xf32>
    %130 = vector.multi_reduction <add>, %129, %cst_45 [1] : vector<8x8xf32> to vector<8xf32>
    %131 = vector.shape_cast %130 : vector<8xf32> to vector<8x1xf32>
    %132 = tpu.reciprocal %131 {approx = true} : vector<8x1xf32> -> vector<8x1xf32>
    %133 = vector.broadcast %132 : vector<8x1xf32> to vector<8x8xf32>
    %134 = arith.mulf %129, %133 : vector<8x8xf32>
    %135 = arith.truncf %134 : vector<8x8xf32> to vector<8x8xbf16>
    %cst_46 = arith.constant dense<0.000000e+00> : vector<8x8xf32>
    %136 = tpu.matmul %135, %117, %cst_46 {dimension_numbers = #tpu.dot_dimension_numbers<[1], [0], [0], [1], [0, 0, 1, 1], [], []>} : vector<8x8xbf16>, vector<8x8xbf16>, vector<8x8xf32> -> vector<8x8xf32>
    %137 = tpu.concatenate %61, %86, %111, %136 in 1 : vector<8x8xf32>, vector<8x8xf32>, vector<8x8xf32>, vector<8x8xf32> -> vector<8x32xf32>
    %138 = arith.truncf %137 : vector<8x32xf32> to vector<8x32xbf16>
    %c0_47 = arith.constant 0 : index
    %c0_48 = arith.constant 0 : index
    %139 = vector.load %arg8[%c0_47, %c0_48] : memref<32x32xbf16, #tpu.memory_space<vmem>>, vector<32x32xbf16>
    %cst_49 = arith.constant dense<0.000000e+00> : vector<8x32xf32>
    %140 = tpu.matmul %138, %139, %cst_49 {dimension_numbers = #tpu.dot_dimension_numbers<[1], [0], [0], [1], [0, 0, 1, 1], [], []>} : vector<8x32xbf16>, vector<32x32xbf16>, vector<8x32xf32> -> vector<8x32xf32>
    %141 = arith.addf %1, %140 : vector<8x32xf32>
    %c0_50 = arith.constant 0 : index
    %c0_51 = arith.constant 0 : index
    %142 = vector.load %arg9[%c0_50, %c0_51] : memref<1x32xf32, #tpu.memory_space<vmem>>, vector<1x32xf32>
    %143 = vector.broadcast %142 : vector<1x32xf32> to vector<8x32xf32>
    %144 = arith.addf %141, %143 : vector<8x32xf32>
    %c0_52 = arith.constant 0 : index
    %c0_53 = arith.constant 0 : index
    %145 = vector.load %arg10[%c0_52, %c0_53] : memref<1x32xf32, #tpu.memory_space<vmem>>, vector<1x32xf32>
    %c0_54 = arith.constant 0 : index
    %c0_55 = arith.constant 0 : index
    %146 = vector.load %arg11[%c0_54, %c0_55] : memref<1x32xf32, #tpu.memory_space<vmem>>, vector<1x32xf32>
    %cst_56 = arith.constant dense<0.000000e+00> : vector<8xf32>
    %147 = vector.multi_reduction <add>, %144, %cst_56 [1] : vector<8x32xf32> to vector<8xf32>
    %148 = vector.shape_cast %147 : vector<8xf32> to vector<8x1xf32>
    %cst_57 = arith.constant 3.200000e+01 : f32
    %149 = vector.broadcast %cst_57 : f32 to vector<8x1xf32>
    %150 = arith.divf %148, %149 : vector<8x1xf32>
    %151 = vector.broadcast %150 : vector<8x1xf32> to vector<8x32xf32>
    %152 = arith.subf %144, %151 : vector<8x32xf32>
    %153 = arith.mulf %152, %152 : vector<8x32xf32>
    %cst_58 = arith.constant dense<0.000000e+00> : vector<8xf32>
    %154 = vector.multi_reduction <add>, %153, %cst_58 [1] : vector<8x32xf32> to vector<8xf32>
    %155 = vector.shape_cast %154 : vector<8xf32> to vector<8x1xf32>
    %cst_59 = arith.constant 3.200000e+01 : f32
    %156 = vector.broadcast %cst_59 : f32 to vector<8x1xf32>
    %157 = arith.divf %155, %156 : vector<8x1xf32>
    %158 = vector.broadcast %150 : vector<8x1xf32> to vector<8x32xf32>
    %159 = arith.subf %144, %158 : vector<8x32xf32>
    %cst_60 = arith.constant 9.99999997E-7 : f32
    %160 = vector.broadcast %cst_60 : f32 to vector<8x1xf32>
    %161 = arith.addf %157, %160 : vector<8x1xf32>
    %162 = math.rsqrt %161 : vector<8x1xf32>
    %163 = vector.broadcast %162 : vector<8x1xf32> to vector<8x32xf32>
    %164 = arith.mulf %159, %163 : vector<8x32xf32>
    %165 = vector.broadcast %145 : vector<1x32xf32> to vector<8x32xf32>
    %166 = arith.mulf %164, %165 : vector<8x32xf32>
    %167 = vector.broadcast %146 : vector<1x32xf32> to vector<8x32xf32>
    %168 = arith.addf %166, %167 : vector<8x32xf32>
    %169 = arith.truncf %168 : vector<8x32xf32> to vector<8x32xbf16>
    %c0_61 = arith.constant 0 : index
    %c0_62 = arith.constant 0 : index
    %170 = vector.load %arg12[%c0_61, %c0_62] : memref<32x64xbf16, #tpu.memory_space<vmem>>, vector<32x64xbf16>
    %cst_63 = arith.constant dense<0.000000e+00> : vector<8x64xf32>
    %171 = tpu.matmul %169, %170, %cst_63 {dimension_numbers = #tpu.dot_dimension_numbers<[1], [0], [0], [1], [0, 0, 1, 1], [], []>} : vector<8x32xbf16>, vector<32x64xbf16>, vector<8x64xf32> -> vector<8x64xf32>
    %c0_64 = arith.constant 0 : index
    %c0_65 = arith.constant 0 : index
    %172 = vector.load %arg13[%c0_64, %c0_65] : memref<1x64xf32, #tpu.memory_space<vmem>>, vector<1x64xf32>
    %173 = vector.broadcast %172 : vector<1x64xf32> to vector<8x64xf32>
    %174 = arith.addf %171, %173 : vector<8x64xf32>
    %cst_66 = arith.constant 0.000000e+00 : f32
    %175 = vector.broadcast %cst_66 : f32 to vector<8x64xf32>
    %176 = arith.maximumf %174, %175 : vector<8x64xf32>
    %177 = arith.truncf %176 : vector<8x64xf32> to vector<8x64xbf16>
    %c0_67 = arith.constant 0 : index
    %c0_68 = arith.constant 0 : index
    %178 = vector.load %arg14[%c0_67, %c0_68] : memref<64x32xbf16, #tpu.memory_space<vmem>>, vector<64x32xbf16>
    %cst_69 = arith.constant dense<0.000000e+00> : vector<8x32xf32>
    %179 = tpu.matmul %177, %178, %cst_69 {dimension_numbers = #tpu.dot_dimension_numbers<[1], [0], [0], [1], [0, 0, 1, 1], [], []>} : vector<8x64xbf16>, vector<64x32xbf16>, vector<8x32xf32> -> vector<8x32xf32>
    %180 = arith.addf %144, %179 : vector<8x32xf32>
    %c0_70 = arith.constant 0 : index
    %c0_71 = arith.constant 0 : index
    %181 = vector.load %arg15[%c0_70, %c0_71] : memref<1x32xf32, #tpu.memory_space<vmem>>, vector<1x32xf32>
    %182 = vector.broadcast %181 : vector<1x32xf32> to vector<8x32xf32>
    %183 = arith.addf %180, %182 : vector<8x32xf32>
    %c0_72 = arith.constant 0 : index
    %c0_73 = arith.constant 0 : index
    %c0_74 = arith.constant 0 : index
    %184 = vector.load %arg16[%c0_72, %c0_73, %c0_74] : memref<1x8x32xf32, #tpu.memory_space<vmem>>, vector<1x8x32xf32>
    %185 = vector.shape_cast %184 : vector<1x8x32xf32> to vector<8x32xf32>
    %186 = vector.shape_cast %183 : vector<8x32xf32> to vector<1x8x32xf32>
    tpu.vector_store %arg16[%c0_72, %c0_73, %c0_74], %186 {strides = array<i32>} : memref<1x8x32xf32, #tpu.memory_space<vmem>>, vector<1x8x32xf32>,
    return
  }
  func.func @transform_0(%arg0: i32) -> (i32, i32, i32) {
    %c0_i32 = arith.constant 0 : i32
    %c0_i32_0 = arith.constant 0 : i32
    %c0_i32_1 = arith.constant 0 : i32
    return %arg0, %c0_i32, %c0_i32_0 : i32, i32, i32
  }
  func.func @transform_1(%arg0: i32) -> (i32, i32) {
    %c0_i32 = arith.constant 0 : i32
    %c0_i32_0 = arith.constant 0 : i32
    %c0_i32_1 = arith.constant 0 : i32
    return %c0_i32, %c0_i32_0 : i32, i32
  }
  func.func @transform_2(%arg0: i32) -> (i32, i32, i32, i32) {
    %c0_i32 = arith.constant 0 : i32
    %c0_i32_0 = arith.constant 0 : i32
    %c0_i32_1 = arith.constant 0 : i32
    %c0_i32_2 = arith.constant 0 : i32
    return %arg0, %c0_i32, %c0_i32_0, %c0_i32_1 : i32, i32, i32, i32
  }
  func.func @transform_3(%arg0: i32) -> (i32, i32) {
    %c0_i32 = arith.constant 0 : i32
    %c0_i32_0 = arith.constant 0 : i32
    %c0_i32_1 = arith.constant 0 : i32
    return %c0_i32, %c0_i32_0 : i32, i32
  }
  func.func @transform_4(%arg0: i32) -> (i32, i32) {
    %c0_i32 = arith.constant 0 : i32
    %c0_i32_0 = arith.constant 0 : i32
    %c0_i32_1 = arith.constant 0 : i32
    return %c0_i32, %c0_i32_0 : i32, i32
  }
  func.func @transform_5(%arg0: i32) -> (i32, i32) {
    %c0_i32 = arith.constant 0 : i32
    %c0_i32_0 = arith.constant 0 : i32
    %c0_i32_1 = arith.constant 0 : i32
    return %c0_i32, %c0_i32_0 : i32, i32
  }
  func.func @transform_6(%arg0: i32) -> (i32, i32) {
    %c0_i32 = arith.constant 0 : i32
    %c0_i32_0 = arith.constant 0 : i32
    %c0_i32_1 = arith.constant 0 : i32
    return %c0_i32, %c0_i32_0 : i32, i32
  }
  func.func @transform_7(%arg0: i32) -> (i32, i32) {
    %c0_i32 = arith.constant 0 : i32
    %c0_i32_0 = arith.constant 0 : i32
    %c0_i32_1 = arith.constant 0 : i32
    return %c0_i32, %c0_i32_0 : i32, i32
  }
  func.func @transform_8(%arg0: i32) -> (i32, i32) {
    %c0_i32 = arith.constant 0 : i32
    %c0_i32_0 = arith.constant 0 : i32
    %c0_i32_1 = arith.constant 0 : i32
    return %c0_i32, %c0_i32_0 : i32, i32
  }
  func.func @transform_9(%arg0: i32) -> (i32, i32) {
    %c0_i32 = arith.constant 0 : i32
    %c0_i32_0 = arith.constant 0 : i32
    %c0_i32_1 = arith.constant 0 : i32
    return %c0_i32, %c0_i32_0 : i32, i32
  }
  func.func @transform_10(%arg0: i32) -> (i32, i32) {
    %c0_i32 = arith.constant 0 : i32
    %c0_i32_0 = arith.constant 0 : i32
    %c0_i32_1 = arith.constant 0 : i32
    return %c0_i32, %c0_i32_0 : i32, i32
  }
  func.func @transform_11(%arg0: i32) -> (i32, i32) {
    %c0_i32 = arith.constant 0 : i32
    %c0_i32_0 = arith.constant 0 : i32
    %c0_i32_1 = arith.constant 0 : i32
    return %c0_i32, %c0_i32_0 : i32, i32
  }
  func.func @transform_12(%arg0: i32) -> (i32, i32) {
    %c0_i32 = arith.constant 0 : i32
    %c0_i32_0 = arith.constant 0 : i32
    %c0_i32_1 = arith.constant 0 : i32
    return %c0_i32, %c0_i32_0 : i32, i32
  }
  func.func @transform_13(%arg0: i32) -> (i32, i32) {
    %c0_i32 = arith.constant 0 : i32
    %c0_i32_0 = arith.constant 0 : i32
    %c0_i32_1 = arith.constant 0 : i32
    return %c0_i32, %c0_i32_0 : i32, i32
  }
  func.func @transform_14(%arg0: i32) -> (i32, i32) {
    %c0_i32 = arith.constant 0 : i32
    %c0_i32_0 = arith.constant 0 : i32
    %c0_i32_1 = arith.constant 0 : i32
    return %c0_i32, %c0_i32_0 : i32, i32
  }
  func.func @transform_15(%arg0: i32) -> (i32, i32, i32) {
    %c0_i32 = arith.constant 0 : i32
    %c0_i32_0 = arith.constant 0 : i32
    %c0_i32_1 = arith.constant 0 : i32
    return %arg0, %c0_i32, %c0_i32_0 : i32, i32, i32
  }
}

module attributes {stable_mosaic.version = 11 : i64} {
  func.func @_decoder_block_kernel(%arg0: i32, %arg1: memref<1x8x32xf32, #tpu.memory_space<vmem>>, %arg2: memref<1x8x32xf32, #tpu.memory_space<vmem>>, %arg3: memref<1x1x8x8xf32, #tpu.memory_space<vmem>>, %arg4: memref<1x32xf32, #tpu.memory_space<vmem>>, %arg5: memref<1x32xf32, #tpu.memory_space<vmem>>, %arg6: memref<32x96xbf16, #tpu.memory_space<vmem>>, %arg7: memref<1x96xf32, #tpu.memory_space<vmem>>, %arg8: memref<32x32xbf16, #tpu.memory_space<vmem>>, %arg9: memref<1x32xf32, #tpu.memory_space<vmem>>, %arg10: memref<1x32xf32, #tpu.memory_space<vmem>>, %arg11: memref<1x32xf32, #tpu.memory_space<vmem>>, %arg12: memref<32x32xbf16, #tpu.memory_space<vmem>>, %arg13: memref<1x32xf32, #tpu.memory_space<vmem>>, %arg14: memref<32x64xbf16, #tpu.memory_space<vmem>>, %arg15: memref<1x64xf32, #tpu.memory_space<vmem>>, %arg16: memref<32x32xbf16, #tpu.memory_space<vmem>>, %arg17: memref<1x32xf32, #tpu.memory_space<vmem>>, %arg18: memref<1x32xf32, #tpu.memory_space<vmem>>, %arg19: memref<1x32xf32, #tpu.memory_space<vmem>>, %arg20: memref<32x64xbf16, #tpu.memory_space<vmem>>, %arg21: memref<1x64xf32, #tpu.memory_space<vmem>>, %arg22: memref<64x32xbf16, #tpu.memory_space<vmem>>, %arg23: memref<1x32xf32, #tpu.memory_space<vmem>>, %arg24: memref<1x8x32xf32, #tpu.memory_space<vmem>>) attributes {dimension_semantics = [#tpu.dimension_semantics<parallel>], iteration_bounds = array<i64: 2>, scalar_prefetch = 0 : i64, scratch_operands = 0 : i64, tpu.core_type = #tpu.core_type<tc>, window_params = [{transform_indices = @transform_0, window_bounds = array<i64: 1, 8, 32>}, {transform_indices = @transform_1, window_bounds = array<i64: 1, 8, 32>}, {transform_indices = @transform_2, window_bounds = array<i64: 1, 1, 8, 8>}, {pipeline_mode = #tpu.pipeline_mode<synchronous>, transform_indices = @transform_3, window_bounds = array<i64: 1, 32>}, {pipeline_mode = #tpu.pipeline_mode<synchronous>, transform_indices = @transform_4, window_bounds = array<i64: 1, 32>}, {pipeline_mode = #tpu.pipeline_mode<synchronous>, transform_indices = @transform_5, window_bounds = array<i64: 32, 96>}, {pipeline_mode = #tpu.pipeline_mode<synchronous>, transform_indices = @transform_6, window_bounds = array<i64: 1, 96>}, {pipeline_mode = #tpu.pipeline_mode<synchronous>, transform_indices = @transform_7, window_bounds = array<i64: 32, 32>}, {pipeline_mode = #tpu.pipeline_mode<synchronous>, transform_indices = @transform_8, window_bounds = array<i64: 1, 32>}, {pipeline_mode = #tpu.pipeline_mode<synchronous>, transform_indices = @transform_9, window_bounds = array<i64: 1, 32>}, {pipeline_mode = #tpu.pipeline_mode<synchronous>, transform_indices = @transform_10, window_bounds = array<i64: 1, 32>}, {pipeline_mode = #tpu.pipeline_mode<synchronous>, transform_indices = @transform_11, window_bounds = array<i64: 32, 32>}, {pipeline_mode = #tpu.pipeline_mode<synchronous>, transform_indices = @transform_12, window_bounds = array<i64: 1, 32>}, {pipeline_mode = #tpu.pipeline_mode<synchronous>, transform_indices = @transform_13, window_bounds = array<i64: 32, 64>}, {pipeline_mode = #tpu.pipeline_mode<synchronous>, transform_indices = @transform_14, window_bounds = array<i64: 1, 64>}, {pipeline_mode = #tpu.pipeline_mode<synchronous>, transform_indices = @transform_15, window_bounds = array<i64: 32, 32>}, {pipeline_mode = #tpu.pipeline_mode<synchronous>, transform_indices = @transform_16, window_bounds = array<i64: 1, 32>}, {pipeline_mode = #tpu.pipeline_mode<synchronous>, transform_indices = @transform_17, window_bounds = array<i64: 1, 32>}, {pipeline_mode = #tpu.pipeline_mode<synchronous>, transform_indices = @transform_18, window_bounds = array<i64: 1, 32>}, {pipeline_mode = #tpu.pipeline_mode<synchronous>, transform_indices = @transform_19, window_bounds = array<i64: 32, 64>}, {pipeline_mode = #tpu.pipeline_mode<synchronous>, transform_indices = @transform_20, window_bounds = array<i64: 1, 64>}, {pipeline_mode = #tpu.pipeline_mode<synchronous>, transform_indices = @transform_21, window_bounds = array<i64: 64, 32>}, {pipeline_mode = #tpu.pipeline_mode<synchronous>, transform_indices = @transform_22, window_bounds = array<i64: 1, 32>}, {transform_indices = @transform_23, window_bounds = array<i64: 1, 8, 32>}]} {
    %c0 = arith.constant 0 : index
    %c0_0 = arith.constant 0 : index
    %c0_1 = arith.constant 0 : index
    %0 = vector.load %arg1[%c0, %c0_0, %c0_1] : memref<1x8x32xf32, #tpu.memory_space<vmem>>, vector<1x8x32xf32>
    %1 = vector.shape_cast %0 : vector<1x8x32xf32> to vector<8x32xf32>
    %c0_2 = arith.constant 0 : index
    %c0_3 = arith.constant 0 : index
    %c0_4 = arith.constant 0 : index
    %2 = vector.load %arg2[%c0_2, %c0_3, %c0_4] : memref<1x8x32xf32, #tpu.memory_space<vmem>>, vector<1x8x32xf32>
    %3 = vector.shape_cast %2 : vector<1x8x32xf32> to vector<8x32xf32>
    %c0_5 = arith.constant 0 : index
    %c0_6 = arith.constant 0 : index
    %4 = vector.load %arg4[%c0_5, %c0_6] : memref<1x32xf32, #tpu.memory_space<vmem>>, vector<1x32xf32>
    %c0_7 = arith.constant 0 : index
    %c0_8 = arith.constant 0 : index
    %5 = vector.load %arg5[%c0_7, %c0_8] : memref<1x32xf32, #tpu.memory_space<vmem>>, vector<1x32xf32>
    %cst = arith.constant dense<0.000000e+00> : vector<8xf32>
    %6 = vector.multi_reduction <add>, %1, %cst [1] : vector<8x32xf32> to vector<8xf32>
    %7 = vector.shape_cast %6 : vector<8xf32> to vector<8x1xf32>
    %cst_9 = arith.constant 3.200000e+01 : f32
    %8 = vector.broadcast %cst_9 : f32 to vector<8x1xf32>
    %9 = arith.divf %7, %8 : vector<8x1xf32>
    %10 = vector.broadcast %9 : vector<8x1xf32> to vector<8x32xf32>
    %11 = arith.subf %1, %10 : vector<8x32xf32>
    %12 = arith.mulf %11, %11 : vector<8x32xf32>
    %cst_10 = arith.constant dense<0.000000e+00> : vector<8xf32>
    %13 = vector.multi_reduction <add>, %12, %cst_10 [1] : vector<8x32xf32> to vector<8xf32>
    %14 = vector.shape_cast %13 : vector<8xf32> to vector<8x1xf32>
    %cst_11 = arith.constant 3.200000e+01 : f32
    %15 = vector.broadcast %cst_11 : f32 to vector<8x1xf32>
    %16 = arith.divf %14, %15 : vector<8x1xf32>
    %17 = vector.broadcast %9 : vector<8x1xf32> to vector<8x32xf32>
    %18 = arith.subf %1, %17 : vector<8x32xf32>
    %cst_12 = arith.constant 9.99999997E-7 : f32
    %19 = vector.broadcast %cst_12 : f32 to vector<8x1xf32>
    %20 = arith.addf %16, %19 : vector<8x1xf32>
    %21 = math.rsqrt %20 : vector<8x1xf32>
    %22 = vector.broadcast %21 : vector<8x1xf32> to vector<8x32xf32>
    %23 = arith.mulf %18, %22 : vector<8x32xf32>
    %24 = vector.broadcast %4 : vector<1x32xf32> to vector<8x32xf32>
    %25 = arith.mulf %23, %24 : vector<8x32xf32>
    %26 = vector.broadcast %5 : vector<1x32xf32> to vector<8x32xf32>
    %27 = arith.addf %25, %26 : vector<8x32xf32>
    %28 = arith.truncf %27 : vector<8x32xf32> to vector<8x32xbf16>
    %c0_13 = arith.constant 0 : index
    %c0_14 = arith.constant 0 : index
    %29 = vector.load %arg6[%c0_13, %c0_14] : memref<32x96xbf16, #tpu.memory_space<vmem>>, vector<32x96xbf16>
    %cst_15 = arith.constant dense<0.000000e+00> : vector<8x96xf32>
    %30 = tpu.matmul %28, %29, %cst_15 {dimension_numbers = #tpu.dot_dimension_numbers<[1], [0], [0], [1], [0, 0, 1, 1], [], []>} : vector<8x32xbf16>, vector<32x96xbf16>, vector<8x96xf32> -> vector<8x96xf32>
    %c0_16 = arith.constant 0 : index
    %c0_17 = arith.constant 0 : index
    %31 = vector.load %arg7[%c0_16, %c0_17] : memref<1x96xf32, #tpu.memory_space<vmem>>, vector<1x96xf32>
    %32 = vector.broadcast %31 : vector<1x96xf32> to vector<8x96xf32>
    %33 = arith.addf %30, %32 : vector<8x96xf32>
    %34 = vector.extract_strided_slice %33 {offsets = [0, 0], sizes = [8, 32], strides = [1, 1]} : vector<8x96xf32> to vector<8x32xf32>
    %35 = vector.extract_strided_slice %33 {offsets = [0, 32], sizes = [8, 32], strides = [1, 1]} : vector<8x96xf32> to vector<8x32xf32>
    %36 = vector.extract_strided_slice %33 {offsets = [0, 64], sizes = [8, 32], strides = [1, 1]} : vector<8x96xf32> to vector<8x32xf32>
    %c0_18 = arith.constant 0 : index
    %c0_19 = arith.constant 0 : index
    %c0_20 = arith.constant 0 : index
    %c0_21 = arith.constant 0 : index
    %37 = vector.load %arg3[%c0_18, %c0_19, %c0_20, %c0_21] : memref<1x1x8x8xf32, #tpu.memory_space<vmem>>, vector<1x1x8x8xf32>
    %38 = vector.shape_cast %37 : vector<1x1x8x8xf32> to vector<8x8xf32>
    %39 = vector.extract_strided_slice %34 {offsets = [0, 0], sizes = [8, 8], strides = [1, 1]} : vector<8x32xf32> to vector<8x8xf32>
    %40 = arith.truncf %39 : vector<8x8xf32> to vector<8x8xbf16>
    %41 = vector.extract_strided_slice %35 {offsets = [0, 0], sizes = [8, 8], strides = [1, 1]} : vector<8x32xf32> to vector<8x8xf32>
    %42 = arith.truncf %41 : vector<8x8xf32> to vector<8x8xbf16>
    %43 = vector.extract_strided_slice %36 {offsets = [0, 0], sizes = [8, 8], strides = [1, 1]} : vector<8x32xf32> to vector<8x8xf32>
    %44 = arith.truncf %43 : vector<8x8xf32> to vector<8x8xbf16>
    %cst_22 = arith.constant dense<0.000000e+00> : vector<8x8xf32>
    %45 = tpu.matmul %40, %42, %cst_22 {dimension_numbers = #tpu.dot_dimension_numbers<[1], [1], [0], [0], [0, 0, 1, 0], [], []>} : vector<8x8xbf16>, vector<8x8xbf16>, vector<8x8xf32> -> vector<8x8xf32>
    %cst_23 = arith.constant 0.353553385 : f32
    %46 = vector.broadcast %cst_23 : f32 to vector<8x8xf32>
    %47 = arith.mulf %45, %46 : vector<8x8xf32>
    %cst_24 = arith.constant 0.000000e+00 : f32
    %48 = vector.broadcast %cst_24 : f32 to vector<8x8xf32>
    %49 = arith.cmpf oeq, %38, %48 : vector<8x8xf32>
    %cst_25 = arith.constant -1.000000e+09 : f32
    %50 = vector.broadcast %cst_25 : f32 to vector<8x8xf32>
    %51 = arith.select %49, %50, %47 : vector<8x8xi1>, vector<8x8xf32>
    %cst_26 = arith.constant dense<0xFF800000> : vector<8xf32>
    %52 = vector.multi_reduction <maximumf>, %51, %cst_26 [1] : vector<8x8xf32> to vector<8xf32>
    %53 = vector.shape_cast %52 : vector<8xf32> to vector<8x1xf32>
    %54 = vector.broadcast %53 : vector<8x1xf32> to vector<8x8xf32>
    %55 = arith.subf %51, %54 : vector<8x8xf32>
    %56 = math.exp %55 : vector<8x8xf32>
    %cst_27 = arith.constant dense<0.000000e+00> : vector<8xf32>
    %57 = vector.multi_reduction <add>, %56, %cst_27 [1] : vector<8x8xf32> to vector<8xf32>
    %58 = vector.shape_cast %57 : vector<8xf32> to vector<8x1xf32>
    %59 = tpu.reciprocal %58 {approx = true} : vector<8x1xf32> -> vector<8x1xf32>
    %60 = vector.broadcast %59 : vector<8x1xf32> to vector<8x8xf32>
    %61 = arith.mulf %56, %60 : vector<8x8xf32>
    %62 = arith.truncf %61 : vector<8x8xf32> to vector<8x8xbf16>
    %cst_28 = arith.constant dense<0.000000e+00> : vector<8x8xf32>
    %63 = tpu.matmul %62, %44, %cst_28 {dimension_numbers = #tpu.dot_dimension_numbers<[1], [0], [0], [1], [0, 0, 1, 1], [], []>} : vector<8x8xbf16>, vector<8x8xbf16>, vector<8x8xf32> -> vector<8x8xf32>
    %64 = vector.extract_strided_slice %34 {offsets = [0, 8], sizes = [8, 8], strides = [1, 1]} : vector<8x32xf32> to vector<8x8xf32>
    %65 = arith.truncf %64 : vector<8x8xf32> to vector<8x8xbf16>
    %66 = vector.extract_strided_slice %35 {offsets = [0, 8], sizes = [8, 8], strides = [1, 1]} : vector<8x32xf32> to vector<8x8xf32>
    %67 = arith.truncf %66 : vector<8x8xf32> to vector<8x8xbf16>
    %68 = vector.extract_strided_slice %36 {offsets = [0, 8], sizes = [8, 8], strides = [1, 1]} : vector<8x32xf32> to vector<8x8xf32>
    %69 = arith.truncf %68 : vector<8x8xf32> to vector<8x8xbf16>
    %cst_29 = arith.constant dense<0.000000e+00> : vector<8x8xf32>
    %70 = tpu.matmul %65, %67, %cst_29 {dimension_numbers = #tpu.dot_dimension_numbers<[1], [1], [0], [0], [0, 0, 1, 0], [], []>} : vector<8x8xbf16>, vector<8x8xbf16>, vector<8x8xf32> -> vector<8x8xf32>
    %cst_30 = arith.constant 0.353553385 : f32
    %71 = vector.broadcast %cst_30 : f32 to vector<8x8xf32>
    %72 = arith.mulf %70, %71 : vector<8x8xf32>
    %cst_31 = arith.constant 0.000000e+00 : f32
    %73 = vector.broadcast %cst_31 : f32 to vector<8x8xf32>
    %74 = arith.cmpf oeq, %38, %73 : vector<8x8xf32>
    %cst_32 = arith.constant -1.000000e+09 : f32
    %75 = vector.broadcast %cst_32 : f32 to vector<8x8xf32>
    %76 = arith.select %74, %75, %72 : vector<8x8xi1>, vector<8x8xf32>
    %cst_33 = arith.constant dense<0xFF800000> : vector<8xf32>
    %77 = vector.multi_reduction <maximumf>, %76, %cst_33 [1] : vector<8x8xf32> to vector<8xf32>
    %78 = vector.shape_cast %77 : vector<8xf32> to vector<8x1xf32>
    %79 = vector.broadcast %78 : vector<8x1xf32> to vector<8x8xf32>
    %80 = arith.subf %76, %79 : vector<8x8xf32>
    %81 = math.exp %80 : vector<8x8xf32>
    %cst_34 = arith.constant dense<0.000000e+00> : vector<8xf32>
    %82 = vector.multi_reduction <add>, %81, %cst_34 [1] : vector<8x8xf32> to vector<8xf32>
    %83 = vector.shape_cast %82 : vector<8xf32> to vector<8x1xf32>
    %84 = tpu.reciprocal %83 {approx = true} : vector<8x1xf32> -> vector<8x1xf32>
    %85 = vector.broadcast %84 : vector<8x1xf32> to vector<8x8xf32>
    %86 = arith.mulf %81, %85 : vector<8x8xf32>
    %87 = arith.truncf %86 : vector<8x8xf32> to vector<8x8xbf16>
    %cst_35 = arith.constant dense<0.000000e+00> : vector<8x8xf32>
    %88 = tpu.matmul %87, %69, %cst_35 {dimension_numbers = #tpu.dot_dimension_numbers<[1], [0], [0], [1], [0, 0, 1, 1], [], []>} : vector<8x8xbf16>, vector<8x8xbf16>, vector<8x8xf32> -> vector<8x8xf32>
    %89 = vector.extract_strided_slice %34 {offsets = [0, 16], sizes = [8, 8], strides = [1, 1]} : vector<8x32xf32> to vector<8x8xf32>
    %90 = arith.truncf %89 : vector<8x8xf32> to vector<8x8xbf16>
    %91 = vector.extract_strided_slice %35 {offsets = [0, 16], sizes = [8, 8], strides = [1, 1]} : vector<8x32xf32> to vector<8x8xf32>
    %92 = arith.truncf %91 : vector<8x8xf32> to vector<8x8xbf16>
    %93 = vector.extract_strided_slice %36 {offsets = [0, 16], sizes = [8, 8], strides = [1, 1]} : vector<8x32xf32> to vector<8x8xf32>
    %94 = arith.truncf %93 : vector<8x8xf32> to vector<8x8xbf16>
    %cst_36 = arith.constant dense<0.000000e+00> : vector<8x8xf32>
    %95 = tpu.matmul %90, %92, %cst_36 {dimension_numbers = #tpu.dot_dimension_numbers<[1], [1], [0], [0], [0, 0, 1, 0], [], []>} : vector<8x8xbf16>, vector<8x8xbf16>, vector<8x8xf32> -> vector<8x8xf32>
    %cst_37 = arith.constant 0.353553385 : f32
    %96 = vector.broadcast %cst_37 : f32 to vector<8x8xf32>
    %97 = arith.mulf %95, %96 : vector<8x8xf32>
    %cst_38 = arith.constant 0.000000e+00 : f32
    %98 = vector.broadcast %cst_38 : f32 to vector<8x8xf32>
    %99 = arith.cmpf oeq, %38, %98 : vector<8x8xf32>
    %cst_39 = arith.constant -1.000000e+09 : f32
    %100 = vector.broadcast %cst_39 : f32 to vector<8x8xf32>
    %101 = arith.select %99, %100, %97 : vector<8x8xi1>, vector<8x8xf32>
    %cst_40 = arith.constant dense<0xFF800000> : vector<8xf32>
    %102 = vector.multi_reduction <maximumf>, %101, %cst_40 [1] : vector<8x8xf32> to vector<8xf32>
    %103 = vector.shape_cast %102 : vector<8xf32> to vector<8x1xf32>
    %104 = vector.broadcast %103 : vector<8x1xf32> to vector<8x8xf32>
    %105 = arith.subf %101, %104 : vector<8x8xf32>
    %106 = math.exp %105 : vector<8x8xf32>
    %cst_41 = arith.constant dense<0.000000e+00> : vector<8xf32>
    %107 = vector.multi_reduction <add>, %106, %cst_41 [1] : vector<8x8xf32> to vector<8xf32>
    %108 = vector.shape_cast %107 : vector<8xf32> to vector<8x1xf32>
    %109 = tpu.reciprocal %108 {approx = true} : vector<8x1xf32> -> vector<8x1xf32>
    %110 = vector.broadcast %109 : vector<8x1xf32> to vector<8x8xf32>
    %111 = arith.mulf %106, %110 : vector<8x8xf32>
    %112 = arith.truncf %111 : vector<8x8xf32> to vector<8x8xbf16>
    %cst_42 = arith.constant dense<0.000000e+00> : vector<8x8xf32>
    %113 = tpu.matmul %112, %94, %cst_42 {dimension_numbers = #tpu.dot_dimension_numbers<[1], [0], [0], [1], [0, 0, 1, 1], [], []>} : vector<8x8xbf16>, vector<8x8xbf16>, vector<8x8xf32> -> vector<8x8xf32>
    %114 = vector.extract_strided_slice %34 {offsets = [0, 24], sizes = [8, 8], strides = [1, 1]} : vector<8x32xf32> to vector<8x8xf32>
    %115 = arith.truncf %114 : vector<8x8xf32> to vector<8x8xbf16>
    %116 = vector.extract_strided_slice %35 {offsets = [0, 24], sizes = [8, 8], strides = [1, 1]} : vector<8x32xf32> to vector<8x8xf32>
    %117 = arith.truncf %116 : vector<8x8xf32> to vector<8x8xbf16>
    %118 = vector.extract_strided_slice %36 {offsets = [0, 24], sizes = [8, 8], strides = [1, 1]} : vector<8x32xf32> to vector<8x8xf32>
    %119 = arith.truncf %118 : vector<8x8xf32> to vector<8x8xbf16>
    %cst_43 = arith.constant dense<0.000000e+00> : vector<8x8xf32>
    %120 = tpu.matmul %115, %117, %cst_43 {dimension_numbers = #tpu.dot_dimension_numbers<[1], [1], [0], [0], [0, 0, 1, 0], [], []>} : vector<8x8xbf16>, vector<8x8xbf16>, vector<8x8xf32> -> vector<8x8xf32>
    %cst_44 = arith.constant 0.353553385 : f32
    %121 = vector.broadcast %cst_44 : f32 to vector<8x8xf32>
    %122 = arith.mulf %120, %121 : vector<8x8xf32>
    %cst_45 = arith.constant 0.000000e+00 : f32
    %123 = vector.broadcast %cst_45 : f32 to vector<8x8xf32>
    %124 = arith.cmpf oeq, %38, %123 : vector<8x8xf32>
    %cst_46 = arith.constant -1.000000e+09 : f32
    %125 = vector.broadcast %cst_46 : f32 to vector<8x8xf32>
    %126 = arith.select %124, %125, %122 : vector<8x8xi1>, vector<8x8xf32>
    %cst_47 = arith.constant dense<0xFF800000> : vector<8xf32>
    %127 = vector.multi_reduction <maximumf>, %126, %cst_47 [1] : vector<8x8xf32> to vector<8xf32>
    %128 = vector.shape_cast %127 : vector<8xf32> to vector<8x1xf32>
    %129 = vector.broadcast %128 : vector<8x1xf32> to vector<8x8xf32>
    %130 = arith.subf %126, %129 : vector<8x8xf32>
    %131 = math.exp %130 : vector<8x8xf32>
    %cst_48 = arith.constant dense<0.000000e+00> : vector<8xf32>
    %132 = vector.multi_reduction <add>, %131, %cst_48 [1] : vector<8x8xf32> to vector<8xf32>
    %133 = vector.shape_cast %132 : vector<8xf32> to vector<8x1xf32>
    %134 = tpu.reciprocal %133 {approx = true} : vector<8x1xf32> -> vector<8x1xf32>
    %135 = vector.broadcast %134 : vector<8x1xf32> to vector<8x8xf32>
    %136 = arith.mulf %131, %135 : vector<8x8xf32>
    %137 = arith.truncf %136 : vector<8x8xf32> to vector<8x8xbf16>
    %cst_49 = arith.constant dense<0.000000e+00> : vector<8x8xf32>
    %138 = tpu.matmul %137, %119, %cst_49 {dimension_numbers = #tpu.dot_dimension_numbers<[1], [0], [0], [1], [0, 0, 1, 1], [], []>} : vector<8x8xbf16>, vector<8x8xbf16>, vector<8x8xf32> -> vector<8x8xf32>
    %139 = tpu.concatenate %63, %88, %113, %138 in 1 : vector<8x8xf32>, vector<8x8xf32>, vector<8x8xf32>, vector<8x8xf32> -> vector<8x32xf32>
    %140 = arith.truncf %139 : vector<8x32xf32> to vector<8x32xbf16>
    %c0_50 = arith.constant 0 : index
    %c0_51 = arith.constant 0 : index
    %141 = vector.load %arg8[%c0_50, %c0_51] : memref<32x32xbf16, #tpu.memory_space<vmem>>, vector<32x32xbf16>
    %cst_52 = arith.constant dense<0.000000e+00> : vector<8x32xf32>
    %142 = tpu.matmul %140, %141, %cst_52 {dimension_numbers = #tpu.dot_dimension_numbers<[1], [0], [0], [1], [0, 0, 1, 1], [], []>} : vector<8x32xbf16>, vector<32x32xbf16>, vector<8x32xf32> -> vector<8x32xf32>
    %143 = arith.addf %1, %142 : vector<8x32xf32>
    %c0_53 = arith.constant 0 : index
    %c0_54 = arith.constant 0 : index
    %144 = vector.load %arg9[%c0_53, %c0_54] : memref<1x32xf32, #tpu.memory_space<vmem>>, vector<1x32xf32>
    %145 = vector.broadcast %144 : vector<1x32xf32> to vector<8x32xf32>
    %146 = arith.addf %143, %145 : vector<8x32xf32>
    %c0_55 = arith.constant 0 : index
    %c0_56 = arith.constant 0 : index
    %147 = vector.load %arg10[%c0_55, %c0_56] : memref<1x32xf32, #tpu.memory_space<vmem>>, vector<1x32xf32>
    %c0_57 = arith.constant 0 : index
    %c0_58 = arith.constant 0 : index
    %148 = vector.load %arg11[%c0_57, %c0_58] : memref<1x32xf32, #tpu.memory_space<vmem>>, vector<1x32xf32>
    %cst_59 = arith.constant dense<0.000000e+00> : vector<8xf32>
    %149 = vector.multi_reduction <add>, %146, %cst_59 [1] : vector<8x32xf32> to vector<8xf32>
    %150 = vector.shape_cast %149 : vector<8xf32> to vector<8x1xf32>
    %cst_60 = arith.constant 3.200000e+01 : f32
    %151 = vector.broadcast %cst_60 : f32 to vector<8x1xf32>
    %152 = arith.divf %150, %151 : vector<8x1xf32>
    %153 = vector.broadcast %152 : vector<8x1xf32> to vector<8x32xf32>
    %154 = arith.subf %146, %153 : vector<8x32xf32>
    %155 = arith.mulf %154, %154 : vector<8x32xf32>
    %cst_61 = arith.constant dense<0.000000e+00> : vector<8xf32>
    %156 = vector.multi_reduction <add>, %155, %cst_61 [1] : vector<8x32xf32> to vector<8xf32>
    %157 = vector.shape_cast %156 : vector<8xf32> to vector<8x1xf32>
    %cst_62 = arith.constant 3.200000e+01 : f32
    %158 = vector.broadcast %cst_62 : f32 to vector<8x1xf32>
    %159 = arith.divf %157, %158 : vector<8x1xf32>
    %160 = vector.broadcast %152 : vector<8x1xf32> to vector<8x32xf32>
    %161 = arith.subf %146, %160 : vector<8x32xf32>
    %cst_63 = arith.constant 9.99999997E-7 : f32
    %162 = vector.broadcast %cst_63 : f32 to vector<8x1xf32>
    %163 = arith.addf %159, %162 : vector<8x1xf32>
    %164 = math.rsqrt %163 : vector<8x1xf32>
    %165 = vector.broadcast %164 : vector<8x1xf32> to vector<8x32xf32>
    %166 = arith.mulf %161, %165 : vector<8x32xf32>
    %167 = vector.broadcast %147 : vector<1x32xf32> to vector<8x32xf32>
    %168 = arith.mulf %166, %167 : vector<8x32xf32>
    %169 = vector.broadcast %148 : vector<1x32xf32> to vector<8x32xf32>
    %170 = arith.addf %168, %169 : vector<8x32xf32>
    %171 = arith.truncf %170 : vector<8x32xf32> to vector<8x32xbf16>
    %c0_64 = arith.constant 0 : index
    %c0_65 = arith.constant 0 : index
    %172 = vector.load %arg12[%c0_64, %c0_65] : memref<32x32xbf16, #tpu.memory_space<vmem>>, vector<32x32xbf16>
    %cst_66 = arith.constant dense<0.000000e+00> : vector<8x32xf32>
    %173 = tpu.matmul %171, %172, %cst_66 {dimension_numbers = #tpu.dot_dimension_numbers<[1], [0], [0], [1], [0, 0, 1, 1], [], []>} : vector<8x32xbf16>, vector<32x32xbf16>, vector<8x32xf32> -> vector<8x32xf32>
    %c0_67 = arith.constant 0 : index
    %c0_68 = arith.constant 0 : index
    %174 = vector.load %arg13[%c0_67, %c0_68] : memref<1x32xf32, #tpu.memory_space<vmem>>, vector<1x32xf32>
    %175 = vector.broadcast %174 : vector<1x32xf32> to vector<8x32xf32>
    %176 = arith.addf %173, %175 : vector<8x32xf32>
    %177 = arith.truncf %3 : vector<8x32xf32> to vector<8x32xbf16>
    %c0_69 = arith.constant 0 : index
    %c0_70 = arith.constant 0 : index
    %178 = vector.load %arg14[%c0_69, %c0_70] : memref<32x64xbf16, #tpu.memory_space<vmem>>, vector<32x64xbf16>
    %cst_71 = arith.constant dense<0.000000e+00> : vector<8x64xf32>
    %179 = tpu.matmul %177, %178, %cst_71 {dimension_numbers = #tpu.dot_dimension_numbers<[1], [0], [0], [1], [0, 0, 1, 1], [], []>} : vector<8x32xbf16>, vector<32x64xbf16>, vector<8x64xf32> -> vector<8x64xf32>
    %c0_72 = arith.constant 0 : index
    %c0_73 = arith.constant 0 : index
    %180 = vector.load %arg15[%c0_72, %c0_73] : memref<1x64xf32, #tpu.memory_space<vmem>>, vector<1x64xf32>
    %181 = vector.broadcast %180 : vector<1x64xf32> to vector<8x64xf32>
    %182 = arith.addf %179, %181 : vector<8x64xf32>
    %183 = vector.extract_strided_slice %182 {offsets = [0, 0], sizes = [8, 32], strides = [1, 1]} : vector<8x64xf32> to vector<8x32xf32>
    %184 = vector.extract_strided_slice %182 {offsets = [0, 32], sizes = [8, 32], strides = [1, 1]} : vector<8x64xf32> to vector<8x32xf32>
    %185 = vector.extract_strided_slice %176 {offsets = [0, 0], sizes = [8, 8], strides = [1, 1]} : vector<8x32xf32> to vector<8x8xf32>
    %186 = arith.truncf %185 : vector<8x8xf32> to vector<8x8xbf16>
    %187 = vector.extract_strided_slice %183 {offsets = [0, 0], sizes = [8, 8], strides = [1, 1]} : vector<8x32xf32> to vector<8x8xf32>
    %188 = arith.truncf %187 : vector<8x8xf32> to vector<8x8xbf16>
    %189 = vector.extract_strided_slice %184 {offsets = [0, 0], sizes = [8, 8], strides = [1, 1]} : vector<8x32xf32> to vector<8x8xf32>
    %190 = arith.truncf %189 : vector<8x8xf32> to vector<8x8xbf16>
    %cst_74 = arith.constant dense<0.000000e+00> : vector<8x8xf32>
    %191 = tpu.matmul %186, %188, %cst_74 {dimension_numbers = #tpu.dot_dimension_numbers<[1], [1], [0], [0], [0, 0, 1, 0], [], []>} : vector<8x8xbf16>, vector<8x8xbf16>, vector<8x8xf32> -> vector<8x8xf32>
    %cst_75 = arith.constant 0.353553385 : f32
    %192 = vector.broadcast %cst_75 : f32 to vector<8x8xf32>
    %193 = arith.mulf %191, %192 : vector<8x8xf32>
    %cst_76 = arith.constant dense<0xFF800000> : vector<8xf32>
    %194 = vector.multi_reduction <maximumf>, %193, %cst_76 [1] : vector<8x8xf32> to vector<8xf32>
    %195 = vector.shape_cast %194 : vector<8xf32> to vector<8x1xf32>
    %196 = vector.broadcast %195 : vector<8x1xf32> to vector<8x8xf32>
    %197 = arith.subf %193, %196 : vector<8x8xf32>
    %198 = math.exp %197 : vector<8x8xf32>
    %cst_77 = arith.constant dense<0.000000e+00> : vector<8xf32>
    %199 = vector.multi_reduction <add>, %198, %cst_77 [1] : vector<8x8xf32> to vector<8xf32>
    %200 = vector.shape_cast %199 : vector<8xf32> to vector<8x1xf32>
    %201 = tpu.reciprocal %200 {approx = true} : vector<8x1xf32> -> vector<8x1xf32>
    %202 = vector.broadcast %201 : vector<8x1xf32> to vector<8x8xf32>
    %203 = arith.mulf %198, %202 : vector<8x8xf32>
    %204 = arith.truncf %203 : vector<8x8xf32> to vector<8x8xbf16>
    %cst_78 = arith.constant dense<0.000000e+00> : vector<8x8xf32>
    %205 = tpu.matmul %204, %190, %cst_78 {dimension_numbers = #tpu.dot_dimension_numbers<[1], [0], [0], [1], [0, 0, 1, 1], [], []>} : vector<8x8xbf16>, vector<8x8xbf16>, vector<8x8xf32> -> vector<8x8xf32>
    %206 = vector.extract_strided_slice %176 {offsets = [0, 8], sizes = [8, 8], strides = [1, 1]} : vector<8x32xf32> to vector<8x8xf32>
    %207 = arith.truncf %206 : vector<8x8xf32> to vector<8x8xbf16>
    %208 = vector.extract_strided_slice %183 {offsets = [0, 8], sizes = [8, 8], strides = [1, 1]} : vector<8x32xf32> to vector<8x8xf32>
    %209 = arith.truncf %208 : vector<8x8xf32> to vector<8x8xbf16>
    %210 = vector.extract_strided_slice %184 {offsets = [0, 8], sizes = [8, 8], strides = [1, 1]} : vector<8x32xf32> to vector<8x8xf32>
    %211 = arith.truncf %210 : vector<8x8xf32> to vector<8x8xbf16>
    %cst_79 = arith.constant dense<0.000000e+00> : vector<8x8xf32>
    %212 = tpu.matmul %207, %209, %cst_79 {dimension_numbers = #tpu.dot_dimension_numbers<[1], [1], [0], [0], [0, 0, 1, 0], [], []>} : vector<8x8xbf16>, vector<8x8xbf16>, vector<8x8xf32> -> vector<8x8xf32>
    %cst_80 = arith.constant 0.353553385 : f32
    %213 = vector.broadcast %cst_80 : f32 to vector<8x8xf32>
    %214 = arith.mulf %212, %213 : vector<8x8xf32>
    %cst_81 = arith.constant dense<0xFF800000> : vector<8xf32>
    %215 = vector.multi_reduction <maximumf>, %214, %cst_81 [1] : vector<8x8xf32> to vector<8xf32>
    %216 = vector.shape_cast %215 : vector<8xf32> to vector<8x1xf32>
    %217 = vector.broadcast %216 : vector<8x1xf32> to vector<8x8xf32>
    %218 = arith.subf %214, %217 : vector<8x8xf32>
    %219 = math.exp %218 : vector<8x8xf32>
    %cst_82 = arith.constant dense<0.000000e+00> : vector<8xf32>
    %220 = vector.multi_reduction <add>, %219, %cst_82 [1] : vector<8x8xf32> to vector<8xf32>
    %221 = vector.shape_cast %220 : vector<8xf32> to vector<8x1xf32>
    %222 = tpu.reciprocal %221 {approx = true} : vector<8x1xf32> -> vector<8x1xf32>
    %223 = vector.broadcast %222 : vector<8x1xf32> to vector<8x8xf32>
    %224 = arith.mulf %219, %223 : vector<8x8xf32>
    %225 = arith.truncf %224 : vector<8x8xf32> to vector<8x8xbf16>
    %cst_83 = arith.constant dense<0.000000e+00> : vector<8x8xf32>
    %226 = tpu.matmul %225, %211, %cst_83 {dimension_numbers = #tpu.dot_dimension_numbers<[1], [0], [0], [1], [0, 0, 1, 1], [], []>} : vector<8x8xbf16>, vector<8x8xbf16>, vector<8x8xf32> -> vector<8x8xf32>
    %227 = vector.extract_strided_slice %176 {offsets = [0, 16], sizes = [8, 8], strides = [1, 1]} : vector<8x32xf32> to vector<8x8xf32>
    %228 = arith.truncf %227 : vector<8x8xf32> to vector<8x8xbf16>
    %229 = vector.extract_strided_slice %183 {offsets = [0, 16], sizes = [8, 8], strides = [1, 1]} : vector<8x32xf32> to vector<8x8xf32>
    %230 = arith.truncf %229 : vector<8x8xf32> to vector<8x8xbf16>
    %231 = vector.extract_strided_slice %184 {offsets = [0, 16], sizes = [8, 8], strides = [1, 1]} : vector<8x32xf32> to vector<8x8xf32>
    %232 = arith.truncf %231 : vector<8x8xf32> to vector<8x8xbf16>
    %cst_84 = arith.constant dense<0.000000e+00> : vector<8x8xf32>
    %233 = tpu.matmul %228, %230, %cst_84 {dimension_numbers = #tpu.dot_dimension_numbers<[1], [1], [0], [0], [0, 0, 1, 0], [], []>} : vector<8x8xbf16>, vector<8x8xbf16>, vector<8x8xf32> -> vector<8x8xf32>
    %cst_85 = arith.constant 0.353553385 : f32
    %234 = vector.broadcast %cst_85 : f32 to vector<8x8xf32>
    %235 = arith.mulf %233, %234 : vector<8x8xf32>
    %cst_86 = arith.constant dense<0xFF800000> : vector<8xf32>
    %236 = vector.multi_reduction <maximumf>, %235, %cst_86 [1] : vector<8x8xf32> to vector<8xf32>
    %237 = vector.shape_cast %236 : vector<8xf32> to vector<8x1xf32>
    %238 = vector.broadcast %237 : vector<8x1xf32> to vector<8x8xf32>
    %239 = arith.subf %235, %238 : vector<8x8xf32>
    %240 = math.exp %239 : vector<8x8xf32>
    %cst_87 = arith.constant dense<0.000000e+00> : vector<8xf32>
    %241 = vector.multi_reduction <add>, %240, %cst_87 [1] : vector<8x8xf32> to vector<8xf32>
    %242 = vector.shape_cast %241 : vector<8xf32> to vector<8x1xf32>
    %243 = tpu.reciprocal %242 {approx = true} : vector<8x1xf32> -> vector<8x1xf32>
    %244 = vector.broadcast %243 : vector<8x1xf32> to vector<8x8xf32>
    %245 = arith.mulf %240, %244 : vector<8x8xf32>
    %246 = arith.truncf %245 : vector<8x8xf32> to vector<8x8xbf16>
    %cst_88 = arith.constant dense<0.000000e+00> : vector<8x8xf32>
    %247 = tpu.matmul %246, %232, %cst_88 {dimension_numbers = #tpu.dot_dimension_numbers<[1], [0], [0], [1], [0, 0, 1, 1], [], []>} : vector<8x8xbf16>, vector<8x8xbf16>, vector<8x8xf32> -> vector<8x8xf32>
    %248 = vector.extract_strided_slice %176 {offsets = [0, 24], sizes = [8, 8], strides = [1, 1]} : vector<8x32xf32> to vector<8x8xf32>
    %249 = arith.truncf %248 : vector<8x8xf32> to vector<8x8xbf16>
    %250 = vector.extract_strided_slice %183 {offsets = [0, 24], sizes = [8, 8], strides = [1, 1]} : vector<8x32xf32> to vector<8x8xf32>
    %251 = arith.truncf %250 : vector<8x8xf32> to vector<8x8xbf16>
    %252 = vector.extract_strided_slice %184 {offsets = [0, 24], sizes = [8, 8], strides = [1, 1]} : vector<8x32xf32> to vector<8x8xf32>
    %253 = arith.truncf %252 : vector<8x8xf32> to vector<8x8xbf16>
    %cst_89 = arith.constant dense<0.000000e+00> : vector<8x8xf32>
    %254 = tpu.matmul %249, %251, %cst_89 {dimension_numbers = #tpu.dot_dimension_numbers<[1], [1], [0], [0], [0, 0, 1, 0], [], []>} : vector<8x8xbf16>, vector<8x8xbf16>, vector<8x8xf32> -> vector<8x8xf32>
    %cst_90 = arith.constant 0.353553385 : f32
    %255 = vector.broadcast %cst_90 : f32 to vector<8x8xf32>
    %256 = arith.mulf %254, %255 : vector<8x8xf32>
    %cst_91 = arith.constant dense<0xFF800000> : vector<8xf32>
    %257 = vector.multi_reduction <maximumf>, %256, %cst_91 [1] : vector<8x8xf32> to vector<8xf32>
    %258 = vector.shape_cast %257 : vector<8xf32> to vector<8x1xf32>
    %259 = vector.broadcast %258 : vector<8x1xf32> to vector<8x8xf32>
    %260 = arith.subf %256, %259 : vector<8x8xf32>
    %261 = math.exp %260 : vector<8x8xf32>
    %cst_92 = arith.constant dense<0.000000e+00> : vector<8xf32>
    %262 = vector.multi_reduction <add>, %261, %cst_92 [1] : vector<8x8xf32> to vector<8xf32>
    %263 = vector.shape_cast %262 : vector<8xf32> to vector<8x1xf32>
    %264 = tpu.reciprocal %263 {approx = true} : vector<8x1xf32> -> vector<8x1xf32>
    %265 = vector.broadcast %264 : vector<8x1xf32> to vector<8x8xf32>
    %266 = arith.mulf %261, %265 : vector<8x8xf32>
    %267 = arith.truncf %266 : vector<8x8xf32> to vector<8x8xbf16>
    %cst_93 = arith.constant dense<0.000000e+00> : vector<8x8xf32>
    %268 = tpu.matmul %267, %253, %cst_93 {dimension_numbers = #tpu.dot_dimension_numbers<[1], [0], [0], [1], [0, 0, 1, 1], [], []>} : vector<8x8xbf16>, vector<8x8xbf16>, vector<8x8xf32> -> vector<8x8xf32>
    %269 = tpu.concatenate %205, %226, %247, %268 in 1 : vector<8x8xf32>, vector<8x8xf32>, vector<8x8xf32>, vector<8x8xf32> -> vector<8x32xf32>
    %270 = arith.truncf %269 : vector<8x32xf32> to vector<8x32xbf16>
    %c0_94 = arith.constant 0 : index
    %c0_95 = arith.constant 0 : index
    %271 = vector.load %arg16[%c0_94, %c0_95] : memref<32x32xbf16, #tpu.memory_space<vmem>>, vector<32x32xbf16>
    %cst_96 = arith.constant dense<0.000000e+00> : vector<8x32xf32>
    %272 = tpu.matmul %270, %271, %cst_96 {dimension_numbers = #tpu.dot_dimension_numbers<[1], [0], [0], [1], [0, 0, 1, 1], [], []>} : vector<8x32xbf16>, vector<32x32xbf16>, vector<8x32xf32> -> vector<8x32xf32>
    %273 = arith.addf %146, %272 : vector<8x32xf32>
    %c0_97 = arith.constant 0 : index
    %c0_98 = arith.constant 0 : index
    %274 = vector.load %arg17[%c0_97, %c0_98] : memref<1x32xf32, #tpu.memory_space<vmem>>, vector<1x32xf32>
    %275 = vector.broadcast %274 : vector<1x32xf32> to vector<8x32xf32>
    %276 = arith.addf %273, %275 : vector<8x32xf32>
    %c0_99 = arith.constant 0 : index
    %c0_100 = arith.constant 0 : index
    %277 = vector.load %arg18[%c0_99, %c0_100] : memref<1x32xf32, #tpu.memory_space<vmem>>, vector<1x32xf32>
    %c0_101 = arith.constant 0 : index
    %c0_102 = arith.constant 0 : index
    %278 = vector.load %arg19[%c0_101, %c0_102] : memref<1x32xf32, #tpu.memory_space<vmem>>, vector<1x32xf32>
    %cst_103 = arith.constant dense<0.000000e+00> : vector<8xf32>
    %279 = vector.multi_reduction <add>, %276, %cst_103 [1] : vector<8x32xf32> to vector<8xf32>
    %280 = vector.shape_cast %279 : vector<8xf32> to vector<8x1xf32>
    %cst_104 = arith.constant 3.200000e+01 : f32
    %281 = vector.broadcast %cst_104 : f32 to vector<8x1xf32>
    %282 = arith.divf %280, %281 : vector<8x1xf32>
    %283 = vector.broadcast %282 : vector<8x1xf32> to vector<8x32xf32>
    %284 = arith.subf %276, %283 : vector<8x32xf32>
    %285 = arith.mulf %284, %284 : vector<8x32xf32>
    %cst_105 = arith.constant dense<0.000000e+00> : vector<8xf32>
    %286 = vector.multi_reduction <add>, %285, %cst_105 [1] : vector<8x32xf32> to vector<8xf32>
    %287 = vector.shape_cast %286 : vector<8xf32> to vector<8x1xf32>
    %cst_106 = arith.constant 3.200000e+01 : f32
    %288 = vector.broadcast %cst_106 : f32 to vector<8x1xf32>
    %289 = arith.divf %287, %288 : vector<8x1xf32>
    %290 = vector.broadcast %282 : vector<8x1xf32> to vector<8x32xf32>
    %291 = arith.subf %276, %290 : vector<8x32xf32>
    %cst_107 = arith.constant 9.99999997E-7 : f32
    %292 = vector.broadcast %cst_107 : f32 to vector<8x1xf32>
    %293 = arith.addf %289, %292 : vector<8x1xf32>
    %294 = math.rsqrt %293 : vector<8x1xf32>
    %295 = vector.broadcast %294 : vector<8x1xf32> to vector<8x32xf32>
    %296 = arith.mulf %291, %295 : vector<8x32xf32>
    %297 = vector.broadcast %277 : vector<1x32xf32> to vector<8x32xf32>
    %298 = arith.mulf %296, %297 : vector<8x32xf32>
    %299 = vector.broadcast %278 : vector<1x32xf32> to vector<8x32xf32>
    %300 = arith.addf %298, %299 : vector<8x32xf32>
    %301 = arith.truncf %300 : vector<8x32xf32> to vector<8x32xbf16>
    %c0_108 = arith.constant 0 : index
    %c0_109 = arith.constant 0 : index
    %302 = vector.load %arg20[%c0_108, %c0_109] : memref<32x64xbf16, #tpu.memory_space<vmem>>, vector<32x64xbf16>
    %cst_110 = arith.constant dense<0.000000e+00> : vector<8x64xf32>
    %303 = tpu.matmul %301, %302, %cst_110 {dimension_numbers = #tpu.dot_dimension_numbers<[1], [0], [0], [1], [0, 0, 1, 1], [], []>} : vector<8x32xbf16>, vector<32x64xbf16>, vector<8x64xf32> -> vector<8x64xf32>
    %c0_111 = arith.constant 0 : index
    %c0_112 = arith.constant 0 : index
    %304 = vector.load %arg21[%c0_111, %c0_112] : memref<1x64xf32, #tpu.memory_space<vmem>>, vector<1x64xf32>
    %305 = vector.broadcast %304 : vector<1x64xf32> to vector<8x64xf32>
    %306 = arith.addf %303, %305 : vector<8x64xf32>
    %cst_113 = arith.constant 0.000000e+00 : f32
    %307 = vector.broadcast %cst_113 : f32 to vector<8x64xf32>
    %308 = arith.maximumf %306, %307 : vector<8x64xf32>
    %309 = arith.truncf %308 : vector<8x64xf32> to vector<8x64xbf16>
    %c0_114 = arith.constant 0 : index
    %c0_115 = arith.constant 0 : index
    %310 = vector.load %arg22[%c0_114, %c0_115] : memref<64x32xbf16, #tpu.memory_space<vmem>>, vector<64x32xbf16>
    %cst_116 = arith.constant dense<0.000000e+00> : vector<8x32xf32>
    %311 = tpu.matmul %309, %310, %cst_116 {dimension_numbers = #tpu.dot_dimension_numbers<[1], [0], [0], [1], [0, 0, 1, 1], [], []>} : vector<8x64xbf16>, vector<64x32xbf16>, vector<8x32xf32> -> vector<8x32xf32>
    %312 = arith.addf %276, %311 : vector<8x32xf32>
    %c0_117 = arith.constant 0 : index
    %c0_118 = arith.constant 0 : index
    %313 = vector.load %arg23[%c0_117, %c0_118] : memref<1x32xf32, #tpu.memory_space<vmem>>, vector<1x32xf32>
    %314 = vector.broadcast %313 : vector<1x32xf32> to vector<8x32xf32>
    %315 = arith.addf %312, %314 : vector<8x32xf32>
    %c0_119 = arith.constant 0 : index
    %c0_120 = arith.constant 0 : index
    %c0_121 = arith.constant 0 : index
    %316 = vector.load %arg24[%c0_119, %c0_120, %c0_121] : memref<1x8x32xf32, #tpu.memory_space<vmem>>, vector<1x8x32xf32>
    %317 = vector.shape_cast %316 : vector<1x8x32xf32> to vector<8x32xf32>
    %318 = vector.shape_cast %315 : vector<8x32xf32> to vector<1x8x32xf32>
    tpu.vector_store %arg24[%c0_119, %c0_120, %c0_121], %318 {strides = array<i32>} : memref<1x8x32xf32, #tpu.memory_space<vmem>>, vector<1x8x32xf32>,
    return
  }
  func.func @transform_0(%arg0: i32) -> (i32, i32, i32) {
    %c0_i32 = arith.constant 0 : i32
    %c0_i32_0 = arith.constant 0 : i32
    %c0_i32_1 = arith.constant 0 : i32
    return %arg0, %c0_i32, %c0_i32_0 : i32, i32, i32
  }
  func.func @transform_1(%arg0: i32) -> (i32, i32, i32) {
    %c0_i32 = arith.constant 0 : i32
    %c0_i32_0 = arith.constant 0 : i32
    %c0_i32_1 = arith.constant 0 : i32
    return %arg0, %c0_i32, %c0_i32_0 : i32, i32, i32
  }
  func.func @transform_2(%arg0: i32) -> (i32, i32, i32, i32) {
    %c0_i32 = arith.constant 0 : i32
    %c0_i32_0 = arith.constant 0 : i32
    %c0_i32_1 = arith.constant 0 : i32
    %c0_i32_2 = arith.constant 0 : i32
    return %arg0, %c0_i32, %c0_i32_0, %c0_i32_1 : i32, i32, i32, i32
  }
  func.func @transform_3(%arg0: i32) -> (i32, i32) {
    %c0_i32 = arith.constant 0 : i32
    %c0_i32_0 = arith.constant 0 : i32
    %c0_i32_1 = arith.constant 0 : i32
    return %c0_i32, %c0_i32_0 : i32, i32
  }
  func.func @transform_4(%arg0: i32) -> (i32, i32) {
    %c0_i32 = arith.constant 0 : i32
    %c0_i32_0 = arith.constant 0 : i32
    %c0_i32_1 = arith.constant 0 : i32
    return %c0_i32, %c0_i32_0 : i32, i32
  }
  func.func @transform_5(%arg0: i32) -> (i32, i32) {
    %c0_i32 = arith.constant 0 : i32
    %c0_i32_0 = arith.constant 0 : i32
    %c0_i32_1 = arith.constant 0 : i32
    return %c0_i32, %c0_i32_0 : i32, i32
  }
  func.func @transform_6(%arg0: i32) -> (i32, i32) {
    %c0_i32 = arith.constant 0 : i32
    %c0_i32_0 = arith.constant 0 : i32
    %c0_i32_1 = arith.constant 0 : i32
    return %c0_i32, %c0_i32_0 : i32, i32
  }
  func.func @transform_7(%arg0: i32) -> (i32, i32) {
    %c0_i32 = arith.constant 0 : i32
    %c0_i32_0 = arith.constant 0 : i32
    %c0_i32_1 = arith.constant 0 : i32
    return %c0_i32, %c0_i32_0 : i32, i32
  }
  func.func @transform_8(%arg0: i32) -> (i32, i32) {
    %c0_i32 = arith.constant 0 : i32
    %c0_i32_0 = arith.constant 0 : i32
    %c0_i32_1 = arith.constant 0 : i32
    return %c0_i32, %c0_i32_0 : i32, i32
  }
  func.func @transform_9(%arg0: i32) -> (i32, i32) {
    %c0_i32 = arith.constant 0 : i32
    %c0_i32_0 = arith.constant 0 : i32
    %c0_i32_1 = arith.constant 0 : i32
    return %c0_i32, %c0_i32_0 : i32, i32
  }
  func.func @transform_10(%arg0: i32) -> (i32, i32) {
    %c0_i32 = arith.constant 0 : i32
    %c0_i32_0 = arith.constant 0 : i32
    %c0_i32_1 = arith.constant 0 : i32
    return %c0_i32, %c0_i32_0 : i32, i32
  }
  func.func @transform_11(%arg0: i32) -> (i32, i32) {
    %c0_i32 = arith.constant 0 : i32
    %c0_i32_0 = arith.constant 0 : i32
    %c0_i32_1 = arith.constant 0 : i32
    return %c0_i32, %c0_i32_0 : i32, i32
  }
  func.func @transform_12(%arg0: i32) -> (i32, i32) {
    %c0_i32 = arith.constant 0 : i32
    %c0_i32_0 = arith.constant 0 : i32
    %c0_i32_1 = arith.constant 0 : i32
    return %c0_i32, %c0_i32_0 : i32, i32
  }
  func.func @transform_13(%arg0: i32) -> (i32, i32) {
    %c0_i32 = arith.constant 0 : i32
    %c0_i32_0 = arith.constant 0 : i32
    %c0_i32_1 = arith.constant 0 : i32
    return %c0_i32, %c0_i32_0 : i32, i32
  }
  func.func @transform_14(%arg0: i32) -> (i32, i32) {
    %c0_i32 = arith.constant 0 : i32
    %c0_i32_0 = arith.constant 0 : i32
    %c0_i32_1 = arith.constant 0 : i32
    return %c0_i32, %c0_i32_0 : i32, i32
  }
  func.func @transform_15(%arg0: i32) -> (i32, i32) {
    %c0_i32 = arith.constant 0 : i32
    %c0_i32_0 = arith.constant 0 : i32
    %c0_i32_1 = arith.constant 0 : i32
    return %c0_i32, %c0_i32_0 : i32, i32
  }
  func.func @transform_16(%arg0: i32) -> (i32, i32) {
    %c0_i32 = arith.constant 0 : i32
    %c0_i32_0 = arith.constant 0 : i32
    %c0_i32_1 = arith.constant 0 : i32
    return %c0_i32, %c0_i32_0 : i32, i32
  }
  func.func @transform_17(%arg0: i32) -> (i32, i32) {
    %c0_i32 = arith.constant 0 : i32
    %c0_i32_0 = arith.constant 0 : i32
    %c0_i32_1 = arith.constant 0 : i32
    return %c0_i32, %c0_i32_0 : i32, i32
  }
  func.func @transform_18(%arg0: i32) -> (i32, i32) {
    %c0_i32 = arith.constant 0 : i32
    %c0_i32_0 = arith.constant 0 : i32
    %c0_i32_1 = arith.constant 0 : i32
    return %c0_i32, %c0_i32_0 : i32, i32
  }
  func.func @transform_19(%arg0: i32) -> (i32, i32) {
    %c0_i32 = arith.constant 0 : i32
    %c0_i32_0 = arith.constant 0 : i32
    %c0_i32_1 = arith.constant 0 : i32
    return %c0_i32, %c0_i32_0 : i32, i32
  }
  func.func @transform_20(%arg0: i32) -> (i32, i32) {
    %c0_i32 = arith.constant 0 : i32
    %c0_i32_0 = arith.constant 0 : i32
    %c0_i32_1 = arith.constant 0 : i32
    return %c0_i32, %c0_i32_0 : i32, i32
  }
  func.func @transform_21(%arg0: i32) -> (i32, i32) {
    %c0_i32 = arith.constant 0 : i32
    %c0_i32_0 = arith.constant 0 : i32
    %c0_i32_1 = arith.constant 0 : i32
    return %c0_i32, %c0_i32_0 : i32, i32
  }
  func.func @transform_22(%arg0: i32) -> (i32, i32) {
    %c0_i32 = arith.constant 0 : i32
    %c0_i32_0 = arith.constant 0 : i32
    %c0_i32_1 = arith.constant 0 : i32
    return %c0_i32, %c0_i32_0 : i32, i32
  }
  func.func @transform_23(%arg0: i32) -> (i32, i32, i32) {
    %c0_i32 = arith.constant 0 : i32
    %c0_i32_0 = arith.constant 0 : i32
    %c0_i32_1 = arith.constant 0 : i32
    return %arg0, %c0_i32, %c0_i32_0 : i32, i32, i32
  }
}

module attributes {stable_mosaic.version = 11 : i64} {
  func.func @_decoder_block_kernel(%arg0: i32, %arg1: memref<1x8x32xf32, #tpu.memory_space<vmem>>, %arg2: memref<1x8x32xf32, #tpu.memory_space<vmem>>, %arg3: memref<1x1x8x8xf32, #tpu.memory_space<vmem>>, %arg4: memref<1x32xf32, #tpu.memory_space<vmem>>, %arg5: memref<1x32xf32, #tpu.memory_space<vmem>>, %arg6: memref<32x96xbf16, #tpu.memory_space<vmem>>, %arg7: memref<1x96xf32, #tpu.memory_space<vmem>>, %arg8: memref<32x32xbf16, #tpu.memory_space<vmem>>, %arg9: memref<1x32xf32, #tpu.memory_space<vmem>>, %arg10: memref<1x32xf32, #tpu.memory_space<vmem>>, %arg11: memref<1x32xf32, #tpu.memory_space<vmem>>, %arg12: memref<32x32xbf16, #tpu.memory_space<vmem>>, %arg13: memref<1x32xf32, #tpu.memory_space<vmem>>, %arg14: memref<32x64xbf16, #tpu.memory_space<vmem>>, %arg15: memref<1x64xf32, #tpu.memory_space<vmem>>, %arg16: memref<32x32xbf16, #tpu.memory_space<vmem>>, %arg17: memref<1x32xf32, #tpu.memory_space<vmem>>, %arg18: memref<1x32xf32, #tpu.memory_space<vmem>>, %arg19: memref<1x32xf32, #tpu.memory_space<vmem>>, %arg20: memref<32x64xbf16, #tpu.memory_space<vmem>>, %arg21: memref<1x64xf32, #tpu.memory_space<vmem>>, %arg22: memref<64x32xbf16, #tpu.memory_space<vmem>>, %arg23: memref<1x32xf32, #tpu.memory_space<vmem>>, %arg24: memref<1x8x32xf32, #tpu.memory_space<vmem>>) attributes {dimension_semantics = [#tpu.dimension_semantics<parallel>], iteration_bounds = array<i64: 2>, scalar_prefetch = 0 : i64, scratch_operands = 0 : i64, tpu.core_type = #tpu.core_type<tc>, window_params = [{transform_indices = @transform_0, window_bounds = array<i64: 1, 8, 32>}, {transform_indices = @transform_1, window_bounds = array<i64: 1, 8, 32>}, {transform_indices = @transform_2, window_bounds = array<i64: 1, 1, 8, 8>}, {pipeline_mode = #tpu.pipeline_mode<synchronous>, transform_indices = @transform_3, window_bounds = array<i64: 1, 32>}, {pipeline_mode = #tpu.pipeline_mode<synchronous>, transform_indices = @transform_4, window_bounds = array<i64: 1, 32>}, {pipeline_mode = #tpu.pipeline_mode<synchronous>, transform_indices = @transform_5, window_bounds = array<i64: 32, 96>}, {pipeline_mode = #tpu.pipeline_mode<synchronous>, transform_indices = @transform_6, window_bounds = array<i64: 1, 96>}, {pipeline_mode = #tpu.pipeline_mode<synchronous>, transform_indices = @transform_7, window_bounds = array<i64: 32, 32>}, {pipeline_mode = #tpu.pipeline_mode<synchronous>, transform_indices = @transform_8, window_bounds = array<i64: 1, 32>}, {pipeline_mode = #tpu.pipeline_mode<synchronous>, transform_indices = @transform_9, window_bounds = array<i64: 1, 32>}, {pipeline_mode = #tpu.pipeline_mode<synchronous>, transform_indices = @transform_10, window_bounds = array<i64: 1, 32>}, {pipeline_mode = #tpu.pipeline_mode<synchronous>, transform_indices = @transform_11, window_bounds = array<i64: 32, 32>}, {pipeline_mode = #tpu.pipeline_mode<synchronous>, transform_indices = @transform_12, window_bounds = array<i64: 1, 32>}, {pipeline_mode = #tpu.pipeline_mode<synchronous>, transform_indices = @transform_13, window_bounds = array<i64: 32, 64>}, {pipeline_mode = #tpu.pipeline_mode<synchronous>, transform_indices = @transform_14, window_bounds = array<i64: 1, 64>}, {pipeline_mode = #tpu.pipeline_mode<synchronous>, transform_indices = @transform_15, window_bounds = array<i64: 32, 32>}, {pipeline_mode = #tpu.pipeline_mode<synchronous>, transform_indices = @transform_16, window_bounds = array<i64: 1, 32>}, {pipeline_mode = #tpu.pipeline_mode<synchronous>, transform_indices = @transform_17, window_bounds = array<i64: 1, 32>}, {pipeline_mode = #tpu.pipeline_mode<synchronous>, transform_indices = @transform_18, window_bounds = array<i64: 1, 32>}, {pipeline_mode = #tpu.pipeline_mode<synchronous>, transform_indices = @transform_19, window_bounds = array<i64: 32, 64>}, {pipeline_mode = #tpu.pipeline_mode<synchronous>, transform_indices = @transform_20, window_bounds = array<i64: 1, 64>}, {pipeline_mode = #tpu.pipeline_mode<synchronous>, transform_indices = @transform_21, window_bounds = array<i64: 64, 32>}, {pipeline_mode = #tpu.pipeline_mode<synchronous>, transform_indices = @transform_22, window_bounds = array<i64: 1, 32>}, {transform_indices = @transform_23, window_bounds = array<i64: 1, 8, 32>}]} {
    %c0 = arith.constant 0 : index
    %c0_0 = arith.constant 0 : index
    %c0_1 = arith.constant 0 : index
    %0 = vector.load %arg1[%c0, %c0_0, %c0_1] : memref<1x8x32xf32, #tpu.memory_space<vmem>>, vector<1x8x32xf32>
    %1 = vector.shape_cast %0 : vector<1x8x32xf32> to vector<8x32xf32>
    %c0_2 = arith.constant 0 : index
    %c0_3 = arith.constant 0 : index
    %c0_4 = arith.constant 0 : index
    %2 = vector.load %arg2[%c0_2, %c0_3, %c0_4] : memref<1x8x32xf32, #tpu.memory_space<vmem>>, vector<1x8x32xf32>
    %3 = vector.shape_cast %2 : vector<1x8x32xf32> to vector<8x32xf32>
    %c0_5 = arith.constant 0 : index
    %c0_6 = arith.constant 0 : index
    %4 = vector.load %arg4[%c0_5, %c0_6] : memref<1x32xf32, #tpu.memory_space<vmem>>, vector<1x32xf32>
    %c0_7 = arith.constant 0 : index
    %c0_8 = arith.constant 0 : index
    %5 = vector.load %arg5[%c0_7, %c0_8] : memref<1x32xf32, #tpu.memory_space<vmem>>, vector<1x32xf32>
    %cst = arith.constant dense<0.000000e+00> : vector<8xf32>
    %6 = vector.multi_reduction <add>, %1, %cst [1] : vector<8x32xf32> to vector<8xf32>
    %7 = vector.shape_cast %6 : vector<8xf32> to vector<8x1xf32>
    %cst_9 = arith.constant 3.200000e+01 : f32
    %8 = vector.broadcast %cst_9 : f32 to vector<8x1xf32>
    %9 = arith.divf %7, %8 : vector<8x1xf32>
    %10 = vector.broadcast %9 : vector<8x1xf32> to vector<8x32xf32>
    %11 = arith.subf %1, %10 : vector<8x32xf32>
    %12 = arith.mulf %11, %11 : vector<8x32xf32>
    %cst_10 = arith.constant dense<0.000000e+00> : vector<8xf32>
    %13 = vector.multi_reduction <add>, %12, %cst_10 [1] : vector<8x32xf32> to vector<8xf32>
    %14 = vector.shape_cast %13 : vector<8xf32> to vector<8x1xf32>
    %cst_11 = arith.constant 3.200000e+01 : f32
    %15 = vector.broadcast %cst_11 : f32 to vector<8x1xf32>
    %16 = arith.divf %14, %15 : vector<8x1xf32>
    %17 = vector.broadcast %9 : vector<8x1xf32> to vector<8x32xf32>
    %18 = arith.subf %1, %17 : vector<8x32xf32>
    %cst_12 = arith.constant 9.99999997E-7 : f32
    %19 = vector.broadcast %cst_12 : f32 to vector<8x1xf32>
    %20 = arith.addf %16, %19 : vector<8x1xf32>
    %21 = math.rsqrt %20 : vector<8x1xf32>
    %22 = vector.broadcast %21 : vector<8x1xf32> to vector<8x32xf32>
    %23 = arith.mulf %18, %22 : vector<8x32xf32>
    %24 = vector.broadcast %4 : vector<1x32xf32> to vector<8x32xf32>
    %25 = arith.mulf %23, %24 : vector<8x32xf32>
    %26 = vector.broadcast %5 : vector<1x32xf32> to vector<8x32xf32>
    %27 = arith.addf %25, %26 : vector<8x32xf32>
    %28 = arith.truncf %27 : vector<8x32xf32> to vector<8x32xbf16>
    %c0_13 = arith.constant 0 : index
    %c0_14 = arith.constant 0 : index
    %29 = vector.load %arg6[%c0_13, %c0_14] : memref<32x96xbf16, #tpu.memory_space<vmem>>, vector<32x96xbf16>
    %cst_15 = arith.constant dense<0.000000e+00> : vector<8x96xf32>
    %30 = tpu.matmul %28, %29, %cst_15 {dimension_numbers = #tpu.dot_dimension_numbers<[1], [0], [0], [1], [0, 0, 1, 1], [], []>} : vector<8x32xbf16>, vector<32x96xbf16>, vector<8x96xf32> -> vector<8x96xf32>
    %c0_16 = arith.constant 0 : index
    %c0_17 = arith.constant 0 : index
    %31 = vector.load %arg7[%c0_16, %c0_17] : memref<1x96xf32, #tpu.memory_space<vmem>>, vector<1x96xf32>
    %32 = vector.broadcast %31 : vector<1x96xf32> to vector<8x96xf32>
    %33 = arith.addf %30, %32 : vector<8x96xf32>
    %34 = vector.extract_strided_slice %33 {offsets = [0, 0], sizes = [8, 32], strides = [1, 1]} : vector<8x96xf32> to vector<8x32xf32>
    %35 = vector.extract_strided_slice %33 {offsets = [0, 32], sizes = [8, 32], strides = [1, 1]} : vector<8x96xf32> to vector<8x32xf32>
    %36 = vector.extract_strided_slice %33 {offsets = [0, 64], sizes = [8, 32], strides = [1, 1]} : vector<8x96xf32> to vector<8x32xf32>
    %c0_18 = arith.constant 0 : index
    %c0_19 = arith.constant 0 : index
    %c0_20 = arith.constant 0 : index
    %c0_21 = arith.constant 0 : index
    %37 = vector.load %arg3[%c0_18, %c0_19, %c0_20, %c0_21] : memref<1x1x8x8xf32, #tpu.memory_space<vmem>>, vector<1x1x8x8xf32>
    %38 = vector.shape_cast %37 : vector<1x1x8x8xf32> to vector<8x8xf32>
    %39 = vector.extract_strided_slice %34 {offsets = [0, 0], sizes = [8, 8], strides = [1, 1]} : vector<8x32xf32> to vector<8x8xf32>
    %40 = arith.truncf %39 : vector<8x8xf32> to vector<8x8xbf16>
    %41 = vector.extract_strided_slice %35 {offsets = [0, 0], sizes = [8, 8], strides = [1, 1]} : vector<8x32xf32> to vector<8x8xf32>
    %42 = arith.truncf %41 : vector<8x8xf32> to vector<8x8xbf16>
    %43 = vector.extract_strided_slice %36 {offsets = [0, 0], sizes = [8, 8], strides = [1, 1]} : vector<8x32xf32> to vector<8x8xf32>
    %44 = arith.truncf %43 : vector<8x8xf32> to vector<8x8xbf16>
    %cst_22 = arith.constant dense<0.000000e+00> : vector<8x8xf32>
    %45 = tpu.matmul %40, %42, %cst_22 {dimension_numbers = #tpu.dot_dimension_numbers<[1], [1], [0], [0], [0, 0, 1, 0], [], []>} : vector<8x8xbf16>, vector<8x8xbf16>, vector<8x8xf32> -> vector<8x8xf32>
    %cst_23 = arith.constant 0.353553385 : f32
    %46 = vector.broadcast %cst_23 : f32 to vector<8x8xf32>
    %47 = arith.mulf %45, %46 : vector<8x8xf32>
    %cst_24 = arith.constant 0.000000e+00 : f32
    %48 = vector.broadcast %cst_24 : f32 to vector<8x8xf32>
    %49 = arith.cmpf oeq, %38, %48 : vector<8x8xf32>
    %cst_25 = arith.constant -1.000000e+09 : f32
    %50 = vector.broadcast %cst_25 : f32 to vector<8x8xf32>
    %51 = arith.select %49, %50, %47 : vector<8x8xi1>, vector<8x8xf32>
    %cst_26 = arith.constant dense<0xFF800000> : vector<8xf32>
    %52 = vector.multi_reduction <maximumf>, %51, %cst_26 [1] : vector<8x8xf32> to vector<8xf32>
    %53 = vector.shape_cast %52 : vector<8xf32> to vector<8x1xf32>
    %54 = vector.broadcast %53 : vector<8x1xf32> to vector<8x8xf32>
    %55 = arith.subf %51, %54 : vector<8x8xf32>
    %56 = math.exp %55 : vector<8x8xf32>
    %cst_27 = arith.constant dense<0.000000e+00> : vector<8xf32>
    %57 = vector.multi_reduction <add>, %56, %cst_27 [1] : vector<8x8xf32> to vector<8xf32>
    %58 = vector.shape_cast %57 : vector<8xf32> to vector<8x1xf32>
    %59 = tpu.reciprocal %58 {approx = true} : vector<8x1xf32> -> vector<8x1xf32>
    %60 = vector.broadcast %59 : vector<8x1xf32> to vector<8x8xf32>
    %61 = arith.mulf %56, %60 : vector<8x8xf32>
    %62 = arith.truncf %61 : vector<8x8xf32> to vector<8x8xbf16>
    %cst_28 = arith.constant dense<0.000000e+00> : vector<8x8xf32>
    %63 = tpu.matmul %62, %44, %cst_28 {dimension_numbers = #tpu.dot_dimension_numbers<[1], [0], [0], [1], [0, 0, 1, 1], [], []>} : vector<8x8xbf16>, vector<8x8xbf16>, vector<8x8xf32> -> vector<8x8xf32>
    %64 = vector.extract_strided_slice %34 {offsets = [0, 8], sizes = [8, 8], strides = [1, 1]} : vector<8x32xf32> to vector<8x8xf32>
    %65 = arith.truncf %64 : vector<8x8xf32> to vector<8x8xbf16>
    %66 = vector.extract_strided_slice %35 {offsets = [0, 8], sizes = [8, 8], strides = [1, 1]} : vector<8x32xf32> to vector<8x8xf32>
    %67 = arith.truncf %66 : vector<8x8xf32> to vector<8x8xbf16>
    %68 = vector.extract_strided_slice %36 {offsets = [0, 8], sizes = [8, 8], strides = [1, 1]} : vector<8x32xf32> to vector<8x8xf32>
    %69 = arith.truncf %68 : vector<8x8xf32> to vector<8x8xbf16>
    %cst_29 = arith.constant dense<0.000000e+00> : vector<8x8xf32>
    %70 = tpu.matmul %65, %67, %cst_29 {dimension_numbers = #tpu.dot_dimension_numbers<[1], [1], [0], [0], [0, 0, 1, 0], [], []>} : vector<8x8xbf16>, vector<8x8xbf16>, vector<8x8xf32> -> vector<8x8xf32>
    %cst_30 = arith.constant 0.353553385 : f32
    %71 = vector.broadcast %cst_30 : f32 to vector<8x8xf32>
    %72 = arith.mulf %70, %71 : vector<8x8xf32>
    %cst_31 = arith.constant 0.000000e+00 : f32
    %73 = vector.broadcast %cst_31 : f32 to vector<8x8xf32>
    %74 = arith.cmpf oeq, %38, %73 : vector<8x8xf32>
    %cst_32 = arith.constant -1.000000e+09 : f32
    %75 = vector.broadcast %cst_32 : f32 to vector<8x8xf32>
    %76 = arith.select %74, %75, %72 : vector<8x8xi1>, vector<8x8xf32>
    %cst_33 = arith.constant dense<0xFF800000> : vector<8xf32>
    %77 = vector.multi_reduction <maximumf>, %76, %cst_33 [1] : vector<8x8xf32> to vector<8xf32>
    %78 = vector.shape_cast %77 : vector<8xf32> to vector<8x1xf32>
    %79 = vector.broadcast %78 : vector<8x1xf32> to vector<8x8xf32>
    %80 = arith.subf %76, %79 : vector<8x8xf32>
    %81 = math.exp %80 : vector<8x8xf32>
    %cst_34 = arith.constant dense<0.000000e+00> : vector<8xf32>
    %82 = vector.multi_reduction <add>, %81, %cst_34 [1] : vector<8x8xf32> to vector<8xf32>
    %83 = vector.shape_cast %82 : vector<8xf32> to vector<8x1xf32>
    %84 = tpu.reciprocal %83 {approx = true} : vector<8x1xf32> -> vector<8x1xf32>
    %85 = vector.broadcast %84 : vector<8x1xf32> to vector<8x8xf32>
    %86 = arith.mulf %81, %85 : vector<8x8xf32>
    %87 = arith.truncf %86 : vector<8x8xf32> to vector<8x8xbf16>
    %cst_35 = arith.constant dense<0.000000e+00> : vector<8x8xf32>
    %88 = tpu.matmul %87, %69, %cst_35 {dimension_numbers = #tpu.dot_dimension_numbers<[1], [0], [0], [1], [0, 0, 1, 1], [], []>} : vector<8x8xbf16>, vector<8x8xbf16>, vector<8x8xf32> -> vector<8x8xf32>
    %89 = vector.extract_strided_slice %34 {offsets = [0, 16], sizes = [8, 8], strides = [1, 1]} : vector<8x32xf32> to vector<8x8xf32>
    %90 = arith.truncf %89 : vector<8x8xf32> to vector<8x8xbf16>
    %91 = vector.extract_strided_slice %35 {offsets = [0, 16], sizes = [8, 8], strides = [1, 1]} : vector<8x32xf32> to vector<8x8xf32>
    %92 = arith.truncf %91 : vector<8x8xf32> to vector<8x8xbf16>
    %93 = vector.extract_strided_slice %36 {offsets = [0, 16], sizes = [8, 8], strides = [1, 1]} : vector<8x32xf32> to vector<8x8xf32>
    %94 = arith.truncf %93 : vector<8x8xf32> to vector<8x8xbf16>
    %cst_36 = arith.constant dense<0.000000e+00> : vector<8x8xf32>
    %95 = tpu.matmul %90, %92, %cst_36 {dimension_numbers = #tpu.dot_dimension_numbers<[1], [1], [0], [0], [0, 0, 1, 0], [], []>} : vector<8x8xbf16>, vector<8x8xbf16>, vector<8x8xf32> -> vector<8x8xf32>
    %cst_37 = arith.constant 0.353553385 : f32
    %96 = vector.broadcast %cst_37 : f32 to vector<8x8xf32>
    %97 = arith.mulf %95, %96 : vector<8x8xf32>
    %cst_38 = arith.constant 0.000000e+00 : f32
    %98 = vector.broadcast %cst_38 : f32 to vector<8x8xf32>
    %99 = arith.cmpf oeq, %38, %98 : vector<8x8xf32>
    %cst_39 = arith.constant -1.000000e+09 : f32
    %100 = vector.broadcast %cst_39 : f32 to vector<8x8xf32>
    %101 = arith.select %99, %100, %97 : vector<8x8xi1>, vector<8x8xf32>
    %cst_40 = arith.constant dense<0xFF800000> : vector<8xf32>
    %102 = vector.multi_reduction <maximumf>, %101, %cst_40 [1] : vector<8x8xf32> to vector<8xf32>
    %103 = vector.shape_cast %102 : vector<8xf32> to vector<8x1xf32>
    %104 = vector.broadcast %103 : vector<8x1xf32> to vector<8x8xf32>
    %105 = arith.subf %101, %104 : vector<8x8xf32>
    %106 = math.exp %105 : vector<8x8xf32>
    %cst_41 = arith.constant dense<0.000000e+00> : vector<8xf32>
    %107 = vector.multi_reduction <add>, %106, %cst_41 [1] : vector<8x8xf32> to vector<8xf32>
    %108 = vector.shape_cast %107 : vector<8xf32> to vector<8x1xf32>
    %109 = tpu.reciprocal %108 {approx = true} : vector<8x1xf32> -> vector<8x1xf32>
    %110 = vector.broadcast %109 : vector<8x1xf32> to vector<8x8xf32>
    %111 = arith.mulf %106, %110 : vector<8x8xf32>
    %112 = arith.truncf %111 : vector<8x8xf32> to vector<8x8xbf16>
    %cst_42 = arith.constant dense<0.000000e+00> : vector<8x8xf32>
    %113 = tpu.matmul %112, %94, %cst_42 {dimension_numbers = #tpu.dot_dimension_numbers<[1], [0], [0], [1], [0, 0, 1, 1], [], []>} : vector<8x8xbf16>, vector<8x8xbf16>, vector<8x8xf32> -> vector<8x8xf32>
    %114 = vector.extract_strided_slice %34 {offsets = [0, 24], sizes = [8, 8], strides = [1, 1]} : vector<8x32xf32> to vector<8x8xf32>
    %115 = arith.truncf %114 : vector<8x8xf32> to vector<8x8xbf16>
    %116 = vector.extract_strided_slice %35 {offsets = [0, 24], sizes = [8, 8], strides = [1, 1]} : vector<8x32xf32> to vector<8x8xf32>
    %117 = arith.truncf %116 : vector<8x8xf32> to vector<8x8xbf16>
    %118 = vector.extract_strided_slice %36 {offsets = [0, 24], sizes = [8, 8], strides = [1, 1]} : vector<8x32xf32> to vector<8x8xf32>
    %119 = arith.truncf %118 : vector<8x8xf32> to vector<8x8xbf16>
    %cst_43 = arith.constant dense<0.000000e+00> : vector<8x8xf32>
    %120 = tpu.matmul %115, %117, %cst_43 {dimension_numbers = #tpu.dot_dimension_numbers<[1], [1], [0], [0], [0, 0, 1, 0], [], []>} : vector<8x8xbf16>, vector<8x8xbf16>, vector<8x8xf32> -> vector<8x8xf32>
    %cst_44 = arith.constant 0.353553385 : f32
    %121 = vector.broadcast %cst_44 : f32 to vector<8x8xf32>
    %122 = arith.mulf %120, %121 : vector<8x8xf32>
    %cst_45 = arith.constant 0.000000e+00 : f32
    %123 = vector.broadcast %cst_45 : f32 to vector<8x8xf32>
    %124 = arith.cmpf oeq, %38, %123 : vector<8x8xf32>
    %cst_46 = arith.constant -1.000000e+09 : f32
    %125 = vector.broadcast %cst_46 : f32 to vector<8x8xf32>
    %126 = arith.select %124, %125, %122 : vector<8x8xi1>, vector<8x8xf32>
    %cst_47 = arith.constant dense<0xFF800000> : vector<8xf32>
    %127 = vector.multi_reduction <maximumf>, %126, %cst_47 [1] : vector<8x8xf32> to vector<8xf32>
    %128 = vector.shape_cast %127 : vector<8xf32> to vector<8x1xf32>
    %129 = vector.broadcast %128 : vector<8x1xf32> to vector<8x8xf32>
    %130 = arith.subf %126, %129 : vector<8x8xf32>
    %131 = math.exp %130 : vector<8x8xf32>
    %cst_48 = arith.constant dense<0.000000e+00> : vector<8xf32>
    %132 = vector.multi_reduction <add>, %131, %cst_48 [1] : vector<8x8xf32> to vector<8xf32>
    %133 = vector.shape_cast %132 : vector<8xf32> to vector<8x1xf32>
    %134 = tpu.reciprocal %133 {approx = true} : vector<8x1xf32> -> vector<8x1xf32>
    %135 = vector.broadcast %134 : vector<8x1xf32> to vector<8x8xf32>
    %136 = arith.mulf %131, %135 : vector<8x8xf32>
    %137 = arith.truncf %136 : vector<8x8xf32> to vector<8x8xbf16>
    %cst_49 = arith.constant dense<0.000000e+00> : vector<8x8xf32>
    %138 = tpu.matmul %137, %119, %cst_49 {dimension_numbers = #tpu.dot_dimension_numbers<[1], [0], [0], [1], [0, 0, 1, 1], [], []>} : vector<8x8xbf16>, vector<8x8xbf16>, vector<8x8xf32> -> vector<8x8xf32>
    %139 = tpu.concatenate %63, %88, %113, %138 in 1 : vector<8x8xf32>, vector<8x8xf32>, vector<8x8xf32>, vector<8x8xf32> -> vector<8x32xf32>
    %140 = arith.truncf %139 : vector<8x32xf32> to vector<8x32xbf16>
    %c0_50 = arith.constant 0 : index
    %c0_51 = arith.constant 0 : index
    %141 = vector.load %arg8[%c0_50, %c0_51] : memref<32x32xbf16, #tpu.memory_space<vmem>>, vector<32x32xbf16>
    %cst_52 = arith.constant dense<0.000000e+00> : vector<8x32xf32>
    %142 = tpu.matmul %140, %141, %cst_52 {dimension_numbers = #tpu.dot_dimension_numbers<[1], [0], [0], [1], [0, 0, 1, 1], [], []>} : vector<8x32xbf16>, vector<32x32xbf16>, vector<8x32xf32> -> vector<8x32xf32>
    %143 = arith.addf %1, %142 : vector<8x32xf32>
    %c0_53 = arith.constant 0 : index
    %c0_54 = arith.constant 0 : index
    %144 = vector.load %arg9[%c0_53, %c0_54] : memref<1x32xf32, #tpu.memory_space<vmem>>, vector<1x32xf32>
    %145 = vector.broadcast %144 : vector<1x32xf32> to vector<8x32xf32>
    %146 = arith.addf %143, %145 : vector<8x32xf32>
    %c0_55 = arith.constant 0 : index
    %c0_56 = arith.constant 0 : index
    %147 = vector.load %arg10[%c0_55, %c0_56] : memref<1x32xf32, #tpu.memory_space<vmem>>, vector<1x32xf32>
    %c0_57 = arith.constant 0 : index
    %c0_58 = arith.constant 0 : index
    %148 = vector.load %arg11[%c0_57, %c0_58] : memref<1x32xf32, #tpu.memory_space<vmem>>, vector<1x32xf32>
    %cst_59 = arith.constant dense<0.000000e+00> : vector<8xf32>
    %149 = vector.multi_reduction <add>, %146, %cst_59 [1] : vector<8x32xf32> to vector<8xf32>
    %150 = vector.shape_cast %149 : vector<8xf32> to vector<8x1xf32>
    %cst_60 = arith.constant 3.200000e+01 : f32
    %151 = vector.broadcast %cst_60 : f32 to vector<8x1xf32>
    %152 = arith.divf %150, %151 : vector<8x1xf32>
    %153 = vector.broadcast %152 : vector<8x1xf32> to vector<8x32xf32>
    %154 = arith.subf %146, %153 : vector<8x32xf32>
    %155 = arith.mulf %154, %154 : vector<8x32xf32>
    %cst_61 = arith.constant dense<0.000000e+00> : vector<8xf32>
    %156 = vector.multi_reduction <add>, %155, %cst_61 [1] : vector<8x32xf32> to vector<8xf32>
    %157 = vector.shape_cast %156 : vector<8xf32> to vector<8x1xf32>
    %cst_62 = arith.constant 3.200000e+01 : f32
    %158 = vector.broadcast %cst_62 : f32 to vector<8x1xf32>
    %159 = arith.divf %157, %158 : vector<8x1xf32>
    %160 = vector.broadcast %152 : vector<8x1xf32> to vector<8x32xf32>
    %161 = arith.subf %146, %160 : vector<8x32xf32>
    %cst_63 = arith.constant 9.99999997E-7 : f32
    %162 = vector.broadcast %cst_63 : f32 to vector<8x1xf32>
    %163 = arith.addf %159, %162 : vector<8x1xf32>
    %164 = math.rsqrt %163 : vector<8x1xf32>
    %165 = vector.broadcast %164 : vector<8x1xf32> to vector<8x32xf32>
    %166 = arith.mulf %161, %165 : vector<8x32xf32>
    %167 = vector.broadcast %147 : vector<1x32xf32> to vector<8x32xf32>
    %168 = arith.mulf %166, %167 : vector<8x32xf32>
    %169 = vector.broadcast %148 : vector<1x32xf32> to vector<8x32xf32>
    %170 = arith.addf %168, %169 : vector<8x32xf32>
    %171 = arith.truncf %170 : vector<8x32xf32> to vector<8x32xbf16>
    %c0_64 = arith.constant 0 : index
    %c0_65 = arith.constant 0 : index
    %172 = vector.load %arg12[%c0_64, %c0_65] : memref<32x32xbf16, #tpu.memory_space<vmem>>, vector<32x32xbf16>
    %cst_66 = arith.constant dense<0.000000e+00> : vector<8x32xf32>
    %173 = tpu.matmul %171, %172, %cst_66 {dimension_numbers = #tpu.dot_dimension_numbers<[1], [0], [0], [1], [0, 0, 1, 1], [], []>} : vector<8x32xbf16>, vector<32x32xbf16>, vector<8x32xf32> -> vector<8x32xf32>
    %c0_67 = arith.constant 0 : index
    %c0_68 = arith.constant 0 : index
    %174 = vector.load %arg13[%c0_67, %c0_68] : memref<1x32xf32, #tpu.memory_space<vmem>>, vector<1x32xf32>
    %175 = vector.broadcast %174 : vector<1x32xf32> to vector<8x32xf32>
    %176 = arith.addf %173, %175 : vector<8x32xf32>
    %177 = arith.truncf %3 : vector<8x32xf32> to vector<8x32xbf16>
    %c0_69 = arith.constant 0 : index
    %c0_70 = arith.constant 0 : index
    %178 = vector.load %arg14[%c0_69, %c0_70] : memref<32x64xbf16, #tpu.memory_space<vmem>>, vector<32x64xbf16>
    %cst_71 = arith.constant dense<0.000000e+00> : vector<8x64xf32>
    %179 = tpu.matmul %177, %178, %cst_71 {dimension_numbers = #tpu.dot_dimension_numbers<[1], [0], [0], [1], [0, 0, 1, 1], [], []>} : vector<8x32xbf16>, vector<32x64xbf16>, vector<8x64xf32> -> vector<8x64xf32>
    %c0_72 = arith.constant 0 : index
    %c0_73 = arith.constant 0 : index
    %180 = vector.load %arg15[%c0_72, %c0_73] : memref<1x64xf32, #tpu.memory_space<vmem>>, vector<1x64xf32>
    %181 = vector.broadcast %180 : vector<1x64xf32> to vector<8x64xf32>
    %182 = arith.addf %179, %181 : vector<8x64xf32>
    %183 = vector.extract_strided_slice %182 {offsets = [0, 0], sizes = [8, 32], strides = [1, 1]} : vector<8x64xf32> to vector<8x32xf32>
    %184 = vector.extract_strided_slice %182 {offsets = [0, 32], sizes = [8, 32], strides = [1, 1]} : vector<8x64xf32> to vector<8x32xf32>
    %185 = vector.extract_strided_slice %176 {offsets = [0, 0], sizes = [8, 8], strides = [1, 1]} : vector<8x32xf32> to vector<8x8xf32>
    %186 = arith.truncf %185 : vector<8x8xf32> to vector<8x8xbf16>
    %187 = vector.extract_strided_slice %183 {offsets = [0, 0], sizes = [8, 8], strides = [1, 1]} : vector<8x32xf32> to vector<8x8xf32>
    %188 = arith.truncf %187 : vector<8x8xf32> to vector<8x8xbf16>
    %189 = vector.extract_strided_slice %184 {offsets = [0, 0], sizes = [8, 8], strides = [1, 1]} : vector<8x32xf32> to vector<8x8xf32>
    %190 = arith.truncf %189 : vector<8x8xf32> to vector<8x8xbf16>
    %cst_74 = arith.constant dense<0.000000e+00> : vector<8x8xf32>
    %191 = tpu.matmul %186, %188, %cst_74 {dimension_numbers = #tpu.dot_dimension_numbers<[1], [1], [0], [0], [0, 0, 1, 0], [], []>} : vector<8x8xbf16>, vector<8x8xbf16>, vector<8x8xf32> -> vector<8x8xf32>
    %cst_75 = arith.constant 0.353553385 : f32
    %192 = vector.broadcast %cst_75 : f32 to vector<8x8xf32>
    %193 = arith.mulf %191, %192 : vector<8x8xf32>
    %cst_76 = arith.constant dense<0xFF800000> : vector<8xf32>
    %194 = vector.multi_reduction <maximumf>, %193, %cst_76 [1] : vector<8x8xf32> to vector<8xf32>
    %195 = vector.shape_cast %194 : vector<8xf32> to vector<8x1xf32>
    %196 = vector.broadcast %195 : vector<8x1xf32> to vector<8x8xf32>
    %197 = arith.subf %193, %196 : vector<8x8xf32>
    %198 = math.exp %197 : vector<8x8xf32>
    %cst_77 = arith.constant dense<0.000000e+00> : vector<8xf32>
    %199 = vector.multi_reduction <add>, %198, %cst_77 [1] : vector<8x8xf32> to vector<8xf32>
    %200 = vector.shape_cast %199 : vector<8xf32> to vector<8x1xf32>
    %201 = tpu.reciprocal %200 {approx = true} : vector<8x1xf32> -> vector<8x1xf32>
    %202 = vector.broadcast %201 : vector<8x1xf32> to vector<8x8xf32>
    %203 = arith.mulf %198, %202 : vector<8x8xf32>
    %204 = arith.truncf %203 : vector<8x8xf32> to vector<8x8xbf16>
    %cst_78 = arith.constant dense<0.000000e+00> : vector<8x8xf32>
    %205 = tpu.matmul %204, %190, %cst_78 {dimension_numbers = #tpu.dot_dimension_numbers<[1], [0], [0], [1], [0, 0, 1, 1], [], []>} : vector<8x8xbf16>, vector<8x8xbf16>, vector<8x8xf32> -> vector<8x8xf32>
    %206 = vector.extract_strided_slice %176 {offsets = [0, 8], sizes = [8, 8], strides = [1, 1]} : vector<8x32xf32> to vector<8x8xf32>
    %207 = arith.truncf %206 : vector<8x8xf32> to vector<8x8xbf16>
    %208 = vector.extract_strided_slice %183 {offsets = [0, 8], sizes = [8, 8], strides = [1, 1]} : vector<8x32xf32> to vector<8x8xf32>
    %209 = arith.truncf %208 : vector<8x8xf32> to vector<8x8xbf16>
    %210 = vector.extract_strided_slice %184 {offsets = [0, 8], sizes = [8, 8], strides = [1, 1]} : vector<8x32xf32> to vector<8x8xf32>
    %211 = arith.truncf %210 : vector<8x8xf32> to vector<8x8xbf16>
    %cst_79 = arith.constant dense<0.000000e+00> : vector<8x8xf32>
    %212 = tpu.matmul %207, %209, %cst_79 {dimension_numbers = #tpu.dot_dimension_numbers<[1], [1], [0], [0], [0, 0, 1, 0], [], []>} : vector<8x8xbf16>, vector<8x8xbf16>, vector<8x8xf32> -> vector<8x8xf32>
    %cst_80 = arith.constant 0.353553385 : f32
    %213 = vector.broadcast %cst_80 : f32 to vector<8x8xf32>
    %214 = arith.mulf %212, %213 : vector<8x8xf32>
    %cst_81 = arith.constant dense<0xFF800000> : vector<8xf32>
    %215 = vector.multi_reduction <maximumf>, %214, %cst_81 [1] : vector<8x8xf32> to vector<8xf32>
    %216 = vector.shape_cast %215 : vector<8xf32> to vector<8x1xf32>
    %217 = vector.broadcast %216 : vector<8x1xf32> to vector<8x8xf32>
    %218 = arith.subf %214, %217 : vector<8x8xf32>
    %219 = math.exp %218 : vector<8x8xf32>
    %cst_82 = arith.constant dense<0.000000e+00> : vector<8xf32>
    %220 = vector.multi_reduction <add>, %219, %cst_82 [1] : vector<8x8xf32> to vector<8xf32>
    %221 = vector.shape_cast %220 : vector<8xf32> to vector<8x1xf32>
    %222 = tpu.reciprocal %221 {approx = true} : vector<8x1xf32> -> vector<8x1xf32>
    %223 = vector.broadcast %222 : vector<8x1xf32> to vector<8x8xf32>
    %224 = arith.mulf %219, %223 : vector<8x8xf32>
    %225 = arith.truncf %224 : vector<8x8xf32> to vector<8x8xbf16>
    %cst_83 = arith.constant dense<0.000000e+00> : vector<8x8xf32>
    %226 = tpu.matmul %225, %211, %cst_83 {dimension_numbers = #tpu.dot_dimension_numbers<[1], [0], [0], [1], [0, 0, 1, 1], [], []>} : vector<8x8xbf16>, vector<8x8xbf16>, vector<8x8xf32> -> vector<8x8xf32>
    %227 = vector.extract_strided_slice %176 {offsets = [0, 16], sizes = [8, 8], strides = [1, 1]} : vector<8x32xf32> to vector<8x8xf32>
    %228 = arith.truncf %227 : vector<8x8xf32> to vector<8x8xbf16>
    %229 = vector.extract_strided_slice %183 {offsets = [0, 16], sizes = [8, 8], strides = [1, 1]} : vector<8x32xf32> to vector<8x8xf32>
    %230 = arith.truncf %229 : vector<8x8xf32> to vector<8x8xbf16>
    %231 = vector.extract_strided_slice %184 {offsets = [0, 16], sizes = [8, 8], strides = [1, 1]} : vector<8x32xf32> to vector<8x8xf32>
    %232 = arith.truncf %231 : vector<8x8xf32> to vector<8x8xbf16>
    %cst_84 = arith.constant dense<0.000000e+00> : vector<8x8xf32>
    %233 = tpu.matmul %228, %230, %cst_84 {dimension_numbers = #tpu.dot_dimension_numbers<[1], [1], [0], [0], [0, 0, 1, 0], [], []>} : vector<8x8xbf16>, vector<8x8xbf16>, vector<8x8xf32> -> vector<8x8xf32>
    %cst_85 = arith.constant 0.353553385 : f32
    %234 = vector.broadcast %cst_85 : f32 to vector<8x8xf32>
    %235 = arith.mulf %233, %234 : vector<8x8xf32>
    %cst_86 = arith.constant dense<0xFF800000> : vector<8xf32>
    %236 = vector.multi_reduction <maximumf>, %235, %cst_86 [1] : vector<8x8xf32> to vector<8xf32>
    %237 = vector.shape_cast %236 : vector<8xf32> to vector<8x1xf32>
    %238 = vector.broadcast %237 : vector<8x1xf32> to vector<8x8xf32>
    %239 = arith.subf %235, %238 : vector<8x8xf32>
    %240 = math.exp %239 : vector<8x8xf32>
    %cst_87 = arith.constant dense<0.000000e+00> : vector<8xf32>
    %241 = vector.multi_reduction <add>, %240, %cst_87 [1] : vector<8x8xf32> to vector<8xf32>
    %242 = vector.shape_cast %241 : vector<8xf32> to vector<8x1xf32>
    %243 = tpu.reciprocal %242 {approx = true} : vector<8x1xf32> -> vector<8x1xf32>
    %244 = vector.broadcast %243 : vector<8x1xf32> to vector<8x8xf32>
    %245 = arith.mulf %240, %244 : vector<8x8xf32>
    %246 = arith.truncf %245 : vector<8x8xf32> to vector<8x8xbf16>
    %cst_88 = arith.constant dense<0.000000e+00> : vector<8x8xf32>
    %247 = tpu.matmul %246, %232, %cst_88 {dimension_numbers = #tpu.dot_dimension_numbers<[1], [0], [0], [1], [0, 0, 1, 1], [], []>} : vector<8x8xbf16>, vector<8x8xbf16>, vector<8x8xf32> -> vector<8x8xf32>
    %248 = vector.extract_strided_slice %176 {offsets = [0, 24], sizes = [8, 8], strides = [1, 1]} : vector<8x32xf32> to vector<8x8xf32>
    %249 = arith.truncf %248 : vector<8x8xf32> to vector<8x8xbf16>
    %250 = vector.extract_strided_slice %183 {offsets = [0, 24], sizes = [8, 8], strides = [1, 1]} : vector<8x32xf32> to vector<8x8xf32>
    %251 = arith.truncf %250 : vector<8x8xf32> to vector<8x8xbf16>
    %252 = vector.extract_strided_slice %184 {offsets = [0, 24], sizes = [8, 8], strides = [1, 1]} : vector<8x32xf32> to vector<8x8xf32>
    %253 = arith.truncf %252 : vector<8x8xf32> to vector<8x8xbf16>
    %cst_89 = arith.constant dense<0.000000e+00> : vector<8x8xf32>
    %254 = tpu.matmul %249, %251, %cst_89 {dimension_numbers = #tpu.dot_dimension_numbers<[1], [1], [0], [0], [0, 0, 1, 0], [], []>} : vector<8x8xbf16>, vector<8x8xbf16>, vector<8x8xf32> -> vector<8x8xf32>
    %cst_90 = arith.constant 0.353553385 : f32
    %255 = vector.broadcast %cst_90 : f32 to vector<8x8xf32>
    %256 = arith.mulf %254, %255 : vector<8x8xf32>
    %cst_91 = arith.constant dense<0xFF800000> : vector<8xf32>
    %257 = vector.multi_reduction <maximumf>, %256, %cst_91 [1] : vector<8x8xf32> to vector<8xf32>
    %258 = vector.shape_cast %257 : vector<8xf32> to vector<8x1xf32>
    %259 = vector.broadcast %258 : vector<8x1xf32> to vector<8x8xf32>
    %260 = arith.subf %256, %259 : vector<8x8xf32>
    %261 = math.exp %260 : vector<8x8xf32>
    %cst_92 = arith.constant dense<0.000000e+00> : vector<8xf32>
    %262 = vector.multi_reduction <add>, %261, %cst_92 [1] : vector<8x8xf32> to vector<8xf32>
    %263 = vector.shape_cast %262 : vector<8xf32> to vector<8x1xf32>
    %264 = tpu.reciprocal %263 {approx = true} : vector<8x1xf32> -> vector<8x1xf32>
    %265 = vector.broadcast %264 : vector<8x1xf32> to vector<8x8xf32>
    %266 = arith.mulf %261, %265 : vector<8x8xf32>
    %267 = arith.truncf %266 : vector<8x8xf32> to vector<8x8xbf16>
    %cst_93 = arith.constant dense<0.000000e+00> : vector<8x8xf32>
    %268 = tpu.matmul %267, %253, %cst_93 {dimension_numbers = #tpu.dot_dimension_numbers<[1], [0], [0], [1], [0, 0, 1, 1], [], []>} : vector<8x8xbf16>, vector<8x8xbf16>, vector<8x8xf32> -> vector<8x8xf32>
    %269 = tpu.concatenate %205, %226, %247, %268 in 1 : vector<8x8xf32>, vector<8x8xf32>, vector<8x8xf32>, vector<8x8xf32> -> vector<8x32xf32>
    %270 = arith.truncf %269 : vector<8x32xf32> to vector<8x32xbf16>
    %c0_94 = arith.constant 0 : index
    %c0_95 = arith.constant 0 : index
    %271 = vector.load %arg16[%c0_94, %c0_95] : memref<32x32xbf16, #tpu.memory_space<vmem>>, vector<32x32xbf16>
    %cst_96 = arith.constant dense<0.000000e+00> : vector<8x32xf32>
    %272 = tpu.matmul %270, %271, %cst_96 {dimension_numbers = #tpu.dot_dimension_numbers<[1], [0], [0], [1], [0, 0, 1, 1], [], []>} : vector<8x32xbf16>, vector<32x32xbf16>, vector<8x32xf32> -> vector<8x32xf32>
    %273 = arith.addf %146, %272 : vector<8x32xf32>
    %c0_97 = arith.constant 0 : index
    %c0_98 = arith.constant 0 : index
    %274 = vector.load %arg17[%c0_97, %c0_98] : memref<1x32xf32, #tpu.memory_space<vmem>>, vector<1x32xf32>
    %275 = vector.broadcast %274 : vector<1x32xf32> to vector<8x32xf32>
    %276 = arith.addf %273, %275 : vector<8x32xf32>
    %c0_99 = arith.constant 0 : index
    %c0_100 = arith.constant 0 : index
    %277 = vector.load %arg18[%c0_99, %c0_100] : memref<1x32xf32, #tpu.memory_space<vmem>>, vector<1x32xf32>
    %c0_101 = arith.constant 0 : index
    %c0_102 = arith.constant 0 : index
    %278 = vector.load %arg19[%c0_101, %c0_102] : memref<1x32xf32, #tpu.memory_space<vmem>>, vector<1x32xf32>
    %cst_103 = arith.constant dense<0.000000e+00> : vector<8xf32>
    %279 = vector.multi_reduction <add>, %276, %cst_103 [1] : vector<8x32xf32> to vector<8xf32>
    %280 = vector.shape_cast %279 : vector<8xf32> to vector<8x1xf32>
    %cst_104 = arith.constant 3.200000e+01 : f32
    %281 = vector.broadcast %cst_104 : f32 to vector<8x1xf32>
    %282 = arith.divf %280, %281 : vector<8x1xf32>
    %283 = vector.broadcast %282 : vector<8x1xf32> to vector<8x32xf32>
    %284 = arith.subf %276, %283 : vector<8x32xf32>
    %285 = arith.mulf %284, %284 : vector<8x32xf32>
    %cst_105 = arith.constant dense<0.000000e+00> : vector<8xf32>
    %286 = vector.multi_reduction <add>, %285, %cst_105 [1] : vector<8x32xf32> to vector<8xf32>
    %287 = vector.shape_cast %286 : vector<8xf32> to vector<8x1xf32>
    %cst_106 = arith.constant 3.200000e+01 : f32
    %288 = vector.broadcast %cst_106 : f32 to vector<8x1xf32>
    %289 = arith.divf %287, %288 : vector<8x1xf32>
    %290 = vector.broadcast %282 : vector<8x1xf32> to vector<8x32xf32>
    %291 = arith.subf %276, %290 : vector<8x32xf32>
    %cst_107 = arith.constant 9.99999997E-7 : f32
    %292 = vector.broadcast %cst_107 : f32 to vector<8x1xf32>
    %293 = arith.addf %289, %292 : vector<8x1xf32>
    %294 = math.rsqrt %293 : vector<8x1xf32>
    %295 = vector.broadcast %294 : vector<8x1xf32> to vector<8x32xf32>
    %296 = arith.mulf %291, %295 : vector<8x32xf32>
    %297 = vector.broadcast %277 : vector<1x32xf32> to vector<8x32xf32>
    %298 = arith.mulf %296, %297 : vector<8x32xf32>
    %299 = vector.broadcast %278 : vector<1x32xf32> to vector<8x32xf32>
    %300 = arith.addf %298, %299 : vector<8x32xf32>
    %301 = arith.truncf %300 : vector<8x32xf32> to vector<8x32xbf16>
    %c0_108 = arith.constant 0 : index
    %c0_109 = arith.constant 0 : index
    %302 = vector.load %arg20[%c0_108, %c0_109] : memref<32x64xbf16, #tpu.memory_space<vmem>>, vector<32x64xbf16>
    %cst_110 = arith.constant dense<0.000000e+00> : vector<8x64xf32>
    %303 = tpu.matmul %301, %302, %cst_110 {dimension_numbers = #tpu.dot_dimension_numbers<[1], [0], [0], [1], [0, 0, 1, 1], [], []>} : vector<8x32xbf16>, vector<32x64xbf16>, vector<8x64xf32> -> vector<8x64xf32>
    %c0_111 = arith.constant 0 : index
    %c0_112 = arith.constant 0 : index
    %304 = vector.load %arg21[%c0_111, %c0_112] : memref<1x64xf32, #tpu.memory_space<vmem>>, vector<1x64xf32>
    %305 = vector.broadcast %304 : vector<1x64xf32> to vector<8x64xf32>
    %306 = arith.addf %303, %305 : vector<8x64xf32>
    %cst_113 = arith.constant 0.000000e+00 : f32
    %307 = vector.broadcast %cst_113 : f32 to vector<8x64xf32>
    %308 = arith.maximumf %306, %307 : vector<8x64xf32>
    %309 = arith.truncf %308 : vector<8x64xf32> to vector<8x64xbf16>
    %c0_114 = arith.constant 0 : index
    %c0_115 = arith.constant 0 : index
    %310 = vector.load %arg22[%c0_114, %c0_115] : memref<64x32xbf16, #tpu.memory_space<vmem>>, vector<64x32xbf16>
    %cst_116 = arith.constant dense<0.000000e+00> : vector<8x32xf32>
    %311 = tpu.matmul %309, %310, %cst_116 {dimension_numbers = #tpu.dot_dimension_numbers<[1], [0], [0], [1], [0, 0, 1, 1], [], []>} : vector<8x64xbf16>, vector<64x32xbf16>, vector<8x32xf32> -> vector<8x32xf32>
    %312 = arith.addf %276, %311 : vector<8x32xf32>
    %c0_117 = arith.constant 0 : index
    %c0_118 = arith.constant 0 : index
    %313 = vector.load %arg23[%c0_117, %c0_118] : memref<1x32xf32, #tpu.memory_space<vmem>>, vector<1x32xf32>
    %314 = vector.broadcast %313 : vector<1x32xf32> to vector<8x32xf32>
    %315 = arith.addf %312, %314 : vector<8x32xf32>
    %c0_119 = arith.constant 0 : index
    %c0_120 = arith.constant 0 : index
    %c0_121 = arith.constant 0 : index
    %316 = vector.load %arg24[%c0_119, %c0_120, %c0_121] : memref<1x8x32xf32, #tpu.memory_space<vmem>>, vector<1x8x32xf32>
    %317 = vector.shape_cast %316 : vector<1x8x32xf32> to vector<8x32xf32>
    %318 = vector.shape_cast %315 : vector<8x32xf32> to vector<1x8x32xf32>
    tpu.vector_store %arg24[%c0_119, %c0_120, %c0_121], %318 {strides = array<i32>} : memref<1x8x32xf32, #tpu.memory_space<vmem>>, vector<1x8x32xf32>,
    return
  }
  func.func @transform_0(%arg0: i32) -> (i32, i32, i32) {
    %c0_i32 = arith.constant 0 : i32
    %c0_i32_0 = arith.constant 0 : i32
    %c0_i32_1 = arith.constant 0 : i32
    return %arg0, %c0_i32, %c0_i32_0 : i32, i32, i32
  }
  func.func @transform_1(%arg0: i32) -> (i32, i32, i32) {
    %c0_i32 = arith.constant 0 : i32
    %c0_i32_0 = arith.constant 0 : i32
    %c0_i32_1 = arith.constant 0 : i32
    return %arg0, %c0_i32, %c0_i32_0 : i32, i32, i32
  }
  func.func @transform_2(%arg0: i32) -> (i32, i32, i32, i32) {
    %c0_i32 = arith.constant 0 : i32
    %c0_i32_0 = arith.constant 0 : i32
    %c0_i32_1 = arith.constant 0 : i32
    %c0_i32_2 = arith.constant 0 : i32
    return %arg0, %c0_i32, %c0_i32_0, %c0_i32_1 : i32, i32, i32, i32
  }
  func.func @transform_3(%arg0: i32) -> (i32, i32) {
    %c0_i32 = arith.constant 0 : i32
    %c0_i32_0 = arith.constant 0 : i32
    %c0_i32_1 = arith.constant 0 : i32
    return %c0_i32, %c0_i32_0 : i32, i32
  }
  func.func @transform_4(%arg0: i32) -> (i32, i32) {
    %c0_i32 = arith.constant 0 : i32
    %c0_i32_0 = arith.constant 0 : i32
    %c0_i32_1 = arith.constant 0 : i32
    return %c0_i32, %c0_i32_0 : i32, i32
  }
  func.func @transform_5(%arg0: i32) -> (i32, i32) {
    %c0_i32 = arith.constant 0 : i32
    %c0_i32_0 = arith.constant 0 : i32
    %c0_i32_1 = arith.constant 0 : i32
    return %c0_i32, %c0_i32_0 : i32, i32
  }
  func.func @transform_6(%arg0: i32) -> (i32, i32) {
    %c0_i32 = arith.constant 0 : i32
    %c0_i32_0 = arith.constant 0 : i32
    %c0_i32_1 = arith.constant 0 : i32
    return %c0_i32, %c0_i32_0 : i32, i32
  }
  func.func @transform_7(%arg0: i32) -> (i32, i32) {
    %c0_i32 = arith.constant 0 : i32
    %c0_i32_0 = arith.constant 0 : i32
    %c0_i32_1 = arith.constant 0 : i32
    return %c0_i32, %c0_i32_0 : i32, i32
  }
  func.func @transform_8(%arg0: i32) -> (i32, i32) {
    %c0_i32 = arith.constant 0 : i32
    %c0_i32_0 = arith.constant 0 : i32
    %c0_i32_1 = arith.constant 0 : i32
    return %c0_i32, %c0_i32_0 : i32, i32
  }
  func.func @transform_9(%arg0: i32) -> (i32, i32) {
    %c0_i32 = arith.constant 0 : i32
    %c0_i32_0 = arith.constant 0 : i32
    %c0_i32_1 = arith.constant 0 : i32
    return %c0_i32, %c0_i32_0 : i32, i32
  }
  func.func @transform_10(%arg0: i32) -> (i32, i32) {
    %c0_i32 = arith.constant 0 : i32
    %c0_i32_0 = arith.constant 0 : i32
    %c0_i32_1 = arith.constant 0 : i32
    return %c0_i32, %c0_i32_0 : i32, i32
  }
  func.func @transform_11(%arg0: i32) -> (i32, i32) {
    %c0_i32 = arith.constant 0 : i32
    %c0_i32_0 = arith.constant 0 : i32
    %c0_i32_1 = arith.constant 0 : i32
    return %c0_i32, %c0_i32_0 : i32, i32
  }
  func.func @transform_12(%arg0: i32) -> (i32, i32) {
    %c0_i32 = arith.constant 0 : i32
    %c0_i32_0 = arith.constant 0 : i32
    %c0_i32_1 = arith.constant 0 : i32
    return %c0_i32, %c0_i32_0 : i32, i32
  }
  func.func @transform_13(%arg0: i32) -> (i32, i32) {
    %c0_i32 = arith.constant 0 : i32
    %c0_i32_0 = arith.constant 0 : i32
    %c0_i32_1 = arith.constant 0 : i32
    return %c0_i32, %c0_i32_0 : i32, i32
  }
  func.func @transform_14(%arg0: i32) -> (i32, i32) {
    %c0_i32 = arith.constant 0 : i32
    %c0_i32_0 = arith.constant 0 : i32
    %c0_i32_1 = arith.constant 0 : i32
    return %c0_i32, %c0_i32_0 : i32, i32
  }
  func.func @transform_15(%arg0: i32) -> (i32, i32) {
    %c0_i32 = arith.constant 0 : i32
    %c0_i32_0 = arith.constant 0 : i32
    %c0_i32_1 = arith.constant 0 : i32
    return %c0_i32, %c0_i32_0 : i32, i32
  }
  func.func @transform_16(%arg0: i32) -> (i32, i32) {
    %c0_i32 = arith.constant 0 : i32
    %c0_i32_0 = arith.constant 0 : i32
    %c0_i32_1 = arith.constant 0 : i32
    return %c0_i32, %c0_i32_0 : i32, i32
  }
  func.func @transform_17(%arg0: i32) -> (i32, i32) {
    %c0_i32 = arith.constant 0 : i32
    %c0_i32_0 = arith.constant 0 : i32
    %c0_i32_1 = arith.constant 0 : i32
    return %c0_i32, %c0_i32_0 : i32, i32
  }
  func.func @transform_18(%arg0: i32) -> (i32, i32) {
    %c0_i32 = arith.constant 0 : i32
    %c0_i32_0 = arith.constant 0 : i32
    %c0_i32_1 = arith.constant 0 : i32
    return %c0_i32, %c0_i32_0 : i32, i32
  }
  func.func @transform_19(%arg0: i32) -> (i32, i32) {
    %c0_i32 = arith.constant 0 : i32
    %c0_i32_0 = arith.constant 0 : i32
    %c0_i32_1 = arith.constant 0 : i32
    return %c0_i32, %c0_i32_0 : i32, i32
  }
  func.func @transform_20(%arg0: i32) -> (i32, i32) {
    %c0_i32 = arith.constant 0 : i32
    %c0_i32_0 = arith.constant 0 : i32
    %c0_i32_1 = arith.constant 0 : i32
    return %c0_i32, %c0_i32_0 : i32, i32
  }
  func.func @transform_21(%arg0: i32) -> (i32, i32) {
    %c0_i32 = arith.constant 0 : i32
    %c0_i32_0 = arith.constant 0 : i32
    %c0_i32_1 = arith.constant 0 : i32
    return %c0_i32, %c0_i32_0 : i32, i32
  }
  func.func @transform_22(%arg0: i32) -> (i32, i32) {
    %c0_i32 = arith.constant 0 : i32
    %c0_i32_0 = arith.constant 0 : i32
    %c0_i32_1 = arith.constant 0 : i32
    return %c0_i32, %c0_i32_0 : i32, i32
  }
  func.func @transform_23(%arg0: i32) -> (i32, i32, i32) {
    %c0_i32 = arith.constant 0 : i32
    %c0_i32_0 = arith.constant 0 : i32
    %c0_i32_1 = arith.constant 0 : i32
    return %arg0, %c0_i32, %c0_i32_0 : i32, i32, i32
  }
}

module attributes {stable_mosaic.version = 11 : i64} {
  func.func @_final_proj_kernel(%arg0: i32, %arg1: memref<16x32xf32, #tpu.memory_space<vmem>>, %arg2: memref<1x32xf32, #tpu.memory_space<vmem>>, %arg3: memref<1x32xf32, #tpu.memory_space<vmem>>, %arg4: memref<32x64xbf16, #tpu.memory_space<vmem>>, %arg5: memref<1x64xf32, #tpu.memory_space<vmem>>, %arg6: memref<16x64xf32, #tpu.memory_space<vmem>>) attributes {dimension_semantics = [#tpu.dimension_semantics<parallel>], iteration_bounds = array<i64: 1>, scalar_prefetch = 0 : i64, scratch_operands = 0 : i64, tpu.core_type = #tpu.core_type<tc>, window_params = [{transform_indices = @transform_0, window_bounds = array<i64: 16, 32>}, {pipeline_mode = #tpu.pipeline_mode<synchronous>, transform_indices = @transform_1, window_bounds = array<i64: 1, 32>}, {pipeline_mode = #tpu.pipeline_mode<synchronous>, transform_indices = @transform_2, window_bounds = array<i64: 1, 32>}, {pipeline_mode = #tpu.pipeline_mode<synchronous>, transform_indices = @transform_3, window_bounds = array<i64: 32, 64>}, {pipeline_mode = #tpu.pipeline_mode<synchronous>, transform_indices = @transform_4, window_bounds = array<i64: 1, 64>}, {transform_indices = @transform_5, window_bounds = array<i64: 16, 64>}]} {
    %c0 = arith.constant 0 : index
    %c0_0 = arith.constant 0 : index
    %0 = vector.load %arg1[%c0, %c0_0] : memref<16x32xf32, #tpu.memory_space<vmem>>, vector<16x32xf32>
    %c0_1 = arith.constant 0 : index
    %c0_2 = arith.constant 0 : index
    %1 = vector.load %arg2[%c0_1, %c0_2] : memref<1x32xf32, #tpu.memory_space<vmem>>, vector<1x32xf32>
    %c0_3 = arith.constant 0 : index
    %c0_4 = arith.constant 0 : index
    %2 = vector.load %arg3[%c0_3, %c0_4] : memref<1x32xf32, #tpu.memory_space<vmem>>, vector<1x32xf32>
    %cst = arith.constant dense<0.000000e+00> : vector<16xf32>
    %3 = vector.multi_reduction <add>, %0, %cst [1] : vector<16x32xf32> to vector<16xf32>
    %4 = vector.shape_cast %3 : vector<16xf32> to vector<16x1xf32>
    %cst_5 = arith.constant 3.200000e+01 : f32
    %5 = vector.broadcast %cst_5 : f32 to vector<16x1xf32>
    %6 = arith.divf %4, %5 : vector<16x1xf32>
    %7 = vector.broadcast %6 : vector<16x1xf32> to vector<16x32xf32>
    %8 = arith.subf %0, %7 : vector<16x32xf32>
    %9 = arith.mulf %8, %8 : vector<16x32xf32>
    %cst_6 = arith.constant dense<0.000000e+00> : vector<16xf32>
    %10 = vector.multi_reduction <add>, %9, %cst_6 [1] : vector<16x32xf32> to vector<16xf32>
    %11 = vector.shape_cast %10 : vector<16xf32> to vector<16x1xf32>
    %cst_7 = arith.constant 3.200000e+01 : f32
    %12 = vector.broadcast %cst_7 : f32 to vector<16x1xf32>
    %13 = arith.divf %11, %12 : vector<16x1xf32>
    %14 = vector.broadcast %6 : vector<16x1xf32> to vector<16x32xf32>
    %15 = arith.subf %0, %14 : vector<16x32xf32>
    %cst_8 = arith.constant 9.99999997E-7 : f32
    %16 = vector.broadcast %cst_8 : f32 to vector<16x1xf32>
    %17 = arith.addf %13, %16 : vector<16x1xf32>
    %18 = math.rsqrt %17 : vector<16x1xf32>
    %19 = vector.broadcast %18 : vector<16x1xf32> to vector<16x32xf32>
    %20 = arith.mulf %15, %19 : vector<16x32xf32>
    %21 = vector.broadcast %1 : vector<1x32xf32> to vector<16x32xf32>
    %22 = arith.mulf %20, %21 : vector<16x32xf32>
    %23 = vector.broadcast %2 : vector<1x32xf32> to vector<16x32xf32>
    %24 = arith.addf %22, %23 : vector<16x32xf32>
    %25 = arith.truncf %24 : vector<16x32xf32> to vector<16x32xbf16>
    %c0_9 = arith.constant 0 : index
    %c0_10 = arith.constant 0 : index
    %26 = vector.load %arg4[%c0_9, %c0_10] : memref<32x64xbf16, #tpu.memory_space<vmem>>, vector<32x64xbf16>
    %cst_11 = arith.constant dense<0.000000e+00> : vector<16x64xf32>
    %27 = tpu.matmul %25, %26, %cst_11 {dimension_numbers = #tpu.dot_dimension_numbers<[1], [0], [0], [1], [0, 0, 1, 1], [], []>} : vector<16x32xbf16>, vector<32x64xbf16>, vector<16x64xf32> -> vector<16x64xf32>
    %c0_12 = arith.constant 0 : index
    %c0_13 = arith.constant 0 : index
    %28 = vector.load %arg5[%c0_12, %c0_13] : memref<1x64xf32, #tpu.memory_space<vmem>>, vector<1x64xf32>
    %29 = vector.broadcast %28 : vector<1x64xf32> to vector<16x64xf32>
    %30 = arith.addf %27, %29 : vector<16x64xf32>
    %cst_14 = arith.constant dense<0xFF800000> : vector<16xf32>
    %31 = vector.multi_reduction <maximumf>, %30, %cst_14 [1] : vector<16x64xf32> to vector<16xf32>
    %32 = vector.shape_cast %31 : vector<16xf32> to vector<16x1xf32>
    %33 = vector.broadcast %32 : vector<16x1xf32> to vector<16x64xf32>
    %34 = arith.subf %30, %33 : vector<16x64xf32>
    %35 = math.exp %34 : vector<16x64xf32>
    %cst_15 = arith.constant dense<0.000000e+00> : vector<16xf32>
    %36 = vector.multi_reduction <add>, %35, %cst_15 [1] : vector<16x64xf32> to vector<16xf32>
    %37 = vector.shape_cast %36 : vector<16xf32> to vector<16x1xf32>
    %38 = vector.broadcast %37 : vector<16x1xf32> to vector<16x64xf32>
    %39 = arith.divf %35, %38 : vector<16x64xf32>
    %c0_16 = arith.constant 0 : index
    %c0_17 = arith.constant 0 : index
    %40 = vector.load %arg6[%c0_16, %c0_17] : memref<16x64xf32, #tpu.memory_space<vmem>>, vector<16x64xf32>
    tpu.vector_store %arg6[%c0_16, %c0_17], %39 {strides = array<i32>} : memref<16x64xf32, #tpu.memory_space<vmem>>, vector<16x64xf32>,
    return
  }
  func.func @transform_0(%arg0: i32) -> (i32, i32) {
    %c0_i32 = arith.constant 0 : i32
    %c0_i32_0 = arith.constant 0 : i32
    return %arg0, %c0_i32 : i32, i32
  }
  func.func @transform_1(%arg0: i32) -> (i32, i32) {
    %c0_i32 = arith.constant 0 : i32
    %c0_i32_0 = arith.constant 0 : i32
    %c0_i32_1 = arith.constant 0 : i32
    return %c0_i32, %c0_i32_0 : i32, i32
  }
  func.func @transform_2(%arg0: i32) -> (i32, i32) {
    %c0_i32 = arith.constant 0 : i32
    %c0_i32_0 = arith.constant 0 : i32
    %c0_i32_1 = arith.constant 0 : i32
    return %c0_i32, %c0_i32_0 : i32, i32
  }
  func.func @transform_3(%arg0: i32) -> (i32, i32) {
    %c0_i32 = arith.constant 0 : i32
    %c0_i32_0 = arith.constant 0 : i32
    %c0_i32_1 = arith.constant 0 : i32
    return %c0_i32, %c0_i32_0 : i32, i32
  }
  func.func @transform_4(%arg0: i32) -> (i32, i32) {
    %c0_i32 = arith.constant 0 : i32
    %c0_i32_0 = arith.constant 0 : i32
    %c0_i32_1 = arith.constant 0 : i32
    return %c0_i32, %c0_i32_0 : i32, i32
  }
  func.func @transform_5(%arg0: i32) -> (i32, i32) {
    %c0_i32 = arith.constant 0 : i32
    %c0_i32_0 = arith.constant 0 : i32
    return %arg0, %c0_i32 : i32, i32
  }
}

</mosaic_0001>

<bundles_post_ra>
// kernel: transformer_forward.8
= control target key start
LH: loop header
LB: loop body
LE: loop exit
PB: predicated region body
PF: predicated region fallthrough
CT: control target
= control target key end

     0   :  { %s335_s15 = smov 0   ;;  %s364_s0 = inlined_call_operand.vmem [shape: f32[2,8,32], index: 0, kind: input, shape index: {}]   ;;  %s365_s1 = inlined_call_operand.vmem [shape: f32[8,32], index: 1, kind: input, shape index: {}]   ;;  %s366_s2 = inlined_call_operand.vmem [shape: f32[1,32], index: 2, kind: input, shape index: {}]   ;;  %s367_s3 = inlined_call_operand.vmem [shape: f32[1,32], index: 3, kind: input, shape index: {}]   ;;  %s368_s4 = inlined_call_operand.vmem [shape: f32[2,8,32], index: 4, kind: output, shape index: {}]  }
   0x1 LB: > { %s281_s16 = sadd.s32 4294967295, %s308_s15   ;;  %p285_p0 = scmp.ge.s32.totalorder %s308_s15, 1  ;;  %s308_s15 = sphi %s335_s15, %s14_s15  }
   0x2   : > { %p161_p1 = scmp.lt.s32.totalorder %s308_s15, 3 }
   0x4   : > { %p162_p2 = pnand %p285_p0, %p161_p1 }
   0x5   : > { %p185_p3 = scmp.lt.s32.totalorder (!%p162_p2), %s281_s16, 1  ;;  %vm196_vm0 = vcmask (!%p162_p2), 261120   ;;  %v288_v11 = vld [vmem:[%s366_s2] ss:$0 sm:$0xff] (!%p162_p2) }
   0x6   : > { %165 = sbr.rel (%p162_p2) target bundleno = 333 (0x14d), region = 36  ;;  %v289_v13 = vld [vmem:[%s367_s3] ss:$0 sm:$0xff] (!%p162_p2) }
   0x7   : > { %v225_v15 = vld [vmem:[%s365_s1] sm:$0xff] (!%p162_p2) }
   0xd   : > { %s370_s16 = smov (!%p185_p3, %s281_s16), 1 }
   0xe   : > { %s286_s17 = sshll.u32 %s370_s16, 3 }
   0xf   : > { %s188_s20 = scalar_lea.vmem %s364_s0, %s286_s17  ;;  %s192_s29 = scalar_lea.vmem %s368_s4, %s286_s17 }
  0x10   : > { %v193_v0 = vld [vmem:[%s188_s20] sm:$0xff] }
  0x11   : > { %v197_v1 = vsel %vm196_vm0, %v193_v0, 0.0 }
  0x12   : > { %198 = vadd.xlane.f32.xlu0 %v197_v1 }
  0x9f   : > { %v199_v2 = vpop.xlane.xlu0 %198 }
  0xa0   : > { %v201_v3 = vmul.f32 0.03125, %v199_v2 }
  0xa2   : > { %v202_v4 = vsub.f32 %v193_v0, %v201_v3 }
  0xa4   : > { %v203_v5 = vmul.f32 %v202_v4, %v202_v4 }
  0xa6   : > { %v204_v6 = vsel %vm196_vm0, %v203_v5, 0.0 }
  0xa7   : > { %205 = vadd.xlane.f32.xlu0 %v204_v6 }
 0x134   : > { %v206_v7 = vpop.xlane.xlu0 %205 }
 0x135   : > { %v207_v8 = vmul.f32 0.03125, %v206_v7 }
 0x137   : > { %v208_v9 = vadd.f32 1e-06, %v207_v8 }
 0x139   : > { %300 = vrsqrt.f32 %v208_v9 }
 0x143   : > { %v301_v10 = vpop.eup %300 }
 0x144   : > { %v210_v12 = vmul.f32 %v301_v10, %v202_v4 }
 0x146   : > { %v217_v14 = vmul.f32 %v288_v11, %v210_v12 }
 0x148   : > { %v224_v16 = vadd.f32 %v289_v13, %v217_v14 }
 0x14a   : > { %v226_v17 = vadd.f32 %v225_v15, %v224_v16 }
 0x14c   : > { %227 = vst.msk [vmem:[%s192_s29] sm:$0xff] %vm196_vm0, %v226_v17 }
 0x14d PF: > { %s14_s15 = sadd.s32 1, %s308_s15  }
 0x14e   : > { %p11_p4 = scmp.ge.s32.totalorder %s14_s15, 4  }
 0x150   :  { %13 = sbr.rel (!%p11_p4) target bundleno = 1 (0x1), region = 66 }

// kernel: transformer_forward.6
= control target key start
LH: loop header
LB: loop body
LE: loop exit
PB: predicated region body
PF: predicated region fallthrough
CT: control target
= control target key end

     0   :  { %s1708_s18 = smov 0   ;;  %s1888_s0 = inlined_call_operand.vmem [shape: f32[2,8,32], index: 0, kind: input, shape index: {}]   ;;  %s1889_s1 = inlined_call_operand.vmem [shape: f32[8,32], index: 1, kind: input, shape index: {}]   ;;  %s1890_s2 = inlined_call_operand.vmem [shape: f32[2,1,8,8], index: 2, kind: input, shape index: {}]   ;;  %s1891_s3 = inlined_call_operand.vmem [shape: f32[1,32], index: 3, kind: input, shape index: {}]   ;;  %s1892_s4 = inlined_call_operand.vmem [shape: f32[1,32], index: 4, kind: input, shape index: {}]   ;;  %s1893_s5 = inlined_call_operand.vmem [shape: bf16[32,96], index: 5, kind: input, shape index: {}]   ;;  %s1894_s6 = inlined_call_operand.vmem [shape: f32[1,96], index: 6, kind: input, shape index: {}]   ;;  %s1895_s7 = inlined_call_operand.vmem [shape: bf16[32,32], index: 7, kind: input, shape index: {}]   ;;  %s1896_s8 = inlined_call_operand.vmem [shape: f32[1,32], index: 8, kind: input, shape index: {}]   ;;  %s1897_s9 = inlined_call_operand.vmem [shape: f32[1,32], index: 9, kind: input, shape index: {}]   ;;  %s1898_s10 = inlined_call_operand.vmem [shape: f32[1,32], index: 10, kind: input, shape index: {}]   ;;  %s1899_s11 = inlined_call_operand.vmem [shape: bf16[32,64], index: 11, kind: input, shape index: {}]   ;;  %s1900_s12 = inlined_call_operand.vmem [shape: f32[1,64], index: 12, kind: input, shape index: {}]   ;;  %s1901_s13 = inlined_call_operand.vmem [shape: bf16[64,32], index: 13, kind: input, shape index: {}]   ;;  %s1902_s14 = inlined_call_operand.vmem [shape: f32[1,32], index: 14, kind: input, shape index: {}]   ;;  %s1903_s15 = inlined_call_operand.vmem [shape: f32[2,8,32], index: 15, kind: output, shape index: {}]  }
   0x1 LB: > { %s1396_s19 = sadd.s32 4294967295, %s1610_s18   ;;  %p1400_p0 = scmp.ge.s32.totalorder %s1610_s18, 1  ;;  %s1610_s18 = sphi %s1708_s18, %s25_s18  }
   0x2   : > { %p445_p1 = scmp.lt.s32.totalorder %s1610_s18, 3 }
   0x4   : > { %p446_p2 = pnand %p1400_p0, %p445_p1 }
   0x5   : > { %p495_p3 = scmp.lt.s32.totalorder (!%p446_p2), %s1396_s19, 1  ;;  %v509_v0 = vld [vmem:[%s1889_s1] sm:$0xff] (!%p446_p2)  ;;  %vm513_vm0 = vcmask (!%p446_p2), 261120   ;;  %v1612_v10 = vmov (!%p446_p2), 0.0   ;;  %vm1613_vm1 = vmmov (!%p446_p2), 0   ;;  %v1575_v11 = vld [vmem:[%s1893_s5 + $0x8] sm:$0xff] (!%p446_p2)  }
   0x6   : > { %449 = sbr.rel (%p446_p2) target bundleno = 2561 (0xa01), region = 80  ;;  %v1574_v9 = vld [vmem:[%s1893_s5] sm:$0xff] (!%p446_p2)   ;;  %1466 = vmatprep.subr.bf16.mxu0 (!%p446_p2), %v1612_v10  ;;  %1470 = vmatprep.mubr.msk.bf16.mxu0 (!%p446_p2), %vm1613_vm1, %v1612_v10  ;;  %s1614_s23 = smov (!%p446_p2), 120   ;;  %vm614_vm2 = vcmask (!%p446_p2), 64512   ;;  %vm681_vm4 = vcmask (!%p446_p2), 1043456   ;;  %vm1074_vm5 = vcmask (!%p446_p2), 130048  }
   0x7   : > { %1467 = vmatpush3.bf16.msra.mxu0 (!%p446_p2), %v1574_v9  ;;  %1474 = vmatprep.subr.bf16.mxu1 (!%p446_p2), %v1612_v10  ;;  %v1404_v16 = vld [vmem:[%s1891_s3] ss:$0 sm:$0xff] (!%p446_p2)  ;;  %s1615_s24 = smov (!%p446_p2), 96   ;;  %s1617_s26 = smov (!%p446_p2), 80   ;;  %vm1076_vm6 = vcmask (!%p446_p2), 195584   ;;  %vm1277_vm7 = vcmask (!%p446_p2), 523264  }
   0x8   : > { %1468 = vmatprep.subr.bf16.mxu0 (!%p446_p2), %v1612_v10  ;;  %1476 = vmatprep.mubr.msk.bf16.mxu1 (!%p446_p2), %vm1613_vm1, %v1612_v10  ;;  %v1405_v18 = vld [vmem:[%s1892_s4] ss:$0 sm:$0xff] (!%p446_p2)  ;;  %s1618_s27 = smov (!%p446_p2), 112   ;;  %s1619_s28 = smov (!%p446_p2), 72  }
   0x9   : > { %v1406_v22 = vld [vmem:[%s1894_s6] ss:$0 sm:$0xff] (!%p446_p2)  ;;  %s1620_s29 = smov (!%p446_p2), 104   ;;  %s1622_s21 = smov (!%p446_p2), 56  }
   0xa   : > { %s1623_s22 = smov (!%p446_p2), 48   ;;  %s1627_s30 = smov (!%p446_p2), 24  }
   0xb   : > { %1469 = vmatpush3.bf16.msra.mxu0 (!%p446_p2), %v1575_v11 }
   0xc   : > { %1480 = vmatprep.subr.bf16.mxu0 (!%p446_p2), %v1612_v10 }
   0xd   : > { %s1905_s19 = smov (!%p495_p3, %s1396_s19), 1 }
   0xe   : > { %s1716_s20 = sshll.u32 %s1905_s19, 3  ;;  %s1621_s19 = smov 64  }
   0xf   : > { %s498_s25 = scalar_lea.vmem %s1888_s0, %s1716_s20  ;;  %s502_s17 = scalar_lea.vmem %s1890_s2, %s1716_s20 }
  0x10   : > { %v508_v1 = vld [vmem:[%s498_s25] sm:$0xff]  ;;  %s1616_s25 = smov 88  }
  0x11   : > { %v1725_v2 = vadd.f32 %v509_v0, %v508_v1  ;;  %v609_v40 = vld [vmem:[%s502_s17] sm:$0xff] }
  0x12   : > { %vm662_vm3 = vcmp.eq.f32.partialorder %v609_v40, 0.0 }
  0x13   : > { %v514_v3 = vsel %vm513_vm0, %v1725_v2, 0.0 }
  0x14   : > { %515 = vadd.xlane.f32.xlu0 %v514_v3 }
  0xa1   : > { %v516_v4 = vpop.xlane.xlu0 %515 }
  0xa2   : > { %v518_v5 = vmul.f32 0.03125, %v516_v4 }
  0xa4   : > { %v519_v6 = vsub.f32 %v1725_v2, %v518_v5 }
  0xa6   : > { %v520_v7 = vmul.f32 %v519_v6, %v519_v6 }
  0xa8   : > { %v521_v8 = vsel %vm513_vm0, %v520_v7, 0.0 }
  0xa9   : > { %522 = vadd.xlane.f32.xlu0 %v521_v8 }
 0x136   : > { %v523_v12 = vpop.xlane.xlu0 %522 }
 0x137   : > { %v524_v13 = vmul.f32 0.03125, %v523_v12 }
 0x139   : > { %v525_v14 = vadd.f32 1e-06, %v524_v13 }
 0x13b   : > { %1584 = vrsqrt.f32 %v525_v14 }
 0x145   : > { %v1585_v15 = vpop.eup %1584 }
 0x146   : > { %v527_v17 = vmul.f32 %v1585_v15, %v519_v6 }
 0x148   : > { %v534_v19 = vmul.f32 %v1404_v16, %v527_v17 }
 0x14a   : > { %v541_v20 = vadd.f32 %v1405_v18, %v534_v19 }
 0x14c   : > { %v542_v21 = vpack.c.bf16 %v541_v20, %v541_v20 }
 0x14e   : > { %1471 = vmatmul.mubr.msk.bf16.vlgmr.msra.gmra.mrb[0].mxu0 %vm513_vm0, %v542_v21 }
 0x14f   : > { %1482 = vmatprep.mubr.msk.bf16.mxu0 %vm1613_vm1, %v1612_v10 }
 0x221   : > { %v603_v23 = vpop.f32.mrb[0].mxu0 }
 0x222   : > { %v604_v24 = vadd.f32 %v1406_v22, %v603_v23  ;;  %v1472_v25 = vpop.f32.mrb[1].mxu0 }
 0x223   : > { %v606_v26 = vpop.f32.mrb[2].mxu0 }
 0x224   : > { %v1757_v27 = vpack.c.bf16 %v604_v24, %v604_v24  ;;  %v1473_v28 = vpop.f32.mrb[3].mxu0 }
 0x226   : > { %725 = vrot.lane.b32.xlu0 %v1757_v27, %s1614_s23  ;;  %612 = vrot.lane.b32.xlu1 %v1757_v27, %s1615_s24  ;;  %s1624_s23 = smov 40   ;;  %s1625_s24 = smov 8  }
 0x22a   : > { %727 = vrot.lane.b32.xlu1 %v1757_v27, %s1616_s25 }
 0x22e   : > { %839 = vrot.lane.b32.xlu1 %v1757_v27, %s1617_s26 }
 0x232   : > { %837 = vrot.lane.b32.xlu1 %v1757_v27, %s1618_s27 }
 0x236   : > { %951 = vrot.lane.b32.xlu1 %v1757_v27, %s1619_s28 }
 0x23a   : > { %949 = vrot.lane.b32.xlu1 %v1757_v27, %s1620_s29  ;;  %s1626_s29 = smov 16  }
 0x298   : > { %v613_v29 = vpop.permute.xlu1 %612  ;;  %v726_v34 = vpop.permute.xlu0 %725 }
 0x299   : > { %v619_v30 = vsel %vm614_vm2, %v613_v29, 0 }
 0x29a   : > { %1475 = vmatpush3.bf16.xpose.msra.mxu1 %v619_v30 }
 0x29b   : > { %1486 = vmatprep.subr.bf16.mxu1 %v1612_v10 }
 0x29c   : > { %v728_v31 = vpop.permute.xlu1 %727 }
 0x29d   : > { %v733_v32 = vsel %vm614_vm2, %v728_v31, 0 }
 0x2a0   : > { %v840_v33 = vpop.permute.xlu1 %839 }
 0x2a1   : > { %1477 = vmatmul.mubr.msk.bf16.vlgmr.msra.gmra.mrb[0].mxu1 %vm614_vm2, %v1757_v27  ;;  %v845_v36 = vsel %vm614_vm2, %v840_v33, 0 }
 0x2a2   : > { %1487 = vmatpush3.bf16.xpose.msra.mxu1 %v733_v32  ;;  %1488 = vmatprep.mubr.msk.bf16.mxu1 %vm1613_vm1, %v1612_v10 }
 0x2a3   : > { %1498 = vmatprep.subr.bf16.mxu1 %v1612_v10 }
 0x2a4   : > { %v838_v35 = vpop.permute.xlu1 %837 }
 0x2a8   : > { %v952_v37 = vpop.permute.xlu1 %951 }
 0x2a9   : > { %1489 = vmatmul.mubr.msk.bf16.vlgmr.msra.gmra.mrb[4].mxu1 %vm614_vm2, %v726_v34  ;;  %v957_v38 = vsel %vm614_vm2, %v952_v37, 0 }
 0x2aa   : > { %1499 = vmatpush3.bf16.xpose.msra.mxu1 %v845_v36  ;;  %1500 = vmatprep.mubr.msk.bf16.mxu1 %vm1613_vm1, %v1612_v10 }
 0x2ab   : > { %1510 = vmatprep.subr.bf16.mxu1 %v1612_v10 }
 0x2ac   : > { %v950_v39 = vpop.permute.xlu1 %949 }
 0x2b1   : > { %1501 = vmatmul.mubr.msk.bf16.vlgmr.msra.gmra.mrb[8].mxu1 %vm614_vm2, %v838_v35 }
 0x2b2   : > { %1511 = vmatpush3.bf16.xpose.msra.mxu1 %v957_v38  ;;  %1512 = vmatprep.mubr.msk.bf16.mxu1 %vm1613_vm1, %v1612_v10 }
 0x2b3   : > { %1522 = vmatprep.subr.bf16.mxu1 %v1612_v10 }
 0x2b9   : > { %1513 = vmatmul.mubr.msk.bf16.vlgmr.msra.gmra.mrb[12].mxu1 %vm614_vm2, %v950_v39 }
 0x2ba   : > { %1526 = vmatprep.mubr.msk.bf16.mxu1 %vm1613_vm1, %v1612_v10 }
 0x374   : > { %v655_v41 = vpop.f32.mrb[0].mxu1 }
 0x375   : > { %v661_v42 = vmul.f32 0.35355338, %v655_v41  ;;  %v1478_v43 = vpop.f32.mrb[1].mxu1 }
 0x376   : > { %v658_v44 = vpop.f32.mrb[2].mxu1 }
 0x377   : > { %v1479_v45 = vpop.f32.mrb[3].mxu1  ;;  %v663_v46 = vsel %vm662_vm3, -1e+09, %v661_v42 }
 0x378   : > { %v664_v47 = vsel %vm614_vm2, %v663_v46, -inf }
 0x379   : > { %665 = vmax.xlane.f32.xlu1 %v664_v47 }
 0x37c   : > { %v769_v48 = vpop.f32.mrb[4].mxu1 }
 0x37d   : > { %v775_v49 = vmul.f32 0.35355338, %v769_v48  ;;  %v1490_v50 = vpop.f32.mrb[5].mxu1 }
 0x37e   : > { %v772_v51 = vpop.f32.mrb[6].mxu1 }
 0x37f   : > { %v1491_v52 = vpop.f32.mrb[7].mxu1  ;;  %v776_v53 = vsel %vm662_vm3, -1e+09, %v775_v49 }
 0x380   : > { %v777_v54 = vsel %vm614_vm2, %v776_v53, -inf }
 0x381   : > { %778 = vmax.xlane.f32.xlu0 %v777_v54 }
 0x384   : > { %v881_v55 = vpop.f32.mrb[8].mxu1 }
 0x385   : > { %v887_v56 = vmul.f32 0.35355338, %v881_v55  ;;  %v1502_v57 = vpop.f32.mrb[9].mxu1 }
 0x386   : > { %v884_v58 = vpop.f32.mrb[10].mxu1 }
 0x387   : > { %v1503_v59 = vpop.f32.mrb[11].mxu1  ;;  %v888_v60 = vsel %vm662_vm3, -1e+09, %v887_v56 }
 0x388   : > { %v889_v61 = vsel %vm614_vm2, %v888_v60, -inf  ;;  %v1576_v59 = vld [vmem:[%s1895_s7] sm:$0xff]  }
 0x389   : > { %890 = vmax.xlane.f32.xlu1 %v889_v61  ;;  %1523 = vmatpush3.bf16.msra.mxu1 %v1576_v59 }
 0x38a   : > { %1524 = vmatprep.subr.bf16.mxu1 %v1612_v10 }
 0x38c   : > { %v993_v62 = vpop.f32.mrb[12].mxu1 }
 0x38d   : > { %v999_v63 = vmul.f32 0.35355338, %v993_v62  ;;  %v1514_v0 = vpop.f32.mrb[13].mxu1 }
 0x38e   : > { %v996_v1 = vpop.f32.mrb[14].mxu1 }
 0x38f   : > { %v1515_v3 = vpop.f32.mrb[15].mxu1  ;;  %v1000_v4 = vsel %vm662_vm3, -1e+09, %v999_v63 }
 0x390   : > { %v1001_v5 = vsel %vm614_vm2, %v1000_v4, -inf }
 0x391   : > { %1002 = vmax.xlane.f32.xlu0 %v1001_v5 }
 0x406   : > { %v666_v6 = vpop.xlane.xlu1 %665 }
 0x407   : > { %v667_v7 = vsub.f32 %v663_v46, %v666_v6 }
 0x409   : > { %v668_v8 = vmul.f32 1.442695, %v667_v7 }
 0x40b   : > { %1586 = vpow2.f32 %v668_v8 }
 0x40e   : > { %v779_v9 = vpop.xlane.xlu0 %778 }
 0x40f   : > { %v780_v11 = vsub.f32 %v776_v53, %v779_v9 }
 0x411   : > { %v781_v12 = vmul.f32 1.442695, %v780_v11 }
 0x413   : > { %1588 = vpow2.f32 %v781_v12 }
 0x415   : > { %v1587_v13 = vpop.eup %1586 }
 0x416   : > { %v670_v14 = vsel %vm614_vm2, %v1587_v13, 0.0  ;;  %v891_v22 = vpop.xlane.xlu1 %890 }
 0x417   : > { %671 = vadd.xlane.f32.xlu1 %v670_v14  ;;  %v892_v23 = vsub.f32 %v888_v60, %v891_v22  ;;  %v1577_v60 = vld [vmem:[%s1895_s7 + $0x8] sm:$0xff]  }
 0x418   : > { %1525 = vmatpush3.bf16.msra.mxu1 %v1577_v60 }
 0x419   : > { %v893_v24 = vmul.f32 1.442695, %v892_v23  ;;  %1538 = vmatprep.subr.bf16.mxu1 %v1612_v10 }
 0x41d   : > { %v1589_v15 = vpop.eup %1588 }
 0x41e   : > { %v1003_v16 = vpop.xlane.xlu0 %1002  ;;  %v783_v17 = vsel %vm614_vm2, %v1589_v15, 0.0 }
 0x41f   : > { %v1004_v18 = vsub.f32 %v1000_v4, %v1003_v16  ;;  %784 = vadd.xlane.f32.xlu0 %v783_v17 }
 0x421   : > { %v1005_v19 = vmul.f32 1.442695, %v1004_v18 }
 0x423   : > { %1590 = vpow2.f32 %v1005_v19 }
 0x424   : > { %1592 = vpow2.f32 %v893_v24 }
 0x428   : > { %676 = vrot.lane.b32.xlu1 %v1757_v27, %s1621_s19 }
 0x42d   : > { %v1591_v20 = vpop.eup %1590 }
 0x42e   : > { %v1007_v21 = vsel %vm614_vm2, %v1591_v20, 0.0  ;;  %v1593_v25 = vpop.eup %1592 }
 0x42f   : > { %1008 = vadd.xlane.f32.xlu0 %v1007_v21  ;;  %v895_v26 = vsel %vm614_vm2, %v1593_v25, 0.0 }
 0x445   : > { %789 = vrot.lane.b32.xlu0 %v1757_v27, %s1622_s21 }
 0x44c   : > { %896 = vadd.xlane.f32.xlu1 %v895_v26 }
 0x45d   : > { %901 = vrot.lane.b32.xlu1 %v1757_v27, %s1623_s22 }
 0x461   : > { %1013 = vrot.lane.b32.xlu1 %v1757_v27, %s1624_s23 }
 0x4a4   : > { %v672_v28 = vpop.xlane.xlu1 %671 }
 0x4a5   : > { %1594 = vrcp.f32 %v672_v28  ;;  %v1578_v28 = vld [vmem:[%s1899_s11] sm:$0xff]  }
 0x4a8   : > { %v677_v29 = vpop.permute.xlu1 %676 }
 0x4a9   : > { %v683_v30 = vsel %vm681_vm4, %v677_v29, 0  ;;  %v1580_v29 = vld [vmem:[%s1901_s13] sm:$0xff]  }
 0x4aa   : > { %1481 = vmatpush3.bf16.msra.mxu0 %v683_v30  ;;  %v1581_v30 = vld [vmem:[%s1901_s13 + $0x8] sm:$0xff]  }
 0x4ab   : > { %1492 = vmatprep.subr.bf16.mxu0 %v1612_v10 }
 0x4ac   : > { %v785_v32 = vpop.xlane.xlu0 %784 }
 0x4ad   : > { %1596 = vrcp.f32 %v785_v32 }
 0x4af   : > { %v1595_v31 = vpop.eup %1594 }
 0x4b0   : > { %v674_v33 = vmul.f32 %v1595_v31, %v1587_v13 }
 0x4b2   : > { %v675_v34 = vpack.c.bf16 %v674_v33, %v674_v33 }
 0x4b4   : > { %1483 = vmatmul.mubr.msk.bf16.vlgmr.msra.gmra.mrb[4].mxu0 %vm614_vm2, %v675_v34 }
 0x4b5   : > { %1494 = vmatprep.mubr.msk.bf16.mxu0 %vm1613_vm1, %v1612_v10 }
 0x4b7   : > { %v1597_v27 = vpop.eup %1596 }
 0x4b8   : > { %v787_v36 = vmul.f32 %v1597_v27, %v1589_v15  ;;  %v1421_v15 = vld [vmem:[%s1896_s8] ss:$0 sm:$0xff] }
 0x4b9   : > { %v1422_v27 = vld [vmem:[%s1897_s9] ss:$0 sm:$0xff] }
 0x4ba   : > { %v788_v39 = vpack.c.bf16 %v787_v36, %v787_v36  ;;  %v1423_v36 = vld [vmem:[%s1898_s10] ss:$0 sm:$0xff] }
 0x4bc   : > { %v1009_v35 = vpop.xlane.xlu0 %1008 }
 0x4c0   : > { %v790_v37 = vpop.permute.xlu0 %789 }
 0x4c1   : > { %v795_v38 = vsel %vm681_vm4, %v790_v37, 0 }
 0x4c2   : > { %1493 = vmatpush3.bf16.msra.mxu0 %v795_v38 }
 0x4c3   : > { %1504 = vmatprep.subr.bf16.mxu0 %v1612_v10 }
 0x4c5   : > { %1495 = vmatmul.mubr.msk.bf16.vlgmr.msra.gmra.mrb[8].mxu0 %vm614_vm2, %v788_v39 }
 0x4c6   : > { %1506 = vmatprep.mubr.msk.bf16.mxu0 %vm1613_vm1, %v1612_v10 }
 0x4d9   : > { %v897_v40 = vpop.xlane.xlu1 %896 }
 0x4da   : > { %1598 = vrcp.f32 %v897_v40  ;;  %v1582_v40 = vld [vmem:[%s1901_s13 + $0x10] sm:$0xff]  }
 0x4db   : > { %1600 = vrcp.f32 %v1009_v35 }
 0x4dd   : > { %v902_v41 = vpop.permute.xlu1 %901 }
 0x4de   : > { %v907_v42 = vsel %vm681_vm4, %v902_v41, 0  ;;  %v1583_v41 = vld [vmem:[%s1901_s13 + $0x18] sm:$0xff]  }
 0x4df   : > { %1505 = vmatpush3.bf16.msra.mxu0 %v907_v42  ;;  %v1424_v42 = vld [vmem:[%s1900_s12] ss:$0 sm:$0xff] }
 0x4e0   : > { %1516 = vmatprep.subr.bf16.mxu0 %v1612_v10 }
 0x4e1   : > { %v1014_v45 = vpop.permute.xlu1 %1013 }
 0x4e2   : > { %v1019_v48 = vsel %vm681_vm4, %v1014_v45, 0 }
 0x4e4   : > { %v1599_v43 = vpop.eup %1598 }
 0x4e5   : > { %v899_v44 = vmul.f32 %v1599_v43, %v1593_v25  ;;  %v1601_v47 = vpop.eup %1600 }
 0x4e6   : > { %v1011_v49 = vmul.f32 %v1601_v47, %v1591_v20 }
 0x4e7   : > { %v900_v46 = vpack.c.bf16 %v899_v44, %v899_v44 }
 0x4e8   : > { %v1012_v50 = vpack.c.bf16 %v1011_v49, %v1011_v49 }
 0x4e9   : > { %1507 = vmatmul.mubr.msk.bf16.vlgmr.msra.gmra.mrb[12].mxu0 %vm614_vm2, %v900_v46 }
 0x4ea   : > { %1517 = vmatpush3.bf16.msra.mxu0 %v1019_v48  ;;  %1518 = vmatprep.mubr.msk.bf16.mxu0 %vm1613_vm1, %v1612_v10 }
 0x4eb   : > { %1530 = vmatprep.subr.bf16.mxu0 %v1612_v10 }
 0x4f1   : > { %1519 = vmatmul.mubr.msk.bf16.vlgmr.msra.gmra.mrb[16].mxu0 %vm614_vm2, %v1012_v50  ;;  %v1433_v50 = vld [vmem:[%s1902_s14] ss:$0 sm:$0xff] }
 0x4f2   : > { %1534 = vmatprep.mubr.msk.bf16.mxu0 %vm1613_vm1, %v1612_v10  ;;  %1531 = vmatpush3.bf16.msra.mxu0 %v1578_v28 }
 0x4f3   : > { %1532 = vmatprep.subr.bf16.mxu0 %v1612_v10 }
 0x587   : > { %v719_v51 = vpop.f32.mrb[4].mxu0 }
 0x588   : > { %v1484_v52 = vpop.f32.mrb[5].mxu0 }
 0x589   : > { %v722_v53 = vpop.f32.mrb[6].mxu0 }
 0x58a   : > { %v1485_v54 = vpop.f32.mrb[7].mxu0 }
 0x598   : > { %v831_v55 = vpop.f32.mrb[8].mxu0 }
 0x599   : > { %1062 = vrot.lane.b32.xlu0 %v831_v55, %s1625_s24  ;;  %v1496_v56 = vpop.f32.mrb[9].mxu0 }
 0x59a   : > { %v834_v57 = vpop.f32.mrb[10].mxu0 }
 0x59b   : > { %v1497_v58 = vpop.f32.mrb[11].mxu0 }
 0x5bc   : > { %v943_v61 = vpop.f32.mrb[12].mxu0 }
 0x5bd   : > { %1066 = vrot.lane.b32.xlu1 %v943_v61, %s1626_s29  ;;  %v1508_v62 = vpop.f32.mrb[13].mxu0  ;;  %s506_s29 = scalar_lea.vmem %s1903_s15, %s1716_s20 }
 0x5be   : > { %v946_v63 = vpop.f32.mrb[14].mxu0 }
 0x5bf   : > { %v1509_v0 = vpop.f32.mrb[15].mxu0 }
 0x5c4   : > { %v1055_v1 = vpop.f32.mrb[16].mxu0 }
 0x5c5   : > { %1070 = vrot.lane.b32.xlu0 %v1055_v1, %s1627_s30  ;;  %v1520_v3 = vpop.f32.mrb[17].mxu0 }
 0x5c6   : > { %v1058_v4 = vpop.f32.mrb[18].mxu0 }
 0x5c7   : > { %v1521_v5 = vpop.f32.mrb[19].mxu0 }
 0x60b   : > { %v1063_v6 = vpop.permute.xlu0 %1062 }
 0x60c   : > { %v1073_v8 = vsel %vm614_vm2, %v719_v51, %v1063_v6 }
 0x62f   : > { %v1067_v7 = vpop.permute.xlu1 %1066 }
 0x630   : > { %v1075_v9 = vsel %vm1074_vm5, %v1073_v8, %v1067_v7 }
 0x637   : > { %v1071_v11 = vpop.permute.xlu0 %1070 }
 0x638   : > { %v1077_v12 = vsel %vm1076_vm6, %v1075_v9, %v1071_v11 }
 0x639   : > { %v1078_v13 = vpack.c.bf16 %v1077_v12, %v1077_v12 }
 0x63b   : > { %1527 = vmatmul.mubr.msk.bf16.vlgmr.msra.gmra.mrb[16].mxu1 %vm513_vm0, %v1078_v13 }
 0x63c   : > { %1546 = vmatprep.mubr.msk.bf16.mxu1 %vm1613_vm1, %v1612_v10  ;;  %1539 = vmatpush3.bf16.msra.mxu1 %v1580_v29 }
 0x63d   : > { %1540 = vmatprep.subr.bf16.mxu1 %v1612_v10 }
 0x640   : > { %1541 = vmatpush3.bf16.msra.mxu1 %v1581_v30 }
 0x641   : > { %1542 = vmatprep.subr.bf16.mxu1 %v1612_v10 }
 0x644   : > { %1543 = vmatpush3.bf16.msra.mxu1 %v1582_v40 }
 0x645   : > { %1544 = vmatprep.subr.bf16.mxu1 %v1612_v10 }
 0x648   : > { %1545 = vmatpush3.bf16.msra.mxu1 %v1583_v41 }
 0x70e   : > { %v1132_v14 = vpop.f32.mrb[16].mxu1 }
 0x70f   : > { %v1138_v16 = vadd.f32 %v1132_v14, %v1725_v2  ;;  %v1528_v17 = vpop.f32.mrb[17].mxu1  ;;  %v1579_v2 = vld [vmem:[%s1899_s11 + $0x8] sm:$0xff]  }
 0x710   : > { %v1135_v18 = vpop.f32.mrb[18].mxu1  ;;  %1533 = vmatpush3.bf16.msra.mxu0 %v1579_v2 }
 0x711   : > { %v1146_v19 = vadd.f32 %v1421_v15, %v1138_v16  ;;  %v1529_v20 = vpop.f32.mrb[19].mxu1 }
 0x713   : > { %v1149_v21 = vsel %vm513_vm0, %v1146_v19, 0.0 }
 0x714   : > { %1150 = vadd.xlane.f32.xlu1 %v1149_v21 }
 0x7a1   : > { %v1151_v22 = vpop.xlane.xlu1 %1150 }
 0x7a2   : > { %v1152_v23 = vmul.f32 0.03125, %v1151_v22 }
 0x7a4   : > { %v1153_v24 = vsub.f32 %v1146_v19, %v1152_v23 }
 0x7a6   : > { %v1154_v25 = vmul.f32 %v1153_v24, %v1153_v24 }
 0x7a8   : > { %v1155_v26 = vsel %vm513_vm0, %v1154_v25, 0.0 }
 0x7a9   : > { %1156 = vadd.xlane.f32.xlu0 %v1155_v26 }
 0x836   : > { %v1157_v31 = vpop.xlane.xlu0 %1156 }
 0x837   : > { %v1158_v32 = vmul.f32 0.03125, %v1157_v31 }
 0x839   : > { %v1159_v33 = vadd.f32 1e-06, %v1158_v32 }
 0x83b   : > { %1602 = vrsqrt.f32 %v1159_v33 }
 0x845   : > { %v1603_v34 = vpop.eup %1602 }
 0x846   : > { %v1161_v35 = vmul.f32 %v1603_v34, %v1153_v24 }
 0x848   : > { %v1168_v37 = vmul.f32 %v1422_v27, %v1161_v35 }
 0x84a   : > { %v1175_v38 = vadd.f32 %v1423_v36, %v1168_v37 }
 0x84c   : > { %v1176_v39 = vpack.c.bf16 %v1175_v38, %v1175_v38 }
 0x84e   : > { %1535 = vmatmul.mubr.msk.bf16.vlgmr.msra.gmra.mrb[20].mxu0 %vm513_vm0, %v1176_v39 }
 0x921   : > { %v1237_v43 = vpop.f32.mrb[20].mxu0 }
 0x922   : > { %v1238_v44 = vadd.f32 %v1424_v42, %v1237_v43  ;;  %v1536_v45 = vpop.f32.mrb[21].mxu0 }
 0x923   : > { %v1240_v46 = vpop.f32.mrb[22].mxu0 }
 0x924   : > { %v1243_v47 = vmax.f32 %v1238_v44, 0.0  ;;  %v1537_v48 = vpop.f32.mrb[23].mxu0 }
 0x926   : > { %v1244_v49 = vpack.c.bf16 %v1243_v47, %v1243_v47 }
 0x928   : > { %1547 = vmatmul.mubr.msk.bf16.vlgmr.msra.gmra.mrb[20].mxu1 %vm1277_vm7, %v1244_v49 }
 0x9fb   : > { %v1315_v10 = vpop.f32.mrb[20].mxu1 }
 0x9fc   : > { %v1321_v51 = vadd.f32 %v1315_v10, %v1146_v19  ;;  %v1548_v52 = vpop.f32.mrb[21].mxu1 }
 0x9fd   : > { %v1318_v53 = vpop.f32.mrb[22].mxu1 }
 0x9fe   : > { %v1329_v54 = vadd.f32 %v1433_v50, %v1321_v51  ;;  %v1549_v55 = vpop.f32.mrb[23].mxu1 }
 0xa00   : > { %1330 = vst.msk [vmem:[%s506_s29] sm:$0xff] %vm513_vm0, %v1329_v54 }
 0xa01 PF: > { %s25_s18 = sadd.s32 1, %s1610_s18  }
 0xa02   : > { %p22_p4 = scmp.ge.s32.totalorder %s25_s18, 4  }
 0xa04   :  { %24 = sbr.rel (!%p22_p4) target bundleno = 1 (0x1), region = 113 }

// kernel: transformer_forward.7
= control target key start
LH: loop header
LB: loop body
LE: loop exit
PB: predicated region body
PF: predicated region fallthrough
CT: control target
= control target key end

     0   :  { %s1706_s17 = smov 0   ;;  %s1883_s0 = inlined_call_operand.vmem [shape: f32[2,8,32], index: 0, kind: input, shape index: {}]   ;;  %s1884_s1 = inlined_call_operand.vmem [shape: f32[8,32], index: 1, kind: input, shape index: {}]   ;;  %s1885_s2 = inlined_call_operand.vmem [shape: f32[2,1,8,8], index: 2, kind: input, shape index: {}]   ;;  %s1886_s3 = inlined_call_operand.vmem [shape: f32[1,32], index: 3, kind: input, shape index: {}]   ;;  %s1887_s4 = inlined_call_operand.vmem [shape: f32[1,32], index: 4, kind: input, shape index: {}]   ;;  %s1888_s5 = inlined_call_operand.vmem [shape: bf16[32,96], index: 5, kind: input, shape index: {}]   ;;  %s1889_s6 = inlined_call_operand.vmem [shape: f32[1,96], index: 6, kind: input, shape index: {}]   ;;  %s1890_s7 = inlined_call_operand.vmem [shape: bf16[32,32], index: 7, kind: input, shape index: {}]   ;;  %s1891_s8 = inlined_call_operand.vmem [shape: f32[1,32], index: 8, kind: input, shape index: {}]   ;;  %s1892_s9 = inlined_call_operand.vmem [shape: f32[1,32], index: 9, kind: input, shape index: {}]   ;;  %s1893_s10 = inlined_call_operand.vmem [shape: f32[1,32], index: 10, kind: input, shape index: {}]   ;;  %s1894_s11 = inlined_call_operand.vmem [shape: bf16[32,64], index: 11, kind: input, shape index: {}]   ;;  %s1895_s12 = inlined_call_operand.vmem [shape: f32[1,64], index: 12, kind: input, shape index: {}]   ;;  %s1896_s13 = inlined_call_operand.vmem [shape: bf16[64,32], index: 13, kind: input, shape index: {}]   ;;  %s1897_s14 = inlined_call_operand.vmem [shape: f32[1,32], index: 14, kind: input, shape index: {}]   ;;  %s1898_s15 = inlined_call_operand.vmem [shape: f32[2,8,32], index: 15, kind: output, shape index: {}]  }
   0x1 LB: > { %s1394_s1 = sadd.s32 4294967295, %s1608_s17   ;;  %p1398_p0 = scmp.ge.s32.totalorder %s1608_s17, 1  ;;  %s1608_s17 = sphi %s1706_s17, %s25_s17  }
   0x2   : > { %p445_p1 = scmp.lt.s32.totalorder %s1608_s17, 3 }
   0x4   : > { %p446_p2 = pnand %p1398_p0, %p445_p1 }
   0x5   : > { %p495_p3 = scmp.lt.s32.totalorder (!%p446_p2), %s1394_s1, 1  ;;  %vm511_vm0 = vcmask (!%p446_p2), 261120   ;;  %v1572_v7 = vld [vmem:[%s1888_s5] sm:$0xff] (!%p446_p2)   ;;  %v1610_v8 = vmov (!%p446_p2), 0.0   ;;  %vm1611_vm1 = vmmov (!%p446_p2), 0   ;;  %v1573_v9 = vld [vmem:[%s1888_s5 + $0x8] sm:$0xff] (!%p446_p2)  }
   0x6   : > { %449 = sbr.rel (%p446_p2) target bundleno = 2559 (0x9ff), region = 80  ;;  %1464 = vmatprep.subr.bf16.mxu0 (!%p446_p2), %v1610_v8  ;;  %1468 = vmatprep.mubr.msk.bf16.mxu0 (!%p446_p2), %vm1611_vm1, %v1610_v8  ;;  %v1402_v14 = vld [vmem:[%s1886_s3] ss:$0 sm:$0xff] (!%p446_p2)  ;;  %s1613_s19 = smov (!%p446_p2), 96   ;;  %vm612_vm2 = vcmask (!%p446_p2), 64512   ;;  %vm679_vm4 = vcmask (!%p446_p2), 1043456  }
   0x7   : > { %1465 = vmatpush3.bf16.msra.mxu0 (!%p446_p2), %v1572_v7  ;;  %1472 = vmatprep.subr.bf16.mxu1 (!%p446_p2), %v1610_v8  ;;  %v1403_v16 = vld [vmem:[%s1887_s4] ss:$0 sm:$0xff] (!%p446_p2)  ;;  %s1614_s20 = smov (!%p446_p2), 88   ;;  %s1616_s22 = smov (!%p446_p2), 112   ;;  %vm1072_vm5 = vcmask (!%p446_p2), 130048   ;;  %vm1074_vm6 = vcmask (!%p446_p2), 195584  }
   0x8   : > { %1466 = vmatprep.subr.bf16.mxu0 (!%p446_p2), %v1610_v8  ;;  %1474 = vmatprep.mubr.msk.bf16.mxu1 (!%p446_p2), %vm1611_vm1, %v1610_v8  ;;  %v1404_v20 = vld [vmem:[%s1889_s6] ss:$0 sm:$0xff] (!%p446_p2)  ;;  %s1617_s23 = smov (!%p446_p2), 72   ;;  %s1618_s24 = smov (!%p446_p2), 104   ;;  %vm1275_vm7 = vcmask (!%p446_p2), 523264  }
   0x9   : > { %s1619_s28 = smov (!%p446_p2), 64   ;;  %s1620_s29 = smov (!%p446_p2), 56  }
   0xa   : > { %s1621_s30 = smov (!%p446_p2), 48   ;;  %s1622_s16 = smov (!%p446_p2), 40  }
   0xb   : > { %1467 = vmatpush3.bf16.msra.mxu0 (!%p446_p2), %v1573_v9 }
   0xc   : > { %1478 = vmatprep.subr.bf16.mxu0 (!%p446_p2), %v1610_v8 }
   0xd   : > { %s1900_s1 = smov (!%p495_p3, %s1394_s1), 1 }
   0xe   : > { %s1714_s18 = sshll.u32 %s1900_s1, 3  ;;  %s1612_s1 = smov 120  }
   0xf   : > { %s498_s21 = scalar_lea.vmem %s1883_s0, %s1714_s18  ;;  %s502_s27 = scalar_lea.vmem %s1885_s2, %s1714_s18 }
  0x10   : > { %v1720_v0 = vld [vmem:[%s498_s21] sm:$0xff]  ;;  %s1615_s21 = smov 80  }
  0x11   : > { %v512_v1 = vsel %vm511_vm0, %v1720_v0, 0.0  ;;  %v607_v38 = vld [vmem:[%s502_s27] sm:$0xff] }
  0x12   : > { %513 = vadd.xlane.f32.xlu0 %v512_v1  ;;  %vm660_vm3 = vcmp.eq.f32.partialorder %v607_v38, 0.0 }
  0x9f   : > { %v514_v2 = vpop.xlane.xlu0 %513 }
  0xa0   : > { %v516_v3 = vmul.f32 0.03125, %v514_v2 }
  0xa2   : > { %v517_v4 = vsub.f32 %v1720_v0, %v516_v3 }
  0xa4   : > { %v518_v5 = vmul.f32 %v517_v4, %v517_v4 }
  0xa6   : > { %v519_v6 = vsel %vm511_vm0, %v518_v5, 0.0 }
  0xa7   : > { %520 = vadd.xlane.f32.xlu0 %v519_v6 }
 0x134   : > { %v521_v10 = vpop.xlane.xlu0 %520 }
 0x135   : > { %v522_v11 = vmul.f32 0.03125, %v521_v10 }
 0x137   : > { %v523_v12 = vadd.f32 1e-06, %v522_v11 }
 0x139   : > { %1582 = vrsqrt.f32 %v523_v12 }
 0x143   : > { %v1583_v13 = vpop.eup %1582 }
 0x144   : > { %v525_v15 = vmul.f32 %v1583_v13, %v517_v4 }
 0x146   : > { %v532_v17 = vmul.f32 %v1402_v14, %v525_v15 }
 0x148   : > { %v539_v18 = vadd.f32 %v1403_v16, %v532_v17 }
 0x14a   : > { %v540_v19 = vpack.c.bf16 %v539_v18, %v539_v18 }
 0x14c   : > { %1469 = vmatmul.mubr.msk.bf16.vlgmr.msra.gmra.mrb[0].mxu0 %vm511_vm0, %v540_v19 }
 0x14d   : > { %1480 = vmatprep.mubr.msk.bf16.mxu0 %vm1611_vm1, %v1610_v8 }
 0x21f   : > { %v601_v21 = vpop.f32.mrb[0].mxu0 }
 0x220   : > { %v602_v22 = vadd.f32 %v1404_v20, %v601_v21  ;;  %v1470_v23 = vpop.f32.mrb[1].mxu0 }
 0x221   : > { %v604_v24 = vpop.f32.mrb[2].mxu0 }
 0x222   : > { %v1752_v25 = vpack.c.bf16 %v602_v22, %v602_v22  ;;  %v1471_v26 = vpop.f32.mrb[3].mxu0 }
 0x224   : > { %723 = vrot.lane.b32.xlu0 %v1752_v25, %s1612_s1  ;;  %610 = vrot.lane.b32.xlu1 %v1752_v25, %s1613_s19  ;;  %s1623_s1 = smov 8  }
 0x228   : > { %725 = vrot.lane.b32.xlu1 %v1752_v25, %s1614_s20 }
 0x22c   : > { %837 = vrot.lane.b32.xlu1 %v1752_v25, %s1615_s21  ;;  %s506_s21 = scalar_lea.vmem %s1898_s15, %s1714_s18 }
 0x230   : > { %835 = vrot.lane.b32.xlu1 %v1752_v25, %s1616_s22 }
 0x234   : > { %949 = vrot.lane.b32.xlu1 %v1752_v25, %s1617_s23  ;;  %s1624_s23 = smov 16  }
 0x238   : > { %947 = vrot.lane.b32.xlu1 %v1752_v25, %s1618_s24  ;;  %s1625_s24 = smov 24  }
 0x296   : > { %v611_v27 = vpop.permute.xlu1 %610  ;;  %v724_v32 = vpop.permute.xlu0 %723 }
 0x297   : > { %v617_v28 = vsel %vm612_vm2, %v611_v27, 0 }
 0x298   : > { %1473 = vmatpush3.bf16.xpose.msra.mxu1 %v617_v28 }
 0x299   : > { %1484 = vmatprep.subr.bf16.mxu1 %v1610_v8 }
 0x29a   : > { %v726_v29 = vpop.permute.xlu1 %725 }
 0x29b   : > { %v731_v30 = vsel %vm612_vm2, %v726_v29, 0 }
 0x29e   : > { %v838_v31 = vpop.permute.xlu1 %837 }
 0x29f   : > { %1475 = vmatmul.mubr.msk.bf16.vlgmr.msra.gmra.mrb[0].mxu1 %vm612_vm2, %v1752_v25  ;;  %v843_v34 = vsel %vm612_vm2, %v838_v31, 0 }
 0x2a0   : > { %1485 = vmatpush3.bf16.xpose.msra.mxu1 %v731_v30  ;;  %1486 = vmatprep.mubr.msk.bf16.mxu1 %vm1611_vm1, %v1610_v8 }
 0x2a1   : > { %1496 = vmatprep.subr.bf16.mxu1 %v1610_v8 }
 0x2a2   : > { %v836_v33 = vpop.permute.xlu1 %835 }
 0x2a6   : > { %v950_v35 = vpop.permute.xlu1 %949 }
 0x2a7   : > { %1487 = vmatmul.mubr.msk.bf16.vlgmr.msra.gmra.mrb[4].mxu1 %vm612_vm2, %v724_v32  ;;  %v955_v36 = vsel %vm612_vm2, %v950_v35, 0 }
 0x2a8   : > { %1497 = vmatpush3.bf16.xpose.msra.mxu1 %v843_v34  ;;  %1498 = vmatprep.mubr.msk.bf16.mxu1 %vm1611_vm1, %v1610_v8 }
 0x2a9   : > { %1508 = vmatprep.subr.bf16.mxu1 %v1610_v8 }
 0x2aa   : > { %v948_v37 = vpop.permute.xlu1 %947 }
 0x2af   : > { %1499 = vmatmul.mubr.msk.bf16.vlgmr.msra.gmra.mrb[8].mxu1 %vm612_vm2, %v836_v33 }
 0x2b0   : > { %1509 = vmatpush3.bf16.xpose.msra.mxu1 %v955_v36  ;;  %1510 = vmatprep.mubr.msk.bf16.mxu1 %vm1611_vm1, %v1610_v8 }
 0x2b1   : > { %1520 = vmatprep.subr.bf16.mxu1 %v1610_v8 }
 0x2b7   : > { %1511 = vmatmul.mubr.msk.bf16.vlgmr.msra.gmra.mrb[12].mxu1 %vm612_vm2, %v948_v37 }
 0x2b8   : > { %1524 = vmatprep.mubr.msk.bf16.mxu1 %vm1611_vm1, %v1610_v8 }
 0x372   : > { %v653_v39 = vpop.f32.mrb[0].mxu1 }
 0x373   : > { %v659_v40 = vmul.f32 0.35355338, %v653_v39  ;;  %v1476_v41 = vpop.f32.mrb[1].mxu1 }
 0x374   : > { %v656_v42 = vpop.f32.mrb[2].mxu1 }
 0x375   : > { %v1477_v43 = vpop.f32.mrb[3].mxu1  ;;  %v661_v44 = vsel %vm660_vm3, -1e+09, %v659_v40 }
 0x376   : > { %v662_v45 = vsel %vm612_vm2, %v661_v44, -inf }
 0x377   : > { %663 = vmax.xlane.f32.xlu1 %v662_v45 }
 0x37a   : > { %v767_v46 = vpop.f32.mrb[4].mxu1 }
 0x37b   : > { %v773_v47 = vmul.f32 0.35355338, %v767_v46  ;;  %v1488_v48 = vpop.f32.mrb[5].mxu1 }
 0x37c   : > { %v770_v49 = vpop.f32.mrb[6].mxu1 }
 0x37d   : > { %v1489_v50 = vpop.f32.mrb[7].mxu1  ;;  %v774_v51 = vsel %vm660_vm3, -1e+09, %v773_v47 }
 0x37e   : > { %v775_v52 = vsel %vm612_vm2, %v774_v51, -inf }
 0x37f   : > { %776 = vmax.xlane.f32.xlu0 %v775_v52 }
 0x382   : > { %v879_v53 = vpop.f32.mrb[8].mxu1 }
 0x383   : > { %v885_v54 = vmul.f32 0.35355338, %v879_v53  ;;  %v1500_v55 = vpop.f32.mrb[9].mxu1 }
 0x384   : > { %v882_v56 = vpop.f32.mrb[10].mxu1 }
 0x385   : > { %v1501_v57 = vpop.f32.mrb[11].mxu1  ;;  %v886_v58 = vsel %vm660_vm3, -1e+09, %v885_v54 }
 0x386   : > { %v887_v59 = vsel %vm612_vm2, %v886_v58, -inf  ;;  %v1574_v57 = vld [vmem:[%s1890_s7] sm:$0xff]  }
 0x387   : > { %888 = vmax.xlane.f32.xlu1 %v887_v59  ;;  %1521 = vmatpush3.bf16.msra.mxu1 %v1574_v57 }
 0x388   : > { %1522 = vmatprep.subr.bf16.mxu1 %v1610_v8 }
 0x38a   : > { %v991_v60 = vpop.f32.mrb[12].mxu1 }
 0x38b   : > { %v997_v61 = vmul.f32 0.35355338, %v991_v60  ;;  %v1512_v62 = vpop.f32.mrb[13].mxu1 }
 0x38c   : > { %v994_v63 = vpop.f32.mrb[14].mxu1 }
 0x38d   : > { %v1513_v1 = vpop.f32.mrb[15].mxu1  ;;  %v998_v2 = vsel %vm660_vm3, -1e+09, %v997_v61 }
 0x38e   : > { %v999_v3 = vsel %vm612_vm2, %v998_v2, -inf }
 0x38f   : > { %1000 = vmax.xlane.f32.xlu0 %v999_v3 }
 0x404   : > { %v664_v4 = vpop.xlane.xlu1 %663 }
 0x405   : > { %v665_v5 = vsub.f32 %v661_v44, %v664_v4 }
 0x407   : > { %v666_v6 = vmul.f32 1.442695, %v665_v5 }
 0x409   : > { %1584 = vpow2.f32 %v666_v6 }
 0x40c   : > { %v777_v7 = vpop.xlane.xlu0 %776 }
 0x40d   : > { %v778_v9 = vsub.f32 %v774_v51, %v777_v7 }
 0x40f   : > { %v779_v10 = vmul.f32 1.442695, %v778_v9 }
 0x411   : > { %1586 = vpow2.f32 %v779_v10 }
 0x413   : > { %v1585_v11 = vpop.eup %1584 }
 0x414   : > { %v668_v12 = vsel %vm612_vm2, %v1585_v11, 0.0  ;;  %v889_v20 = vpop.xlane.xlu1 %888 }
 0x415   : > { %669 = vadd.xlane.f32.xlu1 %v668_v12  ;;  %v890_v21 = vsub.f32 %v886_v58, %v889_v20  ;;  %v1575_v58 = vld [vmem:[%s1890_s7 + $0x8] sm:$0xff]  }
 0x416   : > { %1523 = vmatpush3.bf16.msra.mxu1 %v1575_v58 }
 0x417   : > { %v891_v22 = vmul.f32 1.442695, %v890_v21  ;;  %1536 = vmatprep.subr.bf16.mxu1 %v1610_v8 }
 0x41b   : > { %v1587_v13 = vpop.eup %1586 }
 0x41c   : > { %v1001_v14 = vpop.xlane.xlu0 %1000  ;;  %v781_v15 = vsel %vm612_vm2, %v1587_v13, 0.0 }
 0x41d   : > { %v1002_v16 = vsub.f32 %v998_v2, %v1001_v14  ;;  %782 = vadd.xlane.f32.xlu0 %v781_v15 }
 0x41f   : > { %v1003_v17 = vmul.f32 1.442695, %v1002_v16 }
 0x421   : > { %1588 = vpow2.f32 %v1003_v17 }
 0x422   : > { %1590 = vpow2.f32 %v891_v22 }
 0x426   : > { %674 = vrot.lane.b32.xlu1 %v1752_v25, %s1619_s28 }
 0x42b   : > { %v1589_v18 = vpop.eup %1588 }
 0x42c   : > { %v1005_v19 = vsel %vm612_vm2, %v1589_v18, 0.0  ;;  %v1591_v23 = vpop.eup %1590 }
 0x42d   : > { %1006 = vadd.xlane.f32.xlu0 %v1005_v19  ;;  %v893_v24 = vsel %vm612_vm2, %v1591_v23, 0.0 }
 0x443   : > { %787 = vrot.lane.b32.xlu0 %v1752_v25, %s1620_s29 }
 0x44a   : > { %894 = vadd.xlane.f32.xlu1 %v893_v24 }
 0x45b   : > { %899 = vrot.lane.b32.xlu1 %v1752_v25, %s1621_s30 }
 0x45f   : > { %1011 = vrot.lane.b32.xlu1 %v1752_v25, %s1622_s16 }
 0x4a2   : > { %v670_v26 = vpop.xlane.xlu1 %669 }
 0x4a3   : > { %1592 = vrcp.f32 %v670_v26  ;;  %v1576_v26 = vld [vmem:[%s1894_s11] sm:$0xff]  }
 0x4a6   : > { %v675_v27 = vpop.permute.xlu1 %674 }
 0x4a7   : > { %v681_v28 = vsel %vm679_vm4, %v675_v27, 0  ;;  %v1578_v27 = vld [vmem:[%s1896_s13] sm:$0xff]  }
 0x4a8   : > { %1479 = vmatpush3.bf16.msra.mxu0 %v681_v28  ;;  %v1579_v28 = vld [vmem:[%s1896_s13 + $0x8] sm:$0xff]  }
 0x4a9   : > { %1490 = vmatprep.subr.bf16.mxu0 %v1610_v8 }
 0x4aa   : > { %v783_v30 = vpop.xlane.xlu0 %782 }
 0x4ab   : > { %1594 = vrcp.f32 %v783_v30 }
 0x4ad   : > { %v1593_v29 = vpop.eup %1592 }
 0x4ae   : > { %v672_v31 = vmul.f32 %v1593_v29, %v1585_v11 }
 0x4b0   : > { %v673_v32 = vpack.c.bf16 %v672_v31, %v672_v31 }
 0x4b2   : > { %1481 = vmatmul.mubr.msk.bf16.vlgmr.msra.gmra.mrb[4].mxu0 %vm612_vm2, %v673_v32 }
 0x4b3   : > { %1492 = vmatprep.mubr.msk.bf16.mxu0 %vm1611_vm1, %v1610_v8 }
 0x4b5   : > { %v1595_v25 = vpop.eup %1594 }
 0x4b6   : > { %v785_v34 = vmul.f32 %v1595_v25, %v1587_v13  ;;  %v1419_v13 = vld [vmem:[%s1891_s8] ss:$0 sm:$0xff] }
 0x4b7   : > { %v1420_v25 = vld [vmem:[%s1892_s9] ss:$0 sm:$0xff] }
 0x4b8   : > { %v786_v37 = vpack.c.bf16 %v785_v34, %v785_v34  ;;  %v1421_v34 = vld [vmem:[%s1893_s10] ss:$0 sm:$0xff] }
 0x4ba   : > { %v1007_v33 = vpop.xlane.xlu0 %1006 }
 0x4be   : > { %v788_v35 = vpop.permute.xlu0 %787 }
 0x4bf   : > { %v793_v36 = vsel %vm679_vm4, %v788_v35, 0 }
 0x4c0   : > { %1491 = vmatpush3.bf16.msra.mxu0 %v793_v36 }
 0x4c1   : > { %1502 = vmatprep.subr.bf16.mxu0 %v1610_v8 }
 0x4c3   : > { %1493 = vmatmul.mubr.msk.bf16.vlgmr.msra.gmra.mrb[8].mxu0 %vm612_vm2, %v786_v37 }
 0x4c4   : > { %1504 = vmatprep.mubr.msk.bf16.mxu0 %vm1611_vm1, %v1610_v8 }
 0x4d7   : > { %v895_v38 = vpop.xlane.xlu1 %894 }
 0x4d8   : > { %1596 = vrcp.f32 %v895_v38  ;;  %v1580_v38 = vld [vmem:[%s1896_s13 + $0x10] sm:$0xff]  }
 0x4d9   : > { %1598 = vrcp.f32 %v1007_v33 }
 0x4db   : > { %v900_v39 = vpop.permute.xlu1 %899 }
 0x4dc   : > { %v905_v40 = vsel %vm679_vm4, %v900_v39, 0  ;;  %v1581_v39 = vld [vmem:[%s1896_s13 + $0x18] sm:$0xff]  }
 0x4dd   : > { %1503 = vmatpush3.bf16.msra.mxu0 %v905_v40  ;;  %v1422_v40 = vld [vmem:[%s1895_s12] ss:$0 sm:$0xff] }
 0x4de   : > { %1514 = vmatprep.subr.bf16.mxu0 %v1610_v8 }
 0x4df   : > { %v1012_v43 = vpop.permute.xlu1 %1011 }
 0x4e0   : > { %v1017_v46 = vsel %vm679_vm4, %v1012_v43, 0 }
 0x4e2   : > { %v1597_v41 = vpop.eup %1596 }
 0x4e3   : > { %v897_v42 = vmul.f32 %v1597_v41, %v1591_v23  ;;  %v1599_v45 = vpop.eup %1598 }
 0x4e4   : > { %v1009_v47 = vmul.f32 %v1599_v45, %v1589_v18 }
 0x4e5   : > { %v898_v44 = vpack.c.bf16 %v897_v42, %v897_v42 }
 0x4e6   : > { %v1010_v48 = vpack.c.bf16 %v1009_v47, %v1009_v47 }
 0x4e7   : > { %1505 = vmatmul.mubr.msk.bf16.vlgmr.msra.gmra.mrb[12].mxu0 %vm612_vm2, %v898_v44 }
 0x4e8   : > { %1515 = vmatpush3.bf16.msra.mxu0 %v1017_v46  ;;  %1516 = vmatprep.mubr.msk.bf16.mxu0 %vm1611_vm1, %v1610_v8 }
 0x4e9   : > { %1528 = vmatprep.subr.bf16.mxu0 %v1610_v8 }
 0x4ef   : > { %1517 = vmatmul.mubr.msk.bf16.vlgmr.msra.gmra.mrb[16].mxu0 %vm612_vm2, %v1010_v48  ;;  %v1431_v48 = vld [vmem:[%s1897_s14] ss:$0 sm:$0xff] }
 0x4f0   : > { %1532 = vmatprep.mubr.msk.bf16.mxu0 %vm1611_vm1, %v1610_v8  ;;  %1529 = vmatpush3.bf16.msra.mxu0 %v1576_v26 }
 0x4f1   : > { %1530 = vmatprep.subr.bf16.mxu0 %v1610_v8 }
 0x585   : > { %v717_v49 = vpop.f32.mrb[4].mxu0 }
 0x586   : > { %v1482_v50 = vpop.f32.mrb[5].mxu0 }
 0x587   : > { %v720_v51 = vpop.f32.mrb[6].mxu0 }
 0x588   : > { %v1483_v52 = vpop.f32.mrb[7].mxu0 }
 0x596   : > { %v829_v53 = vpop.f32.mrb[8].mxu0 }
 0x597   : > { %1060 = vrot.lane.b32.xlu0 %v829_v53, %s1623_s1  ;;  %v1494_v54 = vpop.f32.mrb[9].mxu0 }
 0x598   : > { %v832_v55 = vpop.f32.mrb[10].mxu0 }
 0x599   : > { %v1495_v56 = vpop.f32.mrb[11].mxu0 }
 0x5ba   : > { %v941_v59 = vpop.f32.mrb[12].mxu0 }
 0x5bb   : > { %1064 = vrot.lane.b32.xlu1 %v941_v59, %s1624_s23  ;;  %v1506_v60 = vpop.f32.mrb[13].mxu0 }
 0x5bc   : > { %v944_v61 = vpop.f32.mrb[14].mxu0 }
 0x5bd   : > { %v1507_v62 = vpop.f32.mrb[15].mxu0 }
 0x5c2   : > { %v1053_v63 = vpop.f32.mrb[16].mxu0 }
 0x5c3   : > { %1068 = vrot.lane.b32.xlu0 %v1053_v63, %s1625_s24  ;;  %v1518_v1 = vpop.f32.mrb[17].mxu0 }
 0x5c4   : > { %v1056_v2 = vpop.f32.mrb[18].mxu0 }
 0x5c5   : > { %v1519_v3 = vpop.f32.mrb[19].mxu0 }
 0x609   : > { %v1061_v4 = vpop.permute.xlu0 %1060 }
 0x60a   : > { %v1071_v6 = vsel %vm612_vm2, %v717_v49, %v1061_v4 }
 0x62d   : > { %v1065_v5 = vpop.permute.xlu1 %1064 }
 0x62e   : > { %v1073_v7 = vsel %vm1072_vm5, %v1071_v6, %v1065_v5 }
 0x635   : > { %v1069_v9 = vpop.permute.xlu0 %1068 }
 0x636   : > { %v1075_v10 = vsel %vm1074_vm6, %v1073_v7, %v1069_v9 }
 0x637   : > { %v1076_v11 = vpack.c.bf16 %v1075_v10, %v1075_v10 }
 0x639   : > { %1525 = vmatmul.mubr.msk.bf16.vlgmr.msra.gmra.mrb[16].mxu1 %vm511_vm0, %v1076_v11 }
 0x63a   : > { %1544 = vmatprep.mubr.msk.bf16.mxu1 %vm1611_vm1, %v1610_v8  ;;  %1537 = vmatpush3.bf16.msra.mxu1 %v1578_v27 }
 0x63b   : > { %1538 = vmatprep.subr.bf16.mxu1 %v1610_v8 }
 0x63e   : > { %1539 = vmatpush3.bf16.msra.mxu1 %v1579_v28 }
 0x63f   : > { %1540 = vmatprep.subr.bf16.mxu1 %v1610_v8 }
 0x642   : > { %1541 = vmatpush3.bf16.msra.mxu1 %v1580_v38 }
 0x643   : > { %1542 = vmatprep.subr.bf16.mxu1 %v1610_v8 }
 0x646   : > { %1543 = vmatpush3.bf16.msra.mxu1 %v1581_v39 }
 0x70c   : > { %v1130_v12 = vpop.f32.mrb[16].mxu1 }
 0x70d   : > { %v1136_v14 = vadd.f32 %v1130_v12, %v1720_v0  ;;  %v1526_v15 = vpop.f32.mrb[17].mxu1  ;;  %v1577_v0 = vld [vmem:[%s1894_s11 + $0x8] sm:$0xff]  }
 0x70e   : > { %v1133_v16 = vpop.f32.mrb[18].mxu1  ;;  %1531 = vmatpush3.bf16.msra.mxu0 %v1577_v0 }
 0x70f   : > { %v1144_v17 = vadd.f32 %v1419_v13, %v1136_v14  ;;  %v1527_v18 = vpop.f32.mrb[19].mxu1 }
 0x711   : > { %v1147_v19 = vsel %vm511_vm0, %v1144_v17, 0.0 }
 0x712   : > { %1148 = vadd.xlane.f32.xlu1 %v1147_v19 }
 0x79f   : > { %v1149_v20 = vpop.xlane.xlu1 %1148 }
 0x7a0   : > { %v1150_v21 = vmul.f32 0.03125, %v1149_v20 }
 0x7a2   : > { %v1151_v22 = vsub.f32 %v1144_v17, %v1150_v21 }
 0x7a4   : > { %v1152_v23 = vmul.f32 %v1151_v22, %v1151_v22 }
 0x7a6   : > { %v1153_v24 = vsel %vm511_vm0, %v1152_v23, 0.0 }
 0x7a7   : > { %1154 = vadd.xlane.f32.xlu0 %v1153_v24 }
 0x834   : > { %v1155_v29 = vpop.xlane.xlu0 %1154 }
 0x835   : > { %v1156_v30 = vmul.f32 0.03125, %v1155_v29 }
 0x837   : > { %v1157_v31 = vadd.f32 1e-06, %v1156_v30 }
 0x839   : > { %1600 = vrsqrt.f32 %v1157_v31 }
 0x843   : > { %v1601_v32 = vpop.eup %1600 }
 0x844   : > { %v1159_v33 = vmul.f32 %v1601_v32, %v1151_v22 }
 0x846   : > { %v1166_v35 = vmul.f32 %v1420_v25, %v1159_v33 }
 0x848   : > { %v1173_v36 = vadd.f32 %v1421_v34, %v1166_v35 }
 0x84a   : > { %v1174_v37 = vpack.c.bf16 %v1173_v36, %v1173_v36 }
 0x84c   : > { %1533 = vmatmul.mubr.msk.bf16.vlgmr.msra.gmra.mrb[20].mxu0 %vm511_vm0, %v1174_v37 }
 0x91f   : > { %v1235_v41 = vpop.f32.mrb[20].mxu0 }
 0x920   : > { %v1236_v42 = vadd.f32 %v1422_v40, %v1235_v41  ;;  %v1534_v43 = vpop.f32.mrb[21].mxu0 }
 0x921   : > { %v1238_v44 = vpop.f32.mrb[22].mxu0 }
 0x922   : > { %v1241_v45 = vmax.f32 %v1236_v42, 0.0  ;;  %v1535_v46 = vpop.f32.mrb[23].mxu0 }
 0x924   : > { %v1242_v47 = vpack.c.bf16 %v1241_v45, %v1241_v45 }
 0x926   : > { %1545 = vmatmul.mubr.msk.bf16.vlgmr.msra.gmra.mrb[20].mxu1 %vm1275_vm7, %v1242_v47 }
 0x9f9   : > { %v1313_v8 = vpop.f32.mrb[20].mxu1 }
 0x9fa   : > { %v1319_v49 = vadd.f32 %v1313_v8, %v1144_v17  ;;  %v1546_v50 = vpop.f32.mrb[21].mxu1 }
 0x9fb   : > { %v1316_v51 = vpop.f32.mrb[22].mxu1 }
 0x9fc   : > { %v1327_v52 = vadd.f32 %v1431_v48, %v1319_v49  ;;  %v1547_v53 = vpop.f32.mrb[23].mxu1 }
 0x9fe   : > { %1328 = vst.msk [vmem:[%s506_s21] sm:$0xff] %vm511_vm0, %v1327_v52 }
 0x9ff PF: > { %s25_s17 = sadd.s32 1, %s1608_s17  }
 0xa00   : > { %p22_p4 = scmp.ge.s32.totalorder %s25_s17, 4  }
 0xa02   :  { %24 = sbr.rel (!%p22_p4) target bundleno = 1 (0x1), region = 113 }

// kernel: transformer_forward.11
= control target key start
LH: loop header
LB: loop body
LE: loop exit
PB: predicated region body
PF: predicated region fallthrough
CT: control target
= control target key end

     0   :  { %vm26_vm0 = vcmask 261120   ;;  %s318_s0 = inlined_call_operand.vmem [shape: f32[16,32], index: 0, kind: input, shape index: {}]   ;;  %s319_s1 = inlined_call_operand.vmem [shape: f32[1,32], index: 1, kind: input, shape index: {}]   ;;  %s320_s2 = inlined_call_operand.vmem [shape: f32[1,32], index: 2, kind: input, shape index: {}]   ;;  %s321_s3 = inlined_call_operand.vmem [shape: bf16[32,64], index: 3, kind: input, shape index: {}]   ;;  %s322_s4 = inlined_call_operand.vmem [shape: f32[1,64], index: 4, kind: input, shape index: {}]   ;;  %s323_s5 = inlined_call_operand.hbm [shape: f32[16,64], index: 5, kind: output, shape index: {}]  }
   0x1   :  { %v22_v0 = vld [vmem:[%s318_s0] sm:$0xff]  ;;  %v23_v1 = vld [vmem:[%s318_s0 + $0x8] sm:$0xff] }
   0x2   :  { %v27_v2 = vsel %vm26_vm0, %v22_v0, 0.0 }
   0x3   :  { %28 = vadd.xlane.f32.xlu0 %v27_v2 }
   0x4   :  { %10 = vsyncpa [#allocation3], 0  ;;  %v30_v3 = vsel %vm26_vm0, %v23_v1, 0.0  ;;  %v201_v14 = vld [vmem:[%s321_s3] sm:$0xff]   ;;  %v239_v15 = vmov 0.0   ;;  %v202_v16 = vld [vmem:[%s321_s3 + $0x8] sm:$0xff]  }
   0x5   :  { %188 = vmatprep.subr.bf16.mxu0 %v239_v15  ;;  %vm240_vm1 = vmmov 0   ;;  %v179_v25 = vld [vmem:[%s319_s1] ss:$0 sm:$0xff]  ;;  %vm138_vm2 = vcmask 523264   ;;  %s241_s1 = smov [#allocation2]  }
   0x6   :  { %189 = vmatpush3.bf16.msra.mxu0 %v201_v14  ;;  %192 = vmatprep.mubr.msk.bf16.mxu0 %vm240_vm1, %v239_v15  ;;  %v180_v29 = vld [vmem:[%s320_s2] ss:$0 sm:$0xff]  ;;  %s168_s2 = sshll.u32 %s241_s1, 4  ;;  %s169_s2 = int_to_ptr.vmem [resolvable:$true] %s168_s2 }
   0x7   :  { %31 = vadd.xlane.f32.xlu0 %v30_v3  ;;  %190 = vmatprep.subr.bf16.mxu0 %v239_v15  ;;  %v181_v34 = vld [vmem:[%s322_s4] ss:$0 sm:$0xff]  ;;  %s215_s4 = scalar_lea.vmem %s169_s2, 256  ;;  %p220_p1 = scmp.lt.s32.totalorder %s169_s2, %s169_s2 }
   0x8   :  { %p216_p0 = scmp.ne.s32.totalorder %s169_s2, %s215_s4  ;;  %p221_p2 = scmp.lt.s32.totalorder %s215_s4, %s215_s4 }
   0xa   :  { %191 = vmatpush3.bf16.msra.mxu0 %v202_v16  ;;  %p222_p3 = por %p221_p2, %p220_p1 }
   0xc   :  { %p223_p4 = pnand %p222_p3, %p216_p0 }
  0x90   :  { %v29_v4 = vpop.xlane.xlu0 %28 }
  0x91   :  { %v34_v5 = vmul.f32 0.03125, %v29_v4 }
  0x93   :  { %v36_v6 = vsub.f32 %v22_v0, %v34_v5 }
  0x94   :  { %v32_v7 = vpop.xlane.xlu0 %31 }
  0x95   :  { %v35_v8 = vmul.f32 0.03125, %v32_v7  ;;  %v38_v9 = vmul.f32 %v36_v6, %v36_v6 }
  0x97   :  { %v37_v10 = vsub.f32 %v23_v1, %v35_v8  ;;  %v40_v11 = vsel %vm26_vm0, %v38_v9, 0.0 }
  0x98   :  { %41 = vadd.xlane.f32.xlu1 %v40_v11 }
  0x99   :  { %v39_v12 = vmul.f32 %v37_v10, %v37_v10 }
  0x9b   :  { %v43_v13 = vsel %vm26_vm0, %v39_v12, 0.0 }
  0x9c   :  { %44 = vadd.xlane.f32.xlu1 %v43_v13 }
 0x125   :  { %v42_v17 = vpop.xlane.xlu1 %41 }
 0x126   :  { %v46_v18 = vmul.f32 0.03125, %v42_v17 }
 0x128   :  { %v48_v19 = vadd.f32 1e-06, %v46_v18 }
 0x129   :  { %v45_v20 = vpop.xlane.xlu1 %44 }
 0x12a   :  { %203 = vrsqrt.f32 %v48_v19  ;;  %v47_v21 = vmul.f32 0.03125, %v45_v20 }
 0x12c   :  { %v49_v22 = vadd.f32 1e-06, %v47_v21 }
 0x12e   :  { %205 = vrsqrt.f32 %v49_v22 }
 0x134   :  { %v204_v23 = vpop.eup %203 }
 0x135   :  { %v52_v24 = vmul.f32 %v204_v23, %v36_v6 }
 0x137   :  { %v60_v28 = vmul.f32 %v179_v25, %v52_v24 }
 0x138   :  { %v206_v26 = vpop.eup %205 }
 0x139   :  { %v53_v27 = vmul.f32 %v206_v26, %v37_v10  ;;  %v68_v31 = vadd.f32 %v180_v29, %v60_v28 }
 0x13b   :  { %v61_v30 = vmul.f32 %v179_v25, %v53_v27 }
 0x13d   :  { %v69_v32 = vadd.f32 %v180_v29, %v61_v30 }
 0x13f   :  { %v70_v33 = vpack.c.bf16 %v69_v32, %v68_v31 }
 0x141   :  { %193 = vmatmul.mubr.msk.bf16.vlgmr.msra.gmra.mrb[0].mxu0 %vm26_vm0, %v70_v33 }
 0x214   :  { %v131_v35 = vpop.f32.mrb[0].mxu0 }
 0x215   :  { %v132_v36 = vadd.f32 %v181_v34, %v131_v35  ;;  %v194_v37 = vpop.f32.mrb[1].mxu0 }
 0x216   :  { %v134_v38 = vpop.f32.mrb[2].mxu0 }
 0x217   :  { %v135_v39 = vadd.f32 %v181_v34, %v134_v38  ;;  %v195_v40 = vpop.f32.mrb[3].mxu0  ;;  %v139_v41 = vsel %vm138_vm2, %v132_v36, -inf }
 0x218   :  { %140 = vmax.xlane.f32.xlu0 %v139_v41 }
 0x219   :  { %v142_v42 = vsel %vm138_vm2, %v135_v39, -inf }
 0x21a   :  { %143 = vmax.xlane.f32.xlu1 %v142_v42 }
 0x2a5   :  { %v141_v43 = vpop.xlane.xlu0 %140 }
 0x2a6   :  { %v145_v44 = vsub.f32 %v132_v36, %v141_v43 }
 0x2a7   :  { %v144_v45 = vpop.xlane.xlu1 %143 }
 0x2a8   :  { %v147_v46 = vmul.f32 1.442695, %v145_v44  ;;  %v146_v47 = vsub.f32 %v135_v39, %v144_v45 }
 0x2aa   :  { %207 = vpow2.f32 %v147_v46  ;;  %v149_v48 = vmul.f32 1.442695, %v146_v47 }
 0x2ac   :  { %209 = vpow2.f32 %v149_v48 }
 0x2b4   :  { %v208_v49 = vpop.eup %207 }
 0x2b5   :  { %v151_v50 = vsel %vm138_vm2, %v208_v49, 0.0 }
 0x2b6   :  { %v210_v51 = vpop.eup %209  ;;  %152 = vadd.xlane.f32.xlu0 %v151_v50 }
 0x2b7   :  { %v154_v52 = vsel %vm138_vm2, %v210_v51, 0.0 }
 0x2b8   :  { %155 = vadd.xlane.f32.xlu1 %v154_v52 }
 0x343   :  { %v153_v53 = vpop.xlane.xlu0 %152 }
 0x344   :  { %211 = vrcp.f32 %v153_v53 }
 0x345   :  { %v156_v54 = vpop.xlane.xlu1 %155 }
 0x346   :  { %213 = vrcp.f32 %v156_v54 }
 0x34e   :  { %v212_v55 = vpop.eup %211 }
 0x34f   :  { %v158_v56 = vmul.f32 %v212_v55, %v208_v49 }
 0x350   :  { %v214_v57 = vpop.eup %213 }
 0x351   :  { %v160_v58 = vmul.f32 %v214_v57, %v210_v51  ;;  %161 = vst.msk [vmem:[#allocation2] sm:$0xff] %vm138_vm2, %v158_v56 }
 0x353   :  { %162 = vst.msk [vmem:[#allocation2 + $0x8] sm:$0xff] %vm138_vm2, %v160_v58 }
 0x354   :  { %226 = shalt.err (!%p223_p4)
}
 0x355   :  { %s227_s7 = scalar_lea.hbm %s323_s5, 256 }
 0x356   :  { %p228_p5 = scmp.ne.s32.totalorder %s323_s5, %s227_s7  ;;  %p231_p6 = scmp.lt.u32.totalorder %s227_s7, %s323_s5 }
 0x358   :  { %p233_p7 = pnand %p231_p6, %p228_p5 }
 0x35a   :  { %236 = shalt.err (!%p233_p7)
}
 0x35b   :  { %s242_s12 = smov 128   ;;  %s243_s13 = smov 8  }
 0x35c   :  { %174 = dma.vmem_to_hbm [thread:$0]  %s169_s2, 256, %s323_s5, [#allocation3], %s242_s12, %s242_s12, %s243_s13  }
 0x35d   :  { %237 = dma.done.wait [#allocation3], 256  }
 0x35e   :  { %238 = vsyncadd [#allocation3], 4294967040 }
 0x35f   :  { %178 = vsyncpa [#allocation3], 1 }

// kernel: transformer_forward.9
= control target key start
LH: loop header
LB: loop body
LE: loop exit
PB: predicated region body
PF: predicated region fallthrough
CT: control target
= control target key end

     0   :  { %s3149_s0 = inlined_call_operand.vmem [shape: f32[2,8,32], index: 0, kind: input, shape index: {}]   ;;  %s3150_s1 = inlined_call_operand.vmem [shape: f32[2,8,32], index: 1, kind: input, shape index: {}]   ;;  %s3151_s2 = inlined_call_operand.vmem [shape: f32[2,1,8,8], index: 2, kind: input, shape index: {}]   ;;  %s3152_s3 = inlined_call_operand.vmem [shape: f32[1,32], index: 3, kind: input, shape index: {}]   ;;  %s3153_s4 = inlined_call_operand.vmem [shape: f32[1,32], index: 4, kind: input, shape index: {}]   ;;  %s3154_s5 = inlined_call_operand.vmem [shape: bf16[32,96], index: 5, kind: input, shape index: {}]   ;;  %s3155_s6 = inlined_call_operand.vmem [shape: f32[1,96], index: 6, kind: input, shape index: {}]   ;;  %s3156_s7 = inlined_call_operand.vmem [shape: bf16[32,32], index: 7, kind: input, shape index: {}]   ;;  %s3157_s8 = inlined_call_operand.vmem [shape: f32[1,32], index: 8, kind: input, shape index: {}]   ;;  %s3158_s9 = inlined_call_operand.vmem [shape: f32[1,32], index: 9, kind: input, shape index: {}]   ;;  %s3159_s10 = inlined_call_operand.vmem [shape: f32[1,32], index: 10, kind: input, shape index: {}]   ;;  %s3160_s11 = inlined_call_operand.vmem [shape: bf16[32,32], index: 11, kind: input, shape index: {}]   ;;  %s3161_s12 = inlined_call_operand.vmem [shape: f32[1,32], index: 12, kind: input, shape index: {}]   ;;  %s3162_s13 = inlined_call_operand.vmem [shape: bf16[32,64], index: 13, kind: input, shape index: {}]   ;;  %s3163_s14 = inlined_call_operand.vmem [shape: f32[1,64], index: 14, kind: input, shape index: {}]   ;;  %s3164_s15 = inlined_call_operand.vmem [shape: bf16[32,32], index: 15, kind: input, shape index: {}]   ;;  %s3165_s16 = inlined_call_operand.vmem [shape: f32[1,32], index: 16, kind: input, shape index: {}]   ;;  %s3166_s17 = inlined_call_operand.vmem [shape: f32[1,32], index: 17, kind: input, shape index: {}]   ;;  %s3167_s18 = inlined_call_operand.vmem [shape: f32[1,32], index: 18, kind: input, shape index: {}]   ;;  %s3168_s19 = inlined_call_operand.vmem [shape: bf16[32,64], index: 19, kind: input, shape index: {}]   ;;  %s3169_s20 = inlined_call_operand.vmem [shape: f32[1,64], index: 20, kind: input, shape index: {}]   ;;  %s3170_s21 = inlined_call_operand.vmem [shape: bf16[64,32], index: 21, kind: input, shape index: {}]   ;;  %s3171_s22 = inlined_call_operand.vmem [shape: f32[1,32], index: 22, kind: input, shape index: {}]   ;;  %s3172_s23 = inlined_call_operand.vmem [shape: f32[2,8,32], index: 23, kind: output, shape index: {}]  }
   0x1   :  { %3182 = sst [smem:[#allocation2_spill]] %s3149_s0 }
   0x2   :  { %3183 = sst [smem:[#allocation3_spill]] %s3150_s1 }
   0x3   :  { %3184 = sst [smem:[#allocation4_spill]] %s3151_s2 }
   0x4   :  { %3185 = sst [smem:[#allocation5_spill]] %s3152_s3 }
   0x5   :  { %3186 = sst [smem:[#allocation6_spill]] %s3153_s4  ;;  %s2827_s4 = smov 0  }
   0x6   :  { %3187 = sst [smem:[#allocation7_spill]] %s3154_s5 }
   0x7   :  { %3188 = sst [smem:[#allocation8_spill]] %s3155_s6 }
   0x8   :  { %3189 = sst [smem:[#allocation9_spill]] %s3156_s7 }
   0x9 LB: > { %s2331_s30 = sadd.s32 4294967295, %s2689_s4   ;;  %p2335_p0 = scmp.ge.s32.totalorder %s2689_s4, 1  ;;  %s2689_s4 = sphi %s2827_s4, %s33_s4  }
   0xa   : > { %p654_p1 = scmp.lt.s32.totalorder %s2689_s4, 3 }
   0xc   : > { %p655_p2 = pnand %p2335_p0, %p654_p1 }
   0xd   : > { %p724_p3 = scmp.lt.s32.totalorder (!%p655_p2), %s2331_s30, 1  ;;  %vm745_vm0 = vcmask (!%p655_p2), 261120   ;;  %s3190_s1 = sld [smem:[#allocation2_spill]] (!%p655_p2)  ;;  %v2691_v8 = vmov (!%p655_p2), 0.0   ;;  %vm2692_vm1 = vmmov (!%p655_p2), 0   ;;  %vm846_vm2 = vcmask (!%p655_p2), 64512  }
   0xe   : > { %658 = sbr.rel (%p655_p2) target bundleno = 4343 (0x10f7), region = 112  ;;  %s3191_s27 = sld [smem:[#allocation7_spill]] (!%p655_p2)  ;;  %2449 = vmatprep.subr.bf16.mxu1 (!%p655_p2), %v2691_v8  ;;  %2453 = vmatprep.mubr.msk.bf16.mxu1 (!%p655_p2), %vm2692_vm1, %v2691_v8  ;;  %vm913_vm4 = vcmask (!%p655_p2), 1043456   ;;  %vm1306_vm5 = vcmask (!%p655_p2), 130048   ;;  %vm1308_vm6 = vcmask (!%p655_p2), 195584   ;;  %vm2200_vm7 = vcmask (!%p655_p2), 523264  }
   0xf   : > { %2463 = vmatprep.subr.bf16.mxu0 (!%p655_p2), %v2691_v8  ;;  %2465 = vmatprep.mubr.msk.bf16.mxu0 (!%p655_p2), %vm2692_vm1, %v2691_v8  ;;  %s3192_s0 = sld [smem:[#allocation5_spill]] (!%p655_p2)  ;;  %s3193_s5 = sld [smem:[#allocation6_spill]] (!%p655_p2) }
  0x10   : > { %s3194_s2 = sld [smem:[#allocation8_spill]] (!%p655_p2)  ;;  %s2693_s6 = smov (!%p655_p2), 120  }
  0x11   : > { %s3180_s7 = smov (!%p655_p2), 96   ;;  %s3181_s28 = smov (!%p655_p2), 88  }
  0x12   : > { %s3175_s29 = smov (!%p655_p2), 80   ;;  %s2697_s3 = smov (!%p655_p2), 112  }
  0x13   : > { %s2701_s25 = smov (!%p655_p2), 56  }
  0x14   : > { %v2629_v7 = vld [vmem:[%s3191_s27] sm:$0xff] (!%p655_p2)   ;;  %v2630_v9 = vld [vmem:[%s3191_s27 + $0x8] sm:$0xff] (!%p655_p2)  }
  0x15   : > { %s3206_s30 = smov (!%p724_p3, %s2331_s30), 1  ;;  %2450 = vmatpush3.bf16.msra.mxu1 %v2629_v7  ;;  %v2340_v14 = vld [vmem:[%s3192_s0] ss:$0 sm:$0xff]  ;;  %s3176_s0 = smov 72  }
  0x16   : > { %s2835_s24 = sshll.u32 %s3206_s30, 3  ;;  %2451 = vmatprep.subr.bf16.mxu1 %v2691_v8  ;;  %v2341_v16 = vld [vmem:[%s3193_s5] ss:$0 sm:$0xff]  ;;  %s2699_s30 = smov 104  }
  0x17   : > { %s727_s26 = scalar_lea.vmem %s3190_s1, %s2835_s24  ;;  %v2342_v20 = vld [vmem:[%s3194_s2] ss:$0 sm:$0xff]  ;;  %s3195_s1 = sld [smem:[#allocation4_spill]] }
  0x18   : > { %v2841_v0 = vld [vmem:[%s727_s26] sm:$0xff]  ;;  %s2700_s2 = smov 64   ;;  %s2702_s5 = smov 48  }
  0x19   : > { %v746_v1 = vsel %vm745_vm0, %v2841_v0, 0.0  ;;  %2452 = vmatpush3.bf16.msra.mxu1 %v2630_v9 }
  0x1a   : > { %747 = vadd.xlane.f32.xlu0 %v746_v1  ;;  %2457 = vmatprep.subr.bf16.mxu1 %v2691_v8 }
  0x1d   : > { %s735_s26 = scalar_lea.vmem %s3195_s1, %s2835_s24  ;;  %s2703_s1 = smov 40  }
  0x1e   : > { %v841_v38 = vld [vmem:[%s735_s26] sm:$0xff]  ;;  %s3179_s26 = smov 8  }
  0x1f   : > { %vm894_vm3 = vcmp.eq.f32.partialorder %v841_v38, 0.0 }
  0xa7   : > { %v748_v2 = vpop.xlane.xlu0 %747 }
  0xa8   : > { %v750_v3 = vmul.f32 0.03125, %v748_v2 }
  0xaa   : > { %v751_v4 = vsub.f32 %v2841_v0, %v750_v3 }
  0xac   : > { %v752_v5 = vmul.f32 %v751_v4, %v751_v4 }
  0xae   : > { %v753_v6 = vsel %vm745_vm0, %v752_v5, 0.0 }
  0xaf   : > { %754 = vadd.xlane.f32.xlu0 %v753_v6 }
 0x13c   : > { %v755_v10 = vpop.xlane.xlu0 %754 }
 0x13d   : > { %v756_v11 = vmul.f32 0.03125, %v755_v10 }
 0x13f   : > { %v757_v12 = vadd.f32 1e-06, %v756_v11 }
 0x141   : > { %2645 = vrsqrt.f32 %v757_v12 }
 0x14b   : > { %v2646_v13 = vpop.eup %2645 }
 0x14c   : > { %v759_v15 = vmul.f32 %v2646_v13, %v751_v4 }
 0x14e   : > { %v766_v17 = vmul.f32 %v2340_v14, %v759_v15 }
 0x150   : > { %v773_v18 = vadd.f32 %v2341_v16, %v766_v17 }
 0x152   : > { %v774_v19 = vpack.c.bf16 %v773_v18, %v773_v18 }
 0x154   : > { %2454 = vmatmul.mubr.msk.bf16.vlgmr.msra.gmra.mrb[0].mxu1 %vm745_vm0, %v774_v19 }
 0x155   : > { %2459 = vmatprep.mubr.msk.bf16.mxu1 %vm2692_vm1, %v2691_v8 }
 0x227   : > { %v835_v21 = vpop.f32.mrb[0].mxu1 }
 0x228   : > { %v836_v22 = vadd.f32 %v2342_v20, %v835_v21  ;;  %v2455_v23 = vpop.f32.mrb[1].mxu1 }
 0x229   : > { %v838_v24 = vpop.f32.mrb[2].mxu1 }
 0x22a   : > { %v2873_v25 = vpack.c.bf16 %v836_v22, %v836_v22  ;;  %v2456_v26 = vpop.f32.mrb[3].mxu1 }
 0x22c   : > { %957 = vrot.lane.b32.xlu0 %v2873_v25, %s2693_s6  ;;  %844 = vrot.lane.b32.xlu1 %v2873_v25, %s3180_s7  ;;  %s3201_s7 = smov 80  }
 0x230   : > { %959 = vrot.lane.b32.xlu1 %v2873_v25, %s3181_s28  ;;  %s3202_s28 = smov 8  }
 0x234   : > { %1071 = vrot.lane.b32.xlu1 %v2873_v25, %s3175_s29 }
 0x238   : > { %1069 = vrot.lane.b32.xlu1 %v2873_v25, %s2697_s3 }
 0x23c   : > { %1183 = vrot.lane.b32.xlu1 %v2873_v25, %s3176_s0  ;;  %s3178_s0 = smov 16  }
 0x240   : > { %1181 = vrot.lane.b32.xlu1 %v2873_v25, %s2699_s30 }
 0x29e   : > { %v845_v27 = vpop.permute.xlu1 %844  ;;  %v958_v32 = vpop.permute.xlu0 %957 }
 0x29f   : > { %v851_v28 = vsel %vm846_vm2, %v845_v27, 0 }
 0x2a0   : > { %2458 = vmatpush3.bf16.xpose.msra.mxu1 %v851_v28 }
 0x2a1   : > { %2469 = vmatprep.subr.bf16.mxu1 %v2691_v8 }
 0x2a2   : > { %v960_v29 = vpop.permute.xlu1 %959 }
 0x2a3   : > { %v965_v30 = vsel %vm846_vm2, %v960_v29, 0 }
 0x2a6   : > { %v1072_v31 = vpop.permute.xlu1 %1071 }
 0x2a7   : > { %2460 = vmatmul.mubr.msk.bf16.vlgmr.msra.gmra.mrb[4].mxu1 %vm846_vm2, %v2873_v25  ;;  %v1077_v34 = vsel %vm846_vm2, %v1072_v31, 0 }
 0x2a8   : > { %2470 = vmatpush3.bf16.xpose.msra.mxu1 %v965_v30  ;;  %2471 = vmatprep.mubr.msk.bf16.mxu1 %vm2692_vm1, %v2691_v8 }
 0x2a9   : > { %2481 = vmatprep.subr.bf16.mxu1 %v2691_v8 }
 0x2aa   : > { %v1070_v33 = vpop.permute.xlu1 %1069 }
 0x2ae   : > { %v1184_v35 = vpop.permute.xlu1 %1183 }
 0x2af   : > { %2472 = vmatmul.mubr.msk.bf16.vlgmr.msra.gmra.mrb[8].mxu1 %vm846_vm2, %v958_v32  ;;  %v1189_v36 = vsel %vm846_vm2, %v1184_v35, 0 }
 0x2b0   : > { %2482 = vmatpush3.bf16.xpose.msra.mxu1 %v1077_v34  ;;  %2483 = vmatprep.mubr.msk.bf16.mxu1 %vm2692_vm1, %v2691_v8 }
 0x2b1   : > { %2493 = vmatprep.subr.bf16.mxu1 %v2691_v8 }
 0x2b2   : > { %v1182_v37 = vpop.permute.xlu1 %1181 }
 0x2b7   : > { %2484 = vmatmul.mubr.msk.bf16.vlgmr.msra.gmra.mrb[12].mxu1 %vm846_vm2, %v1070_v33 }
 0x2b8   : > { %2494 = vmatpush3.bf16.xpose.msra.mxu1 %v1189_v36  ;;  %2495 = vmatprep.mubr.msk.bf16.mxu1 %vm2692_vm1, %v2691_v8 }
 0x2b9   : > { %2505 = vmatprep.subr.bf16.mxu1 %v2691_v8 }
 0x2bf   : > { %2496 = vmatmul.mubr.msk.bf16.vlgmr.msra.gmra.mrb[16].mxu1 %vm846_vm2, %v1182_v37 }
 0x2c0   : > { %2509 = vmatprep.mubr.msk.bf16.mxu1 %vm2692_vm1, %v2691_v8 }
 0x37a   : > { %v887_v39 = vpop.f32.mrb[4].mxu1 }
 0x37b   : > { %v893_v40 = vmul.f32 0.35355338, %v887_v39  ;;  %v2461_v41 = vpop.f32.mrb[5].mxu1 }
 0x37c   : > { %v890_v42 = vpop.f32.mrb[6].mxu1 }
 0x37d   : > { %v2462_v43 = vpop.f32.mrb[7].mxu1  ;;  %v895_v44 = vsel %vm894_vm3, -1e+09, %v893_v40 }
 0x37e   : > { %v896_v45 = vsel %vm846_vm2, %v895_v44, -inf }
 0x37f   : > { %897 = vmax.xlane.f32.xlu1 %v896_v45 }
 0x382   : > { %v1001_v46 = vpop.f32.mrb[8].mxu1 }
 0x383   : > { %v1007_v47 = vmul.f32 0.35355338, %v1001_v46  ;;  %v2473_v48 = vpop.f32.mrb[9].mxu1 }
 0x384   : > { %v1004_v49 = vpop.f32.mrb[10].mxu1 }
 0x385   : > { %v2474_v50 = vpop.f32.mrb[11].mxu1  ;;  %v1008_v51 = vsel %vm894_vm3, -1e+09, %v1007_v47 }
 0x386   : > { %v1009_v52 = vsel %vm846_vm2, %v1008_v51, -inf }
 0x387   : > { %1010 = vmax.xlane.f32.xlu0 %v1009_v52 }
 0x38a   : > { %v1113_v53 = vpop.f32.mrb[12].mxu1 }
 0x38b   : > { %v1119_v54 = vmul.f32 0.35355338, %v1113_v53  ;;  %v2485_v55 = vpop.f32.mrb[13].mxu1 }
 0x38c   : > { %v1116_v56 = vpop.f32.mrb[14].mxu1 }
 0x38d   : > { %v2486_v57 = vpop.f32.mrb[15].mxu1  ;;  %v1120_v58 = vsel %vm894_vm3, -1e+09, %v1119_v54 }
 0x38e   : > { %v1121_v59 = vsel %vm846_vm2, %v1120_v58, -inf }
 0x38f   : > { %1122 = vmax.xlane.f32.xlu1 %v1121_v59 }
 0x392   : > { %v1225_v60 = vpop.f32.mrb[16].mxu1 }
 0x393   : > { %v1231_v61 = vmul.f32 0.35355338, %v1225_v60  ;;  %v2497_v62 = vpop.f32.mrb[17].mxu1 }
 0x394   : > { %v1228_v63 = vpop.f32.mrb[18].mxu1 }
 0x395   : > { %v2498_v1 = vpop.f32.mrb[19].mxu1  ;;  %v1232_v2 = vsel %vm894_vm3, -1e+09, %v1231_v61 }
 0x396   : > { %v1233_v3 = vsel %vm846_vm2, %v1232_v2, -inf }
 0x397   : > { %1234 = vmax.xlane.f32.xlu0 %v1233_v3 }
 0x40c   : > { %v898_v4 = vpop.xlane.xlu1 %897 }
 0x40d   : > { %v899_v5 = vsub.f32 %v895_v44, %v898_v4 }
 0x40f   : > { %v900_v6 = vmul.f32 1.442695, %v899_v5 }
 0x411   : > { %2647 = vpow2.f32 %v900_v6 }
 0x414   : > { %v1011_v7 = vpop.xlane.xlu0 %1010 }
 0x415   : > { %v1012_v9 = vsub.f32 %v1008_v51, %v1011_v7 }
 0x417   : > { %v1013_v10 = vmul.f32 1.442695, %v1012_v9 }
 0x419   : > { %2649 = vpow2.f32 %v1013_v10 }
 0x41b   : > { %v2648_v11 = vpop.eup %2647 }
 0x41c   : > { %v902_v12 = vsel %vm846_vm2, %v2648_v11, 0.0  ;;  %v1123_v20 = vpop.xlane.xlu1 %1122 }
 0x41d   : > { %903 = vadd.xlane.f32.xlu1 %v902_v12  ;;  %v1124_v21 = vsub.f32 %v1120_v58, %v1123_v20 }
 0x41f   : > { %v1125_v22 = vmul.f32 1.442695, %v1124_v21 }
 0x423   : > { %v2650_v13 = vpop.eup %2649 }
 0x424   : > { %v1235_v14 = vpop.xlane.xlu0 %1234  ;;  %v1015_v15 = vsel %vm846_vm2, %v2650_v13, 0.0 }
 0x425   : > { %v1236_v16 = vsub.f32 %v1232_v2, %v1235_v14  ;;  %1016 = vadd.xlane.f32.xlu0 %v1015_v15 }
 0x427   : > { %v1237_v17 = vmul.f32 1.442695, %v1236_v16 }
 0x429   : > { %2651 = vpow2.f32 %v1237_v17 }
 0x42a   : > { %2653 = vpow2.f32 %v1125_v22 }
 0x42e   : > { %908 = vrot.lane.b32.xlu1 %v2873_v25, %s2700_s2  ;;  %s3177_s2 = smov 24  }
 0x433   : > { %v2652_v18 = vpop.eup %2651 }
 0x434   : > { %v1239_v19 = vsel %vm846_vm2, %v2652_v18, 0.0  ;;  %v2654_v23 = vpop.eup %2653 }
 0x435   : > { %1240 = vadd.xlane.f32.xlu0 %v1239_v19  ;;  %v1127_v24 = vsel %vm846_vm2, %v2654_v23, 0.0 }
 0x44b   : > { %1021 = vrot.lane.b32.xlu0 %v2873_v25, %s2701_s25  ;;  %s3197_s25 = sld [smem:[#allocation3_spill]] }
 0x452   : > { %1128 = vadd.xlane.f32.xlu1 %v1127_v24 }
 0x463   : > { %1133 = vrot.lane.b32.xlu1 %v2873_v25, %s2702_s5  ;;  %s3196_s5 = sld [smem:[#allocation9_spill]] }
 0x467   : > { %1245 = vrot.lane.b32.xlu1 %v2873_v25, %s2703_s1 }
 0x469   : > { %v2631_v57 = vld [vmem:[%s3196_s5] sm:$0xff]   ;;  %v2632_v58 = vld [vmem:[%s3196_s5 + $0x8] sm:$0xff]  }
 0x46a   : > { %2506 = vmatpush3.bf16.msra.mxu1 %v2631_v57 }
 0x46b   : > { %2507 = vmatprep.subr.bf16.mxu1 %v2691_v8 }
 0x46e   : > { %2508 = vmatpush3.bf16.msra.mxu1 %v2632_v58 }
 0x46f   : > { %2521 = vmatprep.subr.bf16.mxu1 %v2691_v8 }
 0x4aa   : > { %v904_v26 = vpop.xlane.xlu1 %903 }
 0x4ab   : > { %2655 = vrcp.f32 %v904_v26 }
 0x4ae   : > { %v909_v27 = vpop.permute.xlu1 %908 }
 0x4af   : > { %v915_v28 = vsel %vm913_vm4, %v909_v27, 0  ;;  %v2634_v27 = vld [vmem:[%s3162_s13 + $0x8] sm:$0xff]  }
 0x4b0   : > { %2464 = vmatpush3.bf16.msra.mxu0 %v915_v28 }
 0x4b1   : > { %2475 = vmatprep.subr.bf16.mxu0 %v2691_v8 }
 0x4b2   : > { %v1017_v30 = vpop.xlane.xlu0 %1016 }
 0x4b3   : > { %2657 = vrcp.f32 %v1017_v30  ;;  %v2636_v30 = vld [vmem:[%s3160_s11 + $0x8] sm:$0xff]  }
 0x4b5   : > { %v2656_v29 = vpop.eup %2655 }
 0x4b6   : > { %v906_v31 = vmul.f32 %v2656_v29, %v2648_v11  ;;  %v2635_v29 = vld [vmem:[%s3160_s11] sm:$0xff]  }
 0x4b8   : > { %v907_v32 = vpack.c.bf16 %v906_v31, %v906_v31 }
 0x4ba   : > { %2466 = vmatmul.mubr.msk.bf16.vlgmr.msra.gmra.mrb[0].mxu0 %vm846_vm2, %v907_v32 }
 0x4bb   : > { %2477 = vmatprep.mubr.msk.bf16.mxu0 %vm2692_vm1, %v2691_v8 }
 0x4bd   : > { %v2658_v25 = vpop.eup %2657 }
 0x4be   : > { %v1019_v34 = vmul.f32 %v2658_v25, %v2650_v13  ;;  %v2357_v13 = vld [vmem:[%s3157_s8] ss:$0 sm:$0xff] }
 0x4c0   : > { %v1020_v37 = vpack.c.bf16 %v1019_v34, %v1019_v34  ;;  %v2358_v34 = vld [vmem:[%s3158_s9] ss:$0 sm:$0xff] }
 0x4c2   : > { %v1241_v33 = vpop.xlane.xlu0 %1240 }
 0x4c6   : > { %v1022_v35 = vpop.permute.xlu0 %1021 }
 0x4c7   : > { %v1027_v36 = vsel %vm913_vm4, %v1022_v35, 0 }
 0x4c8   : > { %2476 = vmatpush3.bf16.msra.mxu0 %v1027_v36  ;;  %v2359_v36 = vld [vmem:[%s3159_s10] ss:$0 sm:$0xff] }
 0x4c9   : > { %2487 = vmatprep.subr.bf16.mxu0 %v2691_v8 }
 0x4cb   : > { %2478 = vmatmul.mubr.msk.bf16.vlgmr.msra.gmra.mrb[4].mxu0 %vm846_vm2, %v1020_v37 }
 0x4cc   : > { %2489 = vmatprep.mubr.msk.bf16.mxu0 %vm2692_vm1, %v2691_v8 }
 0x4df   : > { %v1129_v38 = vpop.xlane.xlu1 %1128 }
 0x4e0   : > { %2659 = vrcp.f32 %v1129_v38 }
 0x4e1   : > { %2661 = vrcp.f32 %v1241_v33 }
 0x4e3   : > { %v1134_v39 = vpop.permute.xlu1 %1133 }
 0x4e4   : > { %v1139_v40 = vsel %vm913_vm4, %v1134_v39, 0 }
 0x4e5   : > { %2488 = vmatpush3.bf16.msra.mxu0 %v1139_v40  ;;  %v2364_v40 = vld [vmem:[%s3163_s14] ss:$0 sm:$0xff] }
 0x4e6   : > { %2499 = vmatprep.subr.bf16.mxu0 %v2691_v8 }
 0x4e7   : > { %v1246_v43 = vpop.permute.xlu1 %1245 }
 0x4e8   : > { %v1251_v46 = vsel %vm913_vm4, %v1246_v43, 0 }
 0x4ea   : > { %v2660_v41 = vpop.eup %2659 }
 0x4eb   : > { %v1131_v42 = vmul.f32 %v2660_v41, %v2654_v23  ;;  %v2662_v45 = vpop.eup %2661 }
 0x4ec   : > { %v1243_v47 = vmul.f32 %v2662_v45, %v2652_v18 }
 0x4ed   : > { %v1132_v44 = vpack.c.bf16 %v1131_v42, %v1131_v42 }
 0x4ee   : > { %v1244_v48 = vpack.c.bf16 %v1243_v47, %v1243_v47 }
 0x4ef   : > { %2490 = vmatmul.mubr.msk.bf16.vlgmr.msra.gmra.mrb[8].mxu0 %vm846_vm2, %v1132_v44 }
 0x4f0   : > { %2500 = vmatpush3.bf16.msra.mxu0 %v1251_v46  ;;  %2501 = vmatprep.mubr.msk.bf16.mxu0 %vm2692_vm1, %v2691_v8 }
 0x4f1   : > { %2513 = vmatprep.subr.bf16.mxu0 %v2691_v8 }
 0x4f7   : > { %2502 = vmatmul.mubr.msk.bf16.vlgmr.msra.gmra.mrb[12].mxu0 %vm846_vm2, %v1244_v48  ;;  %v2360_v48 = vld [vmem:[%s3161_s12] ss:$0 sm:$0xff] }
 0x4f8   : > { %2517 = vmatprep.mubr.msk.bf16.mxu0 %vm2692_vm1, %v2691_v8  ;;  %2514 = vmatpush3.bf16.msra.mxu0 %v2635_v29 }
 0x4f9   : > { %2515 = vmatprep.subr.bf16.mxu0 %v2691_v8 }
 0x4fc   : > { %2516 = vmatpush3.bf16.msra.mxu0 %v2636_v30 }
 0x4fd   : > { %2529 = vmatprep.subr.bf16.mxu0 %v2691_v8 }
 0x58d   : > { %v951_v49 = vpop.f32.mrb[0].mxu0 }
 0x58e   : > { %v2467_v50 = vpop.f32.mrb[1].mxu0 }
 0x58f   : > { %v954_v51 = vpop.f32.mrb[2].mxu0 }
 0x590   : > { %v2468_v52 = vpop.f32.mrb[3].mxu0 }
 0x59e   : > { %v1063_v53 = vpop.f32.mrb[4].mxu0 }
 0x59f   : > { %1294 = vrot.lane.b32.xlu0 %v1063_v53, %s3179_s26  ;;  %v2479_v54 = vpop.f32.mrb[5].mxu0  ;;  %s3203_s26 = smov 16  }
 0x5a0   : > { %v1066_v55 = vpop.f32.mrb[6].mxu0 }
 0x5a1   : > { %v2480_v56 = vpop.f32.mrb[7].mxu0 }
 0x5c2   : > { %v1175_v59 = vpop.f32.mrb[8].mxu0 }
 0x5c3   : > { %1298 = vrot.lane.b32.xlu1 %v1175_v59, %s3178_s0  ;;  %v2491_v60 = vpop.f32.mrb[9].mxu0 }
 0x5c4   : > { %v1178_v61 = vpop.f32.mrb[10].mxu0 }
 0x5c5   : > { %v2492_v62 = vpop.f32.mrb[11].mxu0 }
 0x5ca   : > { %v1287_v63 = vpop.f32.mrb[12].mxu0 }
 0x5cb   : > { %1302 = vrot.lane.b32.xlu0 %v1287_v63, %s3177_s2  ;;  %v2503_v1 = vpop.f32.mrb[13].mxu0  ;;  %s731_s2 = scalar_lea.vmem %s3197_s25, %s2835_s24 }
 0x5cc   : > { %v1290_v2 = vpop.f32.mrb[14].mxu0  ;;  %v742_v26 = vld [vmem:[%s731_s2] sm:$0xff]  ;;  %s3204_s2 = smov 24  }
 0x5cd   : > { %v2504_v3 = vpop.f32.mrb[15].mxu0  ;;  %v1475_v28 = vpack.c.bf16 %v742_v26, %v742_v26 }
 0x611   : > { %v1295_v4 = vpop.permute.xlu0 %1294 }
 0x612   : > { %v1305_v6 = vsel %vm846_vm2, %v951_v49, %v1295_v4 }
 0x635   : > { %v1299_v5 = vpop.permute.xlu1 %1298 }
 0x636   : > { %v1307_v7 = vsel %vm1306_vm5, %v1305_v6, %v1299_v5 }
 0x63d   : > { %v1303_v9 = vpop.permute.xlu0 %1302 }
 0x63e   : > { %v1309_v10 = vsel %vm1308_vm6, %v1307_v7, %v1303_v9 }
 0x63f   : > { %v1310_v11 = vpack.c.bf16 %v1309_v10, %v1309_v10 }
 0x641   : > { %2510 = vmatmul.mubr.msk.bf16.vlgmr.msra.gmra.mrb[20].mxu1 %vm745_vm0, %v1310_v11 }
 0x642   : > { %2525 = vmatprep.mubr.msk.bf16.mxu1 %vm2692_vm1, %v2691_v8 }
 0x714   : > { %v1364_v12 = vpop.f32.mrb[20].mxu1 }
 0x715   : > { %v1370_v14 = vadd.f32 %v1364_v12, %v2841_v0  ;;  %v2511_v15 = vpop.f32.mrb[21].mxu1  ;;  %v2633_v0 = vld [vmem:[%s3162_s13] sm:$0xff]  }
 0x716   : > { %v1367_v16 = vpop.f32.mrb[22].mxu1  ;;  %2522 = vmatpush3.bf16.msra.mxu1 %v2633_v0 }
 0x717   : > { %v2971_v17 = vadd.f32 %v2357_v13, %v1370_v14  ;;  %v2512_v18 = vpop.f32.mrb[23].mxu1  ;;  %2523 = vmatprep.subr.bf16.mxu1 %v2691_v8 }
 0x719   : > { %v1381_v19 = vsel %vm745_vm0, %v2971_v17, 0.0 }
 0x71a   : > { %1382 = vadd.xlane.f32.xlu1 %v1381_v19  ;;  %2524 = vmatpush3.bf16.msra.mxu1 %v2634_v27 }
 0x71b   : > { %2535 = vmatprep.subr.bf16.mxu1 %v2691_v8 }
 0x71d   : > { %2526 = vmatmul.mubr.msk.bf16.vlgmr.msra.gmra.mrb[24].mxu1 %vm745_vm0, %v1475_v28 }
 0x71e   : > { %2537 = vmatprep.mubr.msk.bf16.mxu1 %vm2692_vm1, %v2691_v8 }
 0x7a7   : > { %v1383_v20 = vpop.xlane.xlu1 %1382 }
 0x7a8   : > { %v1384_v21 = vmul.f32 0.03125, %v1383_v20 }
 0x7aa   : > { %v1385_v22 = vsub.f32 %v2971_v17, %v1384_v21 }
 0x7ac   : > { %v1386_v23 = vmul.f32 %v1385_v22, %v1385_v22 }
 0x7ae   : > { %v1387_v24 = vsel %vm745_vm0, %v1386_v23, 0.0 }
 0x7af   : > { %1388 = vadd.xlane.f32.xlu0 %v1387_v24 }
 0x7f0   : > { %v1536_v41 = vpop.f32.mrb[24].mxu1 }
 0x7f1   : > { %v1537_v42 = vadd.f32 %v2364_v40, %v1536_v41  ;;  %v2527_v43 = vpop.f32.mrb[25].mxu1 }
 0x7f2   : > { %v1539_v44 = vpop.f32.mrb[26].mxu1 }
 0x7f3   : > { %v3012_v45 = vpack.c.bf16 %v1537_v42, %v1537_v42  ;;  %v2528_v46 = vpop.f32.mrb[27].mxu1 }
 0x7f5   : > { %1655 = vrot.lane.b32.xlu0 %v3012_v45, %s2693_s6  ;;  %v1548_v47 = vsel %vm846_vm2, %v3012_v45, 0 }
 0x83c   : > { %v1389_v31 = vpop.xlane.xlu0 %1388 }
 0x83d   : > { %v1390_v32 = vmul.f32 0.03125, %v1389_v31 }
 0x83f   : > { %v1391_v25 = vadd.f32 1e-06, %v1390_v32 }
 0x841   : > { %2663 = vrsqrt.f32 %v1391_v25 }
 0x84b   : > { %v2664_v33 = vpop.eup %2663 }
 0x84c   : > { %v1393_v35 = vmul.f32 %v2664_v33, %v1385_v22 }
 0x84e   : > { %v1400_v37 = vmul.f32 %v2358_v34, %v1393_v35 }
 0x850   : > { %v1407_v38 = vadd.f32 %v2359_v36, %v1400_v37 }
 0x852   : > { %v1408_v39 = vpack.c.bf16 %v1407_v38, %v1407_v38 }
 0x854   : > { %2518 = vmatmul.mubr.msk.bf16.vlgmr.msra.gmra.mrb[16].mxu0 %vm745_vm0, %v1408_v39 }
 0x855   : > { %2531 = vmatprep.mubr.msk.bf16.mxu0 %vm2692_vm1, %v2691_v8  ;;  %2530 = vmatpush3.bf16.xpose.msra.mxu0 %v1548_v47 }
 0x856   : > { %2541 = vmatprep.subr.bf16.mxu0 %v2691_v8 }
 0x867   : > { %v1656_v52 = vpop.permute.xlu0 %1655 }
 0x868   : > { %v1661_v56 = vsel %vm846_vm2, %v1656_v52, 0 }
 0x927   : > { %v1469_v49 = vpop.f32.mrb[16].mxu0 }
 0x928   : > { %v1470_v50 = vadd.f32 %v2360_v48, %v1469_v49  ;;  %v2519_v51 = vpop.f32.mrb[17].mxu0 }
 0x929   : > { %v1472_v53 = vpop.f32.mrb[18].mxu0 }
 0x92a   : > { %v1542_v54 = vpack.c.bf16 %v1470_v50, %v1470_v50  ;;  %v2520_v55 = vpop.f32.mrb[19].mxu0 }
 0x92c   : > { %1653 = vrot.lane.b32.xlu1 %v1542_v54, %s2693_s6  ;;  %1764 = vrot.lane.b32.xlu0 %v1542_v54, %s2697_s3  ;;  %s3198_s6 = smov 88  }
 0x92d   : > { %2532 = vmatmul.mubr.msk.bf16.vlgmr.msra.gmra.mrb[20].mxu0 %vm846_vm2, %v1542_v54 }
 0x92e   : > { %2542 = vmatpush3.bf16.xpose.msra.mxu0 %v1661_v56  ;;  %2543 = vmatprep.mubr.msk.bf16.mxu0 %vm2692_vm1, %v2691_v8 }
 0x92f   : > { %2553 = vmatprep.subr.bf16.mxu0 %v2691_v8 }
 0x930   : > { %1766 = vrot.lane.b32.xlu1 %v3012_v45, %s2697_s3  ;;  %1875 = vrot.lane.b32.xlu0 %v1542_v54, %s2699_s30  ;;  %s3199_s3 = smov 96  }
 0x934   : > { %1877 = vrot.lane.b32.xlu1 %v3012_v45, %s2699_s30  ;;  %s3200_s30 = smov 72  }
 0x99e   : > { %v1654_v57 = vpop.permute.xlu1 %1653  ;;  %v1765_v61 = vpop.permute.xlu0 %1764 }
 0x99f   : > { %2544 = vmatmul.mubr.msk.bf16.vlgmr.msra.gmra.mrb[24].mxu0 %vm846_vm2, %v1654_v57 }
 0x9a0   : > { %2555 = vmatprep.mubr.msk.bf16.mxu0 %vm2692_vm1, %v2691_v8 }
 0x9a2   : > { %v1767_v58 = vpop.permute.xlu1 %1766  ;;  %v1876_v63 = vpop.permute.xlu0 %1875 }
 0x9a3   : > { %v1772_v59 = vsel %vm846_vm2, %v1767_v58, 0 }
 0x9a4   : > { %2554 = vmatpush3.bf16.xpose.msra.mxu0 %v1772_v59 }
 0x9a5   : > { %2565 = vmatprep.subr.bf16.mxu0 %v2691_v8 }
 0x9a6   : > { %v1878_v60 = vpop.permute.xlu1 %1877 }
 0x9a7   : > { %v1883_v62 = vsel %vm846_vm2, %v1878_v60, 0 }
 0x9ab   : > { %2556 = vmatmul.mubr.msk.bf16.vlgmr.msra.gmra.mrb[28].mxu0 %vm846_vm2, %v1765_v61 }
 0x9ac   : > { %2566 = vmatpush3.bf16.xpose.msra.mxu0 %v1883_v62  ;;  %2567 = vmatprep.mubr.msk.bf16.mxu0 %vm2692_vm1, %v2691_v8 }
 0x9ad   : > { %2577 = vmatprep.subr.bf16.mxu0 %v2691_v8 }
 0x9b3   : > { %2568 = vmatmul.mubr.msk.bf16.vlgmr.msra.gmra.mrb[32].mxu0 %vm846_vm2, %v1876_v63 }
 0x9b4   : > { %2581 = vmatprep.mubr.msk.bf16.mxu0 %vm2692_vm1, %v2691_v8 }
 0xa00   : > { %v1584_v1 = vpop.f32.mrb[20].mxu0 }
 0xa01   : > { %v1590_v2 = vmul.f32 0.35355338, %v1584_v1  ;;  %v2533_v3 = vpop.f32.mrb[21].mxu0 }
 0xa02   : > { %v1587_v4 = vpop.f32.mrb[22].mxu0 }
 0xa03   : > { %v2534_v5 = vpop.f32.mrb[23].mxu0  ;;  %v1591_v6 = vsel %vm846_vm2, %v1590_v2, -inf }
 0xa04   : > { %1592 = vmax.xlane.f32.xlu1 %v1591_v6 }
 0xa72   : > { %v1697_v7 = vpop.f32.mrb[24].mxu0 }
 0xa73   : > { %v1703_v9 = vmul.f32 0.35355338, %v1697_v7  ;;  %v2545_v10 = vpop.f32.mrb[25].mxu0 }
 0xa74   : > { %v1700_v11 = vpop.f32.mrb[26].mxu0 }
 0xa75   : > { %v2546_v12 = vpop.f32.mrb[27].mxu0  ;;  %v1704_v13 = vsel %vm846_vm2, %v1703_v9, -inf }
 0xa76   : > { %1705 = vmax.xlane.f32.xlu0 %v1704_v13 }
 0xa7e   : > { %v1808_v14 = vpop.f32.mrb[28].mxu0 }
 0xa7f   : > { %v1814_v15 = vmul.f32 0.35355338, %v1808_v14  ;;  %v2557_v16 = vpop.f32.mrb[29].mxu0 }
 0xa80   : > { %v1811_v18 = vpop.f32.mrb[30].mxu0  ;;  %v2637_v16 = vld [vmem:[%s3164_s15] sm:$0xff]  }
 0xa81   : > { %v2558_v19 = vpop.f32.mrb[31].mxu0  ;;  %v1815_v20 = vsel %vm846_vm2, %v1814_v15, -inf  ;;  %2578 = vmatpush3.bf16.msra.mxu0 %v2637_v16  ;;  %v2638_v18 = vld [vmem:[%s3164_s15 + $0x8] sm:$0xff]  }
 0xa82   : > { %1816 = vmax.xlane.f32.xlu0 %v1815_v20  ;;  %2579 = vmatprep.subr.bf16.mxu0 %v2691_v8 }
 0xa85   : > { %2580 = vmatpush3.bf16.msra.mxu0 %v2638_v18 }
 0xa86   : > { %v1919_v21 = vpop.f32.mrb[32].mxu0  ;;  %2593 = vmatprep.subr.bf16.mxu0 %v2691_v8 }
 0xa87   : > { %v1925_v22 = vmul.f32 0.35355338, %v1919_v21  ;;  %v2569_v23 = vpop.f32.mrb[33].mxu0 }
 0xa88   : > { %v1922_v24 = vpop.f32.mrb[34].mxu0 }
 0xa89   : > { %v2570_v0 = vpop.f32.mrb[35].mxu0  ;;  %v1926_v26 = vsel %vm846_vm2, %v1925_v22, -inf }
 0xa8a   : > { %1927 = vmax.xlane.f32.xlu1 %v1926_v26 }
 0xa91   : > { %v1593_v27 = vpop.xlane.xlu1 %1592 }
 0xa92   : > { %v1594_v28 = vsub.f32 %v1590_v2, %v1593_v27 }
 0xa94   : > { %v1595_v29 = vmul.f32 1.442695, %v1594_v28 }
 0xa96   : > { %2665 = vpow2.f32 %v1595_v29 }
 0xaa0   : > { %v2666_v30 = vpop.eup %2665 }
 0xaa1   : > { %v1597_v31 = vsel %vm846_vm2, %v2666_v30, 0.0 }
 0xaa2   : > { %1598 = vadd.xlane.f32.xlu0 %v1597_v31 }
 0xb03   : > { %v1706_v32 = vpop.xlane.xlu0 %1705 }
 0xb04   : > { %v1707_v25 = vsub.f32 %v1703_v9, %v1706_v32 }
 0xb06   : > { %v1708_v33 = vmul.f32 1.442695, %v1707_v25 }
 0xb08   : > { %2667 = vpow2.f32 %v1708_v33 }
 0xb0f   : > { %v1817_v34 = vpop.xlane.xlu0 %1816 }
 0xb10   : > { %v1818_v35 = vsub.f32 %v1814_v15, %v1817_v34  ;;  %v2379_v34 = vld [vmem:[%s3165_s16] ss:$0 sm:$0xff] }
 0xb12   : > { %v2668_v36 = vpop.eup %2667  ;;  %v1819_v37 = vmul.f32 1.442695, %v1818_v35 }
 0xb13   : > { %v1710_v38 = vsel %vm846_vm2, %v2668_v36, 0.0 }
 0xb14   : > { %2669 = vpow2.f32 %v1819_v37  ;;  %1711 = vadd.xlane.f32.xlu1 %v1710_v38 }
 0xb17   : > { %v1928_v41 = vpop.xlane.xlu1 %1927 }
 0xb18   : > { %v1929_v42 = vsub.f32 %v1925_v22, %v1928_v41 }
 0xb1a   : > { %v1930_v43 = vmul.f32 1.442695, %v1929_v42 }
 0xb1c   : > { %2671 = vpow2.f32 %v1930_v43 }
 0xb1e   : > { %v2670_v39 = vpop.eup %2669 }
 0xb1f   : > { %v1821_v40 = vsel %vm846_vm2, %v2670_v39, 0.0 }
 0xb20   : > { %1822 = vadd.xlane.f32.xlu0 %v1821_v40 }
 0xb25   : > { %1716 = vrot.lane.b32.xlu1 %v3012_v45, %s3198_s6 }
 0xb26   : > { %v2672_v44 = vpop.eup %2671 }
 0xb27   : > { %v1932_v46 = vsel %vm846_vm2, %v2672_v44, 0.0 }
 0xb2f   : > { %v1599_v47 = vpop.xlane.xlu0 %1598 }
 0xb30   : > { %2673 = vrcp.f32 %v1599_v47  ;;  %v2639_v47 = vld [vmem:[%s3168_s19] sm:$0xff]  }
 0xb36   : > { %1604 = vrot.lane.b32.xlu0 %v3012_v45, %s3199_s3 }
 0xb3a   : > { %1938 = vrot.lane.b32.xlu0 %v3012_v45, %s3200_s30  ;;  %v2674_v49 = vpop.eup %2673  ;;  %s739_s30 = scalar_lea.vmem %s3172_s23, %s2835_s24 }
 0xb3b   : > { %v1601_v51 = vmul.f32 %v2674_v49, %v2666_v30  ;;  %v2642_v49 = vld [vmem:[%s3170_s21 + $0x8] sm:$0xff]  }
 0xb3d   : > { %v1602_v55 = vpack.c.bf16 %v1601_v51, %v1601_v51 }
 0xb49   : > { %1933 = vadd.xlane.f32.xlu1 %v1932_v46 }
 0xb5a   : > { %1827 = vrot.lane.b32.xlu1 %v3012_v45, %s3201_s7 }
 0xba1   : > { %v1712_v48 = vpop.xlane.xlu1 %1711 }
 0xba2   : > { %2675 = vrcp.f32 %v1712_v48  ;;  %v2641_v48 = vld [vmem:[%s3170_s21] sm:$0xff]  }
 0xba5   : > { %v1717_v54 = vpop.permute.xlu1 %1716 }
 0xba6   : > { %v1722_v57 = vsel %vm913_vm4, %v1717_v54, 0  ;;  %v2380_v54 = vld [vmem:[%s3166_s17] ss:$0 sm:$0xff] }
 0xbac   : > { %v2676_v56 = vpop.eup %2675 }
 0xbad   : > { %v1823_v50 = vpop.xlane.xlu0 %1822  ;;  %v1714_v45 = vmul.f32 %v2676_v56, %v2668_v36  ;;  %v2381_v56 = vld [vmem:[%s3167_s18] ss:$0 sm:$0xff] }
 0xbae   : > { %2677 = vrcp.f32 %v1823_v50 }
 0xbaf   : > { %v1715_v58 = vpack.c.bf16 %v1714_v45, %v1714_v45 }
 0xbb1   : > { %v1605_v52 = vpop.permute.xlu0 %1604 }
 0xbb2   : > { %v1610_v53 = vsel %vm913_vm4, %v1605_v52, 0 }
 0xbb3   : > { %2536 = vmatpush3.bf16.msra.mxu1 %v1610_v53 }
 0xbb4   : > { %2547 = vmatprep.subr.bf16.mxu1 %v2691_v8 }
 0xbb5   : > { %v1939_v1 = vpop.permute.xlu0 %1938 }
 0xbb6   : > { %2538 = vmatmul.mubr.msk.bf16.vlgmr.msra.gmra.mrb[28].mxu1 %vm846_vm2, %v1602_v55  ;;  %v1944_v3 = vsel %vm913_vm4, %v1939_v1, 0 }
 0xbb7   : > { %2548 = vmatpush3.bf16.msra.mxu1 %v1722_v57  ;;  %2549 = vmatprep.mubr.msk.bf16.mxu1 %vm2692_vm1, %v2691_v8 }
 0xbb8   : > { %2559 = vmatprep.subr.bf16.mxu1 %v2691_v8  ;;  %v2678_v59 = vpop.eup %2677 }
 0xbb9   : > { %v1825_v61 = vmul.f32 %v2678_v59, %v2670_v39  ;;  %v2643_v59 = vld [vmem:[%s3170_s21 + $0x10] sm:$0xff]  }
 0xbbb   : > { %v1826_v2 = vpack.c.bf16 %v1825_v61, %v1825_v61  ;;  %v2382_v61 = vld [vmem:[%s3169_s20] ss:$0 sm:$0xff] }
 0xbbe   : > { %2550 = vmatmul.mubr.msk.bf16.vlgmr.msra.gmra.mrb[32].mxu1 %vm846_vm2, %v1715_v58 }
 0xbbf   : > { %2561 = vmatprep.mubr.msk.bf16.mxu1 %vm2692_vm1, %v2691_v8 }
 0xbd6   : > { %v1934_v60 = vpop.xlane.xlu1 %1933 }
 0xbd7   : > { %2679 = vrcp.f32 %v1934_v60  ;;  %v2644_v60 = vld [vmem:[%s3170_s21 + $0x18] sm:$0xff]  }
 0xbda   : > { %v1828_v62 = vpop.permute.xlu1 %1827 }
 0xbdb   : > { %v1833_v63 = vsel %vm913_vm4, %v1828_v62, 0 }
 0xbdc   : > { %2560 = vmatpush3.bf16.msra.mxu1 %v1833_v63 }
 0xbdd   : > { %2571 = vmatprep.subr.bf16.mxu1 %v2691_v8 }
 0xbdf   : > { %2562 = vmatmul.mubr.msk.bf16.vlgmr.msra.gmra.mrb[36].mxu1 %vm846_vm2, %v1826_v2 }
 0xbe0   : > { %2572 = vmatpush3.bf16.msra.mxu1 %v1944_v3  ;;  %2573 = vmatprep.mubr.msk.bf16.mxu1 %vm2692_vm1, %v2691_v8 }
 0xbe1   : > { %v2680_v4 = vpop.eup %2679  ;;  %2585 = vmatprep.subr.bf16.mxu1 %v2691_v8 }
 0xbe2   : > { %v1936_v5 = vmul.f32 %v2680_v4, %v2672_v44 }
 0xbe4   : > { %v1937_v6 = vpack.c.bf16 %v1936_v5, %v1936_v5 }
 0xbe7   : > { %2574 = vmatmul.mubr.msk.bf16.vlgmr.msra.gmra.mrb[40].mxu1 %vm846_vm2, %v1937_v6  ;;  %v2391_v6 = vld [vmem:[%s3171_s22] ss:$0 sm:$0xff] }
 0xbe8   : > { %2589 = vmatprep.mubr.msk.bf16.mxu1 %vm2692_vm1, %v2691_v8  ;;  %2586 = vmatpush3.bf16.msra.mxu1 %v2639_v47 }
 0xbe9   : > { %2587 = vmatprep.subr.bf16.mxu1 %v2691_v8 }
 0xc89   : > { %v1646_v7 = vpop.f32.mrb[28].mxu1 }
 0xc8a   : > { %v2539_v9 = vpop.f32.mrb[29].mxu1 }
 0xc8b   : > { %v1649_v10 = vpop.f32.mrb[30].mxu1 }
 0xc8c   : > { %v2540_v11 = vpop.f32.mrb[31].mxu1 }
 0xc91   : > { %v1758_v12 = vpop.f32.mrb[32].mxu1 }
 0xc92   : > { %1987 = vrot.lane.b32.xlu1 %v1758_v12, %s3202_s28  ;;  %v2551_v13 = vpop.f32.mrb[33].mxu1 }
 0xc93   : > { %v1761_v14 = vpop.f32.mrb[34].mxu1 }
 0xc94   : > { %v2552_v15 = vpop.f32.mrb[35].mxu1 }
 0xcb2   : > { %v1869_v19 = vpop.f32.mrb[36].mxu1 }
 0xcb3   : > { %1991 = vrot.lane.b32.xlu0 %v1869_v19, %s3203_s26  ;;  %v2563_v20 = vpop.f32.mrb[37].mxu1 }
 0xcb4   : > { %v1872_v21 = vpop.f32.mrb[38].mxu1 }
 0xcb5   : > { %v2564_v22 = vpop.f32.mrb[39].mxu1 }
 0xcba   : > { %v1980_v23 = vpop.f32.mrb[40].mxu1 }
 0xcbb   : > { %1995 = vrot.lane.b32.xlu1 %v1980_v23, %s3204_s2  ;;  %v2575_v24 = vpop.f32.mrb[41].mxu1 }
 0xcbc   : > { %v1983_v0 = vpop.f32.mrb[42].mxu1 }
 0xcbd   : > { %v2576_v26 = vpop.f32.mrb[43].mxu1 }
 0xd04   : > { %v1988_v27 = vpop.permute.xlu1 %1987 }
 0xd05   : > { %v1998_v29 = vsel %vm846_vm2, %v1646_v7, %v1988_v27 }
 0xd25   : > { %v1992_v28 = vpop.permute.xlu0 %1991 }
 0xd26   : > { %v1999_v30 = vsel %vm1306_vm5, %v1998_v29, %v1992_v28 }
 0xd2d   : > { %v1996_v31 = vpop.permute.xlu1 %1995 }
 0xd2e   : > { %v2000_v32 = vsel %vm1308_vm6, %v1999_v30, %v1996_v31 }
 0xd2f   : > { %v2001_v25 = vpack.c.bf16 %v2000_v32, %v2000_v32 }
 0xd31   : > { %2582 = vmatmul.mubr.msk.bf16.vlgmr.msra.gmra.mrb[36].mxu0 %vm745_vm0, %v2001_v25 }
 0xd32   : > { %2601 = vmatprep.mubr.msk.bf16.mxu0 %vm2692_vm1, %v2691_v8  ;;  %2594 = vmatpush3.bf16.msra.mxu0 %v2641_v48 }
 0xd33   : > { %2595 = vmatprep.subr.bf16.mxu0 %v2691_v8 }
 0xd36   : > { %2596 = vmatpush3.bf16.msra.mxu0 %v2642_v49 }
 0xd37   : > { %2597 = vmatprep.subr.bf16.mxu0 %v2691_v8 }
 0xd3a   : > { %2598 = vmatpush3.bf16.msra.mxu0 %v2643_v59 }
 0xd3b   : > { %2599 = vmatprep.subr.bf16.mxu0 %v2691_v8 }
 0xd3e   : > { %2600 = vmatpush3.bf16.msra.mxu0 %v2644_v60 }
 0xe04   : > { %v2055_v33 = vpop.f32.mrb[36].mxu0 }
 0xe05   : > { %v2061_v35 = vadd.f32 %v2055_v33, %v2971_v17  ;;  %v2583_v36 = vpop.f32.mrb[37].mxu0  ;;  %v2640_v17 = vld [vmem:[%s3168_s19 + $0x8] sm:$0xff]  }
 0xe06   : > { %v2058_v37 = vpop.f32.mrb[38].mxu0  ;;  %2588 = vmatpush3.bf16.msra.mxu1 %v2640_v17 }
 0xe07   : > { %v2069_v38 = vadd.f32 %v2379_v34, %v2061_v35  ;;  %v2584_v39 = vpop.f32.mrb[39].mxu0 }
 0xe09   : > { %v2072_v40 = vsel %vm745_vm0, %v2069_v38, 0.0 }
 0xe0a   : > { %2073 = vadd.xlane.f32.xlu0 %v2072_v40 }
 0xe97   : > { %v2074_v41 = vpop.xlane.xlu0 %2073 }
 0xe98   : > { %v2075_v42 = vmul.f32 0.03125, %v2074_v41 }
 0xe9a   : > { %v2076_v43 = vsub.f32 %v2069_v38, %v2075_v42 }
 0xe9c   : > { %v2077_v44 = vmul.f32 %v2076_v43, %v2076_v43 }
 0xe9e   : > { %v2078_v46 = vsel %vm745_vm0, %v2077_v44, 0.0 }
 0xe9f   : > { %2079 = vadd.xlane.f32.xlu1 %v2078_v46 }
 0xf2c   : > { %v2080_v50 = vpop.xlane.xlu1 %2079 }
 0xf2d   : > { %v2081_v51 = vmul.f32 0.03125, %v2080_v50 }
 0xf2f   : > { %v2082_v52 = vadd.f32 1e-06, %v2081_v51 }
 0xf31   : > { %2681 = vrsqrt.f32 %v2082_v52 }
 0xf3b   : > { %v2682_v53 = vpop.eup %2681 }
 0xf3c   : > { %v2084_v55 = vmul.f32 %v2682_v53, %v2076_v43 }
 0xf3e   : > { %v2091_v57 = vmul.f32 %v2380_v54, %v2084_v55 }
 0xf40   : > { %v2098_v45 = vadd.f32 %v2381_v56, %v2091_v57 }
 0xf42   : > { %v2099_v58 = vpack.c.bf16 %v2098_v45, %v2098_v45 }
 0xf44   : > { %2590 = vmatmul.mubr.msk.bf16.vlgmr.msra.gmra.mrb[44].mxu1 %vm745_vm0, %v2099_v58 }
0x1017   : > { %v2160_v62 = vpop.f32.mrb[44].mxu1 }
0x1018   : > { %v2161_v63 = vadd.f32 %v2382_v61, %v2160_v62  ;;  %v2591_v1 = vpop.f32.mrb[45].mxu1 }
0x1019   : > { %v2163_v2 = vpop.f32.mrb[46].mxu1 }
0x101a   : > { %v2166_v3 = vmax.f32 %v2161_v63, 0.0  ;;  %v2592_v4 = vpop.f32.mrb[47].mxu1 }
0x101c   : > { %v2167_v5 = vpack.c.bf16 %v2166_v3, %v2166_v3 }
0x101e   : > { %2602 = vmatmul.mubr.msk.bf16.vlgmr.msra.gmra.mrb[40].mxu0 %vm2200_vm7, %v2167_v5 }
0x10f1   : > { %v2238_v8 = vpop.f32.mrb[40].mxu0 }
0x10f2   : > { %v2244_v7 = vadd.f32 %v2238_v8, %v2069_v38  ;;  %v2603_v9 = vpop.f32.mrb[41].mxu0 }
0x10f3   : > { %v2241_v10 = vpop.f32.mrb[42].mxu0 }
0x10f4   : > { %v2252_v11 = vadd.f32 %v2391_v6, %v2244_v7  ;;  %v2604_v12 = vpop.f32.mrb[43].mxu0 }
0x10f6   : > { %2253 = vst.msk [vmem:[%s739_s30] sm:$0xff] %vm745_vm0, %v2252_v11 }
0x10f7 PF: > { %s33_s4 = sadd.s32 1, %s2689_s4  }
0x10f8   : > { %p30_p4 = scmp.ge.s32.totalorder %s33_s4, 4  }
0x10fa   :  { %32 = sbr.rel (!%p30_p4) target bundleno = 9 (0x9), region = 148 }

// kernel: transformer_forward.10
= control target key start
LH: loop header
LB: loop body
LE: loop exit
PB: predicated region body
PF: predicated region fallthrough
CT: control target
= control target key end

     0   :  { %s3359_s0 = inlined_call_operand.vmem [shape: f32[2,8,32], index: 0, kind: input, shape index: {}]   ;;  %s3360_s1 = inlined_call_operand.vmem [shape: f32[2,8,32], index: 1, kind: input, shape index: {}]   ;;  %s3361_s2 = inlined_call_operand.vmem [shape: f32[2,1,8,8], index: 2, kind: input, shape index: {}]   ;;  %s3362_s3 = inlined_call_operand.vmem [shape: f32[1,32], index: 3, kind: input, shape index: {}]   ;;  %s3363_s4 = inlined_call_operand.vmem [shape: f32[1,32], index: 4, kind: input, shape index: {}]   ;;  %s3364_s5 = inlined_call_operand.vmem [shape: bf16[32,96], index: 5, kind: input, shape index: {}]   ;;  %s3365_s6 = inlined_call_operand.vmem [shape: f32[1,96], index: 6, kind: input, shape index: {}]   ;;  %s3366_s7 = inlined_call_operand.vmem [shape: bf16[32,32], index: 7, kind: input, shape index: {}]   ;;  %s3367_s8 = inlined_call_operand.vmem [shape: f32[1,32], index: 8, kind: input, shape index: {}]   ;;  %s3368_s9 = inlined_call_operand.vmem [shape: f32[1,32], index: 9, kind: input, shape index: {}]   ;;  %s3369_s10 = inlined_call_operand.vmem [shape: f32[1,32], index: 10, kind: input, shape index: {}]   ;;  %s3370_s11 = inlined_call_operand.vmem [shape: bf16[32,32], index: 11, kind: input, shape index: {}]   ;;  %s3371_s12 = inlined_call_operand.vmem [shape: f32[1,32], index: 12, kind: input, shape index: {}]   ;;  %s3372_s13 = inlined_call_operand.vmem [shape: bf16[32,64], index: 13, kind: input, shape index: {}]   ;;  %s3373_s14 = inlined_call_operand.vmem [shape: f32[1,64], index: 14, kind: input, shape index: {}]   ;;  %s3374_s15 = inlined_call_operand.vmem [shape: bf16[32,32], index: 15, kind: input, shape index: {}]   ;;  %s3375_s16 = inlined_call_operand.vmem [shape: f32[1,32], index: 16, kind: input, shape index: {}]   ;;  %s3376_s17 = inlined_call_operand.vmem [shape: f32[1,32], index: 17, kind: input, shape index: {}]   ;;  %s3377_s18 = inlined_call_operand.vmem [shape: f32[1,32], index: 18, kind: input, shape index: {}]   ;;  %s3378_s19 = inlined_call_operand.vmem [shape: bf16[32,64], index: 19, kind: input, shape index: {}]   ;;  %s3379_s20 = inlined_call_operand.hbm [shape: f32[1,64], index: 20, kind: input, shape index: {}]   ;;  %s3380_s21 = inlined_call_operand.vmem [shape: bf16[64,32], index: 21, kind: input, shape index: {}]   ;;  %s3381_s22 = inlined_call_operand.hbm [shape: f32[1,32], index: 22, kind: input, shape index: {}]   ;;  %s3382_s23 = inlined_call_operand.vmem [shape: f32[2,8,32], index: 23, kind: output, shape index: {}]  }
   0x1   :  { %3394 = sst [smem:[#allocation8_spill]] %s3359_s0 }
   0x2   :  { %3395 = sst [smem:[#allocation9_spill]] %s3360_s1 }
   0x3   :  { %3396 = sst [smem:[#allocation10_spill]] %s3361_s2 }
   0x4   :  { %3397 = sst [smem:[#allocation11_spill]] %s3362_s3 }
   0x5   :  { %3398 = sst [smem:[#allocation12_spill]] %s3363_s4 }
   0x6   :  { %3399 = sst [smem:[#allocation13_spill]] %s3364_s5 }
   0x7   :  { %3400 = sst [smem:[#allocation14_spill]] %s3365_s6 }
   0x8   :  { %3401 = sst [smem:[#allocation15_spill]] %s3366_s7 }
   0x9   :  { %28 = vsyncpa [#allocation3], 0 }
   0xa   :  { %29 = vsyncpa [#allocation5], 0  ;;  %s2966_s4 = smov 0  }
   0xb LB: > { %s2972_s30 = sadd.s32 4294967295, %s2826_s4   ;;  %p2381_p0 = scmp.ge.s32.totalorder %s2826_s4, 1  ;;  %s2826_s4 = sphi %s2966_s4, %s35_s4  }
   0xc   : > { %p564_p1 = scmp.lt.s32.totalorder %s2826_s4, 3  ;;  %p3385_p2 = scmp.eq.s32.totalorder %s2972_s30, 0 }
   0xd   : > { %s2828_s25 = smov [#allocation2]   ;;  %s2829_s1 = smov [#allocation4]  }
   0xe   : > { %p2977_p3 = pnand %p2381_p0, %p564_p1  ;;  %s628_s5 = sshll.u32 %s2828_s25, 4  ;;  %s629_s5 = int_to_ptr.vmem [resolvable:$true] %s628_s5 }
   0xf   : > { %s642_s26 = sshll.u32 %s2829_s1, 4  ;;  %s2756_s7 = scalar_lea.hbm %s3379_s20, 16  ;;  %s2989_s26 = int_to_ptr.vmem [resolvable:$true] %s642_s26 }
  0x10   : > { %s3402_s24 = scalar_select %p2977_p3, 1, 0 }
  0x11   : > { %p2665_p4 = pneg %p2977_p3  ;;  %p2757_p6 = scmp.ne.s32.totalorder %s3379_s20, %s2756_s7 }
  0x12   : > { %p2763_p10 = scmp.lt.u32.totalorder %s2756_s7, %s3379_s20 }
  0x13   : > { %p2985_p5 = pnand %p3385_p2, %p2665_p4 }
  0x15   : > { %p2758_p7 = pneg %p2985_p5 }
  0x17   : > { %p2759_p8 = pnand %p2758_p7, %p2757_p6 }
  0x19   : > { %p2760_p9 = pneg %p2759_p8 }
  0x1b   : > { %p2765_p11 = pnand %p2763_p10, %p2760_p9 }
  0x1d   : > { %2768 = shalt.err (!%p2765_p11)
}
  0x1e   : > { %s2769_s25 = scalar_lea.vmem %s629_s5, 16  ;;  %s2776_s1 = scalar_lea.vmem %s629_s5, 32 }
  0x1f   : > { %p2770_p12 = scmp.ne.s32.totalorder %s629_s5, %s2769_s25  ;;  %p2777_p1 = scmp.lt.s32.totalorder %s629_s5, %s629_s5 }
  0x20   : > { %p2778_p4 = scmp.lt.s32.totalorder %s2776_s1, %s2769_s25 }
  0x21   : > { %p2772_p13 = pnand %p2770_p12, %p2758_p7 }
  0x22   : > { %p2779_p2 = por %p2778_p4, %p2777_p1 }
  0x23   : > { %p2773_p0 = pneg %p2772_p13 }
  0x25   : > { %p2780_p3 = pnand %p2779_p2, %p2773_p0 }
  0x27   : > { %2783 = shalt.err (!%p2780_p3)
}
  0x28   : > { %2668 = dma.hbm_to_vmem [thread:$0]  (!%p2985_p5), %s3379_s20, 16, %s629_s5, [#allocation3]  }
  0x29   : > { %s2784_s29 = scalar_lea.hbm %s3381_s22, 16 }
  0x2a   : > { %p2785_p6 = scmp.ne.s32.totalorder %s3381_s22, %s2784_s29  ;;  %p2791_p3 = scmp.lt.u32.totalorder %s2784_s29, %s3381_s22 }
  0x2c   : > { %p2787_p8 = pnand %p2785_p6, %p2758_p7 }
  0x2e   : > { %p2788_p2 = pneg %p2787_p8 }
  0x30   : > { %p2793_p9 = pnand %p2791_p3, %p2788_p2 }
  0x32   : > { %2796 = shalt.err (!%p2793_p9)
}
  0x33   : > { %s2797_s5 = scalar_lea.vmem %s2989_s26, 16  ;;  %s2804_s6 = scalar_lea.vmem %s2989_s26, 32 }
  0x34   : > { %p2798_p10 = scmp.ne.s32.totalorder %s2989_s26, %s2797_s5  ;;  %p2805_p13 = scmp.lt.s32.totalorder %s2989_s26, %s2989_s26 }
  0x35   : > { %p2806_p0 = scmp.lt.s32.totalorder %s2804_s6, %s2797_s5 }
  0x36   : > { %p2800_p11 = pnand %p2798_p10, %p2758_p7 }
  0x37   : > { %p2807_p1 = por %p2806_p0, %p2805_p13 }
  0x38   : > { %p2801_p12 = pneg %p2800_p11 }
  0x3a   : > { %p2808_p4 = pnand %p2807_p1, %p2801_p12 }
  0x3c   : > { %2811 = shalt.err (!%p2808_p4)
}
  0x3d   : > { %2671 = dma.hbm_to_vmem [thread:$0]  (!%p2985_p5), %s3381_s22, 16, %s2989_s26, [#allocation5]  }
  0x3e   : > { %p3404_p6 = scmp.ne.s32.totalorder %s3402_s24, 0 }
  0x3f   : > { %p3405_p7 = scmp.eq.s32.totalorder (!%p3404_p6), %s2972_s30, 0 }
  0x40   : > { %676 = sbr.rel (%p3404_p6) target bundleno = 4401 (0x1131), region = 112 }
  0x47   : > { %2817 = dma.done.wait (%p3405_p7), [#allocation3], 16   ;;  %p3406_p8 = pmov %p3405_p7 }
  0x48   : > { %p3407_p2 = pmov %p3405_p7 }
  0x49   : > { %2819 = vsyncadd (%p3406_p8), [#allocation3], 4294967280 }
  0x4a   : > { %2821 = dma.done.wait (%p3407_p2), [#allocation5], 16   ;;  %p3408_p3 = pmov %p3407_p2 }
  0x4b   : > { %p750_p9 = scmp.lt.s32.totalorder %s2972_s30, 1  ;;  %s3409_s28 = sld [smem:[#allocation8_spill]]  ;;  %vm771_vm0 = vcmask 261120   ;;  %v2830_v8 = vmov 0.0   ;;  %vm2831_vm1 = vmmov 0   ;;  %vm872_vm2 = vcmask 64512  }
  0x4c   : > { %2823 = vsyncadd (%p3408_p3), [#allocation5], 4294967280  ;;  %s3410_s0 = sld [smem:[#allocation13_spill]]  ;;  %2501 = vmatprep.subr.bf16.mxu1 %v2830_v8  ;;  %2505 = vmatprep.mubr.msk.bf16.mxu1 %vm2831_vm1, %v2830_v8  ;;  %s3411_s27 = sld [smem:[#allocation11_spill]]  ;;  %vm939_vm4 = vcmask 1043456   ;;  %vm1332_vm5 = vcmask 130048  }
  0x4d   : > { %s3425_s30 = smov (!%p750_p9, %s2972_s30), 1  ;;  %2515 = vmatprep.subr.bf16.mxu0 %v2830_v8  ;;  %2517 = vmatprep.mubr.msk.bf16.mxu0 %vm2831_vm1, %v2830_v8  ;;  %s3412_s2 = sld [smem:[#allocation12_spill]]  ;;  %vm1334_vm6 = vcmask 195584   ;;  %vm2226_vm7 = vcmask 523264  }
  0x4e   : > { %s3051_s26 = sshll.u32 %s3425_s30, 3  ;;  %s3413_s30 = sld [smem:[#allocation14_spill]] }
  0x4f   : > { %s2832_s3 = smov 120   ;;  %s3392_s25 = smov 96  }
  0x50   : > { %s3393_s1 = smov 88   ;;  %s3387_s5 = smov 80  }
  0x51   : > { %s753_s29 = scalar_lea.vmem %s3409_s28, %s3051_s26  ;;  %s2836_s6 = smov 112  }
  0x52   : > { %v3057_v0 = vld [vmem:[%s753_s29] sm:$0xff]  ;;  %v2703_v9 = vld [vmem:[%s3410_s0 + $0x8] sm:$0xff]   ;;  %s2838_s7 = smov 104   ;;  %s3414_s28 = sld [smem:[#allocation10_spill]] }
  0x53   : > { %v772_v1 = vsel %vm771_vm0, %v3057_v0, 0.0  ;;  %v2702_v7 = vld [vmem:[%s3410_s0] sm:$0xff]   ;;  %s2840_s24 = smov 56  }
  0x54   : > { %773 = vadd.xlane.f32.xlu0 %v772_v1  ;;  %2502 = vmatpush3.bf16.msra.mxu1 %v2702_v7  ;;  %v2392_v14 = vld [vmem:[%s3411_s27] ss:$0 sm:$0xff]  ;;  %s3388_s27 = smov 72  }
  0x55   : > { %2503 = vmatprep.subr.bf16.mxu1 %v2830_v8  ;;  %v2393_v16 = vld [vmem:[%s3412_s2] ss:$0 sm:$0xff]  ;;  %s2841_s2 = smov 48  }
  0x56   : > { %v2394_v20 = vld [vmem:[%s3413_s30] ss:$0 sm:$0xff]  ;;  %s2839_s30 = smov 64  }
  0x58   : > { %2504 = vmatpush3.bf16.msra.mxu1 %v2703_v9  ;;  %s761_s29 = scalar_lea.vmem %s3414_s28, %s3051_s26  ;;  %s2842_s28 = smov 40  }
  0x59   : > { %2509 = vmatprep.subr.bf16.mxu1 %v2830_v8  ;;  %v867_v38 = vld [vmem:[%s761_s29] sm:$0xff]  ;;  %s3391_s29 = smov 8  }
  0x5a   : > { %vm920_vm3 = vcmp.eq.f32.partialorder %v867_v38, 0.0 }
  0xe1   : > { %v774_v2 = vpop.xlane.xlu0 %773 }
  0xe2   : > { %v776_v3 = vmul.f32 0.03125, %v774_v2 }
  0xe4   : > { %v777_v4 = vsub.f32 %v3057_v0, %v776_v3 }
  0xe6   : > { %v778_v5 = vmul.f32 %v777_v4, %v777_v4 }
  0xe8   : > { %v779_v6 = vsel %vm771_vm0, %v778_v5, 0.0 }
  0xe9   : > { %780 = vadd.xlane.f32.xlu0 %v779_v6 }
 0x176   : > { %v781_v10 = vpop.xlane.xlu0 %780 }
 0x177   : > { %v782_v11 = vmul.f32 0.03125, %v781_v10 }
 0x179   : > { %v783_v12 = vadd.f32 1e-06, %v782_v11 }
 0x17b   : > { %2718 = vrsqrt.f32 %v783_v12 }
 0x185   : > { %v2719_v13 = vpop.eup %2718 }
 0x186   : > { %v785_v15 = vmul.f32 %v2719_v13, %v777_v4 }
 0x188   : > { %v792_v17 = vmul.f32 %v2392_v14, %v785_v15 }
 0x18a   : > { %v799_v18 = vadd.f32 %v2393_v16, %v792_v17 }
 0x18c   : > { %v800_v19 = vpack.c.bf16 %v799_v18, %v799_v18 }
 0x18e   : > { %2506 = vmatmul.mubr.msk.bf16.vlgmr.msra.gmra.mrb[0].mxu1 %vm771_vm0, %v800_v19 }
 0x18f   : > { %2511 = vmatprep.mubr.msk.bf16.mxu1 %vm2831_vm1, %v2830_v8 }
 0x261   : > { %v861_v21 = vpop.f32.mrb[0].mxu1 }
 0x262   : > { %v862_v22 = vadd.f32 %v2394_v20, %v861_v21  ;;  %v2507_v23 = vpop.f32.mrb[1].mxu1 }
 0x263   : > { %v864_v24 = vpop.f32.mrb[2].mxu1 }
 0x264   : > { %v3089_v25 = vpack.c.bf16 %v862_v22, %v862_v22  ;;  %v2508_v26 = vpop.f32.mrb[3].mxu1 }
 0x266   : > { %983 = vrot.lane.b32.xlu0 %v3089_v25, %s2832_s3  ;;  %870 = vrot.lane.b32.xlu1 %v3089_v25, %s3392_s25  ;;  %s3420_s25 = smov 80  }
 0x26a   : > { %985 = vrot.lane.b32.xlu1 %v3089_v25, %s3393_s1  ;;  %s3421_s1 = smov 8  }
 0x26e   : > { %1097 = vrot.lane.b32.xlu1 %v3089_v25, %s3387_s5 }
 0x272   : > { %1095 = vrot.lane.b32.xlu1 %v3089_v25, %s2836_s6 }
 0x276   : > { %1209 = vrot.lane.b32.xlu1 %v3089_v25, %s3388_s27  ;;  %s3390_s27 = smov 16  }
 0x27a   : > { %1207 = vrot.lane.b32.xlu1 %v3089_v25, %s2838_s7 }
 0x2d8   : > { %v871_v27 = vpop.permute.xlu1 %870  ;;  %v984_v32 = vpop.permute.xlu0 %983 }
 0x2d9   : > { %v877_v28 = vsel %vm872_vm2, %v871_v27, 0 }
 0x2da   : > { %2510 = vmatpush3.bf16.xpose.msra.mxu1 %v877_v28 }
 0x2db   : > { %2521 = vmatprep.subr.bf16.mxu1 %v2830_v8 }
 0x2dc   : > { %v986_v29 = vpop.permute.xlu1 %985 }
 0x2dd   : > { %v991_v30 = vsel %vm872_vm2, %v986_v29, 0 }
 0x2e0   : > { %v1098_v31 = vpop.permute.xlu1 %1097 }
 0x2e1   : > { %2512 = vmatmul.mubr.msk.bf16.vlgmr.msra.gmra.mrb[4].mxu1 %vm872_vm2, %v3089_v25  ;;  %v1103_v34 = vsel %vm872_vm2, %v1098_v31, 0 }
 0x2e2   : > { %2522 = vmatpush3.bf16.xpose.msra.mxu1 %v991_v30  ;;  %2523 = vmatprep.mubr.msk.bf16.mxu1 %vm2831_vm1, %v2830_v8 }
 0x2e3   : > { %2533 = vmatprep.subr.bf16.mxu1 %v2830_v8 }
 0x2e4   : > { %v1096_v33 = vpop.permute.xlu1 %1095 }
 0x2e8   : > { %v1210_v35 = vpop.permute.xlu1 %1209 }
 0x2e9   : > { %2524 = vmatmul.mubr.msk.bf16.vlgmr.msra.gmra.mrb[8].mxu1 %vm872_vm2, %v984_v32  ;;  %v1215_v36 = vsel %vm872_vm2, %v1210_v35, 0 }
 0x2ea   : > { %2534 = vmatpush3.bf16.xpose.msra.mxu1 %v1103_v34  ;;  %2535 = vmatprep.mubr.msk.bf16.mxu1 %vm2831_vm1, %v2830_v8 }
 0x2eb   : > { %2545 = vmatprep.subr.bf16.mxu1 %v2830_v8 }
 0x2ec   : > { %v1208_v37 = vpop.permute.xlu1 %1207 }
 0x2f1   : > { %2536 = vmatmul.mubr.msk.bf16.vlgmr.msra.gmra.mrb[12].mxu1 %vm872_vm2, %v1096_v33 }
 0x2f2   : > { %2546 = vmatpush3.bf16.xpose.msra.mxu1 %v1215_v36  ;;  %2547 = vmatprep.mubr.msk.bf16.mxu1 %vm2831_vm1, %v2830_v8 }
 0x2f3   : > { %2557 = vmatprep.subr.bf16.mxu1 %v2830_v8 }
 0x2f9   : > { %2548 = vmatmul.mubr.msk.bf16.vlgmr.msra.gmra.mrb[16].mxu1 %vm872_vm2, %v1208_v37 }
 0x2fa   : > { %2561 = vmatprep.mubr.msk.bf16.mxu1 %vm2831_vm1, %v2830_v8 }
 0x3b4   : > { %v913_v39 = vpop.f32.mrb[4].mxu1 }
 0x3b5   : > { %v919_v40 = vmul.f32 0.35355338, %v913_v39  ;;  %v2513_v41 = vpop.f32.mrb[5].mxu1 }
 0x3b6   : > { %v916_v42 = vpop.f32.mrb[6].mxu1 }
 0x3b7   : > { %v2514_v43 = vpop.f32.mrb[7].mxu1  ;;  %v921_v44 = vsel %vm920_vm3, -1e+09, %v919_v40 }
 0x3b8   : > { %v922_v45 = vsel %vm872_vm2, %v921_v44, -inf }
 0x3b9   : > { %923 = vmax.xlane.f32.xlu1 %v922_v45 }
 0x3bc   : > { %v1027_v46 = vpop.f32.mrb[8].mxu1 }
 0x3bd   : > { %v1033_v47 = vmul.f32 0.35355338, %v1027_v46  ;;  %v2525_v48 = vpop.f32.mrb[9].mxu1 }
 0x3be   : > { %v1030_v49 = vpop.f32.mrb[10].mxu1 }
 0x3bf   : > { %v2526_v50 = vpop.f32.mrb[11].mxu1  ;;  %v1034_v51 = vsel %vm920_vm3, -1e+09, %v1033_v47 }
 0x3c0   : > { %v1035_v52 = vsel %vm872_vm2, %v1034_v51, -inf }
 0x3c1   : > { %1036 = vmax.xlane.f32.xlu0 %v1035_v52 }
 0x3c4   : > { %v1139_v53 = vpop.f32.mrb[12].mxu1 }
 0x3c5   : > { %v1145_v54 = vmul.f32 0.35355338, %v1139_v53  ;;  %v2537_v55 = vpop.f32.mrb[13].mxu1 }
 0x3c6   : > { %v1142_v56 = vpop.f32.mrb[14].mxu1 }
 0x3c7   : > { %v2538_v57 = vpop.f32.mrb[15].mxu1  ;;  %v1146_v58 = vsel %vm920_vm3, -1e+09, %v1145_v54 }
 0x3c8   : > { %v1147_v59 = vsel %vm872_vm2, %v1146_v58, -inf }
 0x3c9   : > { %1148 = vmax.xlane.f32.xlu1 %v1147_v59 }
 0x3cc   : > { %v1251_v60 = vpop.f32.mrb[16].mxu1 }
 0x3cd   : > { %v1257_v61 = vmul.f32 0.35355338, %v1251_v60  ;;  %v2549_v62 = vpop.f32.mrb[17].mxu1 }
 0x3ce   : > { %v1254_v63 = vpop.f32.mrb[18].mxu1 }
 0x3cf   : > { %v2550_v1 = vpop.f32.mrb[19].mxu1  ;;  %v1258_v2 = vsel %vm920_vm3, -1e+09, %v1257_v61 }
 0x3d0   : > { %v1259_v3 = vsel %vm872_vm2, %v1258_v2, -inf }
 0x3d1   : > { %1260 = vmax.xlane.f32.xlu0 %v1259_v3 }
 0x446   : > { %v924_v4 = vpop.xlane.xlu1 %923 }
 0x447   : > { %v925_v5 = vsub.f32 %v921_v44, %v924_v4 }
 0x449   : > { %v926_v6 = vmul.f32 1.442695, %v925_v5 }
 0x44b   : > { %2720 = vpow2.f32 %v926_v6 }
 0x44e   : > { %v1037_v7 = vpop.xlane.xlu0 %1036 }
 0x44f   : > { %v1038_v9 = vsub.f32 %v1034_v51, %v1037_v7 }
 0x451   : > { %v1039_v10 = vmul.f32 1.442695, %v1038_v9 }
 0x453   : > { %2722 = vpow2.f32 %v1039_v10 }
 0x455   : > { %v2721_v11 = vpop.eup %2720 }
 0x456   : > { %v928_v12 = vsel %vm872_vm2, %v2721_v11, 0.0  ;;  %v1149_v20 = vpop.xlane.xlu1 %1148 }
 0x457   : > { %929 = vadd.xlane.f32.xlu1 %v928_v12  ;;  %v1150_v21 = vsub.f32 %v1146_v58, %v1149_v20 }
 0x459   : > { %v1151_v22 = vmul.f32 1.442695, %v1150_v21 }
 0x45d   : > { %v2723_v13 = vpop.eup %2722 }
 0x45e   : > { %v1261_v14 = vpop.xlane.xlu0 %1260  ;;  %v1041_v15 = vsel %vm872_vm2, %v2723_v13, 0.0 }
 0x45f   : > { %v1262_v16 = vsub.f32 %v1258_v2, %v1261_v14  ;;  %1042 = vadd.xlane.f32.xlu0 %v1041_v15 }
 0x461   : > { %v1263_v17 = vmul.f32 1.442695, %v1262_v16 }
 0x463   : > { %2724 = vpow2.f32 %v1263_v17 }
 0x464   : > { %2726 = vpow2.f32 %v1151_v22 }
 0x468   : > { %934 = vrot.lane.b32.xlu1 %v3089_v25, %s2839_s30  ;;  %s3389_s30 = smov 24  }
 0x46d   : > { %v2725_v18 = vpop.eup %2724 }
 0x46e   : > { %v1265_v19 = vsel %vm872_vm2, %v2725_v18, 0.0  ;;  %v2727_v23 = vpop.eup %2726 }
 0x46f   : > { %1266 = vadd.xlane.f32.xlu0 %v1265_v19  ;;  %v1153_v24 = vsel %vm872_vm2, %v2727_v23, 0.0 }
 0x485   : > { %1047 = vrot.lane.b32.xlu0 %v3089_v25, %s2840_s24 }
 0x48c   : > { %1154 = vadd.xlane.f32.xlu1 %v1153_v24 }
 0x49d   : > { %1159 = vrot.lane.b32.xlu1 %v3089_v25, %s2841_s2  ;;  %s3415_s2 = sld [smem:[#allocation15_spill]] }
 0x4a1   : > { %1271 = vrot.lane.b32.xlu1 %v3089_v25, %s2842_s28 }
 0x4a3   : > { %v2704_v57 = vld [vmem:[%s3415_s2] sm:$0xff]   ;;  %v2705_v58 = vld [vmem:[%s3415_s2 + $0x8] sm:$0xff]  }
 0x4a4   : > { %2558 = vmatpush3.bf16.msra.mxu1 %v2704_v57 }
 0x4a5   : > { %2559 = vmatprep.subr.bf16.mxu1 %v2830_v8 }
 0x4a8   : > { %2560 = vmatpush3.bf16.msra.mxu1 %v2705_v58 }
 0x4a9   : > { %2573 = vmatprep.subr.bf16.mxu1 %v2830_v8 }
 0x4e4   : > { %v930_v26 = vpop.xlane.xlu1 %929 }
 0x4e5   : > { %2728 = vrcp.f32 %v930_v26 }
 0x4e8   : > { %v935_v27 = vpop.permute.xlu1 %934 }
 0x4e9   : > { %v941_v28 = vsel %vm939_vm4, %v935_v27, 0  ;;  %v2707_v27 = vld [vmem:[%s3372_s13 + $0x8] sm:$0xff]  }
 0x4ea   : > { %2516 = vmatpush3.bf16.msra.mxu0 %v941_v28 }
 0x4eb   : > { %2527 = vmatprep.subr.bf16.mxu0 %v2830_v8 }
 0x4ec   : > { %v1043_v30 = vpop.xlane.xlu0 %1042 }
 0x4ed   : > { %2730 = vrcp.f32 %v1043_v30  ;;  %v2709_v30 = vld [vmem:[%s3370_s11 + $0x8] sm:$0xff]  }
 0x4ef   : > { %v2729_v29 = vpop.eup %2728 }
 0x4f0   : > { %v932_v31 = vmul.f32 %v2729_v29, %v2721_v11  ;;  %v2708_v29 = vld [vmem:[%s3370_s11] sm:$0xff]  }
 0x4f2   : > { %v933_v32 = vpack.c.bf16 %v932_v31, %v932_v31 }
 0x4f4   : > { %2518 = vmatmul.mubr.msk.bf16.vlgmr.msra.gmra.mrb[0].mxu0 %vm872_vm2, %v933_v32 }
 0x4f5   : > { %2529 = vmatprep.mubr.msk.bf16.mxu0 %vm2831_vm1, %v2830_v8 }
 0x4f7   : > { %v2731_v25 = vpop.eup %2730 }
 0x4f8   : > { %v1045_v34 = vmul.f32 %v2731_v25, %v2723_v13  ;;  %v2409_v13 = vld [vmem:[%s3367_s8] ss:$0 sm:$0xff] }
 0x4fa   : > { %v1046_v37 = vpack.c.bf16 %v1045_v34, %v1045_v34  ;;  %v2410_v34 = vld [vmem:[%s3368_s9] ss:$0 sm:$0xff] }
 0x4fc   : > { %v1267_v33 = vpop.xlane.xlu0 %1266 }
 0x500   : > { %v1048_v35 = vpop.permute.xlu0 %1047 }
 0x501   : > { %v1053_v36 = vsel %vm939_vm4, %v1048_v35, 0 }
 0x502   : > { %2528 = vmatpush3.bf16.msra.mxu0 %v1053_v36  ;;  %v2411_v36 = vld [vmem:[%s3369_s10] ss:$0 sm:$0xff] }
 0x503   : > { %2539 = vmatprep.subr.bf16.mxu0 %v2830_v8 }
 0x505   : > { %2530 = vmatmul.mubr.msk.bf16.vlgmr.msra.gmra.mrb[4].mxu0 %vm872_vm2, %v1046_v37 }
 0x506   : > { %2541 = vmatprep.mubr.msk.bf16.mxu0 %vm2831_vm1, %v2830_v8 }
 0x519   : > { %v1155_v38 = vpop.xlane.xlu1 %1154 }
 0x51a   : > { %2732 = vrcp.f32 %v1155_v38 }
 0x51b   : > { %2734 = vrcp.f32 %v1267_v33 }
 0x51d   : > { %v1160_v39 = vpop.permute.xlu1 %1159 }
 0x51e   : > { %v1165_v40 = vsel %vm939_vm4, %v1160_v39, 0 }
 0x51f   : > { %2540 = vmatpush3.bf16.msra.mxu0 %v1165_v40  ;;  %v2416_v40 = vld [vmem:[%s3373_s14] ss:$0 sm:$0xff] }
 0x520   : > { %2551 = vmatprep.subr.bf16.mxu0 %v2830_v8 }
 0x521   : > { %v1272_v43 = vpop.permute.xlu1 %1271 }
 0x522   : > { %v1277_v46 = vsel %vm939_vm4, %v1272_v43, 0 }
 0x524   : > { %v2733_v41 = vpop.eup %2732 }
 0x525   : > { %v1157_v42 = vmul.f32 %v2733_v41, %v2727_v23  ;;  %v2735_v45 = vpop.eup %2734 }
 0x526   : > { %v1269_v47 = vmul.f32 %v2735_v45, %v2725_v18 }
 0x527   : > { %v1158_v44 = vpack.c.bf16 %v1157_v42, %v1157_v42 }
 0x528   : > { %v1270_v48 = vpack.c.bf16 %v1269_v47, %v1269_v47 }
 0x529   : > { %2542 = vmatmul.mubr.msk.bf16.vlgmr.msra.gmra.mrb[8].mxu0 %vm872_vm2, %v1158_v44 }
 0x52a   : > { %2552 = vmatpush3.bf16.msra.mxu0 %v1277_v46  ;;  %2553 = vmatprep.mubr.msk.bf16.mxu0 %vm2831_vm1, %v2830_v8 }
 0x52b   : > { %2565 = vmatprep.subr.bf16.mxu0 %v2830_v8 }
 0x531   : > { %2554 = vmatmul.mubr.msk.bf16.vlgmr.msra.gmra.mrb[12].mxu0 %vm872_vm2, %v1270_v48  ;;  %v2412_v48 = vld [vmem:[%s3371_s12] ss:$0 sm:$0xff] }
 0x532   : > { %2569 = vmatprep.mubr.msk.bf16.mxu0 %vm2831_vm1, %v2830_v8  ;;  %2566 = vmatpush3.bf16.msra.mxu0 %v2708_v29 }
 0x533   : > { %2567 = vmatprep.subr.bf16.mxu0 %v2830_v8 }
 0x536   : > { %2568 = vmatpush3.bf16.msra.mxu0 %v2709_v30 }
 0x537   : > { %2581 = vmatprep.subr.bf16.mxu0 %v2830_v8 }
 0x5c7   : > { %v977_v49 = vpop.f32.mrb[0].mxu0 }
 0x5c8   : > { %v2519_v50 = vpop.f32.mrb[1].mxu0 }
 0x5c9   : > { %v980_v51 = vpop.f32.mrb[2].mxu0 }
 0x5ca   : > { %v2520_v52 = vpop.f32.mrb[3].mxu0 }
 0x5d8   : > { %v1089_v53 = vpop.f32.mrb[4].mxu0 }
 0x5d9   : > { %1320 = vrot.lane.b32.xlu0 %v1089_v53, %s3391_s29  ;;  %v2531_v54 = vpop.f32.mrb[5].mxu0 }
 0x5da   : > { %v1092_v55 = vpop.f32.mrb[6].mxu0 }
 0x5db   : > { %v2532_v56 = vpop.f32.mrb[7].mxu0 }
 0x5fc   : > { %v1201_v59 = vpop.f32.mrb[8].mxu0 }
 0x5fd   : > { %1324 = vrot.lane.b32.xlu1 %v1201_v59, %s3390_s27  ;;  %v2543_v60 = vpop.f32.mrb[9].mxu0  ;;  %s3416_s27 = sld [smem:[#allocation9_spill]] }
 0x5fe   : > { %v1204_v61 = vpop.f32.mrb[10].mxu0 }
 0x5ff   : > { %v2544_v62 = vpop.f32.mrb[11].mxu0 }
 0x603   : > { %s757_s29 = scalar_lea.vmem %s3416_s27, %s3051_s26  ;;  %s3422_s27 = smov 16  }
 0x604   : > { %v1313_v63 = vpop.f32.mrb[12].mxu0  ;;  %v768_v26 = vld [vmem:[%s757_s29] sm:$0xff]  ;;  %s3423_s29 = smov 24  }
 0x605   : > { %1328 = vrot.lane.b32.xlu0 %v1313_v63, %s3389_s30  ;;  %v2555_v1 = vpop.f32.mrb[13].mxu0  ;;  %v1501_v28 = vpack.c.bf16 %v768_v26, %v768_v26 }
 0x606   : > { %v1316_v2 = vpop.f32.mrb[14].mxu0 }
 0x607   : > { %v2556_v3 = vpop.f32.mrb[15].mxu0 }
 0x64b   : > { %v1321_v4 = vpop.permute.xlu0 %1320 }
 0x64c   : > { %v1331_v6 = vsel %vm872_vm2, %v977_v49, %v1321_v4 }
 0x66f   : > { %v1325_v5 = vpop.permute.xlu1 %1324 }
 0x670   : > { %v1333_v7 = vsel %vm1332_vm5, %v1331_v6, %v1325_v5 }
 0x677   : > { %v1329_v9 = vpop.permute.xlu0 %1328 }
 0x678   : > { %v1335_v10 = vsel %vm1334_vm6, %v1333_v7, %v1329_v9 }
 0x679   : > { %v1336_v11 = vpack.c.bf16 %v1335_v10, %v1335_v10 }
 0x67b   : > { %2562 = vmatmul.mubr.msk.bf16.vlgmr.msra.gmra.mrb[20].mxu1 %vm771_vm0, %v1336_v11 }
 0x67c   : > { %2577 = vmatprep.mubr.msk.bf16.mxu1 %vm2831_vm1, %v2830_v8 }
 0x74e   : > { %v1390_v12 = vpop.f32.mrb[20].mxu1 }
 0x74f   : > { %v1396_v14 = vadd.f32 %v1390_v12, %v3057_v0  ;;  %v2563_v15 = vpop.f32.mrb[21].mxu1  ;;  %v2706_v0 = vld [vmem:[%s3372_s13] sm:$0xff]  }
 0x750   : > { %v1393_v16 = vpop.f32.mrb[22].mxu1  ;;  %2574 = vmatpush3.bf16.msra.mxu1 %v2706_v0 }
 0x751   : > { %v3187_v17 = vadd.f32 %v2409_v13, %v1396_v14  ;;  %v2564_v18 = vpop.f32.mrb[23].mxu1  ;;  %2575 = vmatprep.subr.bf16.mxu1 %v2830_v8 }
 0x753   : > { %v1407_v19 = vsel %vm771_vm0, %v3187_v17, 0.0 }
 0x754   : > { %1408 = vadd.xlane.f32.xlu1 %v1407_v19  ;;  %2576 = vmatpush3.bf16.msra.mxu1 %v2707_v27 }
 0x755   : > { %2587 = vmatprep.subr.bf16.mxu1 %v2830_v8 }
 0x757   : > { %2578 = vmatmul.mubr.msk.bf16.vlgmr.msra.gmra.mrb[24].mxu1 %vm771_vm0, %v1501_v28 }
 0x758   : > { %2589 = vmatprep.mubr.msk.bf16.mxu1 %vm2831_vm1, %v2830_v8 }
 0x7e1   : > { %v1409_v20 = vpop.xlane.xlu1 %1408 }
 0x7e2   : > { %v1410_v21 = vmul.f32 0.03125, %v1409_v20 }
 0x7e4   : > { %v1411_v22 = vsub.f32 %v3187_v17, %v1410_v21 }
 0x7e6   : > { %v1412_v23 = vmul.f32 %v1411_v22, %v1411_v22 }
 0x7e8   : > { %v1413_v24 = vsel %vm771_vm0, %v1412_v23, 0.0 }
 0x7e9   : > { %1414 = vadd.xlane.f32.xlu0 %v1413_v24 }
 0x82a   : > { %v1562_v41 = vpop.f32.mrb[24].mxu1 }
 0x82b   : > { %v1563_v42 = vadd.f32 %v2416_v40, %v1562_v41  ;;  %v2579_v43 = vpop.f32.mrb[25].mxu1 }
 0x82c   : > { %v1565_v44 = vpop.f32.mrb[26].mxu1 }
 0x82d   : > { %v3228_v45 = vpack.c.bf16 %v1563_v42, %v1563_v42  ;;  %v2580_v46 = vpop.f32.mrb[27].mxu1 }
 0x82f   : > { %1681 = vrot.lane.b32.xlu0 %v3228_v45, %s2832_s3  ;;  %v1574_v47 = vsel %vm872_vm2, %v3228_v45, 0 }
 0x876   : > { %v1415_v31 = vpop.xlane.xlu0 %1414 }
 0x877   : > { %v1416_v32 = vmul.f32 0.03125, %v1415_v31 }
 0x879   : > { %v1417_v25 = vadd.f32 1e-06, %v1416_v32 }
 0x87b   : > { %2736 = vrsqrt.f32 %v1417_v25 }
 0x885   : > { %v2737_v33 = vpop.eup %2736 }
 0x886   : > { %v1419_v35 = vmul.f32 %v2737_v33, %v1411_v22 }
 0x888   : > { %v1426_v37 = vmul.f32 %v2410_v34, %v1419_v35 }
 0x88a   : > { %v1433_v38 = vadd.f32 %v2411_v36, %v1426_v37 }
 0x88c   : > { %v1434_v39 = vpack.c.bf16 %v1433_v38, %v1433_v38 }
 0x88e   : > { %2570 = vmatmul.mubr.msk.bf16.vlgmr.msra.gmra.mrb[16].mxu0 %vm771_vm0, %v1434_v39 }
 0x88f   : > { %2583 = vmatprep.mubr.msk.bf16.mxu0 %vm2831_vm1, %v2830_v8  ;;  %2582 = vmatpush3.bf16.xpose.msra.mxu0 %v1574_v47 }
 0x890   : > { %2593 = vmatprep.subr.bf16.mxu0 %v2830_v8 }
 0x8a1   : > { %v1682_v52 = vpop.permute.xlu0 %1681 }
 0x8a2   : > { %v1687_v56 = vsel %vm872_vm2, %v1682_v52, 0 }
 0x961   : > { %v1495_v49 = vpop.f32.mrb[16].mxu0 }
 0x962   : > { %v1496_v50 = vadd.f32 %v2412_v48, %v1495_v49  ;;  %v2571_v51 = vpop.f32.mrb[17].mxu0 }
 0x963   : > { %v1498_v53 = vpop.f32.mrb[18].mxu0 }
 0x964   : > { %v1568_v54 = vpack.c.bf16 %v1496_v50, %v1496_v50  ;;  %v2572_v55 = vpop.f32.mrb[19].mxu0 }
 0x966   : > { %1679 = vrot.lane.b32.xlu1 %v1568_v54, %s2832_s3  ;;  %1790 = vrot.lane.b32.xlu0 %v1568_v54, %s2836_s6  ;;  %s3417_s3 = smov 88  }
 0x967   : > { %2584 = vmatmul.mubr.msk.bf16.vlgmr.msra.gmra.mrb[20].mxu0 %vm872_vm2, %v1568_v54 }
 0x968   : > { %2594 = vmatpush3.bf16.xpose.msra.mxu0 %v1687_v56  ;;  %2595 = vmatprep.mubr.msk.bf16.mxu0 %vm2831_vm1, %v2830_v8 }
 0x969   : > { %2605 = vmatprep.subr.bf16.mxu0 %v2830_v8 }
 0x96a   : > { %1792 = vrot.lane.b32.xlu1 %v3228_v45, %s2836_s6  ;;  %1901 = vrot.lane.b32.xlu0 %v1568_v54, %s2838_s7  ;;  %s3418_s6 = smov 96  }
 0x96e   : > { %1903 = vrot.lane.b32.xlu1 %v3228_v45, %s2838_s7  ;;  %s3419_s7 = smov 72  }
 0x9d8   : > { %v1680_v57 = vpop.permute.xlu1 %1679  ;;  %v1791_v61 = vpop.permute.xlu0 %1790 }
 0x9d9   : > { %2596 = vmatmul.mubr.msk.bf16.vlgmr.msra.gmra.mrb[24].mxu0 %vm872_vm2, %v1680_v57 }
 0x9da   : > { %2607 = vmatprep.mubr.msk.bf16.mxu0 %vm2831_vm1, %v2830_v8 }
 0x9dc   : > { %v1793_v58 = vpop.permute.xlu1 %1792  ;;  %v1902_v63 = vpop.permute.xlu0 %1901 }
 0x9dd   : > { %v1798_v59 = vsel %vm872_vm2, %v1793_v58, 0 }
 0x9de   : > { %2606 = vmatpush3.bf16.xpose.msra.mxu0 %v1798_v59 }
 0x9df   : > { %2617 = vmatprep.subr.bf16.mxu0 %v2830_v8 }
 0x9e0   : > { %v1904_v60 = vpop.permute.xlu1 %1903 }
 0x9e1   : > { %v1909_v62 = vsel %vm872_vm2, %v1904_v60, 0 }
 0x9e5   : > { %2608 = vmatmul.mubr.msk.bf16.vlgmr.msra.gmra.mrb[28].mxu0 %vm872_vm2, %v1791_v61 }
 0x9e6   : > { %2618 = vmatpush3.bf16.xpose.msra.mxu0 %v1909_v62  ;;  %2619 = vmatprep.mubr.msk.bf16.mxu0 %vm2831_vm1, %v2830_v8 }
 0x9e7   : > { %2629 = vmatprep.subr.bf16.mxu0 %v2830_v8 }
 0x9ed   : > { %2620 = vmatmul.mubr.msk.bf16.vlgmr.msra.gmra.mrb[32].mxu0 %vm872_vm2, %v1902_v63 }
 0x9ee   : > { %2633 = vmatprep.mubr.msk.bf16.mxu0 %vm2831_vm1, %v2830_v8 }
 0xa3a   : > { %v1610_v1 = vpop.f32.mrb[20].mxu0 }
 0xa3b   : > { %v1616_v2 = vmul.f32 0.35355338, %v1610_v1  ;;  %v2585_v3 = vpop.f32.mrb[21].mxu0 }
 0xa3c   : > { %v1613_v4 = vpop.f32.mrb[22].mxu0 }
 0xa3d   : > { %v2586_v5 = vpop.f32.mrb[23].mxu0  ;;  %v1617_v6 = vsel %vm872_vm2, %v1616_v2, -inf }
 0xa3e   : > { %1618 = vmax.xlane.f32.xlu1 %v1617_v6 }
 0xaac   : > { %v1723_v7 = vpop.f32.mrb[24].mxu0 }
 0xaad   : > { %v1729_v9 = vmul.f32 0.35355338, %v1723_v7  ;;  %v2597_v10 = vpop.f32.mrb[25].mxu0 }
 0xaae   : > { %v1726_v11 = vpop.f32.mrb[26].mxu0 }
 0xaaf   : > { %v2598_v12 = vpop.f32.mrb[27].mxu0  ;;  %v1730_v13 = vsel %vm872_vm2, %v1729_v9, -inf }
 0xab0   : > { %1731 = vmax.xlane.f32.xlu0 %v1730_v13 }
 0xab8   : > { %v1834_v14 = vpop.f32.mrb[28].mxu0 }
 0xab9   : > { %v1840_v15 = vmul.f32 0.35355338, %v1834_v14  ;;  %v2609_v16 = vpop.f32.mrb[29].mxu0 }
 0xaba   : > { %v1837_v18 = vpop.f32.mrb[30].mxu0  ;;  %v2710_v16 = vld [vmem:[%s3374_s15] sm:$0xff]  }
 0xabb   : > { %v2610_v19 = vpop.f32.mrb[31].mxu0  ;;  %v1841_v20 = vsel %vm872_vm2, %v1840_v15, -inf  ;;  %2630 = vmatpush3.bf16.msra.mxu0 %v2710_v16  ;;  %v2711_v18 = vld [vmem:[%s3374_s15 + $0x8] sm:$0xff]  }
 0xabc   : > { %1842 = vmax.xlane.f32.xlu0 %v1841_v20  ;;  %2631 = vmatprep.subr.bf16.mxu0 %v2830_v8 }
 0xabf   : > { %2632 = vmatpush3.bf16.msra.mxu0 %v2711_v18 }
 0xac0   : > { %v1945_v21 = vpop.f32.mrb[32].mxu0  ;;  %2645 = vmatprep.subr.bf16.mxu0 %v2830_v8 }
 0xac1   : > { %v1951_v22 = vmul.f32 0.35355338, %v1945_v21  ;;  %v2621_v23 = vpop.f32.mrb[33].mxu0 }
 0xac2   : > { %v1948_v24 = vpop.f32.mrb[34].mxu0 }
 0xac3   : > { %v2622_v0 = vpop.f32.mrb[35].mxu0  ;;  %v1952_v26 = vsel %vm872_vm2, %v1951_v22, -inf }
 0xac4   : > { %1953 = vmax.xlane.f32.xlu1 %v1952_v26 }
 0xacb   : > { %v1619_v27 = vpop.xlane.xlu1 %1618 }
 0xacc   : > { %v1620_v28 = vsub.f32 %v1616_v2, %v1619_v27 }
 0xace   : > { %v1621_v29 = vmul.f32 1.442695, %v1620_v28 }
 0xad0   : > { %2738 = vpow2.f32 %v1621_v29 }
 0xada   : > { %v2739_v30 = vpop.eup %2738 }
 0xadb   : > { %v1623_v31 = vsel %vm872_vm2, %v2739_v30, 0.0 }
 0xadc   : > { %1624 = vadd.xlane.f32.xlu0 %v1623_v31 }
 0xb3d   : > { %v1732_v32 = vpop.xlane.xlu0 %1731 }
 0xb3e   : > { %v1733_v25 = vsub.f32 %v1729_v9, %v1732_v32 }
 0xb40   : > { %v1734_v33 = vmul.f32 1.442695, %v1733_v25 }
 0xb42   : > { %2740 = vpow2.f32 %v1734_v33 }
 0xb49   : > { %v1843_v34 = vpop.xlane.xlu0 %1842 }
 0xb4a   : > { %v1844_v35 = vsub.f32 %v1840_v15, %v1843_v34  ;;  %v2431_v34 = vld [vmem:[%s3375_s16] ss:$0 sm:$0xff] }
 0xb4c   : > { %v2741_v36 = vpop.eup %2740  ;;  %v1845_v37 = vmul.f32 1.442695, %v1844_v35 }
 0xb4d   : > { %v1736_v38 = vsel %vm872_vm2, %v2741_v36, 0.0 }
 0xb4e   : > { %2742 = vpow2.f32 %v1845_v37  ;;  %1737 = vadd.xlane.f32.xlu1 %v1736_v38 }
 0xb51   : > { %v1954_v41 = vpop.xlane.xlu1 %1953 }
 0xb52   : > { %v1955_v42 = vsub.f32 %v1951_v22, %v1954_v41 }
 0xb54   : > { %v1956_v43 = vmul.f32 1.442695, %v1955_v42 }
 0xb56   : > { %2744 = vpow2.f32 %v1956_v43 }
 0xb58   : > { %v2743_v39 = vpop.eup %2742 }
 0xb59   : > { %v1847_v40 = vsel %vm872_vm2, %v2743_v39, 0.0 }
 0xb5a   : > { %1848 = vadd.xlane.f32.xlu0 %v1847_v40 }
 0xb5f   : > { %1742 = vrot.lane.b32.xlu1 %v3228_v45, %s3417_s3 }
 0xb60   : > { %v2745_v44 = vpop.eup %2744 }
 0xb61   : > { %v1958_v46 = vsel %vm872_vm2, %v2745_v44, 0.0 }
 0xb69   : > { %v1625_v47 = vpop.xlane.xlu0 %1624 }
 0xb6a   : > { %2746 = vrcp.f32 %v1625_v47  ;;  %v2712_v47 = vld [vmem:[%s3378_s19] sm:$0xff]  }
 0xb70   : > { %1630 = vrot.lane.b32.xlu0 %v3228_v45, %s3418_s6 }
 0xb74   : > { %1964 = vrot.lane.b32.xlu0 %v3228_v45, %s3419_s7  ;;  %v2747_v49 = vpop.eup %2746 }
 0xb75   : > { %v1627_v51 = vmul.f32 %v2747_v49, %v2739_v30  ;;  %v2715_v49 = vld [vmem:[%s3380_s21 + $0x8] sm:$0xff]  }
 0xb77   : > { %v1628_v55 = vpack.c.bf16 %v1627_v51, %v1627_v51 }
 0xb83   : > { %1959 = vadd.xlane.f32.xlu1 %v1958_v46 }
 0xb94   : > { %1853 = vrot.lane.b32.xlu1 %v3228_v45, %s3420_s25 }
 0xbdb   : > { %v1738_v48 = vpop.xlane.xlu1 %1737 }
 0xbdc   : > { %2748 = vrcp.f32 %v1738_v48  ;;  %v2714_v48 = vld [vmem:[%s3380_s21] sm:$0xff]  }
 0xbdf   : > { %v1743_v54 = vpop.permute.xlu1 %1742 }
 0xbe0   : > { %v1748_v57 = vsel %vm939_vm4, %v1743_v54, 0  ;;  %v2432_v54 = vld [vmem:[%s3376_s17] ss:$0 sm:$0xff] }
 0xbe6   : > { %v2749_v56 = vpop.eup %2748 }
 0xbe7   : > { %v1849_v50 = vpop.xlane.xlu0 %1848  ;;  %v1740_v45 = vmul.f32 %v2749_v56, %v2741_v36  ;;  %v2433_v56 = vld [vmem:[%s3377_s18] ss:$0 sm:$0xff] }
 0xbe8   : > { %2750 = vrcp.f32 %v1849_v50 }
 0xbe9   : > { %v1741_v58 = vpack.c.bf16 %v1740_v45, %v1740_v45 }
 0xbeb   : > { %v1631_v52 = vpop.permute.xlu0 %1630 }
 0xbec   : > { %v1636_v53 = vsel %vm939_vm4, %v1631_v52, 0 }
 0xbed   : > { %2588 = vmatpush3.bf16.msra.mxu1 %v1636_v53 }
 0xbee   : > { %2599 = vmatprep.subr.bf16.mxu1 %v2830_v8 }
 0xbef   : > { %v1965_v1 = vpop.permute.xlu0 %1964 }
 0xbf0   : > { %2590 = vmatmul.mubr.msk.bf16.vlgmr.msra.gmra.mrb[28].mxu1 %vm872_vm2, %v1628_v55  ;;  %v1970_v3 = vsel %vm939_vm4, %v1965_v1, 0 }
 0xbf1   : > { %2600 = vmatpush3.bf16.msra.mxu1 %v1748_v57  ;;  %2601 = vmatprep.mubr.msk.bf16.mxu1 %vm2831_vm1, %v2830_v8 }
 0xbf2   : > { %2611 = vmatprep.subr.bf16.mxu1 %v2830_v8  ;;  %v2751_v59 = vpop.eup %2750 }
 0xbf3   : > { %v1851_v61 = vmul.f32 %v2751_v59, %v2743_v39  ;;  %v2716_v59 = vld [vmem:[%s3380_s21 + $0x10] sm:$0xff]  }
 0xbf5   : > { %v1852_v2 = vpack.c.bf16 %v1851_v61, %v1851_v61  ;;  %v2434_v61 = vld [vmem:[#allocation2] ss:$0 sm:$0xff] }
 0xbf8   : > { %2602 = vmatmul.mubr.msk.bf16.vlgmr.msra.gmra.mrb[32].mxu1 %vm872_vm2, %v1741_v58 }
 0xbf9   : > { %2613 = vmatprep.mubr.msk.bf16.mxu1 %vm2831_vm1, %v2830_v8 }
 0xc10   : > { %v1960_v60 = vpop.xlane.xlu1 %1959 }
 0xc11   : > { %2752 = vrcp.f32 %v1960_v60  ;;  %v2717_v60 = vld [vmem:[%s3380_s21 + $0x18] sm:$0xff]  }
 0xc14   : > { %v1854_v62 = vpop.permute.xlu1 %1853 }
 0xc15   : > { %v1859_v63 = vsel %vm939_vm4, %v1854_v62, 0 }
 0xc16   : > { %2612 = vmatpush3.bf16.msra.mxu1 %v1859_v63 }
 0xc17   : > { %2623 = vmatprep.subr.bf16.mxu1 %v2830_v8 }
 0xc19   : > { %2614 = vmatmul.mubr.msk.bf16.vlgmr.msra.gmra.mrb[36].mxu1 %vm872_vm2, %v1852_v2 }
 0xc1a   : > { %2624 = vmatpush3.bf16.msra.mxu1 %v1970_v3  ;;  %2625 = vmatprep.mubr.msk.bf16.mxu1 %vm2831_vm1, %v2830_v8 }
 0xc1b   : > { %v2753_v4 = vpop.eup %2752  ;;  %2637 = vmatprep.subr.bf16.mxu1 %v2830_v8 }
 0xc1c   : > { %v1962_v5 = vmul.f32 %v2753_v4, %v2745_v44 }
 0xc1e   : > { %v1963_v6 = vpack.c.bf16 %v1962_v5, %v1962_v5 }
 0xc21   : > { %2626 = vmatmul.mubr.msk.bf16.vlgmr.msra.gmra.mrb[40].mxu1 %vm872_vm2, %v1963_v6 }
 0xc22   : > { %2641 = vmatprep.mubr.msk.bf16.mxu1 %vm2831_vm1, %v2830_v8  ;;  %2638 = vmatpush3.bf16.msra.mxu1 %v2712_v47 }
 0xc23   : > { %2639 = vmatprep.subr.bf16.mxu1 %v2830_v8 }
 0xcc3   : > { %v1672_v7 = vpop.f32.mrb[28].mxu1 }
 0xcc4   : > { %v2591_v9 = vpop.f32.mrb[29].mxu1 }
 0xcc5   : > { %v1675_v10 = vpop.f32.mrb[30].mxu1 }
 0xcc6   : > { %v2592_v11 = vpop.f32.mrb[31].mxu1 }
 0xccb   : > { %v1784_v12 = vpop.f32.mrb[32].mxu1 }
 0xccc   : > { %2013 = vrot.lane.b32.xlu1 %v1784_v12, %s3421_s1  ;;  %v2603_v13 = vpop.f32.mrb[33].mxu1 }
 0xccd   : > { %v1787_v14 = vpop.f32.mrb[34].mxu1 }
 0xcce   : > { %v2604_v15 = vpop.f32.mrb[35].mxu1 }
 0xcec   : > { %v1895_v19 = vpop.f32.mrb[36].mxu1 }
 0xced   : > { %2017 = vrot.lane.b32.xlu0 %v1895_v19, %s3422_s27  ;;  %v2615_v20 = vpop.f32.mrb[37].mxu1  ;;  %s765_s27 = scalar_lea.vmem %s3382_s23, %s3051_s26 }
 0xcee   : > { %v1898_v21 = vpop.f32.mrb[38].mxu1 }
 0xcef   : > { %v2616_v22 = vpop.f32.mrb[39].mxu1 }
 0xcf4   : > { %v2006_v23 = vpop.f32.mrb[40].mxu1 }
 0xcf5   : > { %2021 = vrot.lane.b32.xlu1 %v2006_v23, %s3423_s29  ;;  %v2627_v24 = vpop.f32.mrb[41].mxu1 }
 0xcf6   : > { %v2009_v0 = vpop.f32.mrb[42].mxu1 }
 0xcf7   : > { %v2628_v26 = vpop.f32.mrb[43].mxu1 }
 0xd3e   : > { %v2014_v27 = vpop.permute.xlu1 %2013 }
 0xd3f   : > { %v2024_v29 = vsel %vm872_vm2, %v1672_v7, %v2014_v27  ;;  %v2443_v7 = vld [vmem:[#allocation4] ss:$0 sm:$0xff] }
 0xd5f   : > { %v2018_v28 = vpop.permute.xlu0 %2017 }
 0xd60   : > { %v2025_v30 = vsel %vm1332_vm5, %v2024_v29, %v2018_v28 }
 0xd67   : > { %v2022_v31 = vpop.permute.xlu1 %2021 }
 0xd68   : > { %v2026_v32 = vsel %vm1334_vm6, %v2025_v30, %v2022_v31 }
 0xd69   : > { %v2027_v25 = vpack.c.bf16 %v2026_v32, %v2026_v32 }
 0xd6b   : > { %2634 = vmatmul.mubr.msk.bf16.vlgmr.msra.gmra.mrb[36].mxu0 %vm771_vm0, %v2027_v25 }
 0xd6c   : > { %2653 = vmatprep.mubr.msk.bf16.mxu0 %vm2831_vm1, %v2830_v8  ;;  %2646 = vmatpush3.bf16.msra.mxu0 %v2714_v48 }
 0xd6d   : > { %2647 = vmatprep.subr.bf16.mxu0 %v2830_v8 }
 0xd70   : > { %2648 = vmatpush3.bf16.msra.mxu0 %v2715_v49 }
 0xd71   : > { %2649 = vmatprep.subr.bf16.mxu0 %v2830_v8 }
 0xd74   : > { %2650 = vmatpush3.bf16.msra.mxu0 %v2716_v59 }
 0xd75   : > { %2651 = vmatprep.subr.bf16.mxu0 %v2830_v8 }
 0xd78   : > { %2652 = vmatpush3.bf16.msra.mxu0 %v2717_v60 }
 0xe3e   : > { %v2081_v33 = vpop.f32.mrb[36].mxu0 }
 0xe3f   : > { %v2087_v35 = vadd.f32 %v2081_v33, %v3187_v17  ;;  %v2635_v36 = vpop.f32.mrb[37].mxu0  ;;  %v2713_v17 = vld [vmem:[%s3378_s19 + $0x8] sm:$0xff]  }
 0xe40   : > { %v2084_v37 = vpop.f32.mrb[38].mxu0  ;;  %2640 = vmatpush3.bf16.msra.mxu1 %v2713_v17 }
 0xe41   : > { %v2095_v38 = vadd.f32 %v2431_v34, %v2087_v35  ;;  %v2636_v39 = vpop.f32.mrb[39].mxu0 }
 0xe43   : > { %v2098_v40 = vsel %vm771_vm0, %v2095_v38, 0.0 }
 0xe44   : > { %2099 = vadd.xlane.f32.xlu0 %v2098_v40 }
 0xed1   : > { %v2100_v41 = vpop.xlane.xlu0 %2099 }
 0xed2   : > { %v2101_v42 = vmul.f32 0.03125, %v2100_v41 }
 0xed4   : > { %v2102_v43 = vsub.f32 %v2095_v38, %v2101_v42 }
 0xed6   : > { %v2103_v44 = vmul.f32 %v2102_v43, %v2102_v43 }
 0xed8   : > { %v2104_v46 = vsel %vm771_vm0, %v2103_v44, 0.0 }
 0xed9   : > { %2105 = vadd.xlane.f32.xlu1 %v2104_v46 }
 0xf66   : > { %v2106_v50 = vpop.xlane.xlu1 %2105 }
 0xf67   : > { %v2107_v51 = vmul.f32 0.03125, %v2106_v50 }
 0xf69   : > { %v2108_v52 = vadd.f32 1e-06, %v2107_v51 }
 0xf6b   : > { %2754 = vrsqrt.f32 %v2108_v52 }
 0xf75   : > { %v2755_v53 = vpop.eup %2754 }
 0xf76   : > { %v2110_v55 = vmul.f32 %v2755_v53, %v2102_v43 }
 0xf78   : > { %v2117_v57 = vmul.f32 %v2432_v54, %v2110_v55 }
 0xf7a   : > { %v2124_v45 = vadd.f32 %v2433_v56, %v2117_v57 }
 0xf7c   : > { %v2125_v58 = vpack.c.bf16 %v2124_v45, %v2124_v45 }
 0xf7e   : > { %2642 = vmatmul.mubr.msk.bf16.vlgmr.msra.gmra.mrb[44].mxu1 %vm771_vm0, %v2125_v58 }
0x1051   : > { %v2186_v62 = vpop.f32.mrb[44].mxu1 }
0x1052   : > { %v2187_v63 = vadd.f32 %v2434_v61, %v2186_v62  ;;  %v2643_v1 = vpop.f32.mrb[45].mxu1 }
0x1053   : > { %v2189_v2 = vpop.f32.mrb[46].mxu1 }
0x1054   : > { %v2192_v3 = vmax.f32 %v2187_v63, 0.0  ;;  %v2644_v4 = vpop.f32.mrb[47].mxu1 }
0x1056   : > { %v2193_v5 = vpack.c.bf16 %v2192_v3, %v2192_v3 }
0x1058   : > { %2654 = vmatmul.mubr.msk.bf16.vlgmr.msra.gmra.mrb[40].mxu0 %vm2226_vm7, %v2193_v5 }
0x112b   : > { %v2264_v6 = vpop.f32.mrb[40].mxu0 }
0x112c   : > { %v2270_v9 = vadd.f32 %v2264_v6, %v2095_v38  ;;  %v2655_v8 = vpop.f32.mrb[41].mxu0 }
0x112d   : > { %v2267_v10 = vpop.f32.mrb[42].mxu0 }
0x112e   : > { %v2278_v11 = vadd.f32 %v2443_v7, %v2270_v9  ;;  %v2656_v12 = vpop.f32.mrb[43].mxu0 }
0x1130   : > { %2279 = vst.msk [vmem:[%s765_s27] sm:$0xff] %vm771_vm0, %v2278_v11 }
0x1131 PF: > { %s35_s4 = sadd.s32 1, %s2826_s4  }
0x1132   : > { %p32_p5 = scmp.ge.s32.totalorder %s35_s4, 4  }
0x1134   :  { %34 = sbr.rel (!%p32_p5) target bundleno = 11 (0xb), region = 157 }
0x113b   :  { %2299 = vsyncpa [#allocation3], 1 }
0x113c   :  { %2301 = vsyncpa [#allocation3 + $0x1], 1 }
0x113d   :  { %2302 = vsyncpa [#allocation5], 1 }

</bundles_post_ra>
